<compile_context>
chip_gen: v7x
topology: tpu7x:2x2x1
jax: 0.10.0
libtpu: 0.0.40
codegen_flags: <defaults>
</compile_context>

<pallas_src>
import functools

import jax
import jax.numpy as jnp
from jax.experimental import pallas as pl
from jax.experimental.pallas import tpu as pltpu

_BF16 = jnp.bfloat16
_F32 = jnp.float32


def _round_up(x, m):
    return ((x + m - 1) // m) * m


def _pick_tile(total, cap=2048):
    cap = min(cap, total)
    for t in range(cap, 0, -1):
        if total % t == 0 and (t % 8 == 0 or t == total):
            return t
    return total


def _pick_rows(h, cap=8):
    for r in range(min(cap, h), 0, -1):
        if h % r == 0:
            return r
    return 1


# ----------------------------------------------------------------------------
# In-kernel scSE gate: spatial gate on VPU/XLU (mul + lane reduce) plus a
# pre-sigmoided per-image channel gate.  x == 0 stays 0, so zero halo rows and
# zero-padded channels survive gating unchanged.
# ----------------------------------------------------------------------------
def _apply_scse(x_f32, sse_w, sse_b, cgate_sig, apply_relu):
    s_logit = jnp.sum(x_f32 * sse_w, axis=-1, keepdims=True) + sse_b
    out = x_f32 * (jax.nn.sigmoid(s_logit) + cgate_sig)
    if apply_relu:
        out = jnp.maximum(out, 0.0)
    return out


# ----------------------------------------------------------------------------
# Kernel 1: 1x1 conv + BN affine (+ fused prologue scSE/ReLU of prev stage)
#           also emits partial channel sums for this stage's cSE avg-pool
# ----------------------------------------------------------------------------
def _conv1x1_kernel(x_ref, w_ref, scale_ref, bias_ref, *rest, fuse_gate):
    if fuse_gate:
        gw_ref, gb_ref, gcg_ref, y_ref, ps_ref = rest
        xin = _apply_scse(x_ref[0].astype(_F32), gw_ref[...], gb_ref[0],
                          gcg_ref[0], True).astype(_BF16)
    else:
        y_ref, ps_ref = rest
        xin = x_ref[0]
    acc = jnp.dot(xin, w_ref[...], preferred_element_type=jnp.float32)
    y = acc * scale_ref[...] + bias_ref[...]
    y_ref[0] = y.astype(y_ref.dtype)
    ps_ref[0, 0] = jnp.sum(y, axis=0, keepdims=True)


def conv1x1_bn_pool(x, w, scale, bias, *, gate=None, out_dtype=_BF16,
                    tq_cap=2048):
    """x: (N, HW, Cin) bf16; w: (Cin, CoutP) bf16; scale/bias: (1, CoutP) f32."""
    N, HW, Cin = x.shape
    CoutP = w.shape[1]
    tq = _pick_tile(HW, tq_cap)
    S = HW // tq
    fuse = gate is not None

    in_specs = [
        pl.BlockSpec((1, tq, Cin), lambda n, i: (n, i, 0)),
        pl.BlockSpec((Cin, CoutP), lambda n, i: (0, 0)),
        pl.BlockSpec((1, CoutP), lambda n, i: (0, 0)),
        pl.BlockSpec((1, CoutP), lambda n, i: (0, 0)),
    ]
    args = [x, w, scale, bias]
    if fuse:
        in_specs += [
            pl.BlockSpec((1, Cin), lambda n, i: (0, 0)),
            pl.BlockSpec(memory_space=pltpu.MemorySpace.SMEM),
            pl.BlockSpec((1, 1, Cin), lambda n, i: (n, 0, 0)),
        ]
        args += [gate["sse_w"], gate["sse_b"], gate["cgate"]]

    y, ps = pl.pallas_call(
        functools.partial(_conv1x1_kernel, fuse_gate=fuse),
        out_shape=(
            jax.ShapeDtypeStruct((N, HW, CoutP), out_dtype),
            jax.ShapeDtypeStruct((N, S, 1, CoutP), jnp.float32),
        ),
        grid=(N, S),
        in_specs=in_specs,
        out_specs=(
            pl.BlockSpec((1, tq, CoutP), lambda n, i: (n, i, 0)),
            pl.BlockSpec((1, 1, 1, CoutP), lambda n, i: (n, i, 0, 0)),
        ),
        compiler_params=pltpu.CompilerParams(
            dimension_semantics=("parallel", "parallel")),
    )(*args)
    pooled = ps.sum(axis=(1, 2)) / HW
    return y, pooled


# ----------------------------------------------------------------------------
# Kernel 2: row-blocked 3x3 conv (9 taps, no im2col) + BN affine
#           (+ fused prologue scSE/ReLU per input stream) + partial pool sums
# ----------------------------------------------------------------------------
def _top_map(n, b, *, rb):
    # 1-row halo above the block; clamped, zero-masked in-kernel at b == 0.
    return (n, jnp.maximum(b * rb - 1, 0), 0, 0)


def _bot_map(n, b, *, rb, rmax):
    # 1-row halo below the block; clamped, zero-masked in-kernel at last b.
    return (n, jnp.minimum((b + 1) * rb, rmax), 0, 0)


def _conv3x3_kernel(*refs, n_streams, gate_streams, rb, out_w):
    streams = [refs[4 * s:4 * s + 4] for s in range(n_streams)]
    idx = 4 * n_streams
    scale_ref, bias_ref = refs[idx], refs[idx + 1]
    idx += 2
    gates = {}
    for s in gate_streams:
        gates[s] = refs[idx:idx + 3]
        idx += 3
    y_ref, ps_ref = refs[idx], refs[idx + 1]

    b = pl.program_id(1)
    last = pl.num_programs(1) - 1
    cout = y_ref.shape[-1]
    acc = jnp.zeros((rb * out_w, cout), jnp.float32)

    for s, (top_ref, main_ref, bot_ref, w_ref) in enumerate(streams):
        cin = main_ref.shape[-1]
        # Row halo: clamped 1-row fetches, zeroed at the image border.
        tmask = (b > 0).astype(_BF16)
        bmask = (b < last).astype(_BF16)
        top = top_ref[0, 0] * tmask
        bot = bot_ref[0, 0] * bmask
        blk = jnp.concatenate([top[None], main_ref[0], bot[None]], axis=0)
        if s in gates:
            # scSE gate + ReLU of the previous stage fused into the prologue;
            # zero halo rows stay zero so padding semantics are preserved.
            gw_ref, gb_ref, gcg_ref = gates[s]
            blk = _apply_scse(blk.astype(_F32), gw_ref[...], gb_ref[0],
                              gcg_ref[0], True).astype(_BF16)
        # Column halo built in-register (no padded copy in HBM).
        zcol = jnp.zeros((rb + 2, 1, cin), blk.dtype)
        blkp = jnp.concatenate([zcol, blk, zcol], axis=1)   # (rb+2, W+2, Cin)
        for dh in range(3):
            for dw in range(3):
                xt = blkp[dh:dh + rb, dw:dw + out_w, :].reshape(
                    rb * out_w, cin)
                acc = acc + jnp.dot(xt, w_ref[dh, dw],
                                    preferred_element_type=jnp.float32)

    y = acc * scale_ref[...] + bias_ref[...]
    y_ref[0] = y.reshape(rb, out_w, cout).astype(y_ref.dtype)
    ps_ref[0, 0] = jnp.sum(y, axis=0, keepdims=True)


def conv3x3_bn_pool(streams, scale, bias, *, out_dtype=_BF16, rows_cap=8):
    """streams: list of (x (N,H,W,Cin) bf16, w (3,3,Cin,Cout) bf16, gate|None).

    Output channels of all weight groups must match; the per-stream results
    are summed (K-group split of a single 3x3 conv)."""
    N, H, W, _ = streams[0][0].shape
    Cout = streams[0][1].shape[-1]
    rb = _pick_rows(H, rows_cap) if W % 8 == 0 else 1
    S = H // rb

    in_specs, args, gate_ids = [], [], []
    for si, (x, w, gate) in enumerate(streams):
        Cin = x.shape[-1]
        in_specs += [
            pl.BlockSpec((1, 1, W, Cin), functools.partial(_top_map, rb=rb)),
            pl.BlockSpec((1, rb, W, Cin), lambda n, b: (n, b, 0, 0)),
            pl.BlockSpec((1, 1, W, Cin),
                         functools.partial(_bot_map, rb=rb, rmax=H - 1)),
            pl.BlockSpec((3, 3, Cin, Cout), lambda n, b: (0, 0, 0, 0)),
        ]
        args += [x, x, x, w]
        if gate is not None:
            gate_ids.append(si)
    in_specs += [pl.BlockSpec((1, Cout), lambda n, b: (0, 0)),
                 pl.BlockSpec((1, Cout), lambda n, b: (0, 0))]
    args += [scale, bias]
    for si in gate_ids:
        Cin = streams[si][0].shape[-1]
        gate = streams[si][2]
        in_specs += [
            pl.BlockSpec((1, Cin), lambda n, b: (0, 0)),
            pl.BlockSpec(memory_space=pltpu.MemorySpace.SMEM),
            pl.BlockSpec((1, 1, Cin), lambda n, b: (n, 0, 0)),
        ]
        args += [gate["sse_w"], gate["sse_b"], gate["cgate"]]

    y, ps = pl.pallas_call(
        functools.partial(_conv3x3_kernel, n_streams=len(streams),
                          gate_streams=tuple(gate_ids), rb=rb, out_w=W),
        out_shape=(jax.ShapeDtypeStruct((N, H, W, Cout), out_dtype),
                   jax.ShapeDtypeStruct((N, S, 1, Cout), jnp.float32)),
        grid=(N, S),
        in_specs=in_specs,
        out_specs=(pl.BlockSpec((1, rb, W, Cout), lambda n, b: (n, b, 0, 0)),
                   pl.BlockSpec((1, 1, 1, Cout), lambda n, b: (n, b, 0, 0))),
        compiler_params=pltpu.CompilerParams(
            dimension_semantics=("parallel", "parallel")),
    )(*args)
    pooled = ps.sum(axis=(1, 2)) / (H * W)
    return y, pooled


# ----------------------------------------------------------------------------
# Kernel 3: standalone scSE apply (final stage-4 gate only)
# ----------------------------------------------------------------------------
def _scse_kernel(x_ref, gw_ref, gb_ref, gcg_ref, o_ref, *, apply_relu):
    out = _apply_scse(x_ref[0].astype(_F32), gw_ref[...], gb_ref[0],
                      gcg_ref[0], apply_relu)
    o_ref[0] = out.astype(o_ref.dtype)


def scse_apply(x, gate, *, apply_relu, out_dtype, tq_cap=2048):
    N, HW, C = x.shape
    tq = _pick_tile(HW, tq_cap)
    S = HW // tq
    return pl.pallas_call(
        functools.partial(_scse_kernel, apply_relu=apply_relu),
        out_shape=jax.ShapeDtypeStruct((N, HW, C), out_dtype),
        grid=(N, S),
        in_specs=[
            pl.BlockSpec((1, tq, C), lambda n, i: (n, i, 0)),
            pl.BlockSpec((1, C), lambda n, i: (0, 0)),
            pl.BlockSpec(memory_space=pltpu.MemorySpace.SMEM),
            pl.BlockSpec((1, 1, C), lambda n, i: (n, 0, 0)),
        ],
        out_specs=pl.BlockSpec((1, tq, C), lambda n, i: (n, i, 0)),
        compiler_params=pltpu.CompilerParams(
            dimension_semantics=("parallel", "parallel")),
    )(x, gate["sse_w"], gate["sse_b"], gate["cgate"])


# ----------------------------------------------------------------------------
# Glue: cSE excitation MLP (tiny), bilinear resize (align_corners=True)
# ----------------------------------------------------------------------------
def make_gate(scse_p, pooled):
    h = jnp.maximum(pooled @ scse_p["cse_w1"] + scse_p["cse_b1"], 0.0)
    cgate = jax.nn.sigmoid(h @ scse_p["cse_w2"] + scse_p["cse_b2"])
    return dict(sse_w=scse_p["sse_w"], sse_b=scse_p["sse_b"],
                cgate=cgate[:, None, :].astype(jnp.float32))


def interp_matrix(n_in, n_out):
    if n_in == 1 or n_out == 1:
        return jnp.zeros((n_out, n_in), jnp.float32).at[:, 0].set(1.0)
    src = jnp.arange(n_out, dtype=jnp.float32) * (n_in - 1) / (n_out - 1)
    lo = jnp.clip(jnp.floor(src).astype(jnp.int32), 0, n_in - 2)
    frac = src - lo.astype(jnp.float32)
    R = jnp.zeros((n_out, n_in), jnp.float32)
    R = R.at[jnp.arange(n_out), lo].add(1.0 - frac)
    R = R.at[jnp.arange(n_out), lo + 1].add(frac)
    return R


def bilinear_resize_align_corners(x_nhwc, h_out, w_out):
    # Two staged matmuls (height then width) keep the intermediate small.
    _, H, W, _ = x_nhwc.shape
    Rh = interp_matrix(H, h_out)
    Rw = interp_matrix(W, w_out)
    t = jnp.einsum("oh,nhwc->nowc", Rh, x_nhwc,
                   preferred_element_type=jnp.float32)
    return jnp.einsum("pw,nowc->nopc", Rw, t,
                      preferred_element_type=jnp.float32)


# ----------------------------------------------------------------------------
# Deterministic parameters (matches the torch module's shapes / init scheme)
# ----------------------------------------------------------------------------
def kaiming_normal(key, shape):
    fan_in = shape[1] * shape[2] * shape[3]
    std = (2.0 / fan_in) ** 0.5
    return std * jax.random.normal(key, shape, jnp.float32)


def init_scse(key, c, c_pad):
    ks = jax.random.split(key, 6)
    ch = c // 2
    sse_w = kaiming_normal(ks[0], (1, c, 1, 1)).reshape(1, c)
    sse_b = jax.random.uniform(ks[1], (1,), minval=-1.0, maxval=1.0) / (c ** 0.5)
    cse_w1 = kaiming_normal(ks[2], (ch, c, 1, 1)).reshape(ch, c).T
    cse_b1 = jax.random.uniform(ks[3], (ch,), minval=-1.0, maxval=1.0) / (c ** 0.5)
    cse_w2 = kaiming_normal(ks[4], (c, ch, 1, 1)).reshape(c, ch).T
    cse_b2 = jax.random.uniform(ks[5], (c,), minval=-1.0, maxval=1.0) / (ch ** 0.5)
    # zero-pad channel axis c -> c_pad; padded channels stay exactly zero.
    return dict(
        sse_w=jnp.zeros((1, c_pad), jnp.float32).at[:, :c].set(sse_w),
        sse_b=sse_b.astype(jnp.float32),
        cse_w1=jnp.zeros((c_pad, ch), jnp.float32).at[:c].set(cse_w1),
        cse_b1=cse_b1,
        cse_w2=jnp.zeros((ch, c_pad), jnp.float32).at[:, :c].set(cse_w2),
        cse_b2=jnp.zeros((c_pad,), jnp.float32).at[:c].set(cse_b2),
    )


def init_params(key, class_num):
    keys = jax.random.split(key, 9)
    eps = 1e-5
    s = (1.0 + eps) ** -0.5   # BN fold: gamma=1, beta=0, mean=0, var=1

    c1p = 128                                   # conv1: 48 -> pad 128
    c4p = _round_up(max(class_num, 1), 128)     # conv4: class_num -> pad 128

    conv1_w = kaiming_normal(keys[0], (48, 256, 1, 1)).reshape(48, 256).T
    conv1_w = jnp.zeros((256, c1p), jnp.float32).at[:, :48].set(conv1_w)

    conv2_full = jnp.transpose(kaiming_normal(keys[1], (256, 304, 3, 3)),
                               (2, 3, 1, 0))                     # (3,3,304,256)
    conv2_wx = conv2_full[:, :, :256, :]                         # x4 K-group
    conv2_wl = jnp.zeros((3, 3, c1p, 256), jnp.float32).at[:, :, :48, :].set(
        conv2_full[:, :, 256:, :])                               # llf K-group

    conv3_w = jnp.transpose(kaiming_normal(keys[2], (256, 256, 3, 3)),
                            (2, 3, 1, 0))

    conv4_w = kaiming_normal(keys[3], (class_num, 256, 1, 1)).reshape(
        class_num, 256).T
    conv4_w = jnp.zeros((256, c4p), jnp.float32).at[:, :class_num].set(conv4_w)
    conv4_b = jax.random.uniform(keys[4], (class_num,), minval=-1.0,
                                 maxval=1.0) / (256 ** 0.5)
    conv4_b = jnp.zeros((c4p,), jnp.float32).at[:class_num].set(conv4_b)

    return dict(
        conv1_w=conv1_w.astype(_BF16),
        conv2_wx=conv2_wx.astype(_BF16),
        conv2_wl=conv2_wl.astype(_BF16),
        conv3_w=conv3_w.astype(_BF16),
        conv4_w=conv4_w.astype(_BF16),
        bn1_scale=jnp.full((1, c1p), s, jnp.float32),
        bn1_bias=jnp.zeros((1, c1p), jnp.float32),
        bn2_scale=jnp.full((1, 256), s, jnp.float32),
        bn2_bias=jnp.zeros((1, 256), jnp.float32),
        bn3_scale=jnp.full((1, 256), s, jnp.float32),
        bn3_bias=jnp.zeros((1, 256), jnp.float32),
        conv4_scale=jnp.ones((1, c4p), jnp.float32),
        conv4_bias=conv4_b.reshape(1, c4p),
        scse1=init_scse(keys[5], 48, c1p),
        scse2=init_scse(keys[6], 256, 256),
        scse3=init_scse(keys[7], 256, 256),
        scse4=init_scse(keys[8], class_num, c4p),
    )


# ----------------------------------------------------------------------------
# Decoder forward (conv -> BN -> scSE -> ReLU per stage, as in the torch spec)
# ----------------------------------------------------------------------------
def decoder_forward(params, x_nchw, low_nchw, *, class_num):
    x = jnp.transpose(x_nchw, (0, 2, 3, 1)).astype(_F32)
    low = jnp.transpose(low_nchw, (0, 2, 3, 1)).astype(_BF16)
    N, Hl, Wl, _ = low.shape
    HW = Hl * Wl

    # stage 1: conv1 (1x1, 256->48 pad 128) + bn1 + fused cSE partial pool.
    # The pooled stats are taken pre-gate (matching scSE's own avg-pool input).
    y1, pooled1 = conv1x1_bn_pool(low.reshape(N, HW, 256), params["conv1_w"],
                                  params["bn1_scale"], params["bn1_bias"])
    gate1 = make_gate(params["scse1"], pooled1)
    y1 = y1.reshape(N, Hl, Wl, -1)   # stays UNGATED in HBM; gate fused below

    # bilinear upsample of x (align_corners=True) to the low-level size.
    x4 = bilinear_resize_align_corners(x, Hl, Wl).astype(_BF16)

    # stage 2: conv2 (3x3, [256 | 48pad128] -> 256) as two K-groups; gate1 +
    # ReLU fused into the llf stream prologue -> no concat / no padded copies.
    y2, pooled2 = conv3x3_bn_pool(
        [(x4, params["conv2_wx"], None), (y1, params["conv2_wl"], gate1)],
        params["bn2_scale"], params["bn2_bias"])
    gate2 = make_gate(params["scse2"], pooled2)

    # stage 3: conv3 (3x3, 256->256); gate2 + ReLU fused prologue (dropout2=id)
    y3, pooled3 = conv3x3_bn_pool(
        [(y2, params["conv3_w"], gate2)],
        params["bn3_scale"], params["bn3_bias"])
    gate3 = make_gate(params["scse3"], pooled3)

    # stage 4: conv4 (1x1, 256->class_num pad 128, with bias); gate3 + ReLU
    # fused prologue (dropout3 = identity)
    y4, pooled4 = conv1x1_bn_pool(y3.reshape(N, HW, 256), params["conv4_w"],
                                  params["conv4_scale"], params["conv4_bias"],
                                  gate=gate3, out_dtype=_F32)
    gate4 = make_gate(params["scse4"], pooled4)

    # final scse4 (no ReLU), drop channel padding, back to NCHW.
    out = scse_apply(y4, gate4, apply_relu=False, out_dtype=_F32)
    out = out.reshape(N, Hl, Wl, -1)[..., :class_num]
    return jnp.transpose(out, (0, 3, 1, 2))


if __name__ == "__main__":
    key = jax.random.PRNGKey(0)
    k_x, k_low, k_p = jax.random.split(key, 3)

    class_num = 8
    # x: ASPP output at 1/2 resolution of the low-level feature map
    x = jax.random.normal(k_x, (2, 256, 8, 8), jnp.float32)
    low_level_feature = jax.random.normal(k_low, (2, 256, 16, 16), jnp.float32)

    params = init_params(k_p, class_num)

    fwd = jax.jit(decoder_forward, static_argnames=("class_num",))
    out = fwd(params, x, low_level_feature, class_num=class_num)
    out = jax.block_until_ready(out)

    assert out.shape == (2, class_num, 16, 16), out.shape
    assert bool(jnp.all(jnp.isfinite(out)))
    print("KERNEL_OK")
</pallas_src>

<mosaic_0001>
module attributes {stable_mosaic.version = 11 : i64} {
  func.func private @main(%arg0: i32) attributes {dimension_semantics = [#tpu.dimension_semantics<core_parallel>], iteration_bounds = array<i64: 2>, tpu.core_type = #tpu.core_type<sc_scalar_subcore>, window_params = []} {
    return
  }
}

module attributes {stable_mosaic.version = 11 : i64} {
  func.func private @main(%arg0: i32) attributes {dimension_semantics = [#tpu.dimension_semantics<core_parallel>], iteration_bounds = array<i64: 2>, tpu.core_type = #tpu.core_type<sc_scalar_subcore>, window_params = []} {
    return
  }
}

module attributes {stable_mosaic.version = 11 : i64} {
  func.func @_conv1x1_kernel(%arg0: i32, %arg1: i32, %arg2: memref<1x256x256xbf16, #tpu.memory_space<vmem>>, %arg3: memref<256x128xbf16, #tpu.memory_space<vmem>>, %arg4: memref<1x128xf32, #tpu.memory_space<vmem>>, %arg5: memref<1x128xf32, #tpu.memory_space<vmem>>, %arg6: memref<1x256x128xbf16, #tpu.memory_space<vmem>>, %arg7: memref<1x1x1x128xf32, #tpu.memory_space<vmem>>) attributes {dimension_semantics = [#tpu.dimension_semantics<parallel>, #tpu.dimension_semantics<parallel>], iteration_bounds = array<i64: 2, 1>, scalar_prefetch = 0 : i64, scratch_operands = 0 : i64, tpu.core_type = #tpu.core_type<tc>, window_params = [{transform_indices = @transform_0, window_bounds = array<i64: 1, 256, 256>}, {pipeline_mode = #tpu.pipeline_mode<synchronous>, transform_indices = @transform_1, window_bounds = array<i64: 256, 128>}, {pipeline_mode = #tpu.pipeline_mode<synchronous>, transform_indices = @transform_2, window_bounds = array<i64: 1, 128>}, {pipeline_mode = #tpu.pipeline_mode<synchronous>, transform_indices = @transform_3, window_bounds = array<i64: 1, 128>}, {transform_indices = @transform_4, window_bounds = array<i64: 1, 256, 128>}, {transform_indices = @transform_5, window_bounds = array<i64: 1, 1, 1, 128>}]} {
    %c0 = arith.constant 0 : index
    %c0_0 = arith.constant 0 : index
    %c0_1 = arith.constant 0 : index
    %0 = vector.load %arg2[%c0, %c0_0, %c0_1] : memref<1x256x256xbf16, #tpu.memory_space<vmem>>, vector<1x256x256xbf16>
    %1 = vector.shape_cast %0 : vector<1x256x256xbf16> to vector<256x256xbf16>
    %c0_2 = arith.constant 0 : index
    %c0_3 = arith.constant 0 : index
    %2 = vector.load %arg3[%c0_2, %c0_3] : memref<256x128xbf16, #tpu.memory_space<vmem>>, vector<256x128xbf16>
    %cst = arith.constant dense<0.000000e+00> : vector<256x128xf32>
    %3 = tpu.matmul %1, %2, %cst {dimension_numbers = #tpu.dot_dimension_numbers<[1], [0], [0], [1], [0, 0, 1, 1], [], []>} : vector<256x256xbf16>, vector<256x128xbf16>, vector<256x128xf32> -> vector<256x128xf32>
    %c0_4 = arith.constant 0 : index
    %c0_5 = arith.constant 0 : index
    %4 = vector.load %arg4[%c0_4, %c0_5] : memref<1x128xf32, #tpu.memory_space<vmem>>, vector<1x128xf32>
    %5 = vector.broadcast %4 : vector<1x128xf32> to vector<256x128xf32>
    %6 = arith.mulf %3, %5 : vector<256x128xf32>
    %c0_6 = arith.constant 0 : index
    %c0_7 = arith.constant 0 : index
    %7 = vector.load %arg5[%c0_6, %c0_7] : memref<1x128xf32, #tpu.memory_space<vmem>>, vector<1x128xf32>
    %8 = vector.broadcast %7 : vector<1x128xf32> to vector<256x128xf32>
    %9 = arith.addf %6, %8 : vector<256x128xf32>
    %10 = arith.truncf %9 : vector<256x128xf32> to vector<256x128xbf16>
    %c0_8 = arith.constant 0 : index
    %c0_9 = arith.constant 0 : index
    %c0_10 = arith.constant 0 : index
    %11 = vector.load %arg6[%c0_8, %c0_9, %c0_10] : memref<1x256x128xbf16, #tpu.memory_space<vmem>>, vector<1x256x128xbf16>
    %12 = vector.shape_cast %11 : vector<1x256x128xbf16> to vector<256x128xbf16>
    %13 = vector.shape_cast %10 : vector<256x128xbf16> to vector<1x256x128xbf16>
    tpu.vector_store %arg6[%c0_8, %c0_9, %c0_10], %13 {strides = array<i32>} : memref<1x256x128xbf16, #tpu.memory_space<vmem>>, vector<1x256x128xbf16>,
    %cst_11 = arith.constant dense<0.000000e+00> : vector<128xf32>
    %14 = vector.multi_reduction <add>, %9, %cst_11 [0] : vector<256x128xf32> to vector<128xf32>
    %15 = vector.shape_cast %14 : vector<128xf32> to vector<1x128xf32>
    %c0_12 = arith.constant 0 : index
    %c0_13 = arith.constant 0 : index
    %c0_14 = arith.constant 0 : index
    %c0_15 = arith.constant 0 : index
    %16 = vector.load %arg7[%c0_12, %c0_13, %c0_14, %c0_15] : memref<1x1x1x128xf32, #tpu.memory_space<vmem>>, vector<1x1x1x128xf32>
    %17 = vector.shape_cast %16 : vector<1x1x1x128xf32> to vector<1x128xf32>
    %18 = vector.shape_cast %15 : vector<1x128xf32> to vector<1x1x1x128xf32>
    tpu.vector_store %arg7[%c0_12, %c0_13, %c0_14, %c0_15], %18 {strides = array<i32>} : memref<1x1x1x128xf32, #tpu.memory_space<vmem>>, vector<1x1x1x128xf32>,
    return
  }
  func.func @transform_0(%arg0: i32, %arg1: i32) -> (i32, i32, i32) {
    %c0_i32 = arith.constant 0 : i32
    %c0_i32_0 = arith.constant 0 : i32
    return %arg0, %arg1, %c0_i32 : i32, i32, i32
  }
  func.func @transform_1(%arg0: i32, %arg1: i32) -> (i32, i32) {
    %c0_i32 = arith.constant 0 : i32
    %c0_i32_0 = arith.constant 0 : i32
    %c0_i32_1 = arith.constant 0 : i32
    return %c0_i32, %c0_i32_0 : i32, i32
  }
  func.func @transform_2(%arg0: i32, %arg1: i32) -> (i32, i32) {
    %c0_i32 = arith.constant 0 : i32
    %c0_i32_0 = arith.constant 0 : i32
    %c0_i32_1 = arith.constant 0 : i32
    return %c0_i32, %c0_i32_0 : i32, i32
  }
  func.func @transform_3(%arg0: i32, %arg1: i32) -> (i32, i32) {
    %c0_i32 = arith.constant 0 : i32
    %c0_i32_0 = arith.constant 0 : i32
    %c0_i32_1 = arith.constant 0 : i32
    return %c0_i32, %c0_i32_0 : i32, i32
  }
  func.func @transform_4(%arg0: i32, %arg1: i32) -> (i32, i32, i32) {
    %c0_i32 = arith.constant 0 : i32
    %c0_i32_0 = arith.constant 0 : i32
    return %arg0, %arg1, %c0_i32 : i32, i32, i32
  }
  func.func @transform_5(%arg0: i32, %arg1: i32) -> (i32, i32, i32, i32) {
    %c0_i32 = arith.constant 0 : i32
    %c0_i32_0 = arith.constant 0 : i32
    %c0_i32_1 = arith.constant 0 : i32
    return %arg0, %arg1, %c0_i32, %c0_i32_0 : i32, i32, i32, i32
  }
}

module attributes {stable_mosaic.version = 11 : i64} {
  func.func @_conv3x3_kernel(%arg0: i32, %arg1: i32, %arg2: memref<1x1x16x256xbf16, #tpu.memory_space<vmem>>, %arg3: memref<1x8x16x256xbf16, #tpu.memory_space<vmem>>, %arg4: memref<1x1x16x256xbf16, #tpu.memory_space<vmem>>, %arg5: memref<3x3x256x256xbf16, #tpu.memory_space<vmem>>, %arg6: memref<1x1x16x128xbf16, #tpu.memory_space<vmem>>, %arg7: memref<1x8x16x128xbf16, #tpu.memory_space<vmem>>, %arg8: memref<1x1x16x128xbf16, #tpu.memory_space<vmem>>, %arg9: memref<3x3x128x256xbf16, #tpu.memory_space<vmem>>, %arg10: memref<1x256xf32, #tpu.memory_space<vmem>>, %arg11: memref<1x256xf32, #tpu.memory_space<vmem>>, %arg12: memref<1x128xf32, #tpu.memory_space<vmem>>, %arg13: memref<1xf32, #tpu.memory_space<smem>>, %arg14: memref<1x1x128xf32, #tpu.memory_space<vmem>>, %arg15: memref<1x8x16x256xbf16, #tpu.memory_space<vmem>>, %arg16: memref<1x1x1x256xf32, #tpu.memory_space<vmem>>) attributes {dimension_semantics = [#tpu.dimension_semantics<parallel>, #tpu.dimension_semantics<parallel>], iteration_bounds = array<i64: 2, 2>, scalar_prefetch = 0 : i64, scratch_operands = 0 : i64, tpu.core_type = #tpu.core_type<tc>, window_params = [{transform_indices = @transform_0, window_bounds = array<i64: 1, 1, 16, 256>}, {transform_indices = @transform_1, window_bounds = array<i64: 1, 8, 16, 256>}, {transform_indices = @transform_2, window_bounds = array<i64: 1, 1, 16, 256>}, {pipeline_mode = #tpu.pipeline_mode<synchronous>, transform_indices = @transform_3, window_bounds = array<i64: 3, 3, 256, 256>}, {transform_indices = @transform_4, window_bounds = array<i64: 1, 1, 16, 128>}, {transform_indices = @transform_5, window_bounds = array<i64: 1, 8, 16, 128>}, {transform_indices = @transform_6, window_bounds = array<i64: 1, 1, 16, 128>}, {pipeline_mode = #tpu.pipeline_mode<synchronous>, transform_indices = @transform_7, window_bounds = array<i64: 3, 3, 128, 256>}, {pipeline_mode = #tpu.pipeline_mode<synchronous>, transform_indices = @transform_8, window_bounds = array<i64: 1, 256>}, {pipeline_mode = #tpu.pipeline_mode<synchronous>, transform_indices = @transform_9, window_bounds = array<i64: 1, 256>}, {pipeline_mode = #tpu.pipeline_mode<synchronous>, transform_indices = @transform_10, window_bounds = array<i64: 1, 128>}, {transform_indices = @transform_11, window_bounds = array<i64: 1>}, {transform_indices = @transform_12, window_bounds = array<i64: 1, 1, 128>}, {transform_indices = @transform_13, window_bounds = array<i64: 1, 8, 16, 256>}, {transform_indices = @transform_14, window_bounds = array<i64: 1, 1, 1, 256>}]} {
    %cst = arith.constant 0.000000e+00 : f32
    %0 = vector.broadcast %cst : f32 to vector<128x256xf32>
    %c0_i32 = arith.constant 0 : i32
    %1 = arith.cmpi sgt, %arg1, %c0_i32 : i32
    %2 = arith.extui %1 : i1 to i32
    %3 = arith.sitofp %2 : i32 to f32
    %4 = arith.truncf %3 : f32 to bf16
    %c1_i32 = arith.constant 1 : i32
    %5 = arith.cmpi slt, %arg1, %c1_i32 : i32
    %6 = arith.extui %5 : i1 to i32
    %7 = arith.sitofp %6 : i32 to f32
    %8 = arith.truncf %7 : f32 to bf16
    %c0 = arith.constant 0 : index
    %c0_0 = arith.constant 0 : index
    %c0_1 = arith.constant 0 : index
    %c0_2 = arith.constant 0 : index
    %9 = vector.load %arg2[%c0, %c0_0, %c0_1, %c0_2] : memref<1x1x16x256xbf16, #tpu.memory_space<vmem>>, vector<1x1x16x256xbf16>
    %10 = vector.shape_cast %9 : vector<1x1x16x256xbf16> to vector<16x256xbf16>
    %11 = vector.broadcast %4 : bf16 to vector<16x256xbf16>
    %12 = arith.mulf %10, %11 : vector<16x256xbf16>
    %c0_3 = arith.constant 0 : index
    %c0_4 = arith.constant 0 : index
    %c0_5 = arith.constant 0 : index
    %c0_6 = arith.constant 0 : index
    %13 = vector.load %arg4[%c0_3, %c0_4, %c0_5, %c0_6] : memref<1x1x16x256xbf16, #tpu.memory_space<vmem>>, vector<1x1x16x256xbf16>
    %14 = vector.shape_cast %13 : vector<1x1x16x256xbf16> to vector<16x256xbf16>
    %15 = vector.broadcast %8 : bf16 to vector<16x256xbf16>
    %16 = arith.mulf %14, %15 : vector<16x256xbf16>
    %17 = vector.shape_cast %12 : vector<16x256xbf16> to vector<1x16x256xbf16>
    %c0_7 = arith.constant 0 : index
    %c0_8 = arith.constant 0 : index
    %c0_9 = arith.constant 0 : index
    %c0_10 = arith.constant 0 : index
    %18 = vector.load %arg3[%c0_7, %c0_8, %c0_9, %c0_10] : memref<1x8x16x256xbf16, #tpu.memory_space<vmem>>, vector<1x8x16x256xbf16>
    %19 = vector.shape_cast %18 : vector<1x8x16x256xbf16> to vector<8x16x256xbf16>
    %20 = vector.shape_cast %16 : vector<16x256xbf16> to vector<1x16x256xbf16>
    %21 = tpu.concatenate %17, %19, %20 in 0 : vector<1x16x256xbf16>, vector<8x16x256xbf16>, vector<1x16x256xbf16> -> vector<10x16x256xbf16>
    %cst_11 = arith.constant 0.000000e+00 : bf16
    %22 = vector.broadcast %cst_11 : bf16 to vector<10x1x256xbf16>
    %23 = tpu.concatenate %22, %21, %22 in 1 : vector<10x1x256xbf16>, vector<10x16x256xbf16>, vector<10x1x256xbf16> -> vector<10x18x256xbf16>
    %24 = vector.extract_strided_slice %23 {offsets = [0, 0, 0], sizes = [8, 16, 256], strides = [1, 1, 1]} : vector<10x18x256xbf16> to vector<8x16x256xbf16>
    %25 = vector.shape_cast %24 : vector<8x16x256xbf16> to vector<128x256xbf16>
    %c0_12 = arith.constant 0 : index
    %c0_13 = arith.constant 0 : index
    %c0_14 = arith.constant 0 : index
    %c0_15 = arith.constant 0 : index
    %26 = vector.load %arg5[%c0_12, %c0_13, %c0_14, %c0_15] : memref<3x3x256x256xbf16, #tpu.memory_space<vmem>>, vector<1x1x256x256xbf16>
    %27 = vector.shape_cast %26 : vector<1x1x256x256xbf16> to vector<256x256xbf16>
    %cst_16 = arith.constant dense<0.000000e+00> : vector<128x256xf32>
    %28 = tpu.matmul %25, %27, %cst_16 {dimension_numbers = #tpu.dot_dimension_numbers<[1], [0], [0], [1], [0, 0, 1, 1], [], []>} : vector<128x256xbf16>, vector<256x256xbf16>, vector<128x256xf32> -> vector<128x256xf32>
    %29 = arith.addf %0, %28 : vector<128x256xf32>
    %30 = vector.extract_strided_slice %23 {offsets = [0, 1, 0], sizes = [8, 16, 256], strides = [1, 1, 1]} : vector<10x18x256xbf16> to vector<8x16x256xbf16>
    %31 = vector.shape_cast %30 : vector<8x16x256xbf16> to vector<128x256xbf16>
    %c0_17 = arith.constant 0 : index
    %c1 = arith.constant 1 : index
    %c0_18 = arith.constant 0 : index
    %c0_19 = arith.constant 0 : index
    %32 = vector.load %arg5[%c0_17, %c1, %c0_18, %c0_19] : memref<3x3x256x256xbf16, #tpu.memory_space<vmem>>, vector<1x1x256x256xbf16>
    %33 = vector.shape_cast %32 : vector<1x1x256x256xbf16> to vector<256x256xbf16>
    %cst_20 = arith.constant dense<0.000000e+00> : vector<128x256xf32>
    %34 = tpu.matmul %31, %33, %cst_20 {dimension_numbers = #tpu.dot_dimension_numbers<[1], [0], [0], [1], [0, 0, 1, 1], [], []>} : vector<128x256xbf16>, vector<256x256xbf16>, vector<128x256xf32> -> vector<128x256xf32>
    %35 = arith.addf %29, %34 : vector<128x256xf32>
    %36 = vector.extract_strided_slice %23 {offsets = [0, 2, 0], sizes = [8, 16, 256], strides = [1, 1, 1]} : vector<10x18x256xbf16> to vector<8x16x256xbf16>
    %37 = vector.shape_cast %36 : vector<8x16x256xbf16> to vector<128x256xbf16>
    %c0_21 = arith.constant 0 : index
    %c2 = arith.constant 2 : index
    %c0_22 = arith.constant 0 : index
    %c0_23 = arith.constant 0 : index
    %38 = vector.load %arg5[%c0_21, %c2, %c0_22, %c0_23] : memref<3x3x256x256xbf16, #tpu.memory_space<vmem>>, vector<1x1x256x256xbf16>
    %39 = vector.shape_cast %38 : vector<1x1x256x256xbf16> to vector<256x256xbf16>
    %cst_24 = arith.constant dense<0.000000e+00> : vector<128x256xf32>
    %40 = tpu.matmul %37, %39, %cst_24 {dimension_numbers = #tpu.dot_dimension_numbers<[1], [0], [0], [1], [0, 0, 1, 1], [], []>} : vector<128x256xbf16>, vector<256x256xbf16>, vector<128x256xf32> -> vector<128x256xf32>
    %41 = arith.addf %35, %40 : vector<128x256xf32>
    %42 = vector.extract_strided_slice %23 {offsets = [1, 0, 0], sizes = [8, 16, 256], strides = [1, 1, 1]} : vector<10x18x256xbf16> to vector<8x16x256xbf16>
    %43 = vector.shape_cast %42 : vector<8x16x256xbf16> to vector<128x256xbf16>
    %c1_25 = arith.constant 1 : index
    %c0_26 = arith.constant 0 : index
    %c0_27 = arith.constant 0 : index
    %c0_28 = arith.constant 0 : index
    %44 = vector.load %arg5[%c1_25, %c0_26, %c0_27, %c0_28] : memref<3x3x256x256xbf16, #tpu.memory_space<vmem>>, vector<1x1x256x256xbf16>
    %45 = vector.shape_cast %44 : vector<1x1x256x256xbf16> to vector<256x256xbf16>
    %cst_29 = arith.constant dense<0.000000e+00> : vector<128x256xf32>
    %46 = tpu.matmul %43, %45, %cst_29 {dimension_numbers = #tpu.dot_dimension_numbers<[1], [0], [0], [1], [0, 0, 1, 1], [], []>} : vector<128x256xbf16>, vector<256x256xbf16>, vector<128x256xf32> -> vector<128x256xf32>
    %47 = arith.addf %41, %46 : vector<128x256xf32>
    %48 = vector.extract_strided_slice %23 {offsets = [1, 1, 0], sizes = [8, 16, 256], strides = [1, 1, 1]} : vector<10x18x256xbf16> to vector<8x16x256xbf16>
    %49 = vector.shape_cast %48 : vector<8x16x256xbf16> to vector<128x256xbf16>
    %c1_30 = arith.constant 1 : index
    %c1_31 = arith.constant 1 : index
    %c0_32 = arith.constant 0 : index
    %c0_33 = arith.constant 0 : index
    %50 = vector.load %arg5[%c1_30, %c1_31, %c0_32, %c0_33] : memref<3x3x256x256xbf16, #tpu.memory_space<vmem>>, vector<1x1x256x256xbf16>
    %51 = vector.shape_cast %50 : vector<1x1x256x256xbf16> to vector<256x256xbf16>
    %cst_34 = arith.constant dense<0.000000e+00> : vector<128x256xf32>
    %52 = tpu.matmul %49, %51, %cst_34 {dimension_numbers = #tpu.dot_dimension_numbers<[1], [0], [0], [1], [0, 0, 1, 1], [], []>} : vector<128x256xbf16>, vector<256x256xbf16>, vector<128x256xf32> -> vector<128x256xf32>
    %53 = arith.addf %47, %52 : vector<128x256xf32>
    %54 = vector.extract_strided_slice %23 {offsets = [1, 2, 0], sizes = [8, 16, 256], strides = [1, 1, 1]} : vector<10x18x256xbf16> to vector<8x16x256xbf16>
    %55 = vector.shape_cast %54 : vector<8x16x256xbf16> to vector<128x256xbf16>
    %c1_35 = arith.constant 1 : index
    %c2_36 = arith.constant 2 : index
    %c0_37 = arith.constant 0 : index
    %c0_38 = arith.constant 0 : index
    %56 = vector.load %arg5[%c1_35, %c2_36, %c0_37, %c0_38] : memref<3x3x256x256xbf16, #tpu.memory_space<vmem>>, vector<1x1x256x256xbf16>
    %57 = vector.shape_cast %56 : vector<1x1x256x256xbf16> to vector<256x256xbf16>
    %cst_39 = arith.constant dense<0.000000e+00> : vector<128x256xf32>
    %58 = tpu.matmul %55, %57, %cst_39 {dimension_numbers = #tpu.dot_dimension_numbers<[1], [0], [0], [1], [0, 0, 1, 1], [], []>} : vector<128x256xbf16>, vector<256x256xbf16>, vector<128x256xf32> -> vector<128x256xf32>
    %59 = arith.addf %53, %58 : vector<128x256xf32>
    %60 = vector.extract_strided_slice %23 {offsets = [2, 0, 0], sizes = [8, 16, 256], strides = [1, 1, 1]} : vector<10x18x256xbf16> to vector<8x16x256xbf16>
    %61 = vector.shape_cast %60 : vector<8x16x256xbf16> to vector<128x256xbf16>
    %c2_40 = arith.constant 2 : index
    %c0_41 = arith.constant 0 : index
    %c0_42 = arith.constant 0 : index
    %c0_43 = arith.constant 0 : index
    %62 = vector.load %arg5[%c2_40, %c0_41, %c0_42, %c0_43] : memref<3x3x256x256xbf16, #tpu.memory_space<vmem>>, vector<1x1x256x256xbf16>
    %63 = vector.shape_cast %62 : vector<1x1x256x256xbf16> to vector<256x256xbf16>
    %cst_44 = arith.constant dense<0.000000e+00> : vector<128x256xf32>
    %64 = tpu.matmul %61, %63, %cst_44 {dimension_numbers = #tpu.dot_dimension_numbers<[1], [0], [0], [1], [0, 0, 1, 1], [], []>} : vector<128x256xbf16>, vector<256x256xbf16>, vector<128x256xf32> -> vector<128x256xf32>
    %65 = arith.addf %59, %64 : vector<128x256xf32>
    %66 = vector.extract_strided_slice %23 {offsets = [2, 1, 0], sizes = [8, 16, 256], strides = [1, 1, 1]} : vector<10x18x256xbf16> to vector<8x16x256xbf16>
    %67 = vector.shape_cast %66 : vector<8x16x256xbf16> to vector<128x256xbf16>
    %c2_45 = arith.constant 2 : index
    %c1_46 = arith.constant 1 : index
    %c0_47 = arith.constant 0 : index
    %c0_48 = arith.constant 0 : index
    %68 = vector.load %arg5[%c2_45, %c1_46, %c0_47, %c0_48] : memref<3x3x256x256xbf16, #tpu.memory_space<vmem>>, vector<1x1x256x256xbf16>
    %69 = vector.shape_cast %68 : vector<1x1x256x256xbf16> to vector<256x256xbf16>
    %cst_49 = arith.constant dense<0.000000e+00> : vector<128x256xf32>
    %70 = tpu.matmul %67, %69, %cst_49 {dimension_numbers = #tpu.dot_dimension_numbers<[1], [0], [0], [1], [0, 0, 1, 1], [], []>} : vector<128x256xbf16>, vector<256x256xbf16>, vector<128x256xf32> -> vector<128x256xf32>
    %71 = arith.addf %65, %70 : vector<128x256xf32>
    %72 = vector.extract_strided_slice %23 {offsets = [2, 2, 0], sizes = [8, 16, 256], strides = [1, 1, 1]} : vector<10x18x256xbf16> to vector<8x16x256xbf16>
    %73 = vector.shape_cast %72 : vector<8x16x256xbf16> to vector<128x256xbf16>
    %c2_50 = arith.constant 2 : index
    %c2_51 = arith.constant 2 : index
    %c0_52 = arith.constant 0 : index
    %c0_53 = arith.constant 0 : index
    %74 = vector.load %arg5[%c2_50, %c2_51, %c0_52, %c0_53] : memref<3x3x256x256xbf16, #tpu.memory_space<vmem>>, vector<1x1x256x256xbf16>
    %75 = vector.shape_cast %74 : vector<1x1x256x256xbf16> to vector<256x256xbf16>
    %cst_54 = arith.constant dense<0.000000e+00> : vector<128x256xf32>
    %76 = tpu.matmul %73, %75, %cst_54 {dimension_numbers = #tpu.dot_dimension_numbers<[1], [0], [0], [1], [0, 0, 1, 1], [], []>} : vector<128x256xbf16>, vector<256x256xbf16>, vector<128x256xf32> -> vector<128x256xf32>
    %77 = arith.addf %71, %76 : vector<128x256xf32>
    %c0_i32_55 = arith.constant 0 : i32
    %78 = arith.cmpi sgt, %arg1, %c0_i32_55 : i32
    %79 = arith.extui %78 : i1 to i32
    %80 = arith.sitofp %79 : i32 to f32
    %81 = arith.truncf %80 : f32 to bf16
    %c1_i32_56 = arith.constant 1 : i32
    %82 = arith.cmpi slt, %arg1, %c1_i32_56 : i32
    %83 = arith.extui %82 : i1 to i32
    %84 = arith.sitofp %83 : i32 to f32
    %85 = arith.truncf %84 : f32 to bf16
    %c0_57 = arith.constant 0 : index
    %c0_58 = arith.constant 0 : index
    %c0_59 = arith.constant 0 : index
    %c0_60 = arith.constant 0 : index
    %86 = vector.load %arg6[%c0_57, %c0_58, %c0_59, %c0_60] : memref<1x1x16x128xbf16, #tpu.memory_space<vmem>>, vector<1x1x16x128xbf16>
    %87 = vector.shape_cast %86 : vector<1x1x16x128xbf16> to vector<16x128xbf16>
    %88 = vector.broadcast %81 : bf16 to vector<16x128xbf16>
    %89 = arith.mulf %87, %88 : vector<16x128xbf16>
    %c0_61 = arith.constant 0 : index
    %c0_62 = arith.constant 0 : index
    %c0_63 = arith.constant 0 : index
    %c0_64 = arith.constant 0 : index
    %90 = vector.load %arg8[%c0_61, %c0_62, %c0_63, %c0_64] : memref<1x1x16x128xbf16, #tpu.memory_space<vmem>>, vector<1x1x16x128xbf16>
    %91 = vector.shape_cast %90 : vector<1x1x16x128xbf16> to vector<16x128xbf16>
    %92 = vector.broadcast %85 : bf16 to vector<16x128xbf16>
    %93 = arith.mulf %91, %92 : vector<16x128xbf16>
    %94 = vector.shape_cast %89 : vector<16x128xbf16> to vector<1x16x128xbf16>
    %c0_65 = arith.constant 0 : index
    %c0_66 = arith.constant 0 : index
    %c0_67 = arith.constant 0 : index
    %c0_68 = arith.constant 0 : index
    %95 = vector.load %arg7[%c0_65, %c0_66, %c0_67, %c0_68] : memref<1x8x16x128xbf16, #tpu.memory_space<vmem>>, vector<1x8x16x128xbf16>
    %96 = vector.shape_cast %95 : vector<1x8x16x128xbf16> to vector<8x16x128xbf16>
    %97 = vector.shape_cast %93 : vector<16x128xbf16> to vector<1x16x128xbf16>
    %98 = tpu.concatenate %94, %96, %97 in 0 : vector<1x16x128xbf16>, vector<8x16x128xbf16>, vector<1x16x128xbf16> -> vector<10x16x128xbf16>
    %99 = arith.extf %98 : vector<10x16x128xbf16> to vector<10x16x128xf32>
    %c0_69 = arith.constant 0 : index
    %c0_70 = arith.constant 0 : index
    %100 = vector.load %arg12[%c0_69, %c0_70] : memref<1x128xf32, #tpu.memory_space<vmem>>, vector<1x128xf32>
    %c0_71 = arith.constant 0 : index
    %101 = memref.load %arg13[%c0_71] : memref<1xf32, #tpu.memory_space<smem>>
    %c0_72 = arith.constant 0 : index
    %c0_73 = arith.constant 0 : index
    %c0_74 = arith.constant 0 : index
    %102 = vector.load %arg14[%c0_72, %c0_73, %c0_74] : memref<1x1x128xf32, #tpu.memory_space<vmem>>, vector<1x1x128xf32>
    %103 = vector.shape_cast %102 : vector<1x1x128xf32> to vector<1x128xf32>
    %104 = vector.shape_cast %100 : vector<1x128xf32> to vector<1x1x128xf32>
    %105 = vector.broadcast %104 : vector<1x1x128xf32> to vector<10x16x128xf32>
    %106 = arith.mulf %99, %105 : vector<10x16x128xf32>
    %cst_75 = arith.constant dense<0.000000e+00> : vector<10x16xf32>
    %107 = vector.multi_reduction <add>, %106, %cst_75 [2] : vector<10x16x128xf32> to vector<10x16xf32>
    %108 = vector.shape_cast %107 : vector<10x16xf32> to vector<10x16x1xf32>
    %109 = vector.broadcast %101 : f32 to vector<10x16x1xf32>
    %110 = arith.addf %108, %109 : vector<10x16x1xf32>
    %111 = arith.negf %110 : vector<10x16x1xf32>
    %112 = math.exp %111 : vector<10x16x1xf32>
    %cst_76 = arith.constant 1.000000e+00 : f32
    %113 = vector.broadcast %cst_76 : f32 to vector<10x16x1xf32>
    %114 = arith.addf %113, %112 : vector<10x16x1xf32>
    %115 = arith.divf %113, %114 : vector<10x16x1xf32>
    %116 = vector.shape_cast %103 : vector<1x128xf32> to vector<1x1x128xf32>
    %117 = vector.broadcast %115 : vector<10x16x1xf32> to vector<10x16x128xf32>
    %118 = vector.broadcast %116 : vector<1x1x128xf32> to vector<10x16x128xf32>
    %119 = arith.addf %117, %118 : vector<10x16x128xf32>
    %120 = arith.mulf %99, %119 : vector<10x16x128xf32>
    %cst_77 = arith.constant 0.000000e+00 : f32
    %121 = vector.broadcast %cst_77 : f32 to vector<10x16x128xf32>
    %122 = arith.maximumf %120, %121 : vector<10x16x128xf32>
    %123 = arith.truncf %122 : vector<10x16x128xf32> to vector<10x16x128xbf16>
    %cst_78 = arith.constant 0.000000e+00 : bf16
    %124 = vector.broadcast %cst_78 : bf16 to vector<10x1x128xbf16>
    %125 = tpu.concatenate %124, %123, %124 in 1 : vector<10x1x128xbf16>, vector<10x16x128xbf16>, vector<10x1x128xbf16> -> vector<10x18x128xbf16>
    %126 = vector.extract_strided_slice %125 {offsets = [0, 0, 0], sizes = [8, 16, 128], strides = [1, 1, 1]} : vector<10x18x128xbf16> to vector<8x16x128xbf16>
    %127 = vector.shape_cast %126 : vector<8x16x128xbf16> to vector<128x128xbf16>
    %c0_79 = arith.constant 0 : index
    %c0_80 = arith.constant 0 : index
    %c0_81 = arith.constant 0 : index
    %c0_82 = arith.constant 0 : index
    %128 = vector.load %arg9[%c0_79, %c0_80, %c0_81, %c0_82] : memref<3x3x128x256xbf16, #tpu.memory_space<vmem>>, vector<1x1x128x256xbf16>
    %129 = vector.shape_cast %128 : vector<1x1x128x256xbf16> to vector<128x256xbf16>
    %cst_83 = arith.constant dense<0.000000e+00> : vector<128x256xf32>
    %130 = tpu.matmul %127, %129, %cst_83 {dimension_numbers = #tpu.dot_dimension_numbers<[1], [0], [0], [1], [0, 0, 1, 1], [], []>} : vector<128x128xbf16>, vector<128x256xbf16>, vector<128x256xf32> -> vector<128x256xf32>
    %131 = arith.addf %77, %130 : vector<128x256xf32>
    %132 = vector.extract_strided_slice %125 {offsets = [0, 1, 0], sizes = [8, 16, 128], strides = [1, 1, 1]} : vector<10x18x128xbf16> to vector<8x16x128xbf16>
    %133 = vector.shape_cast %132 : vector<8x16x128xbf16> to vector<128x128xbf16>
    %c0_84 = arith.constant 0 : index
    %c1_85 = arith.constant 1 : index
    %c0_86 = arith.constant 0 : index
    %c0_87 = arith.constant 0 : index
    %134 = vector.load %arg9[%c0_84, %c1_85, %c0_86, %c0_87] : memref<3x3x128x256xbf16, #tpu.memory_space<vmem>>, vector<1x1x128x256xbf16>
    %135 = vector.shape_cast %134 : vector<1x1x128x256xbf16> to vector<128x256xbf16>
    %cst_88 = arith.constant dense<0.000000e+00> : vector<128x256xf32>
    %136 = tpu.matmul %133, %135, %cst_88 {dimension_numbers = #tpu.dot_dimension_numbers<[1], [0], [0], [1], [0, 0, 1, 1], [], []>} : vector<128x128xbf16>, vector<128x256xbf16>, vector<128x256xf32> -> vector<128x256xf32>
    %137 = arith.addf %131, %136 : vector<128x256xf32>
    %138 = vector.extract_strided_slice %125 {offsets = [0, 2, 0], sizes = [8, 16, 128], strides = [1, 1, 1]} : vector<10x18x128xbf16> to vector<8x16x128xbf16>
    %139 = vector.shape_cast %138 : vector<8x16x128xbf16> to vector<128x128xbf16>
    %c0_89 = arith.constant 0 : index
    %c2_90 = arith.constant 2 : index
    %c0_91 = arith.constant 0 : index
    %c0_92 = arith.constant 0 : index
    %140 = vector.load %arg9[%c0_89, %c2_90, %c0_91, %c0_92] : memref<3x3x128x256xbf16, #tpu.memory_space<vmem>>, vector<1x1x128x256xbf16>
    %141 = vector.shape_cast %140 : vector<1x1x128x256xbf16> to vector<128x256xbf16>
    %cst_93 = arith.constant dense<0.000000e+00> : vector<128x256xf32>
    %142 = tpu.matmul %139, %141, %cst_93 {dimension_numbers = #tpu.dot_dimension_numbers<[1], [0], [0], [1], [0, 0, 1, 1], [], []>} : vector<128x128xbf16>, vector<128x256xbf16>, vector<128x256xf32> -> vector<128x256xf32>
    %143 = arith.addf %137, %142 : vector<128x256xf32>
    %144 = vector.extract_strided_slice %125 {offsets = [1, 0, 0], sizes = [8, 16, 128], strides = [1, 1, 1]} : vector<10x18x128xbf16> to vector<8x16x128xbf16>
    %145 = vector.shape_cast %144 : vector<8x16x128xbf16> to vector<128x128xbf16>
    %c1_94 = arith.constant 1 : index
    %c0_95 = arith.constant 0 : index
    %c0_96 = arith.constant 0 : index
    %c0_97 = arith.constant 0 : index
    %146 = vector.load %arg9[%c1_94, %c0_95, %c0_96, %c0_97] : memref<3x3x128x256xbf16, #tpu.memory_space<vmem>>, vector<1x1x128x256xbf16>
    %147 = vector.shape_cast %146 : vector<1x1x128x256xbf16> to vector<128x256xbf16>
    %cst_98 = arith.constant dense<0.000000e+00> : vector<128x256xf32>
    %148 = tpu.matmul %145, %147, %cst_98 {dimension_numbers = #tpu.dot_dimension_numbers<[1], [0], [0], [1], [0, 0, 1, 1], [], []>} : vector<128x128xbf16>, vector<128x256xbf16>, vector<128x256xf32> -> vector<128x256xf32>
    %149 = arith.addf %143, %148 : vector<128x256xf32>
    %150 = vector.extract_strided_slice %125 {offsets = [1, 1, 0], sizes = [8, 16, 128], strides = [1, 1, 1]} : vector<10x18x128xbf16> to vector<8x16x128xbf16>
    %151 = vector.shape_cast %150 : vector<8x16x128xbf16> to vector<128x128xbf16>
    %c1_99 = arith.constant 1 : index
    %c1_100 = arith.constant 1 : index
    %c0_101 = arith.constant 0 : index
    %c0_102 = arith.constant 0 : index
    %152 = vector.load %arg9[%c1_99, %c1_100, %c0_101, %c0_102] : memref<3x3x128x256xbf16, #tpu.memory_space<vmem>>, vector<1x1x128x256xbf16>
    %153 = vector.shape_cast %152 : vector<1x1x128x256xbf16> to vector<128x256xbf16>
    %cst_103 = arith.constant dense<0.000000e+00> : vector<128x256xf32>
    %154 = tpu.matmul %151, %153, %cst_103 {dimension_numbers = #tpu.dot_dimension_numbers<[1], [0], [0], [1], [0, 0, 1, 1], [], []>} : vector<128x128xbf16>, vector<128x256xbf16>, vector<128x256xf32> -> vector<128x256xf32>
    %155 = arith.addf %149, %154 : vector<128x256xf32>
    %156 = vector.extract_strided_slice %125 {offsets = [1, 2, 0], sizes = [8, 16, 128], strides = [1, 1, 1]} : vector<10x18x128xbf16> to vector<8x16x128xbf16>
    %157 = vector.shape_cast %156 : vector<8x16x128xbf16> to vector<128x128xbf16>
    %c1_104 = arith.constant 1 : index
    %c2_105 = arith.constant 2 : index
    %c0_106 = arith.constant 0 : index
    %c0_107 = arith.constant 0 : index
    %158 = vector.load %arg9[%c1_104, %c2_105, %c0_106, %c0_107] : memref<3x3x128x256xbf16, #tpu.memory_space<vmem>>, vector<1x1x128x256xbf16>
    %159 = vector.shape_cast %158 : vector<1x1x128x256xbf16> to vector<128x256xbf16>
    %cst_108 = arith.constant dense<0.000000e+00> : vector<128x256xf32>
    %160 = tpu.matmul %157, %159, %cst_108 {dimension_numbers = #tpu.dot_dimension_numbers<[1], [0], [0], [1], [0, 0, 1, 1], [], []>} : vector<128x128xbf16>, vector<128x256xbf16>, vector<128x256xf32> -> vector<128x256xf32>
    %161 = arith.addf %155, %160 : vector<128x256xf32>
    %162 = vector.extract_strided_slice %125 {offsets = [2, 0, 0], sizes = [8, 16, 128], strides = [1, 1, 1]} : vector<10x18x128xbf16> to vector<8x16x128xbf16>
    %163 = vector.shape_cast %162 : vector<8x16x128xbf16> to vector<128x128xbf16>
    %c2_109 = arith.constant 2 : index
    %c0_110 = arith.constant 0 : index
    %c0_111 = arith.constant 0 : index
    %c0_112 = arith.constant 0 : index
    %164 = vector.load %arg9[%c2_109, %c0_110, %c0_111, %c0_112] : memref<3x3x128x256xbf16, #tpu.memory_space<vmem>>, vector<1x1x128x256xbf16>
    %165 = vector.shape_cast %164 : vector<1x1x128x256xbf16> to vector<128x256xbf16>
    %cst_113 = arith.constant dense<0.000000e+00> : vector<128x256xf32>
    %166 = tpu.matmul %163, %165, %cst_113 {dimension_numbers = #tpu.dot_dimension_numbers<[1], [0], [0], [1], [0, 0, 1, 1], [], []>} : vector<128x128xbf16>, vector<128x256xbf16>, vector<128x256xf32> -> vector<128x256xf32>
    %167 = arith.addf %161, %166 : vector<128x256xf32>
    %168 = vector.extract_strided_slice %125 {offsets = [2, 1, 0], sizes = [8, 16, 128], strides = [1, 1, 1]} : vector<10x18x128xbf16> to vector<8x16x128xbf16>
    %169 = vector.shape_cast %168 : vector<8x16x128xbf16> to vector<128x128xbf16>
    %c2_114 = arith.constant 2 : index
    %c1_115 = arith.constant 1 : index
    %c0_116 = arith.constant 0 : index
    %c0_117 = arith.constant 0 : index
    %170 = vector.load %arg9[%c2_114, %c1_115, %c0_116, %c0_117] : memref<3x3x128x256xbf16, #tpu.memory_space<vmem>>, vector<1x1x128x256xbf16>
    %171 = vector.shape_cast %170 : vector<1x1x128x256xbf16> to vector<128x256xbf16>
    %cst_118 = arith.constant dense<0.000000e+00> : vector<128x256xf32>
    %172 = tpu.matmul %169, %171, %cst_118 {dimension_numbers = #tpu.dot_dimension_numbers<[1], [0], [0], [1], [0, 0, 1, 1], [], []>} : vector<128x128xbf16>, vector<128x256xbf16>, vector<128x256xf32> -> vector<128x256xf32>
    %173 = arith.addf %167, %172 : vector<128x256xf32>
    %174 = vector.extract_strided_slice %125 {offsets = [2, 2, 0], sizes = [8, 16, 128], strides = [1, 1, 1]} : vector<10x18x128xbf16> to vector<8x16x128xbf16>
    %175 = vector.shape_cast %174 : vector<8x16x128xbf16> to vector<128x128xbf16>
    %c2_119 = arith.constant 2 : index
    %c2_120 = arith.constant 2 : index
    %c0_121 = arith.constant 0 : index
    %c0_122 = arith.constant 0 : index
    %176 = vector.load %arg9[%c2_119, %c2_120, %c0_121, %c0_122] : memref<3x3x128x256xbf16, #tpu.memory_space<vmem>>, vector<1x1x128x256xbf16>
    %177 = vector.shape_cast %176 : vector<1x1x128x256xbf16> to vector<128x256xbf16>
    %cst_123 = arith.constant dense<0.000000e+00> : vector<128x256xf32>
    %178 = tpu.matmul %175, %177, %cst_123 {dimension_numbers = #tpu.dot_dimension_numbers<[1], [0], [0], [1], [0, 0, 1, 1], [], []>} : vector<128x128xbf16>, vector<128x256xbf16>, vector<128x256xf32> -> vector<128x256xf32>
    %179 = arith.addf %173, %178 : vector<128x256xf32>
    %c0_124 = arith.constant 0 : index
    %c0_125 = arith.constant 0 : index
    %180 = vector.load %arg10[%c0_124, %c0_125] : memref<1x256xf32, #tpu.memory_space<vmem>>, vector<1x256xf32>
    %181 = vector.broadcast %180 : vector<1x256xf32> to vector<128x256xf32>
    %182 = arith.mulf %179, %181 : vector<128x256xf32>
    %c0_126 = arith.constant 0 : index
    %c0_127 = arith.constant 0 : index
    %183 = vector.load %arg11[%c0_126, %c0_127] : memref<1x256xf32, #tpu.memory_space<vmem>>, vector<1x256xf32>
    %184 = vector.broadcast %183 : vector<1x256xf32> to vector<128x256xf32>
    %185 = arith.addf %182, %184 : vector<128x256xf32>
    %186 = vector.shape_cast %185 : vector<128x256xf32> to vector<8x16x256xf32>
    %187 = arith.truncf %186 : vector<8x16x256xf32> to vector<8x16x256xbf16>
    %c0_128 = arith.constant 0 : index
    %c0_129 = arith.constant 0 : index
    %c0_130 = arith.constant 0 : index
    %c0_131 = arith.constant 0 : index
    %188 = vector.load %arg15[%c0_128, %c0_129, %c0_130, %c0_131] : memref<1x8x16x256xbf16, #tpu.memory_space<vmem>>, vector<1x8x16x256xbf16>
    %189 = vector.shape_cast %188 : vector<1x8x16x256xbf16> to vector<8x16x256xbf16>
    %190 = vector.shape_cast %187 : vector<8x16x256xbf16> to vector<1x8x16x256xbf16>
    tpu.vector_store %arg15[%c0_128, %c0_129, %c0_130, %c0_131], %190 {strides = array<i32>} : memref<1x8x16x256xbf16, #tpu.memory_space<vmem>>, vector<1x8x16x256xbf16>,
    %cst_132 = arith.constant dense<0.000000e+00> : vector<256xf32>
    %191 = vector.multi_reduction <add>, %185, %cst_132 [0] : vector<128x256xf32> to vector<256xf32>
    %192 = vector.shape_cast %191 : vector<256xf32> to vector<1x256xf32>
    %c0_133 = arith.constant 0 : index
    %c0_134 = arith.constant 0 : index
    %c0_135 = arith.constant 0 : index
    %c0_136 = arith.constant 0 : index
    %193 = vector.load %arg16[%c0_133, %c0_134, %c0_135, %c0_136] : memref<1x1x1x256xf32, #tpu.memory_space<vmem>>, vector<1x1x1x256xf32>
    %194 = vector.shape_cast %193 : vector<1x1x1x256xf32> to vector<1x256xf32>
    %195 = vector.shape_cast %192 : vector<1x256xf32> to vector<1x1x1x256xf32>
    tpu.vector_store %arg16[%c0_133, %c0_134, %c0_135, %c0_136], %195 {strides = array<i32>} : memref<1x1x1x256xf32, #tpu.memory_space<vmem>>, vector<1x1x1x256xf32>,
    return
  }
  func.func @transform_0(%arg0: i32, %arg1: i32) -> (i32, i32, i32, i32) {
    %c8_i32 = arith.constant 8 : i32
    %0 = arith.muli %arg1, %c8_i32 : i32
    %c1_i32 = arith.constant 1 : i32
    %1 = arith.subi %0, %c1_i32 : i32
    %c0_i32 = arith.constant 0 : i32
    %2 = arith.maxsi %1, %c0_i32 : i32
    %c0_i32_0 = arith.constant 0 : i32
    %c0_i32_1 = arith.constant 0 : i32
    %c0_i32_2 = arith.constant 0 : i32
    return %arg0, %2, %c0_i32_0, %c0_i32_1 : i32, i32, i32, i32
  }
  func.func @transform_1(%arg0: i32, %arg1: i32) -> (i32, i32, i32, i32) {
    %c0_i32 = arith.constant 0 : i32
    %c0_i32_0 = arith.constant 0 : i32
    %c0_i32_1 = arith.constant 0 : i32
    return %arg0, %arg1, %c0_i32, %c0_i32_0 : i32, i32, i32, i32
  }
  func.func @transform_2(%arg0: i32, %arg1: i32) -> (i32, i32, i32, i32) {
    %c1_i32 = arith.constant 1 : i32
    %0 = arith.addi %arg1, %c1_i32 : i32
    %c8_i32 = arith.constant 8 : i32
    %1 = arith.muli %0, %c8_i32 : i32
    %c15_i32 = arith.constant 15 : i32
    %2 = arith.minsi %1, %c15_i32 : i32
    %c0_i32 = arith.constant 0 : i32
    %c0_i32_0 = arith.constant 0 : i32
    %c0_i32_1 = arith.constant 0 : i32
    return %arg0, %2, %c0_i32, %c0_i32_0 : i32, i32, i32, i32
  }
  func.func @transform_3(%arg0: i32, %arg1: i32) -> (i32, i32, i32, i32) {
    %c0_i32 = arith.constant 0 : i32
    %c0_i32_0 = arith.constant 0 : i32
    %c0_i32_1 = arith.constant 0 : i32
    %c0_i32_2 = arith.constant 0 : i32
    %c0_i32_3 = arith.constant 0 : i32
    return %c0_i32, %c0_i32_0, %c0_i32_1, %c0_i32_2 : i32, i32, i32, i32
  }
  func.func @transform_4(%arg0: i32, %arg1: i32) -> (i32, i32, i32, i32) {
    %c8_i32 = arith.constant 8 : i32
    %0 = arith.muli %arg1, %c8_i32 : i32
    %c1_i32 = arith.constant 1 : i32
    %1 = arith.subi %0, %c1_i32 : i32
    %c0_i32 = arith.constant 0 : i32
    %2 = arith.maxsi %1, %c0_i32 : i32
    %c0_i32_0 = arith.constant 0 : i32
    %c0_i32_1 = arith.constant 0 : i32
    %c0_i32_2 = arith.constant 0 : i32
    return %arg0, %2, %c0_i32_0, %c0_i32_1 : i32, i32, i32, i32
  }
  func.func @transform_5(%arg0: i32, %arg1: i32) -> (i32, i32, i32, i32) {
    %c0_i32 = arith.constant 0 : i32
    %c0_i32_0 = arith.constant 0 : i32
    %c0_i32_1 = arith.constant 0 : i32
    return %arg0, %arg1, %c0_i32, %c0_i32_0 : i32, i32, i32, i32
  }
  func.func @transform_6(%arg0: i32, %arg1: i32) -> (i32, i32, i32, i32) {
    %c1_i32 = arith.constant 1 : i32
    %0 = arith.addi %arg1, %c1_i32 : i32
    %c8_i32 = arith.constant 8 : i32
    %1 = arith.muli %0, %c8_i32 : i32
    %c15_i32 = arith.constant 15 : i32
    %2 = arith.minsi %1, %c15_i32 : i32
    %c0_i32 = arith.constant 0 : i32
    %c0_i32_0 = arith.constant 0 : i32
    %c0_i32_1 = arith.constant 0 : i32
    return %arg0, %2, %c0_i32, %c0_i32_0 : i32, i32, i32, i32
  }
  func.func @transform_7(%arg0: i32, %arg1: i32) -> (i32, i32, i32, i32) {
    %c0_i32 = arith.constant 0 : i32
    %c0_i32_0 = arith.constant 0 : i32
    %c0_i32_1 = arith.constant 0 : i32
    %c0_i32_2 = arith.constant 0 : i32
    %c0_i32_3 = arith.constant 0 : i32
    return %c0_i32, %c0_i32_0, %c0_i32_1, %c0_i32_2 : i32, i32, i32, i32
  }
  func.func @transform_8(%arg0: i32, %arg1: i32) -> (i32, i32) {
    %c0_i32 = arith.constant 0 : i32
    %c0_i32_0 = arith.constant 0 : i32
    %c0_i32_1 = arith.constant 0 : i32
    return %c0_i32, %c0_i32_0 : i32, i32
  }
  func.func @transform_9(%arg0: i32, %arg1: i32) -> (i32, i32) {
    %c0_i32 = arith.constant 0 : i32
    %c0_i32_0 = arith.constant 0 : i32
    %c0_i32_1 = arith.constant 0 : i32
    return %c0_i32, %c0_i32_0 : i32, i32
  }
  func.func @transform_10(%arg0: i32, %arg1: i32) -> (i32, i32) {
    %c0_i32 = arith.constant 0 : i32
    %c0_i32_0 = arith.constant 0 : i32
    %c0_i32_1 = arith.constant 0 : i32
    return %c0_i32, %c0_i32_0 : i32, i32
  }
  func.func @transform_11(%arg0: i32, %arg1: i32) -> i32 {
    %c0_i32 = arith.constant 0 : i32
    %c0_i32_0 = arith.constant 0 : i32
    return %c0_i32 : i32
  }
  func.func @transform_12(%arg0: i32, %arg1: i32) -> (i32, i32, i32) {
    %c0_i32 = arith.constant 0 : i32
    %c0_i32_0 = arith.constant 0 : i32
    %c0_i32_1 = arith.constant 0 : i32
    return %arg0, %c0_i32, %c0_i32_0 : i32, i32, i32
  }
  func.func @transform_13(%arg0: i32, %arg1: i32) -> (i32, i32, i32, i32) {
    %c0_i32 = arith.constant 0 : i32
    %c0_i32_0 = arith.constant 0 : i32
    %c0_i32_1 = arith.constant 0 : i32
    return %arg0, %arg1, %c0_i32, %c0_i32_0 : i32, i32, i32, i32
  }
  func.func @transform_14(%arg0: i32, %arg1: i32) -> (i32, i32, i32, i32) {
    %c0_i32 = arith.constant 0 : i32
    %c0_i32_0 = arith.constant 0 : i32
    %c0_i32_1 = arith.constant 0 : i32
    return %arg0, %arg1, %c0_i32, %c0_i32_0 : i32, i32, i32, i32
  }
}

module attributes {stable_mosaic.version = 11 : i64} {
  func.func @_conv3x3_kernel(%arg0: i32, %arg1: i32, %arg2: memref<1x1x16x256xbf16, #tpu.memory_space<vmem>>, %arg3: memref<1x8x16x256xbf16, #tpu.memory_space<vmem>>, %arg4: memref<1x1x16x256xbf16, #tpu.memory_space<vmem>>, %arg5: memref<3x3x256x256xbf16, #tpu.memory_space<vmem>>, %arg6: memref<1x256xf32, #tpu.memory_space<vmem>>, %arg7: memref<1x256xf32, #tpu.memory_space<vmem>>, %arg8: memref<1x256xf32, #tpu.memory_space<vmem>>, %arg9: memref<1xf32, #tpu.memory_space<smem>>, %arg10: memref<1x1x256xf32, #tpu.memory_space<vmem>>, %arg11: memref<1x8x16x256xbf16, #tpu.memory_space<vmem>>, %arg12: memref<1x1x1x256xf32, #tpu.memory_space<vmem>>) attributes {dimension_semantics = [#tpu.dimension_semantics<parallel>, #tpu.dimension_semantics<parallel>], iteration_bounds = array<i64: 2, 2>, scalar_prefetch = 0 : i64, scratch_operands = 0 : i64, tpu.core_type = #tpu.core_type<tc>, window_params = [{transform_indices = @transform_0, window_bounds = array<i64: 1, 1, 16, 256>}, {transform_indices = @transform_1, window_bounds = array<i64: 1, 8, 16, 256>}, {transform_indices = @transform_2, window_bounds = array<i64: 1, 1, 16, 256>}, {pipeline_mode = #tpu.pipeline_mode<synchronous>, transform_indices = @transform_3, window_bounds = array<i64: 3, 3, 256, 256>}, {pipeline_mode = #tpu.pipeline_mode<synchronous>, transform_indices = @transform_4, window_bounds = array<i64: 1, 256>}, {pipeline_mode = #tpu.pipeline_mode<synchronous>, transform_indices = @transform_5, window_bounds = array<i64: 1, 256>}, {pipeline_mode = #tpu.pipeline_mode<synchronous>, transform_indices = @transform_6, window_bounds = array<i64: 1, 256>}, {transform_indices = @transform_7, window_bounds = array<i64: 1>}, {transform_indices = @transform_8, window_bounds = array<i64: 1, 1, 256>}, {transform_indices = @transform_9, window_bounds = array<i64: 1, 8, 16, 256>}, {transform_indices = @transform_10, window_bounds = array<i64: 1, 1, 1, 256>}]} {
    %cst = arith.constant 0.000000e+00 : f32
    %0 = vector.broadcast %cst : f32 to vector<128x256xf32>
    %c0_i32 = arith.constant 0 : i32
    %1 = arith.cmpi sgt, %arg1, %c0_i32 : i32
    %2 = arith.extui %1 : i1 to i32
    %3 = arith.sitofp %2 : i32 to f32
    %4 = arith.truncf %3 : f32 to bf16
    %c1_i32 = arith.constant 1 : i32
    %5 = arith.cmpi slt, %arg1, %c1_i32 : i32
    %6 = arith.extui %5 : i1 to i32
    %7 = arith.sitofp %6 : i32 to f32
    %8 = arith.truncf %7 : f32 to bf16
    %c0 = arith.constant 0 : index
    %c0_0 = arith.constant 0 : index
    %c0_1 = arith.constant 0 : index
    %c0_2 = arith.constant 0 : index
    %9 = vector.load %arg2[%c0, %c0_0, %c0_1, %c0_2] : memref<1x1x16x256xbf16, #tpu.memory_space<vmem>>, vector<1x1x16x256xbf16>
    %10 = vector.shape_cast %9 : vector<1x1x16x256xbf16> to vector<16x256xbf16>
    %11 = vector.broadcast %4 : bf16 to vector<16x256xbf16>
    %12 = arith.mulf %10, %11 : vector<16x256xbf16>
    %c0_3 = arith.constant 0 : index
    %c0_4 = arith.constant 0 : index
    %c0_5 = arith.constant 0 : index
    %c0_6 = arith.constant 0 : index
    %13 = vector.load %arg4[%c0_3, %c0_4, %c0_5, %c0_6] : memref<1x1x16x256xbf16, #tpu.memory_space<vmem>>, vector<1x1x16x256xbf16>
    %14 = vector.shape_cast %13 : vector<1x1x16x256xbf16> to vector<16x256xbf16>
    %15 = vector.broadcast %8 : bf16 to vector<16x256xbf16>
    %16 = arith.mulf %14, %15 : vector<16x256xbf16>
    %17 = vector.shape_cast %12 : vector<16x256xbf16> to vector<1x16x256xbf16>
    %c0_7 = arith.constant 0 : index
    %c0_8 = arith.constant 0 : index
    %c0_9 = arith.constant 0 : index
    %c0_10 = arith.constant 0 : index
    %18 = vector.load %arg3[%c0_7, %c0_8, %c0_9, %c0_10] : memref<1x8x16x256xbf16, #tpu.memory_space<vmem>>, vector<1x8x16x256xbf16>
    %19 = vector.shape_cast %18 : vector<1x8x16x256xbf16> to vector<8x16x256xbf16>
    %20 = vector.shape_cast %16 : vector<16x256xbf16> to vector<1x16x256xbf16>
    %21 = tpu.concatenate %17, %19, %20 in 0 : vector<1x16x256xbf16>, vector<8x16x256xbf16>, vector<1x16x256xbf16> -> vector<10x16x256xbf16>
    %22 = arith.extf %21 : vector<10x16x256xbf16> to vector<10x16x256xf32>
    %c0_11 = arith.constant 0 : index
    %c0_12 = arith.constant 0 : index
    %23 = vector.load %arg8[%c0_11, %c0_12] : memref<1x256xf32, #tpu.memory_space<vmem>>, vector<1x256xf32>
    %c0_13 = arith.constant 0 : index
    %24 = memref.load %arg9[%c0_13] : memref<1xf32, #tpu.memory_space<smem>>
    %c0_14 = arith.constant 0 : index
    %c0_15 = arith.constant 0 : index
    %c0_16 = arith.constant 0 : index
    %25 = vector.load %arg10[%c0_14, %c0_15, %c0_16] : memref<1x1x256xf32, #tpu.memory_space<vmem>>, vector<1x1x256xf32>
    %26 = vector.shape_cast %25 : vector<1x1x256xf32> to vector<1x256xf32>
    %27 = vector.shape_cast %23 : vector<1x256xf32> to vector<1x1x256xf32>
    %28 = vector.broadcast %27 : vector<1x1x256xf32> to vector<10x16x256xf32>
    %29 = arith.mulf %22, %28 : vector<10x16x256xf32>
    %cst_17 = arith.constant dense<0.000000e+00> : vector<10x16xf32>
    %30 = vector.multi_reduction <add>, %29, %cst_17 [2] : vector<10x16x256xf32> to vector<10x16xf32>
    %31 = vector.shape_cast %30 : vector<10x16xf32> to vector<10x16x1xf32>
    %32 = vector.broadcast %24 : f32 to vector<10x16x1xf32>
    %33 = arith.addf %31, %32 : vector<10x16x1xf32>
    %34 = arith.negf %33 : vector<10x16x1xf32>
    %35 = math.exp %34 : vector<10x16x1xf32>
    %cst_18 = arith.constant 1.000000e+00 : f32
    %36 = vector.broadcast %cst_18 : f32 to vector<10x16x1xf32>
    %37 = arith.addf %36, %35 : vector<10x16x1xf32>
    %38 = arith.divf %36, %37 : vector<10x16x1xf32>
    %39 = vector.shape_cast %26 : vector<1x256xf32> to vector<1x1x256xf32>
    %40 = vector.broadcast %38 : vector<10x16x1xf32> to vector<10x16x256xf32>
    %41 = vector.broadcast %39 : vector<1x1x256xf32> to vector<10x16x256xf32>
    %42 = arith.addf %40, %41 : vector<10x16x256xf32>
    %43 = arith.mulf %22, %42 : vector<10x16x256xf32>
    %cst_19 = arith.constant 0.000000e+00 : f32
    %44 = vector.broadcast %cst_19 : f32 to vector<10x16x256xf32>
    %45 = arith.maximumf %43, %44 : vector<10x16x256xf32>
    %46 = arith.truncf %45 : vector<10x16x256xf32> to vector<10x16x256xbf16>
    %cst_20 = arith.constant 0.000000e+00 : bf16
    %47 = vector.broadcast %cst_20 : bf16 to vector<10x1x256xbf16>
    %48 = tpu.concatenate %47, %46, %47 in 1 : vector<10x1x256xbf16>, vector<10x16x256xbf16>, vector<10x1x256xbf16> -> vector<10x18x256xbf16>
    %49 = vector.extract_strided_slice %48 {offsets = [0, 0, 0], sizes = [8, 16, 256], strides = [1, 1, 1]} : vector<10x18x256xbf16> to vector<8x16x256xbf16>
    %50 = vector.shape_cast %49 : vector<8x16x256xbf16> to vector<128x256xbf16>
    %c0_21 = arith.constant 0 : index
    %c0_22 = arith.constant 0 : index
    %c0_23 = arith.constant 0 : index
    %c0_24 = arith.constant 0 : index
    %51 = vector.load %arg5[%c0_21, %c0_22, %c0_23, %c0_24] : memref<3x3x256x256xbf16, #tpu.memory_space<vmem>>, vector<1x1x256x256xbf16>
    %52 = vector.shape_cast %51 : vector<1x1x256x256xbf16> to vector<256x256xbf16>
    %cst_25 = arith.constant dense<0.000000e+00> : vector<128x256xf32>
    %53 = tpu.matmul %50, %52, %cst_25 {dimension_numbers = #tpu.dot_dimension_numbers<[1], [0], [0], [1], [0, 0, 1, 1], [], []>} : vector<128x256xbf16>, vector<256x256xbf16>, vector<128x256xf32> -> vector<128x256xf32>
    %54 = arith.addf %0, %53 : vector<128x256xf32>
    %55 = vector.extract_strided_slice %48 {offsets = [0, 1, 0], sizes = [8, 16, 256], strides = [1, 1, 1]} : vector<10x18x256xbf16> to vector<8x16x256xbf16>
    %56 = vector.shape_cast %55 : vector<8x16x256xbf16> to vector<128x256xbf16>
    %c0_26 = arith.constant 0 : index
    %c1 = arith.constant 1 : index
    %c0_27 = arith.constant 0 : index
    %c0_28 = arith.constant 0 : index
    %57 = vector.load %arg5[%c0_26, %c1, %c0_27, %c0_28] : memref<3x3x256x256xbf16, #tpu.memory_space<vmem>>, vector<1x1x256x256xbf16>
    %58 = vector.shape_cast %57 : vector<1x1x256x256xbf16> to vector<256x256xbf16>
    %cst_29 = arith.constant dense<0.000000e+00> : vector<128x256xf32>
    %59 = tpu.matmul %56, %58, %cst_29 {dimension_numbers = #tpu.dot_dimension_numbers<[1], [0], [0], [1], [0, 0, 1, 1], [], []>} : vector<128x256xbf16>, vector<256x256xbf16>, vector<128x256xf32> -> vector<128x256xf32>
    %60 = arith.addf %54, %59 : vector<128x256xf32>
    %61 = vector.extract_strided_slice %48 {offsets = [0, 2, 0], sizes = [8, 16, 256], strides = [1, 1, 1]} : vector<10x18x256xbf16> to vector<8x16x256xbf16>
    %62 = vector.shape_cast %61 : vector<8x16x256xbf16> to vector<128x256xbf16>
    %c0_30 = arith.constant 0 : index
    %c2 = arith.constant 2 : index
    %c0_31 = arith.constant 0 : index
    %c0_32 = arith.constant 0 : index
    %63 = vector.load %arg5[%c0_30, %c2, %c0_31, %c0_32] : memref<3x3x256x256xbf16, #tpu.memory_space<vmem>>, vector<1x1x256x256xbf16>
    %64 = vector.shape_cast %63 : vector<1x1x256x256xbf16> to vector<256x256xbf16>
    %cst_33 = arith.constant dense<0.000000e+00> : vector<128x256xf32>
    %65 = tpu.matmul %62, %64, %cst_33 {dimension_numbers = #tpu.dot_dimension_numbers<[1], [0], [0], [1], [0, 0, 1, 1], [], []>} : vector<128x256xbf16>, vector<256x256xbf16>, vector<128x256xf32> -> vector<128x256xf32>
    %66 = arith.addf %60, %65 : vector<128x256xf32>
    %67 = vector.extract_strided_slice %48 {offsets = [1, 0, 0], sizes = [8, 16, 256], strides = [1, 1, 1]} : vector<10x18x256xbf16> to vector<8x16x256xbf16>
    %68 = vector.shape_cast %67 : vector<8x16x256xbf16> to vector<128x256xbf16>
    %c1_34 = arith.constant 1 : index
    %c0_35 = arith.constant 0 : index
    %c0_36 = arith.constant 0 : index
    %c0_37 = arith.constant 0 : index
    %69 = vector.load %arg5[%c1_34, %c0_35, %c0_36, %c0_37] : memref<3x3x256x256xbf16, #tpu.memory_space<vmem>>, vector<1x1x256x256xbf16>
    %70 = vector.shape_cast %69 : vector<1x1x256x256xbf16> to vector<256x256xbf16>
    %cst_38 = arith.constant dense<0.000000e+00> : vector<128x256xf32>
    %71 = tpu.matmul %68, %70, %cst_38 {dimension_numbers = #tpu.dot_dimension_numbers<[1], [0], [0], [1], [0, 0, 1, 1], [], []>} : vector<128x256xbf16>, vector<256x256xbf16>, vector<128x256xf32> -> vector<128x256xf32>
    %72 = arith.addf %66, %71 : vector<128x256xf32>
    %73 = vector.extract_strided_slice %48 {offsets = [1, 1, 0], sizes = [8, 16, 256], strides = [1, 1, 1]} : vector<10x18x256xbf16> to vector<8x16x256xbf16>
    %74 = vector.shape_cast %73 : vector<8x16x256xbf16> to vector<128x256xbf16>
    %c1_39 = arith.constant 1 : index
    %c1_40 = arith.constant 1 : index
    %c0_41 = arith.constant 0 : index
    %c0_42 = arith.constant 0 : index
    %75 = vector.load %arg5[%c1_39, %c1_40, %c0_41, %c0_42] : memref<3x3x256x256xbf16, #tpu.memory_space<vmem>>, vector<1x1x256x256xbf16>
    %76 = vector.shape_cast %75 : vector<1x1x256x256xbf16> to vector<256x256xbf16>
    %cst_43 = arith.constant dense<0.000000e+00> : vector<128x256xf32>
    %77 = tpu.matmul %74, %76, %cst_43 {dimension_numbers = #tpu.dot_dimension_numbers<[1], [0], [0], [1], [0, 0, 1, 1], [], []>} : vector<128x256xbf16>, vector<256x256xbf16>, vector<128x256xf32> -> vector<128x256xf32>
    %78 = arith.addf %72, %77 : vector<128x256xf32>
    %79 = vector.extract_strided_slice %48 {offsets = [1, 2, 0], sizes = [8, 16, 256], strides = [1, 1, 1]} : vector<10x18x256xbf16> to vector<8x16x256xbf16>
    %80 = vector.shape_cast %79 : vector<8x16x256xbf16> to vector<128x256xbf16>
    %c1_44 = arith.constant 1 : index
    %c2_45 = arith.constant 2 : index
    %c0_46 = arith.constant 0 : index
    %c0_47 = arith.constant 0 : index
    %81 = vector.load %arg5[%c1_44, %c2_45, %c0_46, %c0_47] : memref<3x3x256x256xbf16, #tpu.memory_space<vmem>>, vector<1x1x256x256xbf16>
    %82 = vector.shape_cast %81 : vector<1x1x256x256xbf16> to vector<256x256xbf16>
    %cst_48 = arith.constant dense<0.000000e+00> : vector<128x256xf32>
    %83 = tpu.matmul %80, %82, %cst_48 {dimension_numbers = #tpu.dot_dimension_numbers<[1], [0], [0], [1], [0, 0, 1, 1], [], []>} : vector<128x256xbf16>, vector<256x256xbf16>, vector<128x256xf32> -> vector<128x256xf32>
    %84 = arith.addf %78, %83 : vector<128x256xf32>
    %85 = vector.extract_strided_slice %48 {offsets = [2, 0, 0], sizes = [8, 16, 256], strides = [1, 1, 1]} : vector<10x18x256xbf16> to vector<8x16x256xbf16>
    %86 = vector.shape_cast %85 : vector<8x16x256xbf16> to vector<128x256xbf16>
    %c2_49 = arith.constant 2 : index
    %c0_50 = arith.constant 0 : index
    %c0_51 = arith.constant 0 : index
    %c0_52 = arith.constant 0 : index
    %87 = vector.load %arg5[%c2_49, %c0_50, %c0_51, %c0_52] : memref<3x3x256x256xbf16, #tpu.memory_space<vmem>>, vector<1x1x256x256xbf16>
    %88 = vector.shape_cast %87 : vector<1x1x256x256xbf16> to vector<256x256xbf16>
    %cst_53 = arith.constant dense<0.000000e+00> : vector<128x256xf32>
    %89 = tpu.matmul %86, %88, %cst_53 {dimension_numbers = #tpu.dot_dimension_numbers<[1], [0], [0], [1], [0, 0, 1, 1], [], []>} : vector<128x256xbf16>, vector<256x256xbf16>, vector<128x256xf32> -> vector<128x256xf32>
    %90 = arith.addf %84, %89 : vector<128x256xf32>
    %91 = vector.extract_strided_slice %48 {offsets = [2, 1, 0], sizes = [8, 16, 256], strides = [1, 1, 1]} : vector<10x18x256xbf16> to vector<8x16x256xbf16>
    %92 = vector.shape_cast %91 : vector<8x16x256xbf16> to vector<128x256xbf16>
    %c2_54 = arith.constant 2 : index
    %c1_55 = arith.constant 1 : index
    %c0_56 = arith.constant 0 : index
    %c0_57 = arith.constant 0 : index
    %93 = vector.load %arg5[%c2_54, %c1_55, %c0_56, %c0_57] : memref<3x3x256x256xbf16, #tpu.memory_space<vmem>>, vector<1x1x256x256xbf16>
    %94 = vector.shape_cast %93 : vector<1x1x256x256xbf16> to vector<256x256xbf16>
    %cst_58 = arith.constant dense<0.000000e+00> : vector<128x256xf32>
    %95 = tpu.matmul %92, %94, %cst_58 {dimension_numbers = #tpu.dot_dimension_numbers<[1], [0], [0], [1], [0, 0, 1, 1], [], []>} : vector<128x256xbf16>, vector<256x256xbf16>, vector<128x256xf32> -> vector<128x256xf32>
    %96 = arith.addf %90, %95 : vector<128x256xf32>
    %97 = vector.extract_strided_slice %48 {offsets = [2, 2, 0], sizes = [8, 16, 256], strides = [1, 1, 1]} : vector<10x18x256xbf16> to vector<8x16x256xbf16>
    %98 = vector.shape_cast %97 : vector<8x16x256xbf16> to vector<128x256xbf16>
    %c2_59 = arith.constant 2 : index
    %c2_60 = arith.constant 2 : index
    %c0_61 = arith.constant 0 : index
    %c0_62 = arith.constant 0 : index
    %99 = vector.load %arg5[%c2_59, %c2_60, %c0_61, %c0_62] : memref<3x3x256x256xbf16, #tpu.memory_space<vmem>>, vector<1x1x256x256xbf16>
    %100 = vector.shape_cast %99 : vector<1x1x256x256xbf16> to vector<256x256xbf16>
    %cst_63 = arith.constant dense<0.000000e+00> : vector<128x256xf32>
    %101 = tpu.matmul %98, %100, %cst_63 {dimension_numbers = #tpu.dot_dimension_numbers<[1], [0], [0], [1], [0, 0, 1, 1], [], []>} : vector<128x256xbf16>, vector<256x256xbf16>, vector<128x256xf32> -> vector<128x256xf32>
    %102 = arith.addf %96, %101 : vector<128x256xf32>
    %c0_64 = arith.constant 0 : index
    %c0_65 = arith.constant 0 : index
    %103 = vector.load %arg6[%c0_64, %c0_65] : memref<1x256xf32, #tpu.memory_space<vmem>>, vector<1x256xf32>
    %104 = vector.broadcast %103 : vector<1x256xf32> to vector<128x256xf32>
    %105 = arith.mulf %102, %104 : vector<128x256xf32>
    %c0_66 = arith.constant 0 : index
    %c0_67 = arith.constant 0 : index
    %106 = vector.load %arg7[%c0_66, %c0_67] : memref<1x256xf32, #tpu.memory_space<vmem>>, vector<1x256xf32>
    %107 = vector.broadcast %106 : vector<1x256xf32> to vector<128x256xf32>
    %108 = arith.addf %105, %107 : vector<128x256xf32>
    %109 = vector.shape_cast %108 : vector<128x256xf32> to vector<8x16x256xf32>
    %110 = arith.truncf %109 : vector<8x16x256xf32> to vector<8x16x256xbf16>
    %c0_68 = arith.constant 0 : index
    %c0_69 = arith.constant 0 : index
    %c0_70 = arith.constant 0 : index
    %c0_71 = arith.constant 0 : index
    %111 = vector.load %arg11[%c0_68, %c0_69, %c0_70, %c0_71] : memref<1x8x16x256xbf16, #tpu.memory_space<vmem>>, vector<1x8x16x256xbf16>
    %112 = vector.shape_cast %111 : vector<1x8x16x256xbf16> to vector<8x16x256xbf16>
    %113 = vector.shape_cast %110 : vector<8x16x256xbf16> to vector<1x8x16x256xbf16>
    tpu.vector_store %arg11[%c0_68, %c0_69, %c0_70, %c0_71], %113 {strides = array<i32>} : memref<1x8x16x256xbf16, #tpu.memory_space<vmem>>, vector<1x8x16x256xbf16>,
    %cst_72 = arith.constant dense<0.000000e+00> : vector<256xf32>
    %114 = vector.multi_reduction <add>, %108, %cst_72 [0] : vector<128x256xf32> to vector<256xf32>
    %115 = vector.shape_cast %114 : vector<256xf32> to vector<1x256xf32>
    %c0_73 = arith.constant 0 : index
    %c0_74 = arith.constant 0 : index
    %c0_75 = arith.constant 0 : index
    %c0_76 = arith.constant 0 : index
    %116 = vector.load %arg12[%c0_73, %c0_74, %c0_75, %c0_76] : memref<1x1x1x256xf32, #tpu.memory_space<vmem>>, vector<1x1x1x256xf32>
    %117 = vector.shape_cast %116 : vector<1x1x1x256xf32> to vector<1x256xf32>
    %118 = vector.shape_cast %115 : vector<1x256xf32> to vector<1x1x1x256xf32>
    tpu.vector_store %arg12[%c0_73, %c0_74, %c0_75, %c0_76], %118 {strides = array<i32>} : memref<1x1x1x256xf32, #tpu.memory_space<vmem>>, vector<1x1x1x256xf32>,
    return
  }
  func.func @transform_0(%arg0: i32, %arg1: i32) -> (i32, i32, i32, i32) {
    %c8_i32 = arith.constant 8 : i32
    %0 = arith.muli %arg1, %c8_i32 : i32
    %c1_i32 = arith.constant 1 : i32
    %1 = arith.subi %0, %c1_i32 : i32
    %c0_i32 = arith.constant 0 : i32
    %2 = arith.maxsi %1, %c0_i32 : i32
    %c0_i32_0 = arith.constant 0 : i32
    %c0_i32_1 = arith.constant 0 : i32
    %c0_i32_2 = arith.constant 0 : i32
    return %arg0, %2, %c0_i32_0, %c0_i32_1 : i32, i32, i32, i32
  }
  func.func @transform_1(%arg0: i32, %arg1: i32) -> (i32, i32, i32, i32) {
    %c0_i32 = arith.constant 0 : i32
    %c0_i32_0 = arith.constant 0 : i32
    %c0_i32_1 = arith.constant 0 : i32
    return %arg0, %arg1, %c0_i32, %c0_i32_0 : i32, i32, i32, i32
  }
  func.func @transform_2(%arg0: i32, %arg1: i32) -> (i32, i32, i32, i32) {
    %c1_i32 = arith.constant 1 : i32
    %0 = arith.addi %arg1, %c1_i32 : i32
    %c8_i32 = arith.constant 8 : i32
    %1 = arith.muli %0, %c8_i32 : i32
    %c15_i32 = arith.constant 15 : i32
    %2 = arith.minsi %1, %c15_i32 : i32
    %c0_i32 = arith.constant 0 : i32
    %c0_i32_0 = arith.constant 0 : i32
    %c0_i32_1 = arith.constant 0 : i32
    return %arg0, %2, %c0_i32, %c0_i32_0 : i32, i32, i32, i32
  }
  func.func @transform_3(%arg0: i32, %arg1: i32) -> (i32, i32, i32, i32) {
    %c0_i32 = arith.constant 0 : i32
    %c0_i32_0 = arith.constant 0 : i32
    %c0_i32_1 = arith.constant 0 : i32
    %c0_i32_2 = arith.constant 0 : i32
    %c0_i32_3 = arith.constant 0 : i32
    return %c0_i32, %c0_i32_0, %c0_i32_1, %c0_i32_2 : i32, i32, i32, i32
  }
  func.func @transform_4(%arg0: i32, %arg1: i32) -> (i32, i32) {
    %c0_i32 = arith.constant 0 : i32
    %c0_i32_0 = arith.constant 0 : i32
    %c0_i32_1 = arith.constant 0 : i32
    return %c0_i32, %c0_i32_0 : i32, i32
  }
  func.func @transform_5(%arg0: i32, %arg1: i32) -> (i32, i32) {
    %c0_i32 = arith.constant 0 : i32
    %c0_i32_0 = arith.constant 0 : i32
    %c0_i32_1 = arith.constant 0 : i32
    return %c0_i32, %c0_i32_0 : i32, i32
  }
  func.func @transform_6(%arg0: i32, %arg1: i32) -> (i32, i32) {
    %c0_i32 = arith.constant 0 : i32
    %c0_i32_0 = arith.constant 0 : i32
    %c0_i32_1 = arith.constant 0 : i32
    return %c0_i32, %c0_i32_0 : i32, i32
  }
  func.func @transform_7(%arg0: i32, %arg1: i32) -> i32 {
    %c0_i32 = arith.constant 0 : i32
    %c0_i32_0 = arith.constant 0 : i32
    return %c0_i32 : i32
  }
  func.func @transform_8(%arg0: i32, %arg1: i32) -> (i32, i32, i32) {
    %c0_i32 = arith.constant 0 : i32
    %c0_i32_0 = arith.constant 0 : i32
    %c0_i32_1 = arith.constant 0 : i32
    return %arg0, %c0_i32, %c0_i32_0 : i32, i32, i32
  }
  func.func @transform_9(%arg0: i32, %arg1: i32) -> (i32, i32, i32, i32) {
    %c0_i32 = arith.constant 0 : i32
    %c0_i32_0 = arith.constant 0 : i32
    %c0_i32_1 = arith.constant 0 : i32
    return %arg0, %arg1, %c0_i32, %c0_i32_0 : i32, i32, i32, i32
  }
  func.func @transform_10(%arg0: i32, %arg1: i32) -> (i32, i32, i32, i32) {
    %c0_i32 = arith.constant 0 : i32
    %c0_i32_0 = arith.constant 0 : i32
    %c0_i32_1 = arith.constant 0 : i32
    return %arg0, %arg1, %c0_i32, %c0_i32_0 : i32, i32, i32, i32
  }
}

module attributes {stable_mosaic.version = 11 : i64} {
  func.func @_conv1x1_kernel(%arg0: i32, %arg1: i32, %arg2: memref<1x256x256xbf16, #tpu.memory_space<vmem>>, %arg3: memref<256x128xbf16, #tpu.memory_space<vmem>>, %arg4: memref<1x128xf32, #tpu.memory_space<vmem>>, %arg5: memref<1x128xf32, #tpu.memory_space<vmem>>, %arg6: memref<1x256xf32, #tpu.memory_space<vmem>>, %arg7: memref<1xf32, #tpu.memory_space<smem>>, %arg8: memref<1x1x256xf32, #tpu.memory_space<vmem>>, %arg9: memref<1x256x128xf32, #tpu.memory_space<vmem>>, %arg10: memref<1x1x1x128xf32, #tpu.memory_space<vmem>>) attributes {dimension_semantics = [#tpu.dimension_semantics<parallel>, #tpu.dimension_semantics<parallel>], iteration_bounds = array<i64: 2, 1>, scalar_prefetch = 0 : i64, scratch_operands = 0 : i64, tpu.core_type = #tpu.core_type<tc>, window_params = [{transform_indices = @transform_0, window_bounds = array<i64: 1, 256, 256>}, {pipeline_mode = #tpu.pipeline_mode<synchronous>, transform_indices = @transform_1, window_bounds = array<i64: 256, 128>}, {pipeline_mode = #tpu.pipeline_mode<synchronous>, transform_indices = @transform_2, window_bounds = array<i64: 1, 128>}, {pipeline_mode = #tpu.pipeline_mode<synchronous>, transform_indices = @transform_3, window_bounds = array<i64: 1, 128>}, {pipeline_mode = #tpu.pipeline_mode<synchronous>, transform_indices = @transform_4, window_bounds = array<i64: 1, 256>}, {transform_indices = @transform_5, window_bounds = array<i64: 1>}, {transform_indices = @transform_6, window_bounds = array<i64: 1, 1, 256>}, {transform_indices = @transform_7, window_bounds = array<i64: 1, 256, 128>}, {transform_indices = @transform_8, window_bounds = array<i64: 1, 1, 1, 128>}]} {
    %c0 = arith.constant 0 : index
    %c0_0 = arith.constant 0 : index
    %c0_1 = arith.constant 0 : index
    %0 = vector.load %arg2[%c0, %c0_0, %c0_1] : memref<1x256x256xbf16, #tpu.memory_space<vmem>>, vector<1x256x256xbf16>
    %1 = vector.shape_cast %0 : vector<1x256x256xbf16> to vector<256x256xbf16>
    %2 = arith.extf %1 : vector<256x256xbf16> to vector<256x256xf32>
    %c0_2 = arith.constant 0 : index
    %c0_3 = arith.constant 0 : index
    %3 = vector.load %arg6[%c0_2, %c0_3] : memref<1x256xf32, #tpu.memory_space<vmem>>, vector<1x256xf32>
    %c0_4 = arith.constant 0 : index
    %4 = memref.load %arg7[%c0_4] : memref<1xf32, #tpu.memory_space<smem>>
    %c0_5 = arith.constant 0 : index
    %c0_6 = arith.constant 0 : index
    %c0_7 = arith.constant 0 : index
    %5 = vector.load %arg8[%c0_5, %c0_6, %c0_7] : memref<1x1x256xf32, #tpu.memory_space<vmem>>, vector<1x1x256xf32>
    %6 = vector.shape_cast %5 : vector<1x1x256xf32> to vector<1x256xf32>
    %7 = vector.broadcast %3 : vector<1x256xf32> to vector<256x256xf32>
    %8 = arith.mulf %2, %7 : vector<256x256xf32>
    %cst = arith.constant dense<0.000000e+00> : vector<256xf32>
    %9 = vector.multi_reduction <add>, %8, %cst [1] : vector<256x256xf32> to vector<256xf32>
    %10 = vector.shape_cast %9 : vector<256xf32> to vector<256x1xf32>
    %11 = vector.broadcast %4 : f32 to vector<256x1xf32>
    %12 = arith.addf %10, %11 : vector<256x1xf32>
    %13 = arith.negf %12 : vector<256x1xf32>
    %14 = math.exp %13 : vector<256x1xf32>
    %cst_8 = arith.constant 1.000000e+00 : f32
    %15 = vector.broadcast %cst_8 : f32 to vector<256x1xf32>
    %16 = arith.addf %15, %14 : vector<256x1xf32>
    %17 = arith.divf %15, %16 : vector<256x1xf32>
    %18 = vector.broadcast %17 : vector<256x1xf32> to vector<256x256xf32>
    %19 = vector.broadcast %6 : vector<1x256xf32> to vector<256x256xf32>
    %20 = arith.addf %18, %19 : vector<256x256xf32>
    %21 = arith.mulf %2, %20 : vector<256x256xf32>
    %cst_9 = arith.constant 0.000000e+00 : f32
    %22 = vector.broadcast %cst_9 : f32 to vector<256x256xf32>
    %23 = arith.maximumf %21, %22 : vector<256x256xf32>
    %24 = arith.truncf %23 : vector<256x256xf32> to vector<256x256xbf16>
    %c0_10 = arith.constant 0 : index
    %c0_11 = arith.constant 0 : index
    %25 = vector.load %arg3[%c0_10, %c0_11] : memref<256x128xbf16, #tpu.memory_space<vmem>>, vector<256x128xbf16>
    %cst_12 = arith.constant dense<0.000000e+00> : vector<256x128xf32>
    %26 = tpu.matmul %24, %25, %cst_12 {dimension_numbers = #tpu.dot_dimension_numbers<[1], [0], [0], [1], [0, 0, 1, 1], [], []>} : vector<256x256xbf16>, vector<256x128xbf16>, vector<256x128xf32> -> vector<256x128xf32>
    %c0_13 = arith.constant 0 : index
    %c0_14 = arith.constant 0 : index
    %27 = vector.load %arg4[%c0_13, %c0_14] : memref<1x128xf32, #tpu.memory_space<vmem>>, vector<1x128xf32>
    %28 = vector.broadcast %27 : vector<1x128xf32> to vector<256x128xf32>
    %29 = arith.mulf %26, %28 : vector<256x128xf32>
    %c0_15 = arith.constant 0 : index
    %c0_16 = arith.constant 0 : index
    %30 = vector.load %arg5[%c0_15, %c0_16] : memref<1x128xf32, #tpu.memory_space<vmem>>, vector<1x128xf32>
    %31 = vector.broadcast %30 : vector<1x128xf32> to vector<256x128xf32>
    %32 = arith.addf %29, %31 : vector<256x128xf32>
    %c0_17 = arith.constant 0 : index
    %c0_18 = arith.constant 0 : index
    %c0_19 = arith.constant 0 : index
    %33 = vector.load %arg9[%c0_17, %c0_18, %c0_19] : memref<1x256x128xf32, #tpu.memory_space<vmem>>, vector<1x256x128xf32>
    %34 = vector.shape_cast %33 : vector<1x256x128xf32> to vector<256x128xf32>
    %35 = vector.shape_cast %32 : vector<256x128xf32> to vector<1x256x128xf32>
    tpu.vector_store %arg9[%c0_17, %c0_18, %c0_19], %35 {strides = array<i32>} : memref<1x256x128xf32, #tpu.memory_space<vmem>>, vector<1x256x128xf32>,
    %cst_20 = arith.constant dense<0.000000e+00> : vector<128xf32>
    %36 = vector.multi_reduction <add>, %32, %cst_20 [0] : vector<256x128xf32> to vector<128xf32>
    %37 = vector.shape_cast %36 : vector<128xf32> to vector<1x128xf32>
    %c0_21 = arith.constant 0 : index
    %c0_22 = arith.constant 0 : index
    %c0_23 = arith.constant 0 : index
    %c0_24 = arith.constant 0 : index
    %38 = vector.load %arg10[%c0_21, %c0_22, %c0_23, %c0_24] : memref<1x1x1x128xf32, #tpu.memory_space<vmem>>, vector<1x1x1x128xf32>
    %39 = vector.shape_cast %38 : vector<1x1x1x128xf32> to vector<1x128xf32>
    %40 = vector.shape_cast %37 : vector<1x128xf32> to vector<1x1x1x128xf32>
    tpu.vector_store %arg10[%c0_21, %c0_22, %c0_23, %c0_24], %40 {strides = array<i32>} : memref<1x1x1x128xf32, #tpu.memory_space<vmem>>, vector<1x1x1x128xf32>,
    return
  }
  func.func @transform_0(%arg0: i32, %arg1: i32) -> (i32, i32, i32) {
    %c0_i32 = arith.constant 0 : i32
    %c0_i32_0 = arith.constant 0 : i32
    return %arg0, %arg1, %c0_i32 : i32, i32, i32
  }
  func.func @transform_1(%arg0: i32, %arg1: i32) -> (i32, i32) {
    %c0_i32 = arith.constant 0 : i32
    %c0_i32_0 = arith.constant 0 : i32
    %c0_i32_1 = arith.constant 0 : i32
    return %c0_i32, %c0_i32_0 : i32, i32
  }
  func.func @transform_2(%arg0: i32, %arg1: i32) -> (i32, i32) {
    %c0_i32 = arith.constant 0 : i32
    %c0_i32_0 = arith.constant 0 : i32
    %c0_i32_1 = arith.constant 0 : i32
    return %c0_i32, %c0_i32_0 : i32, i32
  }
  func.func @transform_3(%arg0: i32, %arg1: i32) -> (i32, i32) {
    %c0_i32 = arith.constant 0 : i32
    %c0_i32_0 = arith.constant 0 : i32
    %c0_i32_1 = arith.constant 0 : i32
    return %c0_i32, %c0_i32_0 : i32, i32
  }
  func.func @transform_4(%arg0: i32, %arg1: i32) -> (i32, i32) {
    %c0_i32 = arith.constant 0 : i32
    %c0_i32_0 = arith.constant 0 : i32
    %c0_i32_1 = arith.constant 0 : i32
    return %c0_i32, %c0_i32_0 : i32, i32
  }
  func.func @transform_5(%arg0: i32, %arg1: i32) -> i32 {
    %c0_i32 = arith.constant 0 : i32
    %c0_i32_0 = arith.constant 0 : i32
    return %c0_i32 : i32
  }
  func.func @transform_6(%arg0: i32, %arg1: i32) -> (i32, i32, i32) {
    %c0_i32 = arith.constant 0 : i32
    %c0_i32_0 = arith.constant 0 : i32
    %c0_i32_1 = arith.constant 0 : i32
    return %arg0, %c0_i32, %c0_i32_0 : i32, i32, i32
  }
  func.func @transform_7(%arg0: i32, %arg1: i32) -> (i32, i32, i32) {
    %c0_i32 = arith.constant 0 : i32
    %c0_i32_0 = arith.constant 0 : i32
    return %arg0, %arg1, %c0_i32 : i32, i32, i32
  }
  func.func @transform_8(%arg0: i32, %arg1: i32) -> (i32, i32, i32, i32) {
    %c0_i32 = arith.constant 0 : i32
    %c0_i32_0 = arith.constant 0 : i32
    %c0_i32_1 = arith.constant 0 : i32
    return %arg0, %arg1, %c0_i32, %c0_i32_0 : i32, i32, i32, i32
  }
}

module attributes {stable_mosaic.version = 11 : i64} {
  func.func @_scse_kernel(%arg0: i32, %arg1: i32, %arg2: memref<1x256x128xf32, #tpu.memory_space<vmem>>, %arg3: memref<1x128xf32, #tpu.memory_space<vmem>>, %arg4: memref<1xf32, #tpu.memory_space<smem>>, %arg5: memref<1x1x128xf32, #tpu.memory_space<vmem>>, %arg6: memref<1x256x128xf32, #tpu.memory_space<vmem>>) attributes {dimension_semantics = [#tpu.dimension_semantics<parallel>, #tpu.dimension_semantics<parallel>], iteration_bounds = array<i64: 2, 1>, scalar_prefetch = 0 : i64, scratch_operands = 0 : i64, tpu.core_type = #tpu.core_type<tc>, window_params = [{transform_indices = @transform_0, window_bounds = array<i64: 1, 256, 128>}, {pipeline_mode = #tpu.pipeline_mode<synchronous>, transform_indices = @transform_1, window_bounds = array<i64: 1, 128>}, {transform_indices = @transform_2, window_bounds = array<i64: 1>}, {transform_indices = @transform_3, window_bounds = array<i64: 1, 1, 128>}, {transform_indices = @transform_4, window_bounds = array<i64: 1, 256, 128>}]} {
    %c0 = arith.constant 0 : index
    %c0_0 = arith.constant 0 : index
    %c0_1 = arith.constant 0 : index
    %0 = vector.load %arg2[%c0, %c0_0, %c0_1] : memref<1x256x128xf32, #tpu.memory_space<vmem>>, vector<1x256x128xf32>
    %1 = vector.shape_cast %0 : vector<1x256x128xf32> to vector<256x128xf32>
    %c0_2 = arith.constant 0 : index
    %c0_3 = arith.constant 0 : index
    %2 = vector.load %arg3[%c0_2, %c0_3] : memref<1x128xf32, #tpu.memory_space<vmem>>, vector<1x128xf32>
    %c0_4 = arith.constant 0 : index
    %3 = memref.load %arg4[%c0_4] : memref<1xf32, #tpu.memory_space<smem>>
    %c0_5 = arith.constant 0 : index
    %c0_6 = arith.constant 0 : index
    %c0_7 = arith.constant 0 : index
    %4 = vector.load %arg5[%c0_5, %c0_6, %c0_7] : memref<1x1x128xf32, #tpu.memory_space<vmem>>, vector<1x1x128xf32>
    %5 = vector.shape_cast %4 : vector<1x1x128xf32> to vector<1x128xf32>
    %6 = vector.broadcast %2 : vector<1x128xf32> to vector<256x128xf32>
    %7 = arith.mulf %1, %6 : vector<256x128xf32>
    %cst = arith.constant dense<0.000000e+00> : vector<256xf32>
    %8 = vector.multi_reduction <add>, %7, %cst [1] : vector<256x128xf32> to vector<256xf32>
    %9 = vector.shape_cast %8 : vector<256xf32> to vector<256x1xf32>
    %10 = vector.broadcast %3 : f32 to vector<256x1xf32>
    %11 = arith.addf %9, %10 : vector<256x1xf32>
    %12 = arith.negf %11 : vector<256x1xf32>
    %13 = math.exp %12 : vector<256x1xf32>
    %cst_8 = arith.constant 1.000000e+00 : f32
    %14 = vector.broadcast %cst_8 : f32 to vector<256x1xf32>
    %15 = arith.addf %14, %13 : vector<256x1xf32>
    %16 = arith.divf %14, %15 : vector<256x1xf32>
    %17 = vector.broadcast %16 : vector<256x1xf32> to vector<256x128xf32>
    %18 = vector.broadcast %5 : vector<1x128xf32> to vector<256x128xf32>
    %19 = arith.addf %17, %18 : vector<256x128xf32>
    %20 = arith.mulf %1, %19 : vector<256x128xf32>
    %c0_9 = arith.constant 0 : index
    %c0_10 = arith.constant 0 : index
    %c0_11 = arith.constant 0 : index
    %21 = vector.load %arg6[%c0_9, %c0_10, %c0_11] : memref<1x256x128xf32, #tpu.memory_space<vmem>>, vector<1x256x128xf32>
    %22 = vector.shape_cast %21 : vector<1x256x128xf32> to vector<256x128xf32>
    %23 = vector.shape_cast %20 : vector<256x128xf32> to vector<1x256x128xf32>
    tpu.vector_store %arg6[%c0_9, %c0_10, %c0_11], %23 {strides = array<i32>} : memref<1x256x128xf32, #tpu.memory_space<vmem>>, vector<1x256x128xf32>,
    return
  }
  func.func @transform_0(%arg0: i32, %arg1: i32) -> (i32, i32, i32) {
    %c0_i32 = arith.constant 0 : i32
    %c0_i32_0 = arith.constant 0 : i32
    return %arg0, %arg1, %c0_i32 : i32, i32, i32
  }
  func.func @transform_1(%arg0: i32, %arg1: i32) -> (i32, i32) {
    %c0_i32 = arith.constant 0 : i32
    %c0_i32_0 = arith.constant 0 : i32
    %c0_i32_1 = arith.constant 0 : i32
    return %c0_i32, %c0_i32_0 : i32, i32
  }
  func.func @transform_2(%arg0: i32, %arg1: i32) -> i32 {
    %c0_i32 = arith.constant 0 : i32
    %c0_i32_0 = arith.constant 0 : i32
    return %c0_i32 : i32
  }
  func.func @transform_3(%arg0: i32, %arg1: i32) -> (i32, i32, i32) {
    %c0_i32 = arith.constant 0 : i32
    %c0_i32_0 = arith.constant 0 : i32
    %c0_i32_1 = arith.constant 0 : i32
    return %arg0, %c0_i32, %c0_i32_0 : i32, i32, i32
  }
  func.func @transform_4(%arg0: i32, %arg1: i32) -> (i32, i32, i32) {
    %c0_i32 = arith.constant 0 : i32
    %c0_i32_0 = arith.constant 0 : i32
    return %arg0, %arg1, %c0_i32 : i32, i32, i32
  }
}

</mosaic_0001>

<bundles_post_ra>
// kernel: decoder_forward.5
= control target key start
LH: loop header
LB: loop body
LE: loop exit
PB: predicated region body
PF: predicated region fallthrough
CT: control target
= control target key end

     0   :  { %11 = vsyncpa [#allocation3], 0  ;;  %s2179_s0 = inlined_call_operand.vmem [shape: bf16[2,256,256], index: 0, kind: input, shape index: {}]   ;;  %s2180_s1 = inlined_call_operand.hbm [shape: bf16[256,128], index: 1, kind: input, shape index: {}]   ;;  %s2181_s2 = inlined_call_operand.hbm [shape: f32[1,128], index: 2, kind: input, shape index: {}]   ;;  %s2182_s3 = inlined_call_operand.hbm [shape: f32[1,128], index: 3, kind: input, shape index: {}]   ;;  %s2183_s4 = inlined_call_operand.vmem [shape: bf16[2,256,128], index: 4, kind: output, shape index: {0}]   ;;  %s2184_s5 = inlined_call_operand.vmem [shape: f32[2,1,1,128], index: 5, kind: output, shape index: {1}]  }
   0x1   :  { %12 = vsyncpa [#allocation5], 0  ;;  %s1866_s18 = smov 0   ;;  %s1868_s19 = smov 0  }
   0x2   :  { %s1870_s20 = smov 0  }
   0x3 LB: > { %s1831_s21 = smov [#allocation4]   ;;  %s1238_s23 = sadd.s32 4294967295, %s1829_s20   ;;  %s1829_s20 = sphi %s1870_s20, %s18_s20   ;;  %s1825_s19 = sphi %s1868_s19, %s2197_s19   ;;  %s1821_s18 = sphi %s1866_s18, %s2196_s18  }
   0x4   : > { %s208_s22 = sshll.u32 %s1831_s21, 4  ;;  %p1240_p0 = scmp.ge.s32.totalorder %s1829_s20, 1  ;;  %s209_s22 = int_to_ptr.vmem [resolvable:$true] %s208_s22 }
   0x5   : > { %p182_p1 = scmp.lt.s32.totalorder %s1829_s20, 3  ;;  %p1884_p2 = scmp.eq.s32.totalorder %s1238_s23, 0 }
   0x6   : > { %s30_s26 = sadd.s32 1, %s1825_s19  ;;  %s1832_s29 = smov [#allocation2]  }
   0x7   : > { %s2188_s24 = scalar_select %p1884_p2, 1, 0 }
   0x8   : > { %p1888_p3 = pnand %p1240_p0, %p182_p1  ;;  %p1901_p6 = scmp.ge.s32.totalorder %s30_s26, 2 }
   0x9   : > { %s194_s30 = sshll.u32 %s1832_s29, 4  ;;  %s1715_s8 = scalar_lea.hbm %s2181_s2, 16  ;;  %s1905_s30 = int_to_ptr.vmem [resolvable:$true] %s194_s30 }
   0xa   : > { %s2189_s25 = scalar_select %p1888_p3, 1, 0 }
   0xb   : > { %p1606_p4 = pneg %p1888_p3  ;;  %p1716_p7 = scmp.ne.s32.totalorder %s2181_s2, %s1715_s8 }
   0xc   : > { %s2191_s28 = scalar_select %p1901_p6, 1, 0 }
   0xd   : > { %p1897_p5 = pnand %p1884_p2, %p1606_p4  ;;  %p1722_p11 = scmp.lt.u32.totalorder %s1715_s8, %s2181_s2 }
   0xf   : > { %p1915_p8 = pneg %p1897_p5 }
  0x11   : > { %p1718_p9 = pnand %p1915_p8, %p1716_p7 }
  0x13   : > { %p1719_p10 = pneg %p1718_p9 }
  0x15   : > { %p1724_p12 = pnand %p1722_p11, %p1719_p10 }
  0x17   : > { %1727 = shalt.err (!%p1724_p12)
}
  0x18   : > { %s1728_s14 = scalar_lea.vmem %s209_s22, 16  ;;  %s1735_s15 = scalar_lea.vmem %s209_s22, 32 }
  0x19   : > { %p1729_p13 = scmp.ne.s32.totalorder %s209_s22, %s1728_s14  ;;  %p1736_p4 = scmp.lt.s32.totalorder %s209_s22, %s209_s22 }
  0x1a   : > { %p1737_p2 = scmp.lt.s32.totalorder %s1735_s15, %s1728_s14 }
  0x1b   : > { %p1731_p0 = pnand %p1729_p13, %p1915_p8 }
  0x1c   : > { %p1738_p3 = por %p1737_p2, %p1736_p4 }
  0x1d   : > { %p1732_p1 = pneg %p1731_p0 }
  0x1f   : > { %p1739_p6 = pnand %p1738_p3, %p1732_p1 }
  0x21   : > { %1742 = shalt.err (!%p1739_p6)
}
  0x22   : > { %1612 = dma.hbm_to_vmem [thread:$0]  (!%p1897_p5), %s2181_s2, 16, %s209_s22, [#allocation5]  }
  0x23   : > { %p2193_p7 = scmp.ne.s32.totalorder %s2191_s28, 0  ;;  %s1743_s29 = scalar_lea.hbm %s2180_s1, 2048 }
  0x24   : > { %p1744_p2 = scmp.ne.s32.totalorder %s2180_s1, %s1743_s29  ;;  %p1750_p9 = scmp.lt.u32.totalorder %s1743_s29, %s2180_s1 }
  0x25   : > { %s2199_s26 = smov (%p2193_p7, %s30_s26), 0 }
  0x26   : > { %p1746_p3 = pnand %p1744_p2, %p1915_p8 }
  0x28   : > { %p1747_p6 = pneg %p1746_p3 }
  0x2a   : > { %p1752_p10 = pnand %p1750_p9, %p1747_p6 }
  0x2c   : > { %1755 = shalt.err (!%p1752_p10)
}
  0x2d   : > { %s1756_s22 = scalar_lea.vmem %s1905_s30, 2048  ;;  %p1764_p0 = scmp.lt.s32.totalorder %s1905_s30, %s1905_s30 }
  0x2e   : > { %p1757_p11 = scmp.ne.s32.totalorder %s1905_s30, %s1756_s22  ;;  %p1765_p1 = scmp.lt.s32.totalorder %s1756_s22, %s1756_s22 }
  0x30   : > { %p1759_p12 = pnand %p1757_p11, %p1915_p8  ;;  %p1766_p4 = por %p1765_p1, %p1764_p0 }
  0x32   : > { %p1760_p13 = pneg %p1759_p12 }
  0x34   : > { %p1767_p7 = pnand %p1766_p4, %p1760_p13 }
  0x36   : > { %1770 = shalt.err (!%p1767_p7)
}
  0x37   : > { %s1833_s28 = smov 64   ;;  %s1834_s10 = smov 4  }
  0x38   : > { %1609 = dma.hbm_to_vmem [thread:$0]  (!%p1897_p5), %s2180_s1, 2048, %s1905_s30, [#allocation3], %s1833_s28, %s1833_s28, %s1834_s10  }
  0x39   : > { %s1835_s14 = smov [#allocation6]   ;;  %s1771_s21 = scalar_lea.hbm %s2182_s3, 16 }
  0x3a   : > { %s219_s15 = sshll.u32 %s1835_s14, 4  ;;  %p1772_p2 = scmp.ne.s32.totalorder %s2182_s3, %s1771_s21  ;;  %s220_s15 = int_to_ptr.vmem [resolvable:$true] %s219_s15 }
  0x3b   : > { %p1778_p9 = scmp.lt.u32.totalorder %s1771_s21, %s2182_s3 }
  0x3c   : > { %p1774_p3 = pnand %p1772_p2, %p1915_p8 }
  0x3e   : > { %p1775_p6 = pneg %p1774_p3 }
  0x40   : > { %p1780_p10 = pnand %p1778_p9, %p1775_p6 }
  0x42   : > { %1783 = shalt.err (!%p1780_p10)
}
  0x43   : > { %s1784_s30 = scalar_lea.vmem %s220_s15, 16  ;;  %s1791_s8 = scalar_lea.vmem %s220_s15, 32 }
  0x44   : > { %p1785_p11 = scmp.ne.s32.totalorder %s220_s15, %s1784_s30  ;;  %p1792_p0 = scmp.lt.s32.totalorder %s220_s15, %s220_s15 }
  0x45   : > { %p1793_p1 = scmp.lt.s32.totalorder %s1791_s8, %s1784_s30 }
  0x46   : > { %p1787_p12 = pnand %p1785_p11, %p1915_p8 }
  0x47   : > { %p1794_p4 = por %p1793_p1, %p1792_p0 }
  0x48   : > { %p1788_p13 = pneg %p1787_p12 }
  0x4a   : > { %p1795_p7 = pnand %p1794_p4, %p1788_p13 }
  0x4c   : > { %1798 = shalt.err (!%p1795_p7)
}
  0x4d   : > { %1615 = dma.hbm_to_vmem [thread:$0]  (!%p1897_p5), %s2182_s3, 16, %s220_s15, [#allocation5]  }
  0x4e   : > { %p2194_p2 = scmp.ne.s32.totalorder %s2189_s25, 0 }
  0x4f   : > { %p2195_p3 = scmp.ne.s32.totalorder (!%p2194_p2), %s2188_s24, 0 }
  0x50   : > { %246 = sbr.rel (%p2194_p2) target bundleno = 447 (0x1bf), region = 36 }
  0x57   : > { %1812 = dma.done.wait (%p2195_p3), [#allocation3], 2048  }
  0x58   : > { %1814 = vsyncadd (%p2195_p3), [#allocation3], 4294965248 }
  0x59   : > { %1816 = dma.done.wait (%p2195_p3), [#allocation5], 32  }
  0x5a   : > { %1818 = vsyncadd (%p2195_p3), [#allocation5], 4294967264  ;;  %v1651_v0 = vld [vmem:[#allocation2 + $0x40] sm:$0xff]   ;;  %v1653_v2 = vld [vmem:[#allocation2 + $0x48] sm:$0xff]   ;;  %p298_p5 = scmp.lt.s32.totalorder %s1821_s18, 1 }
  0x5b   : > { %v1652_v1 = vld [vmem:[#allocation2] sm:$0xff]   ;;  %1466 = vmatprep.subr.bf16.mxu0 %v1651_v0  ;;  %1578 = vmatprep.subr.bf16.mxu1 %v1651_v0  ;;  %v1654_v3 = vld [vmem:[#allocation2 + $0x8] sm:$0xff]   ;;  %v1655_v4 = vld [vmem:[#allocation2 + $0x50] sm:$0xff]  }
  0x5c   : > { %1467 = vmatpush3.bf16.msra.mxu0 %v1652_v1  ;;  %1586 = vmatpush3.bf16.msra.mxu1 %v1652_v1  ;;  %v1656_v5 = vld [vmem:[#allocation2 + $0x10] sm:$0xff]   ;;  %s2201_s18 = smov (!%p298_p5, %s1821_s18), 1  ;;  %v1657_v6 = vld [vmem:[#allocation2 + $0x58] sm:$0xff]   ;;  %v1659_v8 = vld [vmem:[#allocation2 + $0x60] sm:$0xff]  }
  0x5d   : > { %1468 = vmatprep.subr.bf16.mxu0 %v1653_v2  ;;  %1579 = vmatprep.subr.bf16.mxu1 %v1653_v2  ;;  %v1658_v7 = vld [vmem:[#allocation2 + $0x18] sm:$0xff]   ;;  %s1337_s24 = sshll.u32 %s2201_s18, 8  ;;  %v1660_v9 = vld [vmem:[#allocation2 + $0x20] sm:$0xff]   ;;  %v1661_v10 = vld [vmem:[#allocation2 + $0x68] sm:$0xff]   ;;  %s1338_s28 = sshll.u32 %s2201_s18, 7 }
  0x5e   : > { %s1994_s11 = scalar_lea.vmem %s2179_s0, %s1337_s24  ;;  %v1662_v12 = vld [vmem:[#allocation2 + $0x28] sm:$0xff]   ;;  %v1663_v13 = vld [vmem:[#allocation2 + $0x70] sm:$0xff]   ;;  %v1665_v16 = vld [vmem:[#allocation2 + $0x78] sm:$0xff]   ;;  %s2045_s13 = scalar_lea.vmem %s2183_s4, %s1338_s28 }
  0x5f   : > { %v1669_v11 = vld [vmem:[%s1994_s11 + $0x4] ss:$8 sps:$4 sm:$0xff]   ;;  %v1664_v15 = vld [vmem:[#allocation2 + $0x30] sm:$0xff]   ;;  %v1666_v17 = vld [vmem:[#allocation2 + $0x38] sm:$0xff]   ;;  %s323_s16 = scalar_lea.vmem %s2184_s5, %s2201_s18 }
  0x60   : > { %1469 = vmatpush3.bf16.msra.mxu0 %v1654_v3  ;;  %1587 = vmatpush3.bf16.msra.mxu1 %v1654_v3  ;;  %v1681_v14 = vld [vmem:[%s1994_s11 + $0x84] ss:$8 sps:$4 sm:$0xff]   ;;  %v1667_v18 = vld [vmem:[%s1994_s11] ss:$8 sps:$4 sm:$0xff]   ;;  %v1670_v19 = vld [vmem:[%s1994_s11 + $0x14] ss:$8 sps:$4 sm:$0xff]  }
  0x61   : > { %1470 = vmatprep.subr.bf16.mxu0 %v1655_v4  ;;  %1580 = vmatprep.subr.bf16.mxu1 %v1655_v4  ;;  %v1679_v20 = vld [vmem:[%s1994_s11 + $0x80] ss:$8 sps:$4 sm:$0xff]   ;;  %v1685_v21 = vld [vmem:[%s1994_s11 + $0x94] ss:$8 sps:$4 sm:$0xff]   ;;  %v1672_v22 = vld [vmem:[%s1994_s11 + $0x10] ss:$8 sps:$4 sm:$0xff]  }
  0x62   : > { %677 = vmatprep.mubr.bf16.mxu0 %v1669_v11  ;;  %741 = vmatprep.mubr.bf16.mxu1 %v1681_v14  ;;  %v1673_v23 = vld [vmem:[%s1994_s11 + $0x24] ss:$8 sps:$4 sm:$0xff]   ;;  %v1687_v24 = vld [vmem:[%s1994_s11 + $0x90] ss:$8 sps:$4 sm:$0xff]   ;;  %v1675_v26 = vld [vmem:[%s1994_s11 + $0x20] ss:$8 sps:$4 sm:$0xff]  }
  0x63   : > { %v1691_v25 = vld [vmem:[%s1994_s11 + $0xa4] ss:$8 sps:$4 sm:$0xff]   ;;  %v1676_v27 = vld [vmem:[%s1994_s11 + $0x34] ss:$8 sps:$4 sm:$0xff]   ;;  %v1693_v28 = vld [vmem:[%s1994_s11 + $0xa0] ss:$8 sps:$4 sm:$0xff]  }
  0x64   : > { %1471 = vmatpush3.bf16.msra.mxu0 %v1656_v5  ;;  %1588 = vmatpush3.bf16.msra.mxu1 %v1656_v5  ;;  %v1697_v29 = vld [vmem:[%s1994_s11 + $0xb4] ss:$8 sps:$4 sm:$0xff]   ;;  %v1678_v30 = vld [vmem:[%s1994_s11 + $0x30] ss:$8 sps:$4 sm:$0xff]   ;;  %v1682_v31 = vld [vmem:[%s1994_s11 + $0x44] ss:$8 sps:$4 sm:$0xff]  }
  0x65   : > { %1472 = vmatprep.subr.bf16.mxu0 %v1657_v6  ;;  %1581 = vmatprep.subr.bf16.mxu1 %v1657_v6  ;;  %v1699_v32 = vld [vmem:[%s1994_s11 + $0xb0] ss:$8 sps:$4 sm:$0xff]   ;;  %v1703_v33 = vld [vmem:[%s1994_s11 + $0xc4] ss:$8 sps:$4 sm:$0xff]   ;;  %v1684_v34 = vld [vmem:[%s1994_s11 + $0x40] ss:$8 sps:$4 sm:$0xff]  }
  0x66   : > { %v1688_v35 = vld [vmem:[%s1994_s11 + $0x54] ss:$8 sps:$4 sm:$0xff]   ;;  %v1705_v36 = vld [vmem:[%s1994_s11 + $0xc0] ss:$8 sps:$4 sm:$0xff]   ;;  %v1690_v38 = vld [vmem:[%s1994_s11 + $0x50] ss:$8 sps:$4 sm:$0xff]  }
  0x67   : > { %v1706_v37 = vld [vmem:[%s1994_s11 + $0xd4] ss:$8 sps:$4 sm:$0xff]   ;;  %v1694_v39 = vld [vmem:[%s1994_s11 + $0x64] ss:$8 sps:$4 sm:$0xff]   ;;  %v1708_v40 = vld [vmem:[%s1994_s11 + $0xd0] ss:$8 sps:$4 sm:$0xff]  }
  0x68   : > { %1473 = vmatpush3.bf16.msra.mxu0 %v1658_v7  ;;  %1589 = vmatpush3.bf16.msra.mxu1 %v1658_v7  ;;  %v1709_v41 = vld [vmem:[%s1994_s11 + $0xe4] ss:$8 sps:$4 sm:$0xff]   ;;  %v1696_v42 = vld [vmem:[%s1994_s11 + $0x60] ss:$8 sps:$4 sm:$0xff]   ;;  %v1700_v43 = vld [vmem:[%s1994_s11 + $0x74] ss:$8 sps:$4 sm:$0xff]  }
  0x69   : > { %1474 = vmatprep.subr.bf16.mxu0 %v1659_v8  ;;  %1582 = vmatprep.subr.bf16.mxu1 %v1659_v8  ;;  %v1711_v44 = vld [vmem:[%s1994_s11 + $0xe0] ss:$8 sps:$4 sm:$0xff]   ;;  %v1712_v45 = vld [vmem:[%s1994_s11 + $0xf4] ss:$8 sps:$4 sm:$0xff]   ;;  %v1702_v46 = vld [vmem:[%s1994_s11 + $0x70] ss:$8 sps:$4 sm:$0xff]  }
  0x6a   : > { %v1714_v47 = vld [vmem:[%s1994_s11 + $0xf0] ss:$8 sps:$4 sm:$0xff]   ;;  %v2028_v50 = vld [vmem:[#allocation4] ss:$0 sm:$0xff]  ;;  %v2031_v61 = vld [vmem:[#allocation6] ss:$0 sm:$0xff] }
  0x6c   : > { %1475 = vmatpush3.bf16.msra.mxu0 %v1660_v9  ;;  %1590 = vmatpush3.bf16.msra.mxu1 %v1660_v9 }
  0x6d   : > { %1476 = vmatprep.subr.bf16.mxu0 %v1661_v10  ;;  %1583 = vmatprep.subr.bf16.mxu1 %v1661_v10 }
  0x70   : > { %1477 = vmatpush3.bf16.msra.mxu0 %v1662_v12  ;;  %1591 = vmatpush3.bf16.msra.mxu1 %v1662_v12 }
  0x71   : > { %1478 = vmatprep.subr.bf16.mxu0 %v1663_v13  ;;  %1584 = vmatprep.subr.bf16.mxu1 %v1663_v13 }
  0x74   : > { %1479 = vmatpush3.bf16.msra.mxu0 %v1664_v15  ;;  %1592 = vmatpush3.bf16.msra.mxu1 %v1664_v15 }
  0x75   : > { %1480 = vmatprep.subr.bf16.mxu0 %v1665_v16  ;;  %1585 = vmatprep.subr.bf16.mxu1 %v1665_v16 }
  0x78   : > { %1481 = vmatpush3.bf16.msra.mxu0 %v1666_v17  ;;  %1593 = vmatpush3.bf16.msra.mxu1 %v1666_v17 }
  0x7b   : > { %678 = vmatmul.mubr.bf16.vlgmr.msra.gmra.mrb[0].mxu0 %v1667_v18  ;;  %742 = vmatmul.mubr.bf16.vlgmr.msra.gmra.mrb[0].mxu1 %v1679_v20 }
  0x7c   : > { %685 = vmatprep.mubr.bf16.mxu0 %v1670_v19  ;;  %749 = vmatprep.mubr.bf16.mxu1 %v1685_v21 }
  0x83   : > { %686 = vmatmul.mubr.bf16.gmra.mrb[4].mxu0 %v1672_v22  ;;  %750 = vmatmul.mubr.bf16.gmra.mrb[4].mxu1 %v1687_v24 }
  0x84   : > { %693 = vmatprep.mubr.bf16.mxu0 %v1673_v23  ;;  %757 = vmatprep.mubr.bf16.mxu1 %v1691_v25 }
  0x8b   : > { %694 = vmatmul.mubr.bf16.gmra.mrb[8].mxu0 %v1675_v26  ;;  %758 = vmatmul.mubr.bf16.gmra.mrb[8].mxu1 %v1693_v28 }
  0x8c   : > { %701 = vmatprep.mubr.bf16.mxu0 %v1676_v27  ;;  %765 = vmatprep.mubr.bf16.mxu1 %v1697_v29 }
  0x93   : > { %702 = vmatmul.mubr.bf16.gmra.mrb[12].mxu0 %v1678_v30  ;;  %766 = vmatmul.mubr.bf16.gmra.mrb[12].mxu1 %v1699_v32 }
  0x94   : > { %709 = vmatprep.mubr.bf16.mxu0 %v1682_v31  ;;  %773 = vmatprep.mubr.bf16.mxu1 %v1703_v33 }
  0x9b   : > { %710 = vmatmul.mubr.bf16.gmra.mrb[16].mxu0 %v1684_v34  ;;  %774 = vmatmul.mubr.bf16.gmra.mrb[16].mxu1 %v1705_v36 }
  0x9c   : > { %717 = vmatprep.mubr.bf16.mxu0 %v1688_v35  ;;  %781 = vmatprep.mubr.bf16.mxu1 %v1706_v37 }
  0xa3   : > { %718 = vmatmul.mubr.bf16.gmra.mrb[20].mxu0 %v1690_v38  ;;  %782 = vmatmul.mubr.bf16.gmra.mrb[20].mxu1 %v1708_v40 }
  0xa4   : > { %725 = vmatprep.mubr.bf16.mxu0 %v1694_v39  ;;  %789 = vmatprep.mubr.bf16.mxu1 %v1709_v41 }
  0xab   : > { %726 = vmatmul.mubr.bf16.gmra.mrb[24].mxu0 %v1696_v42  ;;  %790 = vmatmul.mubr.bf16.gmra.mrb[24].mxu1 %v1711_v44 }
  0xac   : > { %733 = vmatprep.mubr.bf16.mxu0 %v1700_v43  ;;  %797 = vmatprep.mubr.bf16.mxu1 %v1712_v45 }
  0xb3   : > { %734 = vmatmul.mubr.bf16.gmra.mrb[28].mxu0 %v1702_v46  ;;  %798 = vmatmul.mubr.bf16.gmra.mrb[28].mxu1 %v1714_v47 }
 0x14e   : > { %v1482_v48 = vpop.f32.mrb[0].mxu0  ;;  %v1530_v51 = vpop.f32.mrb[0].mxu1 }
 0x14f   : > { %v1483_v49 = vpop.f32.mrb[1].mxu0  ;;  %v1531_v54 = vpop.f32.mrb[1].mxu1 }
 0x150   : > { %v1484_v52 = vadd.f32 %v1483_v49, %v1482_v48  ;;  %v1485_v53 = vpop.f32.mrb[2].mxu0  ;;  %v1532_v56 = vadd.f32 %v1531_v54, %v1530_v51  ;;  %v1533_v57 = vpop.f32.mrb[2].mxu1 }
 0x151   : > { %v1486_v55 = vpop.f32.mrb[3].mxu0  ;;  %v1534_v60 = vpop.f32.mrb[3].mxu1 }
 0x152   : > { %v813_v58 = vmul.f32 %v1484_v52, %v2028_v50  ;;  %v1487_v59 = vadd.f32 %v1486_v55, %v1485_v53  ;;  %v829_v62 = vmul.f32 %v1532_v56, %v2028_v50  ;;  %v1535_v63 = vadd.f32 %v1534_v60, %v1533_v57 }
 0x154   : > { %v814_v0 = vmul.f32 %v1487_v59, %v2028_v50  ;;  %v2037_v1 = vadd.f32 %v2031_v61, %v829_v62  ;;  %v830_v2 = vmul.f32 %v1535_v63, %v2028_v50  ;;  %v852_v3 = vadd.f32 %v2031_v61, %v813_v58 }
 0x156   : > { %v853_v4 = vadd.f32 %v2031_v61, %v814_v0  ;;  %v1488_v5 = vpop.f32.mrb[4].mxu0  ;;  %v2048_v7 = vadd.f32 %v2031_v61, %v830_v2  ;;  %v1536_v8 = vpop.f32.mrb[4].mxu1 }
 0x157   : > { %v1489_v6 = vpop.f32.mrb[5].mxu0  ;;  %v1537_v13 = vpop.f32.mrb[5].mxu1 }
 0x158   : > { %v1374_v9 = vpack.c.bf16 %v853_v4, %v852_v3  ;;  %v1044_v10 = vadd.f32 %v853_v4, %v852_v3  ;;  %v1490_v11 = vadd.f32 %v1489_v6, %v1488_v5  ;;  %v1491_v12 = vpop.f32.mrb[6].mxu0  ;;  %v1414_v15 = vpack.c.bf16 %v2048_v7, %v2037_v1  ;;  %v1539_v17 = vpop.f32.mrb[6].mxu1 }
 0x159   : > { %v1492_v14 = vpop.f32.mrb[7].mxu0  ;;  %v1538_v16 = vadd.f32 %v1537_v13, %v1536_v8  ;;  %v1540_v20 = vpop.f32.mrb[7].mxu1 }
 0x15a   : > { %1375 = vst [vmem:[%s2045_s13] sm:$0xff] %v1374_v9   ;;  %v815_v18 = vmul.f32 %v1490_v11, %v2028_v50  ;;  %v1493_v19 = vadd.f32 %v1492_v14, %v1491_v12  ;;  %1458 = vst [vmem:[%s2045_s13 + $0x40] sm:$0xff] %v1414_v15   ;;  %v1541_v22 = vadd.f32 %v1540_v20, %v1539_v17 }
 0x15b   : > { %v831_v21 = vmul.f32 %v1538_v16, %v2028_v50 }
 0x15c   : > { %v854_v23 = vadd.f32 %v2031_v61, %v815_v18  ;;  %v816_v24 = vmul.f32 %v1493_v19, %v2028_v50  ;;  %v832_v26 = vmul.f32 %v1541_v22, %v2028_v50 }
 0x15d   : > { %v2059_v25 = vadd.f32 %v2031_v61, %v831_v21 }
 0x15e   : > { %v1045_v27 = vadd.f32 %v1044_v10, %v854_v23  ;;  %v855_v28 = vadd.f32 %v2031_v61, %v816_v24  ;;  %v1494_v29 = vpop.f32.mrb[8].mxu0  ;;  %v2064_v31 = vadd.f32 %v2031_v61, %v832_v26  ;;  %v1542_v32 = vpop.f32.mrb[8].mxu1 }
 0x15f   : > { %v1495_v30 = vpop.f32.mrb[9].mxu0  ;;  %v1543_v37 = vpop.f32.mrb[9].mxu1 }
 0x160   : > { %v1379_v33 = vpack.c.bf16 %v855_v28, %v854_v23  ;;  %v1046_v34 = vadd.f32 %v1045_v27, %v855_v28  ;;  %v1496_v35 = vadd.f32 %v1495_v30, %v1494_v29  ;;  %v1497_v36 = vpop.f32.mrb[10].mxu0  ;;  %v1419_v39 = vpack.c.bf16 %v2064_v31, %v2059_v25  ;;  %v1545_v41 = vpop.f32.mrb[10].mxu1 }
 0x161   : > { %v1498_v38 = vpop.f32.mrb[11].mxu0  ;;  %v1544_v40 = vadd.f32 %v1543_v37, %v1542_v32  ;;  %v1546_v44 = vpop.f32.mrb[11].mxu1 }
 0x162   : > { %1451 = vst [vmem:[%s2045_s13 + $0x8] sm:$0xff] %v1379_v33   ;;  %v817_v42 = vmul.f32 %v1496_v35, %v2028_v50  ;;  %v1499_v43 = vadd.f32 %v1498_v38, %v1497_v36  ;;  %1459 = vst [vmem:[%s2045_s13 + $0x48] sm:$0xff] %v1419_v39   ;;  %v1547_v46 = vadd.f32 %v1546_v44, %v1545_v41 }
 0x163   : > { %v833_v45 = vmul.f32 %v1544_v40, %v2028_v50 }
 0x164   : > { %v856_v47 = vadd.f32 %v2031_v61, %v817_v42  ;;  %v818_v48 = vmul.f32 %v1499_v43, %v2028_v50  ;;  %v834_v51 = vmul.f32 %v1547_v46, %v2028_v50 }
 0x165   : > { %v2075_v49 = vadd.f32 %v2031_v61, %v833_v45 }
 0x166   : > { %v1047_v52 = vadd.f32 %v1046_v34, %v856_v47  ;;  %v857_v53 = vadd.f32 %v2031_v61, %v818_v48  ;;  %v1500_v54 = vpop.f32.mrb[12].mxu0  ;;  %v2080_v56 = vadd.f32 %v2031_v61, %v834_v51  ;;  %v1548_v57 = vpop.f32.mrb[12].mxu1 }
 0x167   : > { %v1501_v55 = vpop.f32.mrb[13].mxu0  ;;  %v1549_v63 = vpop.f32.mrb[13].mxu1 }
 0x168   : > { %v1384_v58 = vpack.c.bf16 %v857_v53, %v856_v47  ;;  %v1048_v59 = vadd.f32 %v1047_v52, %v857_v53  ;;  %v1502_v60 = vadd.f32 %v1501_v55, %v1500_v54  ;;  %v1503_v62 = vpop.f32.mrb[14].mxu0  ;;  %v1424_v2 = vpack.c.bf16 %v2080_v56, %v2075_v49  ;;  %v1551_v4 = vpop.f32.mrb[14].mxu1 }
 0x169   : > { %v1504_v0 = vpop.f32.mrb[15].mxu0  ;;  %v1550_v3 = vadd.f32 %v1549_v63, %v1548_v57  ;;  %v1552_v8 = vpop.f32.mrb[15].mxu1 }
 0x16a   : > { %1452 = vst [vmem:[%s2045_s13 + $0x10] sm:$0xff] %v1384_v58   ;;  %v819_v5 = vmul.f32 %v1502_v60, %v2028_v50  ;;  %v1505_v6 = vadd.f32 %v1504_v0, %v1503_v62  ;;  %1460 = vst [vmem:[%s2045_s13 + $0x50] sm:$0xff] %v1424_v2   ;;  %v1553_v10 = vadd.f32 %v1552_v8, %v1551_v4 }
 0x16b   : > { %v835_v9 = vmul.f32 %v1550_v3, %v2028_v50 }
 0x16c   : > { %v858_v11 = vadd.f32 %v2031_v61, %v819_v5  ;;  %v820_v12 = vmul.f32 %v1505_v6, %v2028_v50  ;;  %v836_v14 = vmul.f32 %v1553_v10, %v2028_v50 }
 0x16d   : > { %v2091_v13 = vadd.f32 %v2031_v61, %v835_v9 }
 0x16e   : > { %v1049_v15 = vadd.f32 %v1048_v59, %v858_v11  ;;  %v859_v16 = vadd.f32 %v2031_v61, %v820_v12  ;;  %v1506_v17 = vpop.f32.mrb[16].mxu0  ;;  %v2096_v19 = vadd.f32 %v2031_v61, %v836_v14  ;;  %v1554_v20 = vpop.f32.mrb[16].mxu1 }
 0x16f   : > { %v1507_v18 = vpop.f32.mrb[17].mxu0  ;;  %v1555_v26 = vpop.f32.mrb[17].mxu1 }
 0x170   : > { %v1389_v21 = vpack.c.bf16 %v859_v16, %v858_v11  ;;  %v1050_v22 = vadd.f32 %v1049_v15, %v859_v16  ;;  %v1508_v23 = vadd.f32 %v1507_v18, %v1506_v17  ;;  %v1509_v24 = vpop.f32.mrb[18].mxu0  ;;  %v1429_v28 = vpack.c.bf16 %v2096_v19, %v2091_v13  ;;  %v1557_v30 = vpop.f32.mrb[18].mxu1 }
 0x171   : > { %v1510_v27 = vpop.f32.mrb[19].mxu0  ;;  %v1556_v29 = vadd.f32 %v1555_v26, %v1554_v20  ;;  %v1558_v34 = vpop.f32.mrb[19].mxu1 }
 0x172   : > { %1453 = vst [vmem:[%s2045_s13 + $0x18] sm:$0xff] %v1389_v21   ;;  %v821_v32 = vmul.f32 %v1508_v23, %v2028_v50  ;;  %v1511_v33 = vadd.f32 %v1510_v27, %v1509_v24  ;;  %1461 = vst [vmem:[%s2045_s13 + $0x58] sm:$0xff] %v1429_v28   ;;  %v1559_v36 = vadd.f32 %v1558_v34, %v1557_v30 }
 0x173   : > { %v837_v35 = vmul.f32 %v1556_v29, %v2028_v50 }
 0x174   : > { %v860_v37 = vadd.f32 %v2031_v61, %v821_v32  ;;  %v822_v38 = vmul.f32 %v1511_v33, %v2028_v50  ;;  %v838_v40 = vmul.f32 %v1559_v36, %v2028_v50 }
 0x175   : > { %v2107_v39 = vadd.f32 %v2031_v61, %v837_v35 }
 0x176   : > { %v1051_v41 = vadd.f32 %v1050_v22, %v860_v37  ;;  %v861_v42 = vadd.f32 %v2031_v61, %v822_v38  ;;  %v1512_v43 = vpop.f32.mrb[20].mxu0  ;;  %v2112_v45 = vadd.f32 %v2031_v61, %v838_v40  ;;  %v1560_v46 = vpop.f32.mrb[20].mxu1 }
 0x177   : > { %v1513_v44 = vpop.f32.mrb[21].mxu0  ;;  %v1561_v53 = vpop.f32.mrb[21].mxu1 }
 0x178   : > { %v1394_v47 = vpack.c.bf16 %v861_v42, %v860_v37  ;;  %v1052_v48 = vadd.f32 %v1051_v41, %v861_v42  ;;  %v1514_v51 = vadd.f32 %v1513_v44, %v1512_v43  ;;  %v1515_v52 = vpop.f32.mrb[22].mxu0  ;;  %v1434_v55 = vpack.c.bf16 %v2112_v45, %v2107_v39  ;;  %v1563_v58 = vpop.f32.mrb[22].mxu1 }
 0x179   : > { %v1516_v54 = vpop.f32.mrb[23].mxu0  ;;  %v1562_v57 = vadd.f32 %v1561_v53, %v1560_v46  ;;  %v1564_v62 = vpop.f32.mrb[23].mxu1 }
 0x17a   : > { %1454 = vst [vmem:[%s2045_s13 + $0x20] sm:$0xff] %v1394_v47   ;;  %v823_v59 = vmul.f32 %v1514_v51, %v2028_v50  ;;  %v1517_v60 = vadd.f32 %v1516_v54, %v1515_v52  ;;  %1462 = vst [vmem:[%s2045_s13 + $0x60] sm:$0xff] %v1434_v55   ;;  %v1565_v0 = vadd.f32 %v1564_v62, %v1563_v58 }
 0x17b   : > { %v839_v63 = vmul.f32 %v1562_v57, %v2028_v50 }
 0x17c   : > { %v862_v2 = vadd.f32 %v2031_v61, %v823_v59  ;;  %v824_v3 = vmul.f32 %v1517_v60, %v2028_v50  ;;  %v840_v5 = vmul.f32 %v1565_v0, %v2028_v50 }
 0x17d   : > { %v2123_v4 = vadd.f32 %v2031_v61, %v839_v63 }
 0x17e   : > { %v1053_v6 = vadd.f32 %v1052_v48, %v862_v2  ;;  %v863_v8 = vadd.f32 %v2031_v61, %v824_v3  ;;  %v1518_v9 = vpop.f32.mrb[24].mxu0  ;;  %v2128_v11 = vadd.f32 %v2031_v61, %v840_v5  ;;  %v1566_v12 = vpop.f32.mrb[24].mxu1 }
 0x17f   : > { %v1519_v10 = vpop.f32.mrb[25].mxu0  ;;  %v1567_v18 = vpop.f32.mrb[25].mxu1 }
 0x180   : > { %v1399_v14 = vpack.c.bf16 %v863_v8, %v862_v2  ;;  %v1054_v15 = vadd.f32 %v1053_v6, %v863_v8  ;;  %v1520_v16 = vadd.f32 %v1519_v10, %v1518_v9  ;;  %v1521_v17 = vpop.f32.mrb[26].mxu0  ;;  %v1439_v21 = vpack.c.bf16 %v2128_v11, %v2123_v4  ;;  %v1569_v23 = vpop.f32.mrb[26].mxu1 }
 0x181   : > { %v1522_v20 = vpop.f32.mrb[27].mxu0  ;;  %v1568_v22 = vadd.f32 %v1567_v18, %v1566_v12  ;;  %v1570_v27 = vpop.f32.mrb[27].mxu1 }
 0x182   : > { %1455 = vst [vmem:[%s2045_s13 + $0x28] sm:$0xff] %v1399_v14   ;;  %v825_v24 = vmul.f32 %v1520_v16, %v2028_v50  ;;  %v1523_v26 = vadd.f32 %v1522_v20, %v1521_v17  ;;  %1463 = vst [vmem:[%s2045_s13 + $0x68] sm:$0xff] %v1439_v21   ;;  %v1571_v29 = vadd.f32 %v1570_v27, %v1569_v23 }
 0x183   : > { %v841_v28 = vmul.f32 %v1568_v22, %v2028_v50 }
 0x184   : > { %v864_v30 = vadd.f32 %v2031_v61, %v825_v24  ;;  %v826_v32 = vmul.f32 %v1523_v26, %v2028_v50  ;;  %v842_v34 = vmul.f32 %v1571_v29, %v2028_v50 }
 0x185   : > { %v880_v33 = vadd.f32 %v2031_v61, %v841_v28 }
 0x186   : > { %v1055_v35 = vadd.f32 %v1054_v15, %v864_v30  ;;  %v865_v36 = vadd.f32 %v2031_v61, %v826_v32  ;;  %v1524_v37 = vpop.f32.mrb[28].mxu0  ;;  %v881_v40 = vadd.f32 %v2031_v61, %v842_v34  ;;  %v1572_v41 = vpop.f32.mrb[28].mxu1 }
 0x187   : > { %v1525_v38 = vpop.f32.mrb[29].mxu0  ;;  %v1573_v47 = vpop.f32.mrb[29].mxu1 }
 0x188   : > { %v1404_v42 = vpack.c.bf16 %v865_v36, %v864_v30  ;;  %v1056_v43 = vadd.f32 %v1055_v35, %v865_v36  ;;  %v1526_v44 = vadd.f32 %v1525_v38, %v1524_v37  ;;  %v1527_v46 = vpop.f32.mrb[30].mxu0  ;;  %v1444_v51 = vpack.c.bf16 %v881_v40, %v880_v33  ;;  %v1575_v53 = vpop.f32.mrb[30].mxu1 }
 0x189   : > { %v1528_v48 = vpop.f32.mrb[31].mxu0  ;;  %v1574_v52 = vadd.f32 %v1573_v47, %v1572_v41  ;;  %v1576_v57 = vpop.f32.mrb[31].mxu1 }
 0x18a   : > { %1456 = vst [vmem:[%s2045_s13 + $0x30] sm:$0xff] %v1404_v42   ;;  %v827_v54 = vmul.f32 %v1526_v44, %v2028_v50  ;;  %v1529_v55 = vadd.f32 %v1528_v48, %v1527_v46  ;;  %1464 = vst [vmem:[%s2045_s13 + $0x70] sm:$0xff] %v1444_v51   ;;  %v1577_v59 = vadd.f32 %v1576_v57, %v1575_v53 }
 0x18b   : > { %v843_v58 = vmul.f32 %v1574_v52, %v2028_v50 }
 0x18c   : > { %v866_v60 = vadd.f32 %v2031_v61, %v827_v54  ;;  %v828_v62 = vmul.f32 %v1529_v55, %v2028_v50  ;;  %v844_v0 = vmul.f32 %v1577_v59, %v2028_v50 }
 0x18d   : > { %v882_v63 = vadd.f32 %v2031_v61, %v843_v58 }
 0x18e   : > { %v1057_v2 = vadd.f32 %v1056_v43, %v866_v60  ;;  %v867_v3 = vadd.f32 %v2031_v61, %v828_v62  ;;  %v883_v5 = vadd.f32 %v2031_v61, %v844_v0 }
 0x190   : > { %v1409_v6 = vpack.c.bf16 %v867_v3, %v866_v60  ;;  %v1058_v8 = vadd.f32 %v1057_v2, %v867_v3  ;;  %v1449_v9 = vpack.c.bf16 %v883_v5, %v882_v63 }
 0x192   : > { %1457 = vst [vmem:[%s2045_s13 + $0x38] sm:$0xff] %v1409_v6   ;;  %v1059_v10 = vadd.f32 %v1058_v8, %v2037_v1  ;;  %1465 = vst [vmem:[%s2045_s13 + $0x78] sm:$0xff] %v1449_v9  }
 0x194   : > { %v1060_v12 = vadd.f32 %v1059_v10, %v2048_v7 }
 0x196   : > { %v1061_v14 = vadd.f32 %v1060_v12, %v2059_v25 }
 0x198   : > { %v1062_v15 = vadd.f32 %v1061_v14, %v2064_v31 }
 0x19a   : > { %v1063_v50 = vadd.f32 %v1062_v15, %v2075_v49 }
 0x19c   : > { %v1064_v16 = vadd.f32 %v1063_v50, %v2080_v56 }
 0x19e   : > { %v1065_v61 = vadd.f32 %v1064_v16, %v2091_v13 }
 0x1a0   : > { %v1066_v17 = vadd.f32 %v1065_v61, %v2096_v19 }
 0x1a2   : > { %v1067_v18 = vadd.f32 %v1066_v17, %v2107_v39 }
 0x1a4   : > { %v1068_v1 = vadd.f32 %v1067_v18, %v2112_v45 }
 0x1a6   : > { %v1069_v20 = vadd.f32 %v1068_v1, %v2123_v4 }
 0x1a8   : > { %v1070_v7 = vadd.f32 %v1069_v20, %v2128_v11 }
 0x1aa   : > { %v1071_v25 = vadd.f32 %v1070_v7, %v880_v33 }
 0x1ac   : > { %v1072_v21 = vadd.f32 %v1071_v25, %v881_v40 }
 0x1ae   : > { %v1073_v31 = vadd.f32 %v1072_v21, %v882_v63 }
 0x1b0   : > { %v1074_v22 = vadd.f32 %v1073_v31, %v883_v5 }
 0x1b2   : > { %v1075_v49 = vrot.slane %v1074_v22, 4 }
 0x1b4   : > { %v1076_v23 = vadd.f32 %v1075_v49, %v1074_v22 }
 0x1b6   : > { %v1077_v56 = vrot.slane %v1076_v23, 2 }
 0x1b8   : > { %v1078_v24 = vadd.f32 %v1077_v56, %v1076_v23 }
 0x1ba   : > { %v1079_v26 = vrot.slane %v1078_v24, 1 }
 0x1bc   : > { %v1080_v13 = vadd.f32 %v1079_v26, %v1078_v24 }
 0x1be   : > { %1081 = vst [vmem:[%s323_s16] sm:$0x1] %v1080_v13 }
 0x1bf PF: > { %s18_s20 = sadd.s32 1, %s1829_s20   ;;  %s2196_s18 = smov %s1825_s19 }
 0x1c0   : > { %p15_p8 = scmp.ge.s32.totalorder %s18_s20, 4   ;;  %s2197_s19 = smov %s2199_s26 }
 0x1c2   :  { %17 = sbr.rel (!%p15_p8) target bundleno = 3 (0x3), region = 91 }
 0x1c9   :  { %1130 = vsyncpa [#allocation3], 1 }
 0x1ca   :  { %1132 = vsyncpa [#allocation3 + $0x1], 1 }
 0x1cb   :  { %1133 = vsyncpa [#allocation5], 1 }

// kernel: decoder_forward.9
= control target key start
LH: loop header
LB: loop body
LE: loop exit
PB: predicated region body
PF: predicated region fallthrough
CT: control target
= control target key end

     0   :  { %s1063_s17 = smov 0   ;;  %s1065_s18 = smov 0   ;;  %s1408_s0 = inlined_call_operand.vmem [shape: f32[2,256,128], index: 0, kind: input, shape index: {}]   ;;  %s1409_s1 = inlined_call_operand.vmem [shape: f32[1,128], index: 1, kind: input, shape index: {}]   ;;  %s1410_s2 = inlined_call_operand.<no memory space> [shape: f32[1], index: 2, kind: input, shape index: {}]   ;;  %s1411_s3 = inlined_call_operand.vmem [shape: f32[2,1,128], index: 3, kind: input, shape index: {}]   ;;  %s1412_s4 = inlined_call_operand.vmem [shape: f32[2,256,128], index: 4, kind: output, shape index: {}]  }
   0x1   :  { %9 = sst [smem:[#allocation2]] %s1410_s2  ;;  %s1067_s19 = smov 0  }
   0x2 LB: > { %s27_s2 = sadd.s32 1, %s1029_s18  ;;  %p816_p0 = scmp.ge.s32.totalorder %s1033_s19, 1  ;;  %s1033_s19 = sphi %s1067_s19, %s15_s19   ;;  %s1029_s18 = sphi %s1065_s18, %s1414_s18   ;;  %s1025_s17 = sphi %s1063_s17, %s1413_s17  }
   0x3   : > { %p29_p1 = scmp.ge.s32.totalorder %s27_s2, 2  ;;  %p192_p2 = scmp.lt.s32.totalorder %s1033_s19, 3 }
   0x5   : > { %s1416_s2 = smov (%p29_p1, %s27_s2), 0  ;;  %p193_p3 = pnand %p816_p0, %p192_p2 }
   0x6   : > { %p230_p4 = scmp.lt.s32.totalorder (!%p193_p3), %s1025_s17, 1  ;;  %v1087_v0 = vld [vmem:[%s1409_s1] ss:$0 sm:$0xff] (!%p193_p3)  ;;  %s285_s26 = sld [smem:[#allocation2]] (!%p193_p3) }
   0x7   : > { %196 = sbr.rel (%p193_p3) target bundleno = 259 (0x103), region = 36 }
   0xe   : > { %s1418_s17 = smov (!%p230_p4, %s1025_s17), 1 }
   0xf   : > { %s857_s20 = sshll.u32 %s1418_s17, 8  ;;  %s241_s29 = scalar_lea.vmem %s1411_s3, %s1418_s17 }
  0x10   : > { %s1094_s25 = scalar_lea.vmem %s1408_s0, %s857_s20  ;;  %s1286_s6 = scalar_lea.vmem %s1412_s4, %s857_s20 }
  0x11   : > { %v1097_v1 = vld [vmem:[%s1094_s25 + $0x10] sm:$0xff]  ;;  %v1100_v2 = vld [vmem:[%s1094_s25] sm:$0xff]  ;;  %v1103_v3 = vld [vmem:[%s1094_s25 + $0x18] sm:$0xff] }
  0x12   : > { %v295_v4 = vmul.f32 %v1087_v0, %v1097_v1  ;;  %v293_v5 = vmul.f32 %v1087_v0, %v1100_v2  ;;  %v1110_v6 = vld [vmem:[%s1094_s25 + $0x8] sm:$0xff]  ;;  %v296_v7 = vmul.f32 %v1087_v0, %v1103_v3  ;;  %v1120_v10 = vld [vmem:[%s1094_s25 + $0x20] sm:$0xff]  ;;  %v1127_v13 = vld [vmem:[%s1094_s25 + $0x38] sm:$0xff] }
  0x13   : > { %v294_v8 = vmul.f32 %v1087_v0, %v1110_v6  ;;  %v1117_v9 = vld [vmem:[%s1094_s25 + $0x28] sm:$0xff]  ;;  %v297_v12 = vmul.f32 %v1087_v0, %v1120_v10  ;;  %v1130_v14 = vld [vmem:[%s1094_s25 + $0x30] sm:$0xff]  ;;  %v300_v15 = vmul.f32 %v1087_v0, %v1127_v13  ;;  %v1140_v18 = vld [vmem:[%s1094_s25 + $0x40] sm:$0xff] }
  0x14   : > { %329 = vadd.xlane.f32.xlu1 %v295_v4  ;;  %325 = vadd.xlane.f32.xlu0 %v293_v5  ;;  %v298_v11 = vmul.f32 %v1087_v0, %v1117_v9  ;;  %v299_v16 = vmul.f32 %v1087_v0, %v1130_v14  ;;  %v1137_v17 = vld [vmem:[%s1094_s25 + $0x48] sm:$0xff]  ;;  %v301_v20 = vmul.f32 %v1087_v0, %v1140_v18  ;;  %v1147_v21 = vld [vmem:[%s1094_s25 + $0x58] sm:$0xff]  ;;  %v1150_v22 = vld [vmem:[%s1094_s25 + $0x50] sm:$0xff]  ;;  %v1256_v5 = vstv %s285_s26 }
  0x15   : > { %v302_v19 = vmul.f32 %v1087_v0, %v1137_v17  ;;  %v304_v23 = vmul.f32 %v1087_v0, %v1147_v21  ;;  %v303_v24 = vmul.f32 %v1087_v0, %v1150_v22  ;;  %v1157_v25 = vld [vmem:[%s1094_s25 + $0x68] sm:$0xff]  ;;  %v1160_v26 = vld [vmem:[%s1094_s25 + $0x60] sm:$0xff]  ;;  %v1167_v29 = vld [vmem:[%s1094_s25 + $0x78] sm:$0xff] }
  0x16   : > { %v306_v27 = vmul.f32 %v1087_v0, %v1157_v25  ;;  %v305_v28 = vmul.f32 %v1087_v0, %v1160_v26  ;;  %v1170_v30 = vld [vmem:[%s1094_s25 + $0x70] sm:$0xff]  ;;  %v308_v31 = vmul.f32 %v1087_v0, %v1167_v29  ;;  %v1177_v33 = vld [vmem:[%s1094_s25 + $0x88] sm:$0xff]  ;;  %v1180_v34 = vld [vmem:[%s1094_s25 + $0x80] sm:$0xff] }
  0x17   : > { %v307_v32 = vmul.f32 %v1087_v0, %v1170_v30  ;;  %v310_v35 = vmul.f32 %v1087_v0, %v1177_v33  ;;  %v309_v36 = vmul.f32 %v1087_v0, %v1180_v34  ;;  %v1187_v37 = vld [vmem:[%s1094_s25 + $0x98] sm:$0xff]  ;;  %v1190_v38 = vld [vmem:[%s1094_s25 + $0x90] sm:$0xff]  ;;  %v1197_v41 = vld [vmem:[%s1094_s25 + $0xa8] sm:$0xff] }
  0x18   : > { %331 = vadd.xlane.f32.xlu1 %v296_v7  ;;  %327 = vadd.xlane.f32.xlu0 %v294_v8  ;;  %v312_v39 = vmul.f32 %v1087_v0, %v1187_v37  ;;  %v311_v40 = vmul.f32 %v1087_v0, %v1190_v38  ;;  %v1200_v42 = vld [vmem:[%s1094_s25 + $0xa0] sm:$0xff]  ;;  %v314_v43 = vmul.f32 %v1087_v0, %v1197_v41  ;;  %v1207_v45 = vld [vmem:[%s1094_s25 + $0xb8] sm:$0xff]  ;;  %v1210_v46 = vld [vmem:[%s1094_s25 + $0xb0] sm:$0xff] }
  0x19   : > { %v313_v44 = vmul.f32 %v1087_v0, %v1200_v42  ;;  %v316_v47 = vmul.f32 %v1087_v0, %v1207_v45  ;;  %v315_v48 = vmul.f32 %v1087_v0, %v1210_v46  ;;  %v1217_v49 = vld [vmem:[%s1094_s25 + $0xc8] sm:$0xff]  ;;  %v1220_v50 = vld [vmem:[%s1094_s25 + $0xc0] sm:$0xff]  ;;  %v1227_v53 = vld [vmem:[%s1094_s25 + $0xd8] sm:$0xff] }
  0x1a   : > { %v318_v51 = vmul.f32 %v1087_v0, %v1217_v49  ;;  %v317_v52 = vmul.f32 %v1087_v0, %v1220_v50  ;;  %v1230_v54 = vld [vmem:[%s1094_s25 + $0xd0] sm:$0xff]  ;;  %v320_v55 = vmul.f32 %v1087_v0, %v1227_v53  ;;  %v1237_v57 = vld [vmem:[%s1094_s25 + $0xe8] sm:$0xff]  ;;  %v1240_v58 = vld [vmem:[%s1094_s25 + $0xe0] sm:$0xff] }
  0x1b   : > { %v319_v56 = vmul.f32 %v1087_v0, %v1230_v54  ;;  %v322_v59 = vmul.f32 %v1087_v0, %v1237_v57  ;;  %v321_v60 = vmul.f32 %v1087_v0, %v1240_v58  ;;  %v1247_v61 = vld [vmem:[%s1094_s25 + $0xf8] sm:$0xff]  ;;  %v1250_v62 = vld [vmem:[%s1094_s25 + $0xf0] sm:$0xff] }
  0x1c   : > { %335 = vadd.xlane.f32.xlu1 %v298_v11  ;;  %333 = vadd.xlane.f32.xlu0 %v297_v12  ;;  %v324_v63 = vmul.f32 %v1087_v0, %v1247_v61  ;;  %v323_v4 = vmul.f32 %v1087_v0, %v1250_v62 }
  0x20   : > { %339 = vadd.xlane.f32.xlu1 %v300_v15  ;;  %337 = vadd.xlane.f32.xlu0 %v299_v16 }
  0x24   : > { %343 = vadd.xlane.f32.xlu1 %v302_v19  ;;  %341 = vadd.xlane.f32.xlu0 %v301_v20 }
  0x28   : > { %347 = vadd.xlane.f32.xlu1 %v304_v23  ;;  %345 = vadd.xlane.f32.xlu0 %v303_v24 }
  0x2c   : > { %351 = vadd.xlane.f32.xlu1 %v306_v27  ;;  %349 = vadd.xlane.f32.xlu0 %v305_v28 }
  0x30   : > { %355 = vadd.xlane.f32.xlu1 %v308_v31  ;;  %353 = vadd.xlane.f32.xlu0 %v307_v32 }
  0x34   : > { %359 = vadd.xlane.f32.xlu1 %v310_v35  ;;  %357 = vadd.xlane.f32.xlu0 %v309_v36 }
  0x38   : > { %363 = vadd.xlane.f32.xlu1 %v312_v39  ;;  %361 = vadd.xlane.f32.xlu0 %v311_v40 }
  0x3c   : > { %367 = vadd.xlane.f32.xlu1 %v314_v43  ;;  %365 = vadd.xlane.f32.xlu0 %v313_v44 }
  0x40   : > { %371 = vadd.xlane.f32.xlu1 %v316_v47  ;;  %369 = vadd.xlane.f32.xlu0 %v315_v48 }
  0x44   : > { %375 = vadd.xlane.f32.xlu1 %v318_v51  ;;  %373 = vadd.xlane.f32.xlu0 %v317_v52 }
  0x48   : > { %379 = vadd.xlane.f32.xlu1 %v320_v55  ;;  %377 = vadd.xlane.f32.xlu0 %v319_v56 }
  0x4c   : > { %383 = vadd.xlane.f32.xlu1 %v322_v59  ;;  %381 = vadd.xlane.f32.xlu0 %v321_v60 }
  0x50   : > { %387 = vadd.xlane.f32.xlu1 %v324_v63  ;;  %385 = vadd.xlane.f32.xlu0 %v323_v4 }
  0xa1   : > { %v330_v7 = vpop.xlane.xlu1 %329  ;;  %v326_v8 = vpop.xlane.xlu0 %325 }
  0xa2   : > { %v392_v11 = vadd.f32 %v1256_v5, %v330_v7  ;;  %v390_v12 = vadd.f32 %v1256_v5, %v326_v8 }
  0xa4   : > { %v824_v15 = vmul.f32 -1.442695, %v392_v11  ;;  %v822_v16 = vmul.f32 -1.442695, %v390_v12 }
  0xa5   : > { %v332_v19 = vpop.xlane.xlu1 %331  ;;  %v328_v20 = vpop.xlane.xlu0 %327 }
  0xa6   : > { %883 = vpow2.f32 %v824_v15  ;;  %v393_v23 = vadd.f32 %v1256_v5, %v332_v19  ;;  %v391_v0 = vadd.f32 %v1256_v5, %v328_v20 }
  0xa7   : > { %885 = vpow2.f32 %v822_v16 }
  0xa8   : > { %v825_v24 = vmul.f32 -1.442695, %v393_v23  ;;  %v823_v27 = vmul.f32 -1.442695, %v391_v0 }
  0xa9   : > { %v336_v28 = vpop.xlane.xlu1 %335  ;;  %v334_v31 = vpop.xlane.xlu0 %333 }
  0xaa   : > { %887 = vpow2.f32 %v825_v24  ;;  %v395_v32 = vadd.f32 %v1256_v5, %v336_v28  ;;  %v394_v35 = vadd.f32 %v1256_v5, %v334_v31 }
  0xab   : > { %889 = vpow2.f32 %v823_v27 }
  0xac   : > { %v827_v36 = vmul.f32 -1.442695, %v395_v32  ;;  %v826_v39 = vmul.f32 -1.442695, %v394_v35 }
  0xad   : > { %v340_v40 = vpop.xlane.xlu1 %339  ;;  %v338_v43 = vpop.xlane.xlu0 %337 }
  0xae   : > { %891 = vpow2.f32 %v827_v36  ;;  %v397_v44 = vadd.f32 %v1256_v5, %v340_v40  ;;  %v396_v47 = vadd.f32 %v1256_v5, %v338_v43 }
  0xaf   : > { %893 = vpow2.f32 %v826_v39 }
  0xb0   : > { %v884_v48 = vpop.eup %883  ;;  %v829_v51 = vmul.f32 -1.442695, %v397_v44  ;;  %v828_v56 = vmul.f32 -1.442695, %v396_v47  ;;  %v1276_v47 = vld [vmem:[%s241_s29] ss:$0 sm:$0xff] }
  0xb1   : > { %v886_v52 = vpop.eup %885  ;;  %v520_v55 = vadd.f32 1.0, %v884_v48  ;;  %v344_v59 = vpop.xlane.xlu1 %343 }
  0xb2   : > { %v342_v60 = vpop.xlane.xlu0 %341  ;;  %v518_v63 = vadd.f32 1.0, %v886_v52  ;;  %895 = vpow2.f32 %v829_v51  ;;  %v399_v4 = vadd.f32 %v1256_v5, %v344_v59 }
  0xb3   : > { %v398_v7 = vadd.f32 %v1256_v5, %v342_v60  ;;  %897 = vrcp.f32 %v520_v55 }
  0xb4   : > { %v888_v8 = vpop.eup %887  ;;  %899 = vrcp.f32 %v518_v63  ;;  %v831_v11 = vmul.f32 -1.442695, %v399_v4 }
  0xb5   : > { %v890_v12 = vpop.eup %889  ;;  %v521_v15 = vadd.f32 1.0, %v888_v8  ;;  %901 = vpow2.f32 %v828_v56  ;;  %v830_v16 = vmul.f32 -1.442695, %v398_v7  ;;  %v348_v19 = vpop.xlane.xlu1 %347 }
  0xb6   : > { %v346_v20 = vpop.xlane.xlu0 %345  ;;  %v519_v23 = vadd.f32 1.0, %v890_v12  ;;  %903 = vpow2.f32 %v831_v11  ;;  %v401_v0 = vadd.f32 %v1256_v5, %v348_v19 }
  0xb7   : > { %v400_v24 = vadd.f32 %v1256_v5, %v346_v20  ;;  %905 = vrcp.f32 %v521_v15 }
  0xb8   : > { %v892_v27 = vpop.eup %891  ;;  %907 = vrcp.f32 %v519_v23  ;;  %v833_v28 = vmul.f32 -1.442695, %v401_v0 }
  0xb9   : > { %v894_v31 = vpop.eup %893  ;;  %v523_v32 = vadd.f32 1.0, %v892_v27  ;;  %909 = vpow2.f32 %v830_v16  ;;  %v832_v35 = vmul.f32 -1.442695, %v400_v24  ;;  %v352_v36 = vpop.xlane.xlu1 %351 }
  0xba   : > { %v350_v39 = vpop.xlane.xlu0 %349  ;;  %v522_v40 = vadd.f32 1.0, %v894_v31  ;;  %911 = vpow2.f32 %v833_v28  ;;  %v403_v43 = vadd.f32 %v1256_v5, %v352_v36 }
  0xbb   : > { %v402_v44 = vadd.f32 %v1256_v5, %v350_v39  ;;  %913 = vrcp.f32 %v523_v32 }
  0xbc   : > { %v896_v48 = vpop.eup %895  ;;  %915 = vrcp.f32 %v522_v40  ;;  %v835_v51 = vmul.f32 -1.442695, %v403_v43 }
  0xbd   : > { %v834_v52 = vmul.f32 -1.442695, %v402_v44  ;;  %v898_v55 = vpop.eup %897  ;;  %v525_v56 = vadd.f32 1.0, %v896_v48  ;;  %917 = vpow2.f32 %v832_v35  ;;  %v356_v59 = vpop.xlane.xlu1 %355 }
  0xbe   : > { %v354_v60 = vpop.xlane.xlu0 %353  ;;  %v900_v63 = vpop.eup %899  ;;  %v622_v4 = vadd.f32 %v898_v55, %v1276_v47  ;;  %919 = vpow2.f32 %v835_v51  ;;  %v405_v7 = vadd.f32 %v1256_v5, %v356_v59 }
  0xbf   : > { %v404_v8 = vadd.f32 %v1256_v5, %v354_v60  ;;  %v902_v11 = vpop.eup %901  ;;  %v620_v12 = vadd.f32 %v900_v63, %v1276_v47  ;;  %921 = vrcp.f32 %v525_v56 }
  0xc0   : > { %v904_v15 = vpop.eup %903  ;;  %v654_v16 = vmul.f32 %v622_v4, %v1097_v1  ;;  %v524_v19 = vadd.f32 1.0, %v902_v11  ;;  %923 = vpow2.f32 %v834_v52  ;;  %v837_v20 = vmul.f32 -1.442695, %v405_v7 }
  0xc1   : > { %v906_v23 = vpop.eup %905  ;;  %v652_v0 = vmul.f32 %v620_v12, %v1100_v2  ;;  %v527_v24 = vadd.f32 1.0, %v904_v15  ;;  %v836_v27 = vmul.f32 -1.442695, %v404_v8  ;;  %v360_v28 = vpop.xlane.xlu1 %359 }
  0xc2   : > { %v358_v31 = vpop.xlane.xlu0 %357  ;;  %v908_v32 = vpop.eup %907  ;;  %686 = vst [vmem:[%s1286_s6 + $0x10] sm:$0xff] %v654_v16  ;;  %v623_v35 = vadd.f32 %v906_v23, %v1276_v47  ;;  %925 = vrcp.f32 %v524_v19  ;;  %v407_v36 = vadd.f32 %v1256_v5, %v360_v28 }
  0xc3   : > { %v406_v1 = vadd.f32 %v1256_v5, %v358_v31  ;;  %v910_v39 = vpop.eup %909  ;;  %684 = vst [vmem:[%s1286_s6] sm:$0xff] %v652_v0  ;;  %v621_v40 = vadd.f32 %v908_v32, %v1276_v47  ;;  %927 = vrcp.f32 %v527_v24 }
  0xc4   : > { %v912_v2 = vpop.eup %911  ;;  %v655_v43 = vmul.f32 %v623_v35, %v1103_v3  ;;  %v526_v44 = vadd.f32 1.0, %v910_v39  ;;  %929 = vpow2.f32 %v837_v20  ;;  %v839_v48 = vmul.f32 -1.442695, %v407_v36 }
  0xc5   : > { %v914_v51 = vpop.eup %913  ;;  %v653_v52 = vmul.f32 %v621_v40, %v1110_v6  ;;  %v529_v55 = vadd.f32 1.0, %v912_v2  ;;  %931 = vpow2.f32 %v836_v27  ;;  %v838_v56 = vmul.f32 -1.442695, %v406_v1  ;;  %v364_v59 = vpop.xlane.xlu1 %363 }
  0xc6   : > { %v362_v60 = vpop.xlane.xlu0 %361  ;;  %v916_v63 = vpop.eup %915  ;;  %687 = vst [vmem:[%s1286_s6 + $0x18] sm:$0xff] %v655_v43  ;;  %v625_v4 = vadd.f32 %v914_v51, %v1276_v47  ;;  %933 = vrcp.f32 %v526_v44  ;;  %v409_v7 = vadd.f32 %v1256_v5, %v364_v59 }
  0xc7   : > { %v408_v3 = vadd.f32 %v1256_v5, %v362_v60  ;;  %v918_v8 = vpop.eup %917  ;;  %685 = vst [vmem:[%s1286_s6 + $0x8] sm:$0xff] %v653_v52  ;;  %v624_v11 = vadd.f32 %v916_v63, %v1276_v47  ;;  %935 = vrcp.f32 %v529_v55 }
  0xc8   : > { %v920_v6 = vpop.eup %919  ;;  %v657_v12 = vmul.f32 %v625_v4, %v1117_v9  ;;  %v528_v15 = vadd.f32 1.0, %v918_v8  ;;  %937 = vpow2.f32 %v839_v48  ;;  %v841_v16 = vmul.f32 -1.442695, %v409_v7 }
  0xc9   : > { %v922_v19 = vpop.eup %921  ;;  %v656_v20 = vmul.f32 %v624_v11, %v1120_v10  ;;  %v531_v23 = vadd.f32 1.0, %v920_v6  ;;  %939 = vpow2.f32 %v838_v56  ;;  %v840_v0 = vmul.f32 -1.442695, %v408_v3  ;;  %v368_v24 = vpop.xlane.xlu1 %367 }
  0xca   : > { %v366_v27 = vpop.xlane.xlu0 %365  ;;  %v924_v28 = vpop.eup %923  ;;  %689 = vst [vmem:[%s1286_s6 + $0x28] sm:$0xff] %v657_v12  ;;  %v627_v31 = vadd.f32 %v922_v19, %v1276_v47  ;;  %941 = vrcp.f32 %v528_v15  ;;  %v411_v32 = vadd.f32 %v1256_v5, %v368_v24 }
  0xcb   : > { %v410_v9 = vadd.f32 %v1256_v5, %v366_v27  ;;  %688 = vst [vmem:[%s1286_s6 + $0x20] sm:$0xff] %v656_v20  ;;  %943 = vrcp.f32 %v531_v23  ;;  %v530_v35 = vadd.f32 1.0, %v924_v28 }
  0xcc   : > { %v926_v36 = vpop.eup %925  ;;  %v659_v10 = vmul.f32 %v627_v31, %v1127_v13  ;;  %945 = vpow2.f32 %v841_v16  ;;  %v843_v1 = vmul.f32 -1.442695, %v411_v32 }
  0xcd   : > { %v842_v39 = vmul.f32 -1.442695, %v410_v9  ;;  %v928_v40 = vpop.eup %927  ;;  %v626_v2 = vadd.f32 %v926_v36, %v1276_v47  ;;  %947 = vrcp.f32 %v530_v35  ;;  %v372_v43 = vpop.xlane.xlu1 %371 }
  0xce   : > { %v370_v44 = vpop.xlane.xlu0 %369  ;;  %v930_v48 = vpop.eup %929  ;;  %691 = vst [vmem:[%s1286_s6 + $0x38] sm:$0xff] %v659_v10  ;;  %v629_v51 = vadd.f32 %v928_v40, %v1276_v47  ;;  %949 = vpow2.f32 %v840_v0  ;;  %v413_v52 = vadd.f32 %v1256_v5, %v372_v43 }
  0xcf   : > { %v412_v55 = vadd.f32 %v1256_v5, %v370_v44  ;;  %v932_v13 = vpop.eup %931  ;;  %v658_v56 = vmul.f32 %v626_v2, %v1130_v14  ;;  %v533_v59 = vadd.f32 1.0, %v930_v48  ;;  %951 = vpow2.f32 %v843_v1 }
  0xd0   : > { %v934_v60 = vpop.eup %933  ;;  %v661_v63 = vmul.f32 %v629_v51, %v1137_v17  ;;  %v532_v4 = vadd.f32 1.0, %v932_v13  ;;  %953 = vpow2.f32 %v842_v39  ;;  %v845_v7 = vmul.f32 -1.442695, %v413_v52 }
  0xd1   : > { %v936_v3 = vpop.eup %935  ;;  %690 = vst [vmem:[%s1286_s6 + $0x30] sm:$0xff] %v658_v56  ;;  %v628_v8 = vadd.f32 %v934_v60, %v1276_v47  ;;  %955 = vrcp.f32 %v533_v59  ;;  %v844_v11 = vmul.f32 -1.442695, %v412_v55  ;;  %v376_v6 = vpop.xlane.xlu1 %375 }
  0xd2   : > { %v374_v12 = vpop.xlane.xlu0 %373  ;;  %v938_v15 = vpop.eup %937  ;;  %693 = vst [vmem:[%s1286_s6 + $0x48] sm:$0xff] %v661_v63  ;;  %v631_v14 = vadd.f32 %v936_v3, %v1276_v47  ;;  %957 = vrcp.f32 %v532_v4  ;;  %v415_v16 = vadd.f32 %v1256_v5, %v376_v6 }
  0xd3   : > { %v414_v17 = vadd.f32 %v1256_v5, %v374_v12  ;;  %v940_v19 = vpop.eup %939  ;;  %v660_v20 = vmul.f32 %v628_v8, %v1140_v18  ;;  %v535_v23 = vadd.f32 1.0, %v938_v15  ;;  %959 = vpow2.f32 %v845_v7 }
  0xd4   : > { %v942_v0 = vpop.eup %941  ;;  %v663_v24 = vmul.f32 %v631_v14, %v1147_v21  ;;  %v534_v27 = vadd.f32 1.0, %v940_v19  ;;  %961 = vpow2.f32 %v844_v11  ;;  %v847_v28 = vmul.f32 -1.442695, %v415_v16 }
  0xd5   : > { %v944_v31 = vpop.eup %943  ;;  %692 = vst [vmem:[%s1286_s6 + $0x40] sm:$0xff] %v660_v20  ;;  %v630_v32 = vadd.f32 %v942_v0, %v1276_v47  ;;  %963 = vrcp.f32 %v535_v23  ;;  %v846_v9 = vmul.f32 -1.442695, %v414_v17  ;;  %v380_v35 = vpop.xlane.xlu1 %379 }
  0xd6   : > { %v378_v36 = vpop.xlane.xlu0 %377  ;;  %v946_v10 = vpop.eup %945  ;;  %695 = vst [vmem:[%s1286_s6 + $0x58] sm:$0xff] %v663_v24  ;;  %v633_v18 = vadd.f32 %v944_v31, %v1276_v47  ;;  %965 = vrcp.f32 %v534_v27  ;;  %v417_v1 = vadd.f32 %v1256_v5, %v380_v35 }
  0xd7   : > { %v416_v21 = vadd.f32 %v1256_v5, %v378_v36  ;;  %v948_v39 = vpop.eup %947  ;;  %v662_v40 = vmul.f32 %v630_v32, %v1150_v22  ;;  %v537_v2 = vadd.f32 1.0, %v946_v10  ;;  %967 = vpow2.f32 %v847_v28 }
  0xd8   : > { %v950_v43 = vpop.eup %949  ;;  %v665_v44 = vmul.f32 %v633_v18, %v1157_v25  ;;  %v632_v48 = vadd.f32 %v948_v39, %v1276_v47  ;;  %969 = vpow2.f32 %v846_v9  ;;  %v849_v51 = vmul.f32 -1.442695, %v417_v1 }
  0xd9   : > { %v952_v52 = vpop.eup %951  ;;  %694 = vst [vmem:[%s1286_s6 + $0x50] sm:$0xff] %v662_v40  ;;  %971 = vrcp.f32 %v537_v2  ;;  %v536_v55 = vadd.f32 1.0, %v950_v43  ;;  %v848_v13 = vmul.f32 -1.442695, %v416_v21  ;;  %v384_v56 = vpop.xlane.xlu1 %383 }
  0xda   : > { %v382_v59 = vpop.xlane.xlu0 %381  ;;  %v954_v60 = vpop.eup %953  ;;  %697 = vst [vmem:[%s1286_s6 + $0x68] sm:$0xff] %v665_v44  ;;  %v664_v22 = vmul.f32 %v632_v48, %v1160_v26  ;;  %v539_v63 = vadd.f32 1.0, %v952_v52  ;;  %973 = vpow2.f32 %v849_v51  ;;  %v419_v25 = vadd.f32 %v1256_v5, %v384_v56 }
  0xdb   : > { %v956_v4 = vpop.eup %955  ;;  %975 = vrcp.f32 %v536_v55  ;;  %v538_v7 = vadd.f32 1.0, %v954_v60  ;;  %v418_v3 = vadd.f32 %v1256_v5, %v382_v59 }
  0xdc   : > { %v958_v8 = vpop.eup %957  ;;  %696 = vst [vmem:[%s1286_s6 + $0x60] sm:$0xff] %v664_v22  ;;  %v635_v11 = vadd.f32 %v956_v4, %v1276_v47  ;;  %977 = vrcp.f32 %v539_v63  ;;  %v851_v6 = vmul.f32 -1.442695, %v419_v25 }
  0xdd   : > { %v960_v12 = vpop.eup %959  ;;  %v634_v15 = vadd.f32 %v958_v8, %v1276_v47  ;;  %979 = vrcp.f32 %v538_v7  ;;  %v850_v26 = vmul.f32 -1.442695, %v418_v3  ;;  %v388_v14 = vpop.xlane.xlu1 %387 }
  0xde   : > { %v386_v16 = vpop.xlane.xlu0 %385  ;;  %v962_v17 = vpop.eup %961  ;;  %v667_v19 = vmul.f32 %v635_v11, %v1167_v29  ;;  %v541_v20 = vadd.f32 1.0, %v960_v12  ;;  %981 = vpow2.f32 %v848_v13  ;;  %v421_v23 = vadd.f32 %v1256_v5, %v388_v14 }
  0xdf   : > { %v964_v0 = vpop.eup %963  ;;  %v666_v24 = vmul.f32 %v634_v15, %v1170_v30  ;;  %v540_v27 = vadd.f32 1.0, %v962_v17  ;;  %983 = vpow2.f32 %v851_v6  ;;  %v420_v28 = vadd.f32 %v1256_v5, %v386_v16 }
  0xe0   : > { %v966_v31 = vpop.eup %965  ;;  %699 = vst [vmem:[%s1286_s6 + $0x78] sm:$0xff] %v667_v19  ;;  %v637_v32 = vadd.f32 %v964_v0, %v1276_v47  ;;  %985 = vrcp.f32 %v541_v20  ;;  %v853_v9 = vmul.f32 -1.442695, %v421_v23 }
  0xe1   : > { %v968_v35 = vpop.eup %967  ;;  %698 = vst [vmem:[%s1286_s6 + $0x70] sm:$0xff] %v666_v24  ;;  %v636_v29 = vadd.f32 %v966_v31, %v1276_v47  ;;  %987 = vrcp.f32 %v540_v27  ;;  %v852_v18 = vmul.f32 -1.442695, %v420_v28 }
  0xe2   : > { %v970_v36 = vpop.eup %969  ;;  %v669_v30 = vmul.f32 %v637_v32, %v1177_v33  ;;  %v543_v10 = vadd.f32 1.0, %v968_v35  ;;  %989 = vpow2.f32 %v850_v26 }
  0xe3   : > { %v972_v5 = vpop.eup %971  ;;  %v668_v1 = vmul.f32 %v636_v29, %v1180_v34  ;;  %v542_v21 = vadd.f32 1.0, %v970_v36  ;;  %991 = vpow2.f32 %v853_v9 }
  0xe4   : > { %v974_v39 = vpop.eup %973  ;;  %701 = vst [vmem:[%s1286_s6 + $0x88] sm:$0xff] %v669_v30  ;;  %v639_v40 = vadd.f32 %v972_v5, %v1276_v47  ;;  %993 = vrcp.f32 %v543_v10 }
  0xe5   : > { %v976_v2 = vpop.eup %975  ;;  %700 = vst [vmem:[%s1286_s6 + $0x80] sm:$0xff] %v668_v1  ;;  %995 = vrcp.f32 %v542_v21  ;;  %v545_v43 = vadd.f32 1.0, %v974_v39 }
  0xe6   : > { %v978_v33 = vpop.eup %977  ;;  %v671_v44 = vmul.f32 %v639_v40, %v1187_v37  ;;  %v638_v48 = vadd.f32 %v976_v2, %v1276_v47  ;;  %997 = vpow2.f32 %v852_v18 }
  0xe7   : > { %v980_v34 = vpop.eup %979  ;;  %v641_v51 = vadd.f32 %v978_v33, %v1276_v47  ;;  %999 = vrcp.f32 %v545_v43 }
  0xe8   : > { %v982_v52 = vpop.eup %981  ;;  %703 = vst [vmem:[%s1286_s6 + $0x98] sm:$0xff] %v671_v44  ;;  %v670_v55 = vmul.f32 %v638_v48, %v1190_v38  ;;  %v640_v13 = vadd.f32 %v980_v34, %v1276_v47 }
  0xe9   : > { %v984_v56 = vpop.eup %983  ;;  %v673_v59 = vmul.f32 %v641_v51, %v1197_v41  ;;  %v544_v60 = vadd.f32 1.0, %v982_v52 }
  0xea   : > { %v986_v37 = vpop.eup %985  ;;  %702 = vst [vmem:[%s1286_s6 + $0x90] sm:$0xff] %v670_v55  ;;  %v672_v22 = vmul.f32 %v640_v13, %v1200_v42  ;;  %v547_v63 = vadd.f32 1.0, %v984_v56 }
  0xeb   : > { %v988_v25 = vpop.eup %987  ;;  %705 = vst [vmem:[%s1286_s6 + $0xa8] sm:$0xff] %v673_v59  ;;  %v643_v4 = vadd.f32 %v986_v37, %v1276_v47  ;;  %1001 = vrcp.f32 %v544_v60 }
  0xec   : > { %v990_v7 = vpop.eup %989  ;;  %704 = vst [vmem:[%s1286_s6 + $0xa0] sm:$0xff] %v672_v22  ;;  %v642_v38 = vadd.f32 %v988_v25, %v1276_v47  ;;  %1003 = vrcp.f32 %v547_v63 }
  0xed   : > { %v992_v3 = vpop.eup %991  ;;  %v675_v41 = vmul.f32 %v643_v4, %v1207_v45  ;;  %v546_v8 = vadd.f32 1.0, %v990_v7 }
  0xee   : > { %v994_v11 = vpop.eup %993  ;;  %v674_v42 = vmul.f32 %v642_v38, %v1210_v46  ;;  %v549_v6 = vadd.f32 1.0, %v992_v3 }
  0xef   : > { %v996_v12 = vpop.eup %995  ;;  %707 = vst [vmem:[%s1286_s6 + $0xb8] sm:$0xff] %v675_v41  ;;  %v645_v15 = vadd.f32 %v994_v11, %v1276_v47  ;;  %1005 = vrcp.f32 %v546_v8 }
  0xf0   : > { %v998_v26 = vpop.eup %997  ;;  %706 = vst [vmem:[%s1286_s6 + $0xb0] sm:$0xff] %v674_v42  ;;  %v644_v14 = vadd.f32 %v996_v12, %v1276_v47  ;;  %1007 = vrcp.f32 %v549_v6 }
  0xf1   : > { %v1000_v16 = vpop.eup %999  ;;  %v677_v45 = vmul.f32 %v645_v15, %v1217_v49  ;;  %v548_v17 = vadd.f32 1.0, %v998_v26 }
  0xf2   : > { %v676_v46 = vmul.f32 %v644_v14, %v1220_v50  ;;  %v647_v19 = vadd.f32 %v1000_v16, %v1276_v47 }
  0xf3   : > { %709 = vst [vmem:[%s1286_s6 + $0xc8] sm:$0xff] %v677_v45  ;;  %1009 = vrcp.f32 %v548_v17 }
  0xf4   : > { %708 = vst [vmem:[%s1286_s6 + $0xc0] sm:$0xff] %v676_v46  ;;  %v679_v20 = vmul.f32 %v647_v19, %v1227_v53 }
  0xf5   : > { %v1002_v23 = vpop.eup %1001 }
  0xf6   : > { %v1004_v0 = vpop.eup %1003  ;;  %711 = vst [vmem:[%s1286_s6 + $0xd8] sm:$0xff] %v679_v20  ;;  %v646_v24 = vadd.f32 %v1002_v23, %v1276_v47 }
  0xf7   : > { %v649_v49 = vadd.f32 %v1004_v0, %v1276_v47 }
  0xf8   : > { %v678_v50 = vmul.f32 %v646_v24, %v1230_v54 }
  0xf9   : > { %v1006_v27 = vpop.eup %1005  ;;  %v681_v28 = vmul.f32 %v649_v49, %v1237_v57 }
  0xfa   : > { %v1008_v31 = vpop.eup %1007  ;;  %710 = vst [vmem:[%s1286_s6 + $0xd0] sm:$0xff] %v678_v50  ;;  %v648_v32 = vadd.f32 %v1006_v27, %v1276_v47 }
  0xfb   : > { %713 = vst [vmem:[%s1286_s6 + $0xe8] sm:$0xff] %v681_v28  ;;  %v651_v53 = vadd.f32 %v1008_v31, %v1276_v47 }
  0xfc   : > { %v680_v9 = vmul.f32 %v648_v32, %v1240_v58 }
  0xfd   : > { %v1010_v35 = vpop.eup %1009  ;;  %v683_v29 = vmul.f32 %v651_v53, %v1247_v61 }
  0xfe   : > { %712 = vst [vmem:[%s1286_s6 + $0xe0] sm:$0xff] %v680_v9  ;;  %v650_v36 = vadd.f32 %v1010_v35, %v1276_v47 }
  0xff   : > { %715 = vst [vmem:[%s1286_s6 + $0xf8] sm:$0xff] %v683_v29 }
 0x100   : > { %v682_v54 = vmul.f32 %v650_v36, %v1250_v62 }
 0x102   : > { %714 = vst [vmem:[%s1286_s6 + $0xf0] sm:$0xff] %v682_v54 }
 0x103 PF: > { %s15_s19 = sadd.s32 1, %s1033_s19   ;;  %s1413_s17 = smov %s1029_s18 }
 0x104   : > { %p12_p5 = scmp.ge.s32.totalorder %s15_s19, 4   ;;  %s1414_s18 = smov %s1416_s2 }
 0x106   :  { %14 = sbr.rel (!%p12_p5) target bundleno = 2 (0x2), region = 69 }

// kernel: decoder_forward.8
= control target key start
LH: loop header
LB: loop body
LE: loop exit
PB: predicated region body
PF: predicated region fallthrough
CT: control target
= control target key end

     0   :  { %s2120_s29 = smov 0   ;;  %s2122_s30 = smov 0   ;;  %s3042_s0 = inlined_call_operand.vmem [shape: bf16[2,256,256], index: 0, kind: input, shape index: {}]   ;;  %s3043_s1 = inlined_call_operand.vmem [shape: bf16[256,128], index: 1, kind: input, shape index: {}]   ;;  %s3044_s2 = inlined_call_operand.vmem [shape: f32[1,128], index: 2, kind: input, shape index: {}]   ;;  %s3045_s3 = inlined_call_operand.vmem [shape: f32[1,128], index: 3, kind: input, shape index: {}]   ;;  %s3046_s4 = inlined_call_operand.vmem [shape: f32[1,256], index: 4, kind: input, shape index: {}]   ;;  %s3047_s5 = inlined_call_operand.<no memory space> [shape: f32[1], index: 5, kind: input, shape index: {}]   ;;  %s3048_s6 = inlined_call_operand.vmem [shape: f32[2,1,256], index: 6, kind: input, shape index: {}]   ;;  %s3049_s7 = inlined_call_operand.vmem [shape: f32[2,256,128], index: 7, kind: output, shape index: {0}]   ;;  %s3050_s8 = inlined_call_operand.vmem [shape: f32[2,1,1,128], index: 8, kind: output, shape index: {1}]  }
   0x1   :  { %14 = sst [smem:[#allocation2]] %s3047_s5  ;;  %s2124_s9 = smov 0  }
   0x2 LB: > { %s32_s5 = sadd.s32 1, %s2066_s30  ;;  %p1692_p0 = scmp.ge.s32.totalorder %s2070_s9, 1  ;;  %s2070_s9 = sphi %s2124_s9, %s20_s9   ;;  %s2066_s30 = sphi %s2122_s30, %s3164_s30   ;;  %s2062_s29 = sphi %s2120_s29, %s3163_s29  }
   0x3   : > { %p34_p1 = scmp.ge.s32.totalorder %s32_s5, 2  ;;  %p299_p2 = scmp.lt.s32.totalorder %s2070_s9, 3 }
   0x5   : > { %s3166_s5 = smov (%p34_p1, %s32_s5), 0  ;;  %p300_p3 = pnand %p1692_p0, %p299_p2 }
   0x6   : > { %p353_p4 = scmp.lt.s32.totalorder (!%p300_p3), %s2062_s29, 1  ;;  %v484_v0 = vlaneseq (!%p300_p3)  ;;  %v480_v1 = vld [vmem:[%s3046_s4] sm:$0x3] (!%p300_p3)  ;;  %s481_s11 = sld [smem:[#allocation2]] (!%p300_p3) }
   0x7   : > { %303 = sbr.rel (%p300_p3) target bundleno = 546 (0x222), region = 48 }
   0x8   : > { %v2143_v2 = vshrl.u32 (!%p300_p3), %v484_v0, 7 }
   0xa   : > { %v486_v3 = vsub.s32 (!%p300_p3), 0, %v2143_v2  ;;  %v490_v4 = vsub.s32 (!%p300_p3), 1, %v2143_v2 }
   0xc   : > { %v2160_v6 = vrot.slane (!%p300_p3), %v480_v1, %v486_v3  ;;  %v2164_v7 = vrot.slane (!%p300_p3), %v480_v1, %v490_v4 }
   0xe   : > { %s3168_s29 = smov (!%p353_p4, %s2062_s29), 1 }
   0xf   : > { %s1750_s12 = sshll.u32 %s3168_s29, 8  ;;  %s1695_s13 = sshll.u32 %s3168_s29, 1 }
  0x10   : > { %s2153_s15 = scalar_lea.vmem %s3042_s0, %s1750_s12  ;;  %s366_s17 = scalar_lea.vmem %s3048_s6, %s1695_s13 }
  0x11   : > { %v2156_v5 = vld [vmem:[%s2153_s15] sm:$0xff]  ;;  %v2167_v8 = vld [vmem:[%s2153_s15 + $0x10] sm:$0xff]  ;;  %v2172_v11 = vld [vmem:[%s2153_s15 + $0x8] sm:$0xff]  ;;  %s2908_s24 = scalar_lea.vmem %s3049_s7, %s1750_s12  ;;  %s382_s26 = scalar_lea.vmem %s3050_s8, %s3168_s29 }
  0x12   : > { %v416_v9 = vunpack.c.l.bf16 %v2156_v5  ;;  %v417_v10 = vunpack.c.h.bf16 %v2156_v5  ;;  %v2175_v12 = vld [vmem:[%s2153_s15 + $0x18] sm:$0xff]  ;;  %v420_v13 = vunpack.c.l.bf16 %v2167_v8  ;;  %v421_v14 = vunpack.c.h.bf16 %v2167_v8  ;;  %v2182_v17 = vld [vmem:[%s2153_s15 + $0x28] sm:$0xff]  ;;  %v2193_v22 = vld [vmem:[%s2153_s15 + $0x20] sm:$0xff] }
  0x13   : > { %v418_v15 = vunpack.c.l.bf16 %v2172_v11  ;;  %v419_v16 = vunpack.c.h.bf16 %v2172_v11  ;;  %v422_v20 = vunpack.c.l.bf16 %v2175_v12  ;;  %v423_v21 = vunpack.c.h.bf16 %v2175_v12  ;;  %v2208_v27 = vld [vmem:[%s2153_s15 + $0x38] sm:$0xff]  ;;  %v2218_v32 = vld [vmem:[%s2153_s15 + $0x30] sm:$0xff]  ;;  %v2228_v41 = vld [vmem:[%s2153_s15 + $0x48] sm:$0xff] }
  0x14   : > { %v494_v18 = vmul.f32 %v2160_v6, %v416_v9  ;;  %v495_v19 = vmul.f32 %v2164_v7, %v417_v10  ;;  %v498_v23 = vmul.f32 %v2160_v6, %v420_v13  ;;  %v499_v24 = vmul.f32 %v2164_v7, %v421_v14  ;;  %v2239_v46 = vld [vmem:[%s2153_s15 + $0x40] sm:$0xff]  ;;  %v2258_v56 = vld [vmem:[%s2153_s15 + $0x88] sm:$0xff]  ;;  %v2275_v0 = vld [vmem:[%s2153_s15 + $0x50] sm:$0xff] }
  0x15   : > { %v496_v25 = vmul.f32 %v2160_v6, %v418_v15  ;;  %v497_v26 = vmul.f32 %v2164_v7, %v419_v16  ;;  %v500_v29 = vmul.f32 %v2160_v6, %v422_v20  ;;  %v501_v30 = vmul.f32 %v2164_v7, %v423_v21  ;;  %v2248_v51 = vld [vmem:[%s2153_s15 + $0x80] sm:$0xff] }
  0x16   : > { %v558_v28 = vadd.f32 %v495_v19, %v494_v18  ;;  %v3087_v31 = vunpack.c.l.bf16 %v2182_v17  ;;  %v564_v33 = vadd.f32 %v499_v24, %v498_v23  ;;  %v3096_v35 = vunpack.c.h.bf16 %v2182_v17 }
  0x17   : > { %v561_v34 = vadd.f32 %v497_v26, %v496_v25  ;;  %v3088_v36 = vunpack.c.l.bf16 %v2193_v22  ;;  %v567_v37 = vadd.f32 %v501_v30, %v500_v29  ;;  %v3106_v39 = vunpack.c.h.bf16 %v2193_v22 }
  0x18   : > { %559 = vadd.xlane.f32.xlu0 %v558_v28  ;;  %v504_v38 = vmul.f32 %v2160_v6, %v3087_v31  ;;  %v3078_v40 = vunpack.c.l.bf16 %v2208_v27  ;;  %565 = vadd.xlane.f32.xlu1 %v564_v33  ;;  %v505_v42 = vmul.f32 %v2164_v7, %v3096_v35  ;;  %v3081_v44 = vunpack.c.h.bf16 %v2208_v27  ;;  %v2287_v28 = vld [vmem:[%s2153_s15 + $0x58] sm:$0xff]  ;;  %v2518_v35 = vld [vmem:[%s2153_s15 + $0xf0] sm:$0xff] }
  0x19   : > { %v502_v43 = vmul.f32 %v2160_v6, %v3088_v36  ;;  %v3080_v45 = vunpack.c.l.bf16 %v2218_v32  ;;  %v503_v47 = vmul.f32 %v2164_v7, %v3106_v39  ;;  %v3086_v48 = vunpack.c.h.bf16 %v2218_v32 }
  0x1a   : > { %v3056_v49 = vunpack.c.l.bf16 %v2228_v41  ;;  %v3069_v50 = vunpack.c.h.bf16 %v2228_v41  ;;  %v3058_v55 = vunpack.c.l.bf16 %v2239_v46  ;;  %v573_v57 = vadd.f32 %v505_v42, %v504_v38  ;;  %v2298_v42 = vld [vmem:[%s2153_s15 + $0x98] sm:$0xff] }
  0x1b   : > { %v570_v52 = vadd.f32 %v503_v47, %v502_v43  ;;  %v506_v53 = vmul.f32 %v2160_v6, %v3080_v45  ;;  %v507_v54 = vmul.f32 %v2164_v7, %v3086_v48  ;;  %v508_v58 = vmul.f32 %v2160_v6, %v3078_v40  ;;  %v2301_v43 = vld [vmem:[%s2153_s15 + $0x90] sm:$0xff]  ;;  %v2434_v40 = vld [vmem:[%s2153_s15 + $0xc0] sm:$0xff] }
  0x1c   : > { %562 = vadd.xlane.f32.xlu0 %v561_v34  ;;  %568 = vadd.xlane.f32.xlu1 %v567_v37  ;;  %v509_v59 = vmul.f32 %v2164_v7, %v3081_v44  ;;  %v3070_v60 = vunpack.c.h.bf16 %v2239_v46  ;;  %v512_v61 = vmul.f32 %v2160_v6, %v3056_v49  ;;  %v513_v62 = vmul.f32 %v2164_v7, %v3069_v50  ;;  %v2457_v44 = vld [vmem:[%s2153_s15 + $0xd0] sm:$0xff] }
  0x1d   : > { %v3062_v63 = vunpack.c.l.bf16 %v2248_v51  ;;  %v576_v1 = vadd.f32 %v507_v54, %v506_v53  ;;  %v510_v18 = vmul.f32 %v2160_v6, %v3058_v55  ;;  %v3068_v23 = vunpack.c.h.bf16 %v2248_v51  ;;  %v2350_v55 = vld [vmem:[%s2153_s15 + $0xa0] sm:$0xff] }
  0x1e   : > { %v511_v19 = vmul.f32 %v2164_v7, %v3070_v60  ;;  %v579_v24 = vadd.f32 %v509_v59, %v508_v58  ;;  %v3061_v25 = vunpack.c.l.bf16 %v2258_v56  ;;  %v3063_v26 = vunpack.c.h.bf16 %v2258_v56 }
  0x1f   : > { %v585_v29 = vadd.f32 %v513_v62, %v512_v61  ;;  %v526_v30 = vmul.f32 %v2160_v6, %v3062_v63  ;;  %v527_v34 = vmul.f32 %v2164_v7, %v3068_v23  ;;  %v3051_v37 = vunpack.c.l.bf16 %v2275_v0 }
  0x20   : > { %571 = vadd.xlane.f32.xlu0 %v570_v52  ;;  %574 = vadd.xlane.f32.xlu1 %v573_v57  ;;  %v582_v33 = vadd.f32 %v511_v19, %v510_v18  ;;  %v3054_v38 = vunpack.c.h.bf16 %v2275_v0  ;;  %v528_v47 = vmul.f32 %v2160_v6, %v3061_v25  ;;  %v529_v52 = vmul.f32 %v2164_v7, %v3063_v26  ;;  %v2373_v26 = vld [vmem:[%s2153_s15 + $0x70] sm:$0xff] }
  0x21   : > { %v3052_v53 = vunpack.c.l.bf16 %v2287_v28  ;;  %v3053_v54 = vunpack.c.h.bf16 %v2287_v28  ;;  %v3055_v57 = vunpack.c.l.bf16 %v2298_v42  ;;  %v3057_v58 = vunpack.c.h.bf16 %v2298_v42 }
  0x22   : > { %v3059_v59 = vunpack.c.l.bf16 %v2301_v43  ;;  %v3060_v61 = vunpack.c.h.bf16 %v2301_v43  ;;  %v606_v62 = vadd.f32 %v527_v34, %v526_v30  ;;  %v515_v18 = vmul.f32 %v2164_v7, %v3054_v38  ;;  %v2328_v30 = vld [vmem:[%s2153_s15 + $0x60] sm:$0xff]  ;;  %v2331_v34 = vld [vmem:[%s2153_s15 + $0x68] sm:$0xff] }
  0x23   : > { %v609_v19 = vadd.f32 %v529_v52, %v528_v47  ;;  %v3067_v38 = vunpack.c.h.bf16 %v2328_v30  ;;  %v3064_v49 = vunpack.c.l.bf16 %v2331_v34  ;;  %v3073_v25 = vunpack.c.l.bf16 %v2350_v55 }
  0x24   : > { %577 = vadd.xlane.f32.xlu0 %v576_v1  ;;  %580 = vadd.xlane.f32.xlu1 %v579_v24  ;;  %v514_v1 = vmul.f32 %v2160_v6, %v3051_v37  ;;  %v516_v24 = vmul.f32 %v2160_v6, %v3052_v53  ;;  %v532_v37 = vmul.f32 %v2160_v6, %v3055_v57  ;;  %v3076_v63 = vunpack.c.h.bf16 %v2350_v55 }
  0x25   : > { %v530_v47 = vmul.f32 %v2160_v6, %v3059_v59  ;;  %v531_v52 = vmul.f32 %v2164_v7, %v3060_v61  ;;  %v1904_v59 = vld [vmem:[%s3043_s1 + $0x40] sm:$0xff]   ;;  %v2356_v61 = vld [vmem:[%s2153_s15 + $0xa8] sm:$0xff]  ;;  %v3094_v45 = vunpack.c.h.bf16 %v2434_v40 }
  0x26   : > { %v588_v53 = vadd.f32 %v515_v18, %v514_v1  ;;  %1752 = vmatprep.subr.bf16.mxu0 %v1904_v59  ;;  %1864 = vmatprep.subr.bf16.mxu1 %v1904_v59  ;;  %v3071_v59 = vunpack.c.l.bf16 %v2356_v61  ;;  %v535_v23 = vmul.f32 %v2164_v7, %v3076_v63 }
  0x27   : > { %v612_v18 = vadd.f32 %v531_v52, %v530_v47  ;;  %v1906_v47 = vld [vmem:[%s3043_s1 + $0x48] sm:$0xff]   ;;  %v543_v48 = vmul.f32 %v2164_v7, %v3094_v45 }
  0x28   : > { %583 = vadd.xlane.f32.xlu0 %v582_v33  ;;  %586 = vadd.xlane.f32.xlu1 %v585_v29  ;;  %v517_v33 = vmul.f32 %v2164_v7, %v3053_v54  ;;  %v533_v29 = vmul.f32 %v2164_v7, %v3057_v58  ;;  %v3065_v54 = vunpack.c.l.bf16 %v2328_v30  ;;  %v3066_v58 = vunpack.c.h.bf16 %v2331_v34 }
  0x29   : > { %v536_v60 = vmul.f32 %v2160_v6, %v3071_v59 }
  0x2a   : > { %v591_v57 = vadd.f32 %v517_v33, %v516_v24  ;;  %v615_v1 = vadd.f32 %v533_v29, %v532_v37  ;;  %v518_v24 = vmul.f32 %v2160_v6, %v3065_v54  ;;  %v519_v33 = vmul.f32 %v2164_v7, %v3067_v38 }
  0x2b   : > { %v520_v37 = vmul.f32 %v2160_v6, %v3064_v49  ;;  %v3074_v29 = vunpack.c.h.bf16 %v2356_v61  ;;  %v3077_v54 = vunpack.c.l.bf16 %v2373_v26 }
  0x2c   : > { %607 = vadd.xlane.f32.xlu0 %v606_v62  ;;  %610 = vadd.xlane.f32.xlu1 %v609_v19  ;;  %v1905_v62 = vld [vmem:[%s3043_s1] sm:$0xff]   ;;  %v2362_v19 = vld [vmem:[%s2153_s15 + $0x78] sm:$0xff]  ;;  %v594_v38 = vadd.f32 %v519_v33, %v518_v24  ;;  %v2406_v24 = vld [vmem:[%s2153_s15 + $0xb0] sm:$0xff] }
  0x2d   : > { %1753 = vmatpush3.bf16.msra.mxu0 %v1905_v62  ;;  %1872 = vmatpush3.bf16.msra.mxu1 %v1905_v62  ;;  %v3072_v52 = vunpack.c.l.bf16 %v2362_v19  ;;  %v3075_v49 = vunpack.c.h.bf16 %v2362_v19  ;;  %v534_v62 = vmul.f32 %v2160_v6, %v3073_v25  ;;  %v1908_v33 = vld [vmem:[%s3043_s1 + $0x50] sm:$0xff]   ;;  %v522_v59 = vmul.f32 %v2160_v6, %v3077_v54 }
  0x2e   : > { %1754 = vmatprep.subr.bf16.mxu0 %v1906_v47  ;;  %1865 = vmatprep.subr.bf16.mxu1 %v1906_v47  ;;  %v3083_v25 = vunpack.c.l.bf16 %v2406_v24 }
  0x2f   : > { %v525_v47 = vmul.f32 %v2164_v7, %v3075_v49 }
  0x30   : > { %589 = vadd.xlane.f32.xlu0 %v588_v53  ;;  %592 = vadd.xlane.f32.xlu1 %v591_v57  ;;  %v521_v53 = vmul.f32 %v2164_v7, %v3066_v58  ;;  %v1907_v57 = vld [vmem:[%s3043_s1 + $0x8] sm:$0xff]   ;;  %v3079_v58 = vunpack.c.h.bf16 %v2373_v26 }
  0x31   : > { %1755 = vmatpush3.bf16.msra.mxu0 %v1907_v57  ;;  %1873 = vmatpush3.bf16.msra.mxu1 %v1907_v57 }
  0x32   : > { %v597_v50 = vadd.f32 %v521_v53, %v520_v37  ;;  %v2415_v37 = vld [vmem:[%s2153_s15 + $0xb8] sm:$0xff]  ;;  %v1909_v53 = vld [vmem:[%s3043_s1 + $0x10] sm:$0xff]   ;;  %v523_v57 = vmul.f32 %v2164_v7, %v3079_v58  ;;  %1756 = vmatprep.subr.bf16.mxu0 %v1908_v33  ;;  %1866 = vmatprep.subr.bf16.mxu1 %v1908_v33  ;;  %v538_v33 = vmul.f32 %v2160_v6, %v3083_v25  ;;  %v3091_v58 = vunpack.c.l.bf16 %v2434_v40 }
  0x33   : > { %v3082_v63 = vunpack.c.l.bf16 %v2415_v37  ;;  %v3084_v54 = vunpack.c.h.bf16 %v2415_v37  ;;  %v3095_v25 = vunpack.c.l.bf16 %v2457_v44 }
  0x34   : > { %613 = vadd.xlane.f32.xlu0 %v612_v18  ;;  %616 = vadd.xlane.f32.xlu1 %v615_v1  ;;  %v537_v18 = vmul.f32 %v2164_v7, %v3074_v29  ;;  %v524_v1 = vmul.f32 %v2160_v6, %v3072_v52  ;;  %v618_v52 = vadd.f32 %v535_v23, %v534_v62  ;;  %v3085_v29 = vunpack.c.h.bf16 %v2406_v24  ;;  %v2440_v23 = vld [vmem:[%s2153_s15 + $0xc8] sm:$0xff]  ;;  %v1911_v62 = vld [vmem:[%s3043_s1 + $0x18] sm:$0xff]  }
  0x35   : > { %1757 = vmatpush3.bf16.msra.mxu0 %v1909_v53  ;;  %1874 = vmatpush3.bf16.msra.mxu1 %v1909_v53 }
  0x36   : > { %v621_v49 = vadd.f32 %v537_v18, %v536_v60  ;;  %v600_v60 = vadd.f32 %v523_v57, %v522_v59  ;;  %v2446_v18 = vld [vmem:[%s2153_s15 + $0xd8] sm:$0xff]  ;;  %v539_v53 = vmul.f32 %v2164_v7, %v3085_v29  ;;  %v540_v59 = vmul.f32 %v2160_v6, %v3082_v63  ;;  %v1912_v57 = vld [vmem:[%s3043_s1 + $0x60] sm:$0xff]  }
  0x37   : > { %v3093_v63 = vunpack.c.h.bf16 %v2446_v18 }
  0x38   : > { %595 = vadd.xlane.f32.xlu0 %v594_v38  ;;  %598 = vadd.xlane.f32.xlu1 %v597_v50  ;;  %v1910_v38 = vld [vmem:[%s3043_s1 + $0x58] sm:$0xff]   ;;  %v603_v50 = vadd.f32 %v525_v47, %v524_v1  ;;  %v3089_v1 = vunpack.c.l.bf16 %v2440_v23  ;;  %v3092_v47 = vunpack.c.h.bf16 %v2440_v23  ;;  %v624_v29 = vadd.f32 %v539_v53, %v538_v33  ;;  %v2490_v33 = vld [vmem:[%s2153_s15 + $0xe0] sm:$0xff]  ;;  %v1914_v53 = vld [vmem:[%s3043_s1 + $0x68] sm:$0xff]  }
  0x39   : > { %1758 = vmatprep.subr.bf16.mxu0 %v1910_v38  ;;  %1867 = vmatprep.subr.bf16.mxu1 %v1910_v38  ;;  %v3090_v38 = vunpack.c.l.bf16 %v2446_v18 }
  0x3a   : > { %1759 = vmatpush3.bf16.msra.mxu0 %v1911_v62  ;;  %1875 = vmatpush3.bf16.msra.mxu1 %v1911_v62  ;;  %v542_v62 = vmul.f32 %v2160_v6, %v3091_v58  ;;  %v544_v36 = vmul.f32 %v2160_v6, %v3089_v1  ;;  %v546_v1 = vmul.f32 %v2160_v6, %v3095_v25  ;;  %v3099_v58 = vunpack.c.l.bf16 %v2490_v33 }
  0x3b   : > { %1760 = vmatprep.subr.bf16.mxu0 %v1912_v57  ;;  %1868 = vmatprep.subr.bf16.mxu1 %v1912_v57  ;;  %v549_v57 = vmul.f32 %v2164_v7, %v3093_v63 }
  0x3c   : > { %619 = vadd.xlane.f32.xlu0 %v618_v52  ;;  %622 = vadd.xlane.f32.xlu1 %v621_v49  ;;  %v541_v52 = vmul.f32 %v2164_v7, %v3084_v54  ;;  %v1913_v49 = vld [vmem:[%s3043_s1 + $0x20] sm:$0xff]   ;;  %v3097_v54 = vunpack.c.h.bf16 %v2457_v44 }
  0x3e   : > { %1761 = vmatpush3.bf16.msra.mxu0 %v1913_v49  ;;  %v627_v31 = vadd.f32 %v541_v52, %v540_v59  ;;  %1876 = vmatpush3.bf16.msra.mxu1 %v1913_v49  ;;  %v2499_v59 = vld [vmem:[%s2153_s15 + $0xe8] sm:$0xff]  ;;  %v547_v49 = vmul.f32 %v2164_v7, %v3097_v54  ;;  %v1916_v54 = vld [vmem:[%s3043_s1 + $0x70] sm:$0xff]  }
  0x3f   : > { %v1915_v52 = vld [vmem:[%s3043_s1 + $0x28] sm:$0xff]   ;;  %1762 = vmatprep.subr.bf16.mxu0 %v1914_v53  ;;  %1869 = vmatprep.subr.bf16.mxu1 %v1914_v53  ;;  %v3098_v45 = vunpack.c.l.bf16 %v2499_v59  ;;  %v3100_v25 = vunpack.c.h.bf16 %v2499_v59  ;;  %v3102_v53 = vunpack.c.l.bf16 %v2518_v35 }
  0x40   : > { %601 = vadd.xlane.f32.xlu0 %v600_v60  ;;  %604 = vadd.xlane.f32.xlu1 %v603_v50  ;;  %v545_v60 = vmul.f32 %v2164_v7, %v3092_v47  ;;  %v548_v50 = vmul.f32 %v2160_v6, %v3090_v38  ;;  %v630_v38 = vadd.f32 %v543_v48, %v542_v62  ;;  %v3105_v47 = vunpack.c.h.bf16 %v2490_v33  ;;  %v1917_v48 = vld [vmem:[%s3043_s1 + $0x30] sm:$0xff]  }
  0x42   : > { %1763 = vmatpush3.bf16.msra.mxu0 %v1915_v52  ;;  %v633_v63 = vadd.f32 %v545_v60, %v544_v36  ;;  %1877 = vmatpush3.bf16.msra.mxu1 %v1915_v52  ;;  %v639_v62 = vadd.f32 %v549_v57, %v548_v50  ;;  %v550_v36 = vmul.f32 %v2160_v6, %v3099_v58  ;;  %v3103_v52 = vunpack.c.h.bf16 %v2518_v35  ;;  %v1918_v57 = vld [vmem:[%s3043_s1 + $0x78] sm:$0xff]  }
  0x43   : > { %1764 = vmatprep.subr.bf16.mxu0 %v1916_v54  ;;  %1870 = vmatprep.subr.bf16.mxu1 %v1916_v54  ;;  %v551_v60 = vmul.f32 %v2164_v7, %v3105_v47  ;;  %v553_v54 = vmul.f32 %v2164_v7, %v3100_v25 }
  0x44   : > { %625 = vadd.xlane.f32.xlu0 %v624_v29  ;;  %628 = vadd.xlane.f32.xlu1 %v627_v31  ;;  %v2524_v29 = vld [vmem:[%s2153_s15 + $0xf8] sm:$0xff]  ;;  %v636_v31 = vadd.f32 %v547_v49, %v546_v1  ;;  %v552_v1 = vmul.f32 %v2160_v6, %v3098_v45  ;;  %v554_v45 = vmul.f32 %v2160_v6, %v3102_v53 }
  0x45   : > { %v3104_v50 = vunpack.c.h.bf16 %v2524_v29  ;;  %v642_v49 = vadd.f32 %v551_v60, %v550_v36  ;;  %v555_v58 = vmul.f32 %v2164_v7, %v3103_v52 }
  0x46   : > { %1765 = vmatpush3.bf16.msra.mxu0 %v1917_v48  ;;  %1878 = vmatpush3.bf16.msra.mxu1 %v1917_v48  ;;  %v645_v25 = vadd.f32 %v553_v54, %v552_v1 }
  0x47   : > { %1766 = vmatprep.subr.bf16.mxu0 %v1918_v57  ;;  %1871 = vmatprep.subr.bf16.mxu1 %v1918_v57  ;;  %v648_v36 = vadd.f32 %v555_v58, %v554_v45  ;;  %v2563_v57 = vstv %s481_s11 }
  0x48   : > { %631 = vadd.xlane.f32.xlu0 %v630_v38  ;;  %634 = vadd.xlane.f32.xlu1 %v633_v63  ;;  %v3101_v38 = vunpack.c.l.bf16 %v2524_v29  ;;  %v1919_v63 = vld [vmem:[%s3043_s1 + $0x38] sm:$0xff]  }
  0x4a   : > { %1767 = vmatpush3.bf16.msra.mxu0 %v1919_v63  ;;  %v556_v48 = vmul.f32 %v2160_v6, %v3101_v38  ;;  %1879 = vmatpush3.bf16.msra.mxu1 %v1919_v63 }
  0x4c   : > { %637 = vadd.xlane.f32.xlu0 %v636_v31  ;;  %640 = vadd.xlane.f32.xlu1 %v639_v62  ;;  %v557_v31 = vmul.f32 %v2164_v7, %v3104_v50 }
  0x4e   : > { %v651_v60 = vadd.f32 %v557_v31, %v556_v48 }
  0x50   : > { %643 = vadd.xlane.f32.xlu0 %v642_v49  ;;  %646 = vadd.xlane.f32.xlu1 %v645_v25 }
  0x54   : > { %649 = vadd.xlane.f32.xlu0 %v648_v36  ;;  %652 = vadd.xlane.f32.xlu1 %v651_v60 }
  0xa5   : > { %v560_v62 = vpop.xlane.xlu0 %559  ;;  %v566_v54 = vpop.xlane.xlu1 %565 }
  0xa6   : > { %v655_v1 = vadd.f32 %v2563_v57, %v560_v62  ;;  %v657_v6 = vadd.f32 %v2563_v57, %v566_v54 }
  0xa8   : > { %v1698_v38 = vmul.f32 -1.442695, %v655_v1  ;;  %v1700_v53 = vmul.f32 -1.442695, %v657_v6 }
  0xa9   : > { %v563_v52 = vpop.xlane.xlu0 %562  ;;  %v569_v45 = vpop.xlane.xlu1 %568 }
  0xaa   : > { %1920 = vpow2.f32 %v1698_v38  ;;  %v656_v7 = vadd.f32 %v2563_v57, %v563_v52  ;;  %v658_v25 = vadd.f32 %v2563_v57, %v569_v45 }
  0xab   : > { %1922 = vpow2.f32 %v1700_v53 }
  0xac   : > { %v1699_v58 = vmul.f32 -1.442695, %v656_v7  ;;  %v1701_v63 = vmul.f32 -1.442695, %v658_v25 }
  0xad   : > { %v572_v49 = vpop.xlane.xlu0 %571  ;;  %v575_v48 = vpop.xlane.xlu1 %574 }
  0xae   : > { %1924 = vpow2.f32 %v1699_v58  ;;  %v659_v31 = vadd.f32 %v2563_v57, %v572_v49  ;;  %v660_v36 = vadd.f32 %v2563_v57, %v575_v48 }
  0xaf   : > { %1926 = vpow2.f32 %v1701_v63 }
  0xb0   : > { %v1702_v60 = vmul.f32 -1.442695, %v659_v31  ;;  %v1703_v62 = vmul.f32 -1.442695, %v660_v36 }
  0xb1   : > { %v578_v38 = vpop.xlane.xlu0 %577  ;;  %v581_v52 = vpop.xlane.xlu1 %580 }
  0xb2   : > { %1928 = vpow2.f32 %v1702_v60  ;;  %v661_v53 = vadd.f32 %v2563_v57, %v578_v38  ;;  %v662_v1 = vadd.f32 %v2563_v57, %v581_v52 }
  0xb3   : > { %1930 = vpow2.f32 %v1703_v62 }
  0xb4   : > { %v1921_v54 = vpop.eup %1920  ;;  %v1704_v6 = vmul.f32 -1.442695, %v661_v53  ;;  %v1705_v25 = vmul.f32 -1.442695, %v662_v1  ;;  %v482_v1 = vld [vmem:[%s366_s17] sm:$0x3] }
  0xb5   : > { %v1923_v7 = vpop.eup %1922  ;;  %v783_v45 = vadd.f32 1.0, %v1921_v54  ;;  %v584_v58 = vpop.xlane.xlu0 %583 }
  0xb6   : > { %v785_v63 = vadd.f32 1.0, %v1923_v7  ;;  %1932 = vpow2.f32 %v1704_v6  ;;  %v587_v49 = vpop.xlane.xlu1 %586  ;;  %v663_v48 = vadd.f32 %v2563_v57, %v584_v58 }
  0xb7   : > { %1934 = vrcp.f32 %v783_v45  ;;  %v664_v31 = vadd.f32 %v2563_v57, %v587_v49 }
  0xb8   : > { %v1925_v36 = vpop.eup %1924  ;;  %1936 = vrcp.f32 %v785_v63  ;;  %v1706_v60 = vmul.f32 -1.442695, %v663_v48  ;;  %v2583_v63 = vrot.slane %v482_v1, %v486_v3 }
  0xb9   : > { %v1927_v62 = vpop.eup %1926  ;;  %v784_v38 = vadd.f32 1.0, %v1925_v36  ;;  %1938 = vpow2.f32 %v1705_v25  ;;  %v1707_v52 = vmul.f32 -1.442695, %v664_v31  ;;  %v608_v53 = vpop.xlane.xlu0 %607  ;;  %v2587_v36 = vrot.slane %v482_v1, %v490_v4 }
  0xba   : > { %v786_v54 = vadd.f32 1.0, %v1927_v62  ;;  %1940 = vpow2.f32 %v1706_v60  ;;  %v611_v6 = vpop.xlane.xlu1 %610  ;;  %v671_v7 = vadd.f32 %v2563_v57, %v608_v53 }
  0xbb   : > { %1942 = vrcp.f32 %v784_v38  ;;  %v672_v58 = vadd.f32 %v2563_v57, %v611_v6 }
  0xbc   : > { %v1929_v45 = vpop.eup %1928  ;;  %1944 = vrcp.f32 %v786_v54  ;;  %v1714_v49 = vmul.f32 -1.442695, %v671_v7 }
  0xbd   : > { %v1931_v50 = vpop.eup %1930  ;;  %v787_v25 = vadd.f32 1.0, %v1929_v45  ;;  %1946 = vpow2.f32 %v1707_v52  ;;  %v1715_v48 = vmul.f32 -1.442695, %v672_v58  ;;  %v590_v31 = vpop.xlane.xlu0 %589 }
  0xbe   : > { %v788_v60 = vadd.f32 1.0, %v1931_v50  ;;  %1948 = vpow2.f32 %v1714_v49  ;;  %v593_v62 = vpop.xlane.xlu1 %592  ;;  %v665_v38 = vadd.f32 %v2563_v57, %v590_v31 }
  0xbf   : > { %1950 = vrcp.f32 %v787_v25  ;;  %v666_v53 = vadd.f32 %v2563_v57, %v593_v62 }
  0xc0   : > { %v1933_v54 = vpop.eup %1932  ;;  %1952 = vrcp.f32 %v788_v60  ;;  %v1708_v3 = vmul.f32 -1.442695, %v665_v38 }
  0xc1   : > { %v1935_v6 = vpop.eup %1934  ;;  %v789_v7 = vadd.f32 1.0, %v1933_v54  ;;  %1954 = vpow2.f32 %v1715_v48  ;;  %v1709_v52 = vmul.f32 -1.442695, %v666_v53  ;;  %v614_v58 = vpop.xlane.xlu0 %613 }
  0xc2   : > { %v1937_v45 = vpop.eup %1936  ;;  %1956 = vpow2.f32 %v1708_v3  ;;  %v617_v2 = vpop.xlane.xlu1 %616  ;;  %v673_v4 = vadd.f32 %v2563_v57, %v614_v58  ;;  %v891_v50 = vadd.f32 %v1935_v6, %v2587_v36  ;;  %v890_v1 = vadd.f32 %v1935_v6, %v2583_v63 }
  0xc3   : > { %v1939_v49 = vpop.eup %1938  ;;  %1958 = vrcp.f32 %v789_v7  ;;  %v674_v25 = vadd.f32 %v2563_v57, %v617_v2  ;;  %v895_v31 = vadd.f32 %v1937_v45, %v2587_v36  ;;  %v894_v60 = vadd.f32 %v1937_v45, %v2583_v63 }
  0xc4   : > { %v1941_v48 = vpop.eup %1940  ;;  %v790_v62 = vadd.f32 1.0, %v1939_v49  ;;  %1960 = vpow2.f32 %v1709_v52  ;;  %v1716_v38 = vmul.f32 -1.442695, %v673_v4  ;;  %v955_v53 = vmul.f32 %v891_v50, %v417_v10 }
  0xc5   : > { %v1943_v54 = vpop.eup %1942  ;;  %v791_v3 = vadd.f32 1.0, %v1941_v48  ;;  %v1717_v58 = vmul.f32 -1.442695, %v674_v25  ;;  %v954_v6 = vmul.f32 %v890_v1, %v416_v9  ;;  %v596_v7 = vpop.xlane.xlu0 %595  ;;  %v2603_v2 = vmul.f32 %v895_v31, %v421_v14 }
  0xc6   : > { %v1945_v47 = vpop.eup %1944  ;;  %1962 = vrcp.f32 %v790_v62  ;;  %v893_v45 = vadd.f32 %v1943_v54, %v2587_v36  ;;  %v1019_v52 = vmax.f32 %v955_v53, 0.0  ;;  %v892_v4 = vadd.f32 %v1943_v54, %v2583_v63  ;;  %v599_v49 = vpop.xlane.xlu1 %598 }
  0xc7   : > { %v1947_v10 = vpop.eup %1946  ;;  %1964 = vrcp.f32 %v791_v3  ;;  %v1018_v50 = vmax.f32 %v954_v6, 0.0  ;;  %v668_v25 = vadd.f32 %v2563_v57, %v599_v49  ;;  %v667_v5 = vadd.f32 %v2563_v57, %v596_v7 }
  0xc8   : > { %v1949_v9 = vpop.eup %1948  ;;  %v792_v1 = vadd.f32 1.0, %v1947_v10  ;;  %1966 = vpow2.f32 %v1717_v58  ;;  %v957_v14 = vmul.f32 %v893_v45, %v419_v16  ;;  %v956_v31 = vmul.f32 %v892_v4, %v418_v15 }
  0xc9   : > { %v2613_v48 = vpop.eup %1950  ;;  %v799_v62 = vadd.f32 1.0, %v1949_v9  ;;  %1968 = vpow2.f32 %v1716_v38  ;;  %v1711_v53 = vmul.f32 -1.442695, %v668_v25  ;;  %v1710_v54 = vmul.f32 -1.442695, %v667_v5  ;;  %v620_v3 = vpop.xlane.xlu0 %619 }
  0xca   : > { %v2615_v6 = vpop.eup %1952  ;;  %1970 = vrcp.f32 %v792_v1  ;;  %v1021_v7 = vmax.f32 %v957_v14, 0.0  ;;  %v1020_v49 = vmax.f32 %v956_v31, 0.0  ;;  %v897_v58 = vadd.f32 %v1945_v47, %v2587_v36  ;;  %v623_v10 = vpop.xlane.xlu1 %622 }
  0xcb   : > { %v1955_v39 = vpop.eup %1954  ;;  %1972 = vrcp.f32 %v799_v62  ;;  %v1023_v11 = vmax.f32 %v2603_v2, 0.0  ;;  %v676_v15 = vadd.f32 %v2563_v57, %v623_v10  ;;  %v675_v16 = vadd.f32 %v2563_v57, %v620_v3 }
  0xcc   : > { %v1957_v38 = vpop.eup %1956  ;;  %v800_v45 = vadd.f32 1.0, %v1955_v39  ;;  %v1083_v4 = vpack.c.bf16 %v1021_v7, %v1019_v52  ;;  %v1082_v25 = vpack.c.bf16 %v1020_v49, %v1018_v50  ;;  %1974 = vpow2.f32 %v1711_v53 }
  0xcd   : > { %v2621_v5 = vpop.eup %1958  ;;  %v793_v9 = vadd.f32 1.0, %v1957_v38  ;;  %1976 = vpow2.f32 %v1710_v54  ;;  %v961_v1 = vmul.f32 %v897_v58, %v423_v21  ;;  %v1719_v14 = vmul.f32 -1.442695, %v676_v15  ;;  %v602_v31 = vpop.xlane.xlu0 %601 }
  0xce   : > { %v1961_v62 = vpop.eup %1960  ;;  %1978 = vrcp.f32 %v800_v45  ;;  %1274 = vmatprep.mubr.bf16.mxu0 %v1083_v4  ;;  %v1718_v2 = vmul.f32 -1.442695, %v675_v16  ;;  %v896_v3 = vadd.f32 %v1945_v47, %v2583_v63  ;;  %v958_v39 = vmul.f32 %v894_v60, %v420_v13  ;;  %v605_v52 = vpop.xlane.xlu1 %604 }
  0xcf   : > { %v794_v50 = vadd.f32 1.0, %v1961_v62  ;;  %1980 = vrcp.f32 %v793_v9  ;;  %1275 = vmatmul.mubr.bf16.vlgmr.msra.gmra.mrb[0].mxu0 %v1082_v25  ;;  %v1025_v53 = vmax.f32 %v961_v1, 0.0  ;;  %v670_v54 = vadd.f32 %v2563_v57, %v605_v52 }
  0xd0   : > { %v2629_v7 = vpop.eup %1962  ;;  %1982 = vpow2.f32 %v1719_v14  ;;  %v960_v21 = vmul.f32 %v896_v3, %v422_v20  ;;  %v1022_v49 = vmax.f32 %v958_v39, 0.0  ;;  %v669_v58 = vadd.f32 %v2563_v57, %v602_v31 }
  0xd1   : > { %v2634_v47 = vpop.eup %1964  ;;  %1984 = vrcp.f32 %v794_v50  ;;  %v1085_v8 = vpack.c.bf16 %v1025_v53, %v1023_v11  ;;  %v1713_v13 = vmul.f32 -1.442695, %v670_v54  ;;  %v626_v60 = vpop.xlane.xlu0 %625  ;;  %v899_v10 = vadd.f32 %v2613_v48, %v2587_v36 }
  0xd2   : > { %v1967_v15 = vpop.eup %1966  ;;  %1986 = vpow2.f32 %v1718_v2  ;;  %v1024_v16 = vmax.f32 %v960_v21, 0.0  ;;  %v1712_v38 = vmul.f32 -1.442695, %v669_v58  ;;  %v629_v45 = vpop.xlane.xlu1 %628  ;;  %v677_v12 = vadd.f32 %v2563_v57, %v626_v60 }
  0xd3   : > { %v1969_v20 = vpop.eup %1968  ;;  %v802_v4 = vadd.f32 1.0, %v1967_v15  ;;  %1282 = vmatprep.mubr.bf16.mxu0 %v1085_v8  ;;  %1988 = vpow2.f32 %v1713_v13  ;;  %v678_v25 = vadd.f32 %v2563_v57, %v629_v45  ;;  %v901_v11 = vadd.f32 %v2615_v6, %v2587_v36 }
  0xd4   : > { %v2642_v9 = vpop.eup %1970  ;;  %v801_v1 = vadd.f32 1.0, %v1969_v20  ;;  %v1084_v14 = vpack.c.bf16 %v1024_v16, %v1022_v49  ;;  %1990 = vpow2.f32 %v1712_v38  ;;  %v1720_v31 = vmul.f32 -1.442695, %v677_v12 }
  0xd5   : > { %v2644_v62 = vpop.eup %1972  ;;  %1992 = vrcp.f32 %v802_v4  ;;  %v1721_v2 = vmul.f32 -1.442695, %v678_v25  ;;  %v3107_v3 = vunpack.c.h.bf16 %v2193_v22  ;;  %v3108_v52 = vunpack.c.h.bf16 %v2182_v17  ;;  %v632_v53 = vpop.xlane.xlu0 %631 }
  0xd6   : > { %v1975_v54 = vpop.eup %1974  ;;  %1994 = vrcp.f32 %v801_v1  ;;  %v898_v21 = vadd.f32 %v2613_v48, %v2583_v63  ;;  %v900_v49 = vadd.f32 %v2615_v6, %v2583_v63  ;;  %v635_v58 = vpop.xlane.xlu1 %634  ;;  %v679_v8 = vadd.f32 %v2563_v57, %v632_v53 }
  0xd7   : > { %v963_v39 = vmul.f32 %v899_v10, %v3107_v3  ;;  %v965_v50 = vmul.f32 %v901_v11, %v3108_v52  ;;  %v1977_v13 = vpop.eup %1976  ;;  %v796_v60 = vadd.f32 1.0, %v1975_v54  ;;  %1283 = vmatmul.mubr.bf16.gmra.mrb[4].mxu0 %v1084_v14  ;;  %1996 = vpow2.f32 %v1721_v2 }
  0xd8   : > { %v2655_v16 = vpop.eup %1978  ;;  %v795_v38 = vadd.f32 1.0, %v1977_v13  ;;  %1998 = vpow2.f32 %v1720_v31  ;;  %v3109_v45 = vunpack.c.l.bf16 %v2193_v22  ;;  %v3110_v48 = vunpack.c.l.bf16 %v2182_v17 }
  0xd9   : > { %v1027_v10 = vmax.f32 %v963_v39, 0.0  ;;  %v1029_v15 = vmax.f32 %v965_v50, 0.0  ;;  %v2661_v6 = vpop.eup %1980  ;;  %2000 = vrcp.f32 %v796_v60  ;;  %v680_v25 = vadd.f32 %v2563_v57, %v635_v58 }
  0xda   : > { %v962_v12 = vmul.f32 %v898_v21, %v3109_v45  ;;  %v964_v20 = vmul.f32 %v900_v49, %v3110_v48  ;;  %v1722_v11 = vmul.f32 -1.442695, %v679_v8  ;;  %v1983_v1 = vpop.eup %1982  ;;  %2002 = vrcp.f32 %v795_v38 }
  0xdb   : > { %v1087_v4 = vpack.c.bf16 %v1029_v15, %v1027_v10  ;;  %v903_v31 = vadd.f32 %v2621_v5, %v2587_v36  ;;  %v2666_v3 = vpop.eup %1984  ;;  %v804_v22 = vadd.f32 1.0, %v1983_v1  ;;  %v1723_v17 = vmul.f32 -1.442695, %v680_v25 }
  0xdc   : > { %v1026_v14 = vmax.f32 %v962_v12, 0.0  ;;  %v1028_v2 = vmax.f32 %v964_v20, 0.0  ;;  %2004 = vpow2.f32 %v1722_v11  ;;  %v905_v39 = vadd.f32 %v2629_v7, %v2587_v36  ;;  %v1987_v52 = vpop.eup %1986 }
  0xdd   : > { %1290 = vmatprep.mubr.bf16.mxu0 %v1087_v4  ;;  %v3111_v53 = vunpack.c.h.bf16 %v2218_v32  ;;  %v902_v21 = vadd.f32 %v2621_v5, %v2583_v63  ;;  %v904_v49 = vadd.f32 %v2629_v7, %v2583_v63  ;;  %v1989_v58 = vpop.eup %1988  ;;  %2006 = vrcp.f32 %v804_v22 }
  0xde   : > { %v1086_v50 = vpack.c.bf16 %v1028_v2, %v1026_v14  ;;  %v803_v8 = vadd.f32 1.0, %v1987_v52  ;;  %v3112_v13 = vunpack.c.h.bf16 %v2208_v27  ;;  %v907_v10 = vadd.f32 %v2634_v47, %v2587_v36  ;;  %v1991_v15 = vpop.eup %1990 }
  0xdf   : > { %v967_v54 = vmul.f32 %v903_v31, %v3111_v53  ;;  %v798_v38 = vadd.f32 1.0, %v1989_v58  ;;  %2008 = vpow2.f32 %v1723_v17  ;;  %v3113_v12 = vunpack.c.l.bf16 %v2218_v32  ;;  %v2682_v5 = vpop.eup %1992 }
  0xe0   : > { %v969_v60 = vmul.f32 %v905_v39, %v3112_v13  ;;  %2010 = vrcp.f32 %v803_v8  ;;  %v797_v7 = vadd.f32 1.0, %v1991_v15  ;;  %1291 = vmatmul.mubr.bf16.gmra.mrb[8].mxu0 %v1086_v50  ;;  %v3114_v4 = vunpack.c.l.bf16 %v2208_v27  ;;  %v2686_v11 = vpop.eup %1994 }
  0xe1   : > { %v1031_v45 = vmax.f32 %v967_v54, 0.0  ;;  %v966_v48 = vmul.f32 %v902_v21, %v3113_v12  ;;  %2012 = vrcp.f32 %v798_v38  ;;  %v909_v14 = vadd.f32 %v2642_v9, %v2587_v36  ;;  %v1997_v31 = vpop.eup %1996 }
  0xe2   : > { %v1033_v20 = vmax.f32 %v969_v60, 0.0  ;;  %v968_v25 = vmul.f32 %v904_v49, %v3114_v4  ;;  %v3115_v2 = vunpack.c.h.bf16 %v2239_v46  ;;  %2014 = vrcp.f32 %v797_v7  ;;  %v1999_v52 = vpop.eup %1998  ;;  %v641_v49 = vpop.xlane.xlu1 %640 }
  0xe3   : > { %v1030_v1 = vmax.f32 %v966_v48, 0.0  ;;  %v923_v39 = vadd.f32 %v2644_v62, %v2587_v36  ;;  %v806_v27 = vadd.f32 1.0, %v1997_v31  ;;  %v3116_v50 = vunpack.c.h.bf16 %v2228_v41  ;;  %v2698_v58 = vpop.eup %2000 }
  0xe4   : > { %v971_v32 = vmul.f32 %v907_v10, %v3115_v2  ;;  %v1089_v22 = vpack.c.bf16 %v1033_v20, %v1031_v45  ;;  %v1032_v17 = vmax.f32 %v968_v25, 0.0  ;;  %v925_v21 = vadd.f32 %v2655_v16, %v2587_v36  ;;  %v2704_v38 = vpop.eup %2002  ;;  %v638_v20 = vpop.xlane.xlu0 %637 }
  0xe5   : > { %v973_v53 = vmul.f32 %v909_v14, %v3116_v50  ;;  %v805_v8 = vadd.f32 1.0, %v1999_v52  ;;  %v3117_v60 = vunpack.c.h.bf16 %v2248_v51  ;;  %v922_v15 = vadd.f32 %v2644_v62, %v2583_v63 }
  0xe6   : > { %v1035_v54 = vmax.f32 %v971_v32, 0.0  ;;  %1298 = vmatprep.mubr.bf16.mxu0 %v1089_v22  ;;  %v1088_v13 = vpack.c.bf16 %v1032_v17, %v1030_v1  ;;  %2016 = vrcp.f32 %v806_v27  ;;  %v3118_v12 = vunpack.c.h.bf16 %v2258_v56  ;;  %v2005_v4 = vpop.eup %2004 }
  0xe7   : > { %v987_v10 = vmul.f32 %v923_v39, %v3117_v60  ;;  %v1037_v45 = vmax.f32 %v973_v53, 0.0  ;;  %v924_v7 = vadd.f32 %v2655_v16, %v2583_v63  ;;  %2018 = vrcp.f32 %v805_v8  ;;  %v2715_v39 = vpop.eup %2006 }
  0xe8   : > { %v989_v48 = vmul.f32 %v925_v21, %v3118_v12  ;;  %v3119_v1 = vunpack.c.l.bf16 %v2248_v51  ;;  %v682_v2 = vadd.f32 %v2563_v57, %v641_v49  ;;  %v807_v62 = vadd.f32 1.0, %v2005_v4  ;;  %1299 = vmatmul.mubr.bf16.gmra.mrb[12].mxu0 %v1088_v13  ;;  %v647_v4 = vpop.xlane.xlu1 %646 }
  0xe9   : > { %v1051_v25 = vmax.f32 %v987_v10, 0.0  ;;  %v1091_v32 = vpack.c.bf16 %v1037_v45, %v1035_v54  ;;  %v3120_v22 = vunpack.c.l.bf16 %v2258_v56  ;;  %v681_v27 = vadd.f32 %v2563_v57, %v638_v20  ;;  %v2009_v51 = vpop.eup %2008 }
  0xea   : > { %v986_v14 = vmul.f32 %v922_v15, %v3119_v1  ;;  %v1053_v31 = vmax.f32 %v989_v48, 0.0  ;;  %v1725_v16 = vmul.f32 -1.442695, %v682_v2  ;;  %v906_v50 = vadd.f32 %v2634_v47, %v2583_v63  ;;  %v2722_v56 = vpop.eup %2010 }
  0xeb   : > { %v988_v17 = vmul.f32 %v924_v7, %v3120_v22  ;;  %2020 = vrcp.f32 %v807_v62  ;;  %1306 = vmatprep.mubr.bf16.mxu0 %v1091_v32  ;;  %v908_v54 = vadd.f32 %v2642_v9, %v2583_v63  ;;  %v808_v49 = vadd.f32 1.0, %v2009_v51  ;;  %v2726_v10 = vpop.eup %2012 }
  0xec   : > { %v1050_v52 = vmax.f32 %v986_v14, 0.0  ;;  %v1099_v53 = vpack.c.bf16 %v1053_v31, %v1051_v25  ;;  %2022 = vpow2.f32 %v1725_v16  ;;  %v1724_v8 = vmul.f32 -1.442695, %v681_v27  ;;  %v2734_v48 = vpop.eup %2014  ;;  %v644_v16 = vpop.xlane.xlu0 %643 }
  0xed   : > { %v1052_v21 = vmax.f32 %v988_v17, 0.0  ;;  %v3121_v13 = vunpack.c.l.bf16 %v2239_v46  ;;  %v3122_v15 = vunpack.c.l.bf16 %v2228_v41  ;;  %v911_v12 = vadd.f32 %v2661_v6, %v2587_v36 }
  0xee   : > { %1338 = vmatprep.mubr.bf16.mxu1 %v1099_v53  ;;  %v913_v9 = vadd.f32 %v2666_v3, %v2587_v36  ;;  %2024 = vrcp.f32 %v808_v49  ;;  %v927_v46 = vadd.f32 %v2686_v11, %v2587_v36  ;;  %v929_v20 = vadd.f32 %v2682_v5, %v2587_v36 }
  0xef   : > { %v970_v60 = vmul.f32 %v906_v50, %v3121_v13  ;;  %v1098_v47 = vpack.c.bf16 %v1052_v21, %v1050_v52  ;;  %v972_v45 = vmul.f32 %v908_v54, %v3122_v15  ;;  %2026 = vpow2.f32 %v1724_v8 }
  0xf0   : > { %v3123_v25 = vunpack.c.h.bf16 %v2275_v0  ;;  %v3124_v14 = vunpack.c.h.bf16 %v2287_v28  ;;  %v3125_v62 = vunpack.c.h.bf16 %v2301_v43  ;;  %v3126_v31 = vunpack.c.h.bf16 %v2298_v42  ;;  %v2752_v27 = vpop.eup %2016 }
  0xf1   : > { %v1034_v7 = vmax.f32 %v970_v60, 0.0  ;;  %1339 = vmatmul.mubr.bf16.vlgmr.msra.gmra.mrb[0].mxu1 %v1098_v47  ;;  %v1036_v41 = vmax.f32 %v972_v45, 0.0  ;;  %v926_v17 = vadd.f32 %v2686_v11, %v2583_v63  ;;  %v928_v52 = vadd.f32 %v2682_v5, %v2583_v63  ;;  %v2755_v54 = vpop.eup %2018 }
  0xf2   : > { %v975_v1 = vmul.f32 %v911_v12, %v3123_v25  ;;  %v977_v2 = vmul.f32 %v913_v9, %v3124_v14  ;;  %v991_v32 = vmul.f32 %v927_v46, %v3125_v62  ;;  %v993_v22 = vmul.f32 %v929_v20, %v3126_v31 }
  0xf3   : > { %v1090_v50 = vpack.c.bf16 %v1036_v41, %v1034_v7  ;;  %v684_v21 = vadd.f32 %v2563_v57, %v647_v4  ;;  %v3127_v13 = vunpack.c.l.bf16 %v2301_v43  ;;  %v3128_v11 = vunpack.c.l.bf16 %v2298_v42 }
  0xf4   : > { %v1039_v51 = vmax.f32 %v975_v1, 0.0  ;;  %v1041_v53 = vmax.f32 %v977_v2, 0.0  ;;  %v1055_v49 = vmax.f32 %v991_v32, 0.0  ;;  %v1057_v8 = vmax.f32 %v993_v22, 0.0 }
  0xf5   : > { %v990_v60 = vmul.f32 %v926_v17, %v3127_v13  ;;  %v992_v47 = vmul.f32 %v928_v52, %v3128_v11  ;;  %1307 = vmatmul.mubr.bf16.gmra.mrb[16].mxu0 %v1090_v50  ;;  %v1727_v15 = vmul.f32 -1.442695, %v684_v21  ;;  %v683_v45 = vadd.f32 %v2563_v57, %v644_v16  ;;  %v2766_v4 = vpop.eup %2020  ;;  %v653_v21 = vpop.xlane.xlu1 %652 }
  0xf6   : > { %v1093_v5 = vpack.c.bf16 %v1041_v53, %v1039_v51  ;;  %v910_v12 = vadd.f32 %v2661_v6, %v2583_v63  ;;  %v1101_v9 = vpack.c.bf16 %v1057_v8, %v1055_v49  ;;  %v912_v20 = vadd.f32 %v2666_v3, %v2583_v63  ;;  %v2023_v1 = vpop.eup %2022  ;;  %v650_v11 = vpop.xlane.xlu0 %649 }
  0xf7   : > { %v1054_v7 = vmax.f32 %v990_v60, 0.0  ;;  %v1056_v46 = vmax.f32 %v992_v47, 0.0  ;;  %2028 = vpow2.f32 %v1727_v15  ;;  %v1726_v42 = vmul.f32 -1.442695, %v683_v45 }
  0xf8   : > { %1314 = vmatprep.mubr.bf16.mxu0 %v1093_v5  ;;  %v3129_v43 = vunpack.c.l.bf16 %v2275_v0  ;;  %v915_v25 = vadd.f32 %v2704_v38, %v2587_v36  ;;  %1346 = vmatprep.mubr.bf16.mxu1 %v1101_v9  ;;  %v3130_v14 = vunpack.c.l.bf16 %v2287_v28  ;;  %v917_v3 = vadd.f32 %v2698_v58, %v2587_v36  ;;  %v2780_v17 = vpop.eup %2024 }
  0xf9   : > { %v1100_v6 = vpack.c.bf16 %v1056_v46, %v1054_v7  ;;  %v931_v62 = vadd.f32 %v2722_v56, %v2587_v36  ;;  %v810_v32 = vadd.f32 1.0, %v2023_v1  ;;  %2030 = vpow2.f32 %v1726_v42  ;;  %v2027_v49 = vpop.eup %2026 }
  0xfa   : > { %v974_v41 = vmul.f32 %v910_v12, %v3129_v43  ;;  %v976_v2 = vmul.f32 %v912_v20, %v3130_v14  ;;  %v3131_v0 = vunpack.c.h.bf16 %v2328_v30  ;;  %v3132_v16 = vunpack.c.h.bf16 %v2331_v34 }
  0xfb   : > { %1347 = vmatmul.mubr.bf16.gmra.mrb[4].mxu1 %v1100_v6  ;;  %v933_v50 = vadd.f32 %v2715_v39, %v2587_v36  ;;  %v3133_v51 = vunpack.c.h.bf16 %v2350_v55  ;;  %2032 = vrcp.f32 %v810_v32  ;;  %v930_v13 = vadd.f32 %v2722_v56, %v2583_v63 }
  0xfc   : > { %v1038_v31 = vmax.f32 %v974_v41, 0.0  ;;  %v979_v22 = vmul.f32 %v915_v25, %v3131_v0  ;;  %v1040_v52 = vmax.f32 %v976_v2, 0.0  ;;  %v981_v28 = vmul.f32 %v917_v3, %v3132_v16 }
  0xfd   : > { %v995_v53 = vmul.f32 %v931_v62, %v3133_v51  ;;  %v932_v60 = vadd.f32 %v2715_v39, %v2583_v63  ;;  %v809_v47 = vadd.f32 1.0, %v2027_v49  ;;  %v3134_v45 = vunpack.c.h.bf16 %v2356_v61 }
  0xfe   : > { %v1043_v8 = vmax.f32 %v979_v22, 0.0  ;;  %v1092_v5 = vpack.c.bf16 %v1040_v52, %v1038_v31  ;;  %v1045_v15 = vmax.f32 %v981_v28, 0.0  ;;  %v3135_v7 = vunpack.c.l.bf16 %v2350_v55 }
  0xff   : > { %v997_v12 = vmul.f32 %v933_v50, %v3134_v45  ;;  %v1059_v9 = vmax.f32 %v995_v53, 0.0  ;;  %v3136_v20 = vunpack.c.l.bf16 %v2356_v61  ;;  %v686_v43 = vadd.f32 %v2563_v57, %v653_v21 }
 0x100   : > { %v994_v46 = vmul.f32 %v930_v13, %v3135_v7  ;;  %2034 = vrcp.f32 %v809_v47  ;;  %1315 = vmatmul.mubr.bf16.gmra.mrb[20].mxu0 %v1092_v5  ;;  %v1095_v56 = vpack.c.bf16 %v1045_v15, %v1043_v8  ;;  %v685_v41 = vadd.f32 %v2563_v57, %v650_v11 }
 0x101   : > { %v996_v42 = vmul.f32 %v932_v60, %v3136_v20  ;;  %v1061_v39 = vmax.f32 %v997_v12, 0.0  ;;  %v1729_v6 = vmul.f32 -1.442695, %v686_v43  ;;  %v914_v14 = vadd.f32 %v2704_v38, %v2583_v63  ;;  %v2029_v62 = vpop.eup %2028 }
 0x102   : > { %v1058_v25 = vmax.f32 %v994_v46, 0.0  ;;  %1322 = vmatprep.mubr.bf16.mxu0 %v1095_v56  ;;  %v1728_v2 = vmul.f32 -1.442695, %v685_v41  ;;  %v916_v61 = vadd.f32 %v2698_v58, %v2583_v63  ;;  %v919_v3 = vadd.f32 %v2734_v48, %v2587_v36 }
 0x103   : > { %v1060_v1 = vmax.f32 %v996_v42, 0.0  ;;  %v1103_v55 = vpack.c.bf16 %v1061_v39, %v1059_v9  ;;  %2036 = vpow2.f32 %v1729_v6  ;;  %v3137_v57 = vunpack.c.l.bf16 %v2328_v30  ;;  %v2031_v28 = vpop.eup %2030 }
 0x104   : > { %v921_v0 = vadd.f32 %v2726_v10, %v2587_v36  ;;  %v812_v22 = vadd.f32 1.0, %v2029_v62  ;;  %2038 = vpow2.f32 %v1728_v2  ;;  %v3138_v38 = vunpack.c.l.bf16 %v2331_v34 }
 0x105   : > { %v1102_v32 = vpack.c.bf16 %v1060_v1, %v1058_v25  ;;  %v978_v31 = vmul.f32 %v914_v14, %v3137_v57  ;;  %1354 = vmatprep.mubr.bf16.mxu1 %v1103_v55  ;;  %v3139_v58 = vunpack.c.h.bf16 %v2373_v26  ;;  %v3140_v51 = vunpack.c.h.bf16 %v2362_v19  ;;  %v2033_v13 = vpop.eup %2032 }
 0x106   : > { %v980_v52 = vmul.f32 %v916_v61, %v3138_v38  ;;  %v935_v30 = vadd.f32 %v2755_v54, %v2587_v36  ;;  %v937_v21 = vadd.f32 %v2752_v27, %v2587_v36  ;;  %2040 = vrcp.f32 %v812_v22 }
 0x107   : > { %v983_v16 = vmul.f32 %v919_v3, %v3139_v58  ;;  %1355 = vmatmul.mubr.bf16.gmra.mrb[8].mxu1 %v1102_v32  ;;  %v1042_v50 = vmax.f32 %v978_v31, 0.0  ;;  %v985_v53 = vmul.f32 %v921_v0, %v3140_v51  ;;  %v811_v49 = vadd.f32 1.0, %v2031_v28 }
 0x108   : > { %v1044_v8 = vmax.f32 %v980_v52, 0.0  ;;  %v3141_v11 = vunpack.c.h.bf16 %v2406_v24  ;;  %v3142_v5 = vunpack.c.h.bf16 %v2415_v37  ;;  %v934_v45 = vadd.f32 %v2755_v54, %v2583_v63 }
 0x109   : > { %v1047_v34 = vmax.f32 %v983_v16, 0.0  ;;  %v1049_v60 = vmax.f32 %v985_v53, 0.0  ;;  %2042 = vrcp.f32 %v811_v49  ;;  %v936_v9 = vadd.f32 %v2752_v27, %v2583_v63 }
 0x10a   : > { %v999_v47 = vmul.f32 %v935_v30, %v3141_v11  ;;  %v1001_v15 = vmul.f32 %v937_v21, %v3142_v5  ;;  %v1094_v12 = vpack.c.bf16 %v1044_v8, %v1042_v50  ;;  %v918_v7 = vadd.f32 %v2734_v48, %v2583_v63  ;;  %v2035_v39 = vpop.eup %2034 }
 0x10b   : > { %v1097_v46 = vpack.c.bf16 %v1049_v60, %v1047_v34  ;;  %v3143_v43 = vunpack.c.l.bf16 %v2406_v24  ;;  %v3144_v41 = vunpack.c.l.bf16 %v2415_v37  ;;  %v920_v54 = vadd.f32 %v2726_v10, %v2583_v63 }
 0x10c   : > { %v1063_v20 = vmax.f32 %v999_v47, 0.0  ;;  %v1065_v42 = vmax.f32 %v1001_v15, 0.0  ;;  %1323 = vmatmul.mubr.bf16.gmra.mrb[24].mxu0 %v1094_v12  ;;  %v3145_v1 = vunpack.c.l.bf16 %v2373_v26  ;;  %v939_v48 = vadd.f32 %v2766_v4, %v2587_v36 }
 0x10d   : > { %v998_v56 = vmul.f32 %v934_v45, %v3143_v43  ;;  %v1000_v25 = vmul.f32 %v936_v9, %v3144_v41  ;;  %1330 = vmatprep.mubr.bf16.mxu0 %v1097_v46  ;;  %v941_v24 = vadd.f32 %v2780_v17, %v2587_v36  ;;  %v938_v55 = vadd.f32 %v2766_v4, %v2583_v63  ;;  %v2037_v62 = vpop.eup %2036 }
 0x10e   : > { %v982_v27 = vmul.f32 %v918_v7, %v3145_v1  ;;  %v1105_v6 = vpack.c.bf16 %v1065_v42, %v1063_v20  ;;  %v3146_v2 = vunpack.c.l.bf16 %v2362_v19  ;;  %v3147_v26 = vunpack.c.h.bf16 %v2434_v40  ;;  %v2039_v38 = vpop.eup %2038 }
 0x10f   : > { %v1062_v14 = vmax.f32 %v998_v56, 0.0  ;;  %v1064_v37 = vmax.f32 %v1000_v25, 0.0  ;;  %v3148_v32 = vunpack.c.h.bf16 %v2440_v23  ;;  %v940_v31 = vadd.f32 %v2780_v17, %v2583_v63 }
 0x110   : > { %v984_v61 = vmul.f32 %v920_v54, %v3146_v2  ;;  %v1046_v10 = vmax.f32 %v982_v27, 0.0  ;;  %v1003_v3 = vmul.f32 %v939_v48, %v3147_v26  ;;  %1362 = vmatprep.mubr.bf16.mxu1 %v1105_v6  ;;  %v3149_v0 = vunpack.c.l.bf16 %v2434_v40  ;;  %v2041_v21 = vpop.eup %2040 }
 0x111   : > { %v1005_v57 = vmul.f32 %v941_v24, %v3148_v32  ;;  %v943_v4 = vadd.f32 %v2035_v39, %v2587_v36  ;;  %v814_v19 = vadd.f32 1.0, %v2037_v62  ;;  %v1104_v52 = vpack.c.bf16 %v1064_v37, %v1062_v14 }
 0x112   : > { %v1002_v22 = vmul.f32 %v938_v55, %v3149_v0  ;;  %v1048_v58 = vmax.f32 %v984_v61, 0.0  ;;  %v1067_v16 = vmax.f32 %v1003_v3, 0.0  ;;  %v813_v28 = vadd.f32 1.0, %v2039_v38 }
 0x113   : > { %v1069_v50 = vmax.f32 %v1005_v57, 0.0  ;;  %v3150_v51 = vunpack.c.l.bf16 %v2440_v23  ;;  %2044 = vrcp.f32 %v814_v19  ;;  %1363 = vmatmul.mubr.bf16.gmra.mrb[12].mxu1 %v1104_v52  ;;  %v945_v40 = vadd.f32 %v2033_v13, %v2587_v36  ;;  %v2043_v47 = vpop.eup %2042 }
 0x114   : > { %v1066_v30 = vmax.f32 %v1002_v22, 0.0  ;;  %v1096_v17 = vpack.c.bf16 %v1048_v58, %v1046_v10  ;;  %v3151_v49 = vunpack.c.h.bf16 %v2457_v44  ;;  %2046 = vrcp.f32 %v813_v28 }
 0x115   : > { %v1004_v53 = vmul.f32 %v940_v31, %v3150_v51  ;;  %v1107_v34 = vpack.c.bf16 %v1069_v50, %v1067_v16  ;;  %v942_v11 = vadd.f32 %v2035_v39, %v2583_v63  ;;  %v3152_v23 = vunpack.c.h.bf16 %v2446_v18 }
 0x116   : > { %v1007_v8 = vmul.f32 %v943_v4, %v3151_v49  ;;  %1331 = vmatmul.mubr.bf16.gmra.mrb[28].mxu0 %v1096_v17  ;;  %v944_v45 = vadd.f32 %v2033_v13, %v2583_v63  ;;  %v949_v12 = vadd.f32 %v2041_v21, %v2587_v36  ;;  %v947_v9 = vadd.f32 %v2043_v47, %v2587_v36  ;;  %v2895_v17 = vld [vmem:[%s3044_s2] ss:$0 sm:$0xff] }
 0x117   : > { %v1068_v60 = vmax.f32 %v1004_v53, 0.0  ;;  %v1009_v5 = vmul.f32 %v945_v40, %v3152_v23  ;;  %1370 = vmatprep.mubr.bf16.mxu1 %v1107_v34  ;;  %v3153_v20 = vunpack.c.l.bf16 %v2457_v44  ;;  %v3154_v43 = vunpack.c.l.bf16 %v2446_v18 }
 0x118   : > { %v1071_v15 = vmax.f32 %v1007_v8, 0.0  ;;  %v3155_v39 = vunpack.c.h.bf16 %v2490_v33  ;;  %v3156_v25 = vunpack.c.h.bf16 %v2499_v59  ;;  %v946_v48 = vadd.f32 %v2043_v47, %v2583_v63 }
 0x119   : > { %v1106_v7 = vpack.c.bf16 %v1068_v60, %v1066_v30  ;;  %v1073_v46 = vmax.f32 %v1009_v5, 0.0  ;;  %v1006_v42 = vmul.f32 %v942_v11, %v3153_v20  ;;  %v1008_v56 = vmul.f32 %v944_v45, %v3154_v43 }
 0x11a   : > { %v1011_v41 = vmul.f32 %v947_v9, %v3155_v39  ;;  %v1013_v54 = vmul.f32 %v949_v12, %v3156_v25  ;;  %v948_v6 = vadd.f32 %v2041_v21, %v2583_v63  ;;  %v3157_v2 = vunpack.c.l.bf16 %v2490_v33 }
 0x11b   : > { %v1109_v13 = vpack.c.bf16 %v1073_v46, %v1071_v15  ;;  %1371 = vmatmul.mubr.bf16.gmra.mrb[16].mxu1 %v1106_v7  ;;  %v1070_v1 = vmax.f32 %v1006_v42, 0.0  ;;  %v1072_v27 = vmax.f32 %v1008_v56, 0.0  ;;  %v3158_v10 = vunpack.c.l.bf16 %v2499_v59 }
 0x11c   : > { %v1075_v44 = vmax.f32 %v1011_v41, 0.0  ;;  %v1077_v14 = vmax.f32 %v1013_v54, 0.0  ;;  %v1010_v61 = vmul.f32 %v946_v48, %v3157_v2  ;;  %v3159_v32 = vunpack.c.h.bf16 %v2524_v29 }
 0x11d   : > { %1378 = vmatprep.mubr.bf16.mxu1 %v1109_v13  ;;  %v2045_v24 = vpop.eup %2044  ;;  %v1108_v37 = vpack.c.bf16 %v1072_v27, %v1070_v1  ;;  %v1012_v26 = vmul.f32 %v948_v6, %v3158_v10  ;;  %v3160_v31 = vunpack.c.h.bf16 %v2518_v35  ;;  %v3162_v16 = vunpack.c.l.bf16 %v2524_v29  ;;  %v2900_v29 = vld [vmem:[%s3045_s3] ss:$0 sm:$0xff] }
 0x11e   : > { %v2047_v18 = vpop.eup %2046  ;;  %v953_v55 = vadd.f32 %v2045_v24, %v2587_v36  ;;  %v1111_v62 = vpack.c.bf16 %v1077_v14, %v1075_v44  ;;  %v1074_v22 = vmax.f32 %v1010_v61, 0.0  ;;  %v952_v33 = vadd.f32 %v2045_v24, %v2583_v63 }
 0x11f   : > { %v951_v3 = vadd.f32 %v2047_v18, %v2587_v36  ;;  %v1076_v4 = vmax.f32 %v1012_v26, 0.0  ;;  %v950_v38 = vadd.f32 %v2047_v18, %v2583_v63  ;;  %v3161_v36 = vunpack.c.l.bf16 %v2518_v35 }
 0x120   : > { %v1017_v57 = vmul.f32 %v953_v55, %v3159_v32  ;;  %v1016_v28 = vmul.f32 %v952_v33, %v3162_v16 }
 0x121   : > { %v1015_v0 = vmul.f32 %v951_v3, %v3160_v31  ;;  %v1110_v52 = vpack.c.bf16 %v1076_v4, %v1074_v22  ;;  %v1014_v58 = vmul.f32 %v950_v38, %v3161_v36 }
 0x122   : > { %v1081_v59 = vmax.f32 %v1017_v57, 0.0  ;;  %v1080_v53 = vmax.f32 %v1016_v28, 0.0 }
 0x123   : > { %1379 = vmatmul.mubr.bf16.gmra.mrb[20].mxu1 %v1108_v37  ;;  %v1079_v19 = vmax.f32 %v1015_v0, 0.0  ;;  %v1078_v51 = vmax.f32 %v1014_v58, 0.0 }
 0x124   : > { %1386 = vmatprep.mubr.bf16.mxu1 %v1111_v62 }
 0x125   : > { %v1113_v50 = vpack.c.bf16 %v1081_v59, %v1079_v19  ;;  %v1112_v30 = vpack.c.bf16 %v1080_v53, %v1078_v51 }
 0x12b   : > { %1387 = vmatmul.mubr.bf16.gmra.mrb[24].mxu1 %v1110_v52 }
 0x12c   : > { %1394 = vmatprep.mubr.bf16.mxu1 %v1113_v50 }
 0x133   : > { %1395 = vmatmul.mubr.bf16.gmra.mrb[28].mxu1 %v1112_v30 }
 0x1a2   : > { %v1768_v21 = vpop.f32.mrb[0].mxu0 }
 0x1a3   : > { %v1769_v63 = vpop.f32.mrb[1].mxu0 }
 0x1a4   : > { %v1770_v35 = vadd.f32 %v1769_v63, %v1768_v21  ;;  %v1771_v40 = vpop.f32.mrb[2].mxu0 }
 0x1a5   : > { %v1772_v49 = vpop.f32.mrb[3].mxu0 }
 0x1a6   : > { %v1410_v8 = vmul.f32 %v1770_v35, %v2895_v17  ;;  %v1773_v34 = vadd.f32 %v1772_v49, %v1771_v40 }
 0x1a8   : > { %v1449_v60 = vadd.f32 %v2900_v29, %v1410_v8  ;;  %v1411_v11 = vmul.f32 %v1773_v34, %v2895_v17 }
 0x1aa   : > { %1481 = vst [vmem:[%s2908_s24] sm:$0xff] %v1449_v60  ;;  %v1450_v47 = vadd.f32 %v2900_v29, %v1411_v11  ;;  %v1774_v23 = vpop.f32.mrb[4].mxu0 }
 0x1ab   : > { %v1775_v5 = vpop.f32.mrb[5].mxu0 }
 0x1ac   : > { %1482 = vst [vmem:[%s2908_s24 + $0x8] sm:$0xff] %v1450_v47  ;;  %v1513_v15 = vadd.f32 %v1450_v47, %v1449_v60  ;;  %v1776_v45 = vadd.f32 %v1775_v5, %v1774_v23  ;;  %v1777_v12 = vpop.f32.mrb[6].mxu0 }
 0x1ad   : > { %v1778_v9 = vpop.f32.mrb[7].mxu0 }
 0x1ae   : > { %v1412_v7 = vmul.f32 %v1776_v45, %v2895_v17  ;;  %v1779_v46 = vadd.f32 %v1778_v9, %v1777_v12 }
 0x1b0   : > { %v1451_v20 = vadd.f32 %v2900_v29, %v1412_v7  ;;  %v1413_v42 = vmul.f32 %v1779_v46, %v2895_v17 }
 0x1b2   : > { %1483 = vst [vmem:[%s2908_s24 + $0x10] sm:$0xff] %v1451_v20  ;;  %v1514_v43 = vadd.f32 %v1513_v15, %v1451_v20  ;;  %v1452_v56 = vadd.f32 %v2900_v29, %v1413_v42 }
 0x1b3   : > { %v1780_v39 = vpop.f32.mrb[8].mxu0 }
 0x1b4   : > { %v1781_v41 = vpop.f32.mrb[9].mxu0  ;;  %1484 = vst [vmem:[%s2908_s24 + $0x18] sm:$0xff] %v1452_v56  ;;  %v1515_v25 = vadd.f32 %v1514_v43, %v1452_v56 }
 0x1b5   : > { %v1782_v54 = vadd.f32 %v1781_v41, %v1780_v39  ;;  %v1783_v13 = vpop.f32.mrb[10].mxu0 }
 0x1b6   : > { %v1784_v1 = vpop.f32.mrb[11].mxu0 }
 0x1b7   : > { %v1414_v27 = vmul.f32 %v1782_v54, %v2895_v17  ;;  %v1785_v48 = vadd.f32 %v1784_v1, %v1783_v13 }
 0x1b9   : > { %v1453_v6 = vadd.f32 %v2900_v29, %v1414_v27  ;;  %v1415_v44 = vmul.f32 %v1785_v48, %v2895_v17 }
 0x1bb   : > { %1485 = vst [vmem:[%s2908_s24 + $0x20] sm:$0xff] %v1453_v6  ;;  %v1516_v14 = vadd.f32 %v1515_v25, %v1453_v6  ;;  %v1454_v24 = vadd.f32 %v2900_v29, %v1415_v44  ;;  %v1786_v18 = vpop.f32.mrb[12].mxu0 }
 0x1bc   : > { %v1787_v55 = vpop.f32.mrb[13].mxu0 }
 0x1bd   : > { %1486 = vst [vmem:[%s2908_s24 + $0x28] sm:$0xff] %v1454_v24  ;;  %v1517_v37 = vadd.f32 %v1516_v14, %v1454_v24  ;;  %v1788_v2 = vadd.f32 %v1787_v55, %v1786_v18  ;;  %v1789_v61 = vpop.f32.mrb[14].mxu0 }
 0x1be   : > { %v1790_v10 = vpop.f32.mrb[15].mxu0 }
 0x1bf   : > { %v1416_v26 = vmul.f32 %v1788_v2, %v2895_v17  ;;  %v1791_v3 = vadd.f32 %v1790_v10, %v1789_v61 }
 0x1c1   : > { %v1455_v32 = vadd.f32 %v2900_v29, %v1416_v26  ;;  %v1417_v57 = vmul.f32 %v1791_v3, %v2895_v17 }
 0x1c3   : > { %1487 = vst [vmem:[%s2908_s24 + $0x30] sm:$0xff] %v1455_v32  ;;  %v1518_v4 = vadd.f32 %v1517_v37, %v1455_v32  ;;  %v1456_v38 = vadd.f32 %v2900_v29, %v1417_v57 }
 0x1c4   : > { %v1816_v62 = vpop.f32.mrb[0].mxu1 }
 0x1c5   : > { %v1817_v31 = vpop.f32.mrb[1].mxu1  ;;  %1488 = vst [vmem:[%s2908_s24 + $0x38] sm:$0xff] %v1456_v38  ;;  %v1519_v36 = vadd.f32 %v1518_v4, %v1456_v38 }
 0x1c6   : > { %v1818_v0 = vadd.f32 %v1817_v31, %v1816_v62  ;;  %v1819_v22 = vpop.f32.mrb[2].mxu1 }
 0x1c7   : > { %v1820_v33 = vpop.f32.mrb[3].mxu1 }
 0x1c8   : > { %v1426_v19 = vmul.f32 %v1818_v0, %v2895_v17  ;;  %v1821_v59 = vadd.f32 %v1820_v33, %v1819_v22  ;;  %v1792_v52 = vpop.f32.mrb[16].mxu0 }
 0x1c9   : > { %v1793_v58 = vpop.f32.mrb[17].mxu0 }
 0x1ca   : > { %v2935_v16 = vadd.f32 %v2900_v29, %v1426_v19  ;;  %v1427_v28 = vmul.f32 %v1821_v59, %v2895_v17  ;;  %v1794_v50 = vadd.f32 %v1793_v58, %v1792_v52  ;;  %v1795_v51 = vpop.f32.mrb[18].mxu0 }
 0x1cb   : > { %v1796_v53 = vpop.f32.mrb[19].mxu0 }
 0x1cc   : > { %1497 = vst [vmem:[%s2908_s24 + $0x80] sm:$0xff] %v2935_v16  ;;  %v2941_v30 = vadd.f32 %v2900_v29, %v1427_v28  ;;  %v1418_v21 = vmul.f32 %v1794_v50, %v2895_v17  ;;  %v1797_v63 = vadd.f32 %v1796_v53, %v1795_v51 }
 0x1ce   : > { %v1822_v35 = vpop.f32.mrb[4].mxu1  ;;  %1498 = vst [vmem:[%s2908_s24 + $0x88] sm:$0xff] %v2941_v30  ;;  %v1457_v40 = vadd.f32 %v2900_v29, %v1418_v21  ;;  %v1419_v49 = vmul.f32 %v1797_v63, %v2895_v17 }
 0x1cf   : > { %v1823_v8 = vpop.f32.mrb[5].mxu1 }
 0x1d0   : > { %v1824_v34 = vadd.f32 %v1823_v8, %v1822_v35  ;;  %v1825_v60 = vpop.f32.mrb[6].mxu1  ;;  %1489 = vst [vmem:[%s2908_s24 + $0x40] sm:$0xff] %v1457_v40  ;;  %v1520_v11 = vadd.f32 %v1519_v36, %v1457_v40  ;;  %v1458_v47 = vadd.f32 %v2900_v29, %v1419_v49 }
 0x1d1   : > { %v1826_v23 = vpop.f32.mrb[7].mxu1 }
 0x1d2   : > { %v1428_v5 = vmul.f32 %v1824_v34, %v2895_v17  ;;  %v1827_v15 = vadd.f32 %v1826_v23, %v1825_v60  ;;  %1490 = vst [vmem:[%s2908_s24 + $0x48] sm:$0xff] %v1458_v47  ;;  %v1521_v12 = vadd.f32 %v1520_v11, %v1458_v47 }
 0x1d3   : > { %v1798_v45 = vpop.f32.mrb[20].mxu0 }
 0x1d4   : > { %v1799_v9 = vpop.f32.mrb[21].mxu0  ;;  %v2953_v7 = vadd.f32 %v2900_v29, %v1428_v5  ;;  %v1429_v46 = vmul.f32 %v1827_v15, %v2895_v17 }
 0x1d5   : > { %v1800_v20 = vadd.f32 %v1799_v9, %v1798_v45  ;;  %v1801_v42 = vpop.f32.mrb[22].mxu0 }
 0x1d6   : > { %v1802_v43 = vpop.f32.mrb[23].mxu0  ;;  %1499 = vst [vmem:[%s2908_s24 + $0x90] sm:$0xff] %v2953_v7  ;;  %v2959_v56 = vadd.f32 %v2900_v29, %v1429_v46 }
 0x1d7   : > { %v1420_v39 = vmul.f32 %v1800_v20, %v2895_v17  ;;  %v1803_v41 = vadd.f32 %v1802_v43, %v1801_v42 }
 0x1d8   : > { %1500 = vst [vmem:[%s2908_s24 + $0x98] sm:$0xff] %v2959_v56 }
 0x1d9   : > { %v1459_v54 = vadd.f32 %v2900_v29, %v1420_v39  ;;  %v1421_v13 = vmul.f32 %v1803_v41, %v2895_v17 }
 0x1da   : > { %v1828_v25 = vpop.f32.mrb[8].mxu1 }
 0x1db   : > { %v1829_v1 = vpop.f32.mrb[9].mxu1  ;;  %1491 = vst [vmem:[%s2908_s24 + $0x50] sm:$0xff] %v1459_v54  ;;  %v1522_v6 = vadd.f32 %v1521_v12, %v1459_v54  ;;  %v1460_v44 = vadd.f32 %v2900_v29, %v1421_v13 }
 0x1dc   : > { %v1830_v27 = vadd.f32 %v1829_v1, %v1828_v25  ;;  %v1831_v48 = vpop.f32.mrb[10].mxu1 }
 0x1dd   : > { %v1832_v14 = vpop.f32.mrb[11].mxu1  ;;  %1492 = vst [vmem:[%s2908_s24 + $0x58] sm:$0xff] %v1460_v44  ;;  %v1523_v55 = vadd.f32 %v1522_v6, %v1460_v44 }
 0x1de   : > { %v1430_v24 = vmul.f32 %v1830_v27, %v2895_v17  ;;  %v1833_v18 = vadd.f32 %v1832_v14, %v1831_v48 }
 0x1df   : > { %v1804_v37 = vpop.f32.mrb[24].mxu0 }
 0x1e0   : > { %v2971_v2 = vadd.f32 %v2900_v29, %v1430_v24  ;;  %v1431_v61 = vmul.f32 %v1833_v18, %v2895_v17  ;;  %v1805_v10 = vpop.f32.mrb[25].mxu0 }
 0x1e1   : > { %v1806_v26 = vadd.f32 %v1805_v10, %v1804_v37  ;;  %v1807_v3 = vpop.f32.mrb[26].mxu0 }
 0x1e2   : > { %1501 = vst [vmem:[%s2908_s24 + $0xa0] sm:$0xff] %v2971_v2  ;;  %v2977_v62 = vadd.f32 %v2900_v29, %v1431_v61  ;;  %v1808_v32 = vpop.f32.mrb[27].mxu0 }
 0x1e3   : > { %v1422_v57 = vmul.f32 %v1806_v26, %v2895_v17  ;;  %v1809_v31 = vadd.f32 %v1808_v32, %v1807_v3 }
 0x1e4   : > { %1502 = vst [vmem:[%s2908_s24 + $0xa8] sm:$0xff] %v2977_v62 }
 0x1e5   : > { %v1461_v0 = vadd.f32 %v2900_v29, %v1422_v57  ;;  %v1423_v22 = vmul.f32 %v1809_v31, %v2895_v17 }
 0x1e6   : > { %v1834_v4 = vpop.f32.mrb[12].mxu1 }
 0x1e7   : > { %v1835_v38 = vpop.f32.mrb[13].mxu1  ;;  %1493 = vst [vmem:[%s2908_s24 + $0x60] sm:$0xff] %v1461_v0  ;;  %v1524_v33 = vadd.f32 %v1523_v55, %v1461_v0  ;;  %v1462_v19 = vadd.f32 %v2900_v29, %v1423_v22 }
 0x1e8   : > { %v1836_v59 = vadd.f32 %v1835_v38, %v1834_v4  ;;  %v1837_v52 = vpop.f32.mrb[14].mxu1 }
 0x1e9   : > { %v1810_v36 = vpop.f32.mrb[28].mxu0  ;;  %v1838_v58 = vpop.f32.mrb[15].mxu1  ;;  %1494 = vst [vmem:[%s2908_s24 + $0x68] sm:$0xff] %v1462_v19  ;;  %v1525_v50 = vadd.f32 %v1524_v33, %v1462_v19 }
 0x1ea   : > { %v1811_v28 = vpop.f32.mrb[29].mxu0  ;;  %v1432_v51 = vmul.f32 %v1836_v59, %v2895_v17  ;;  %v1839_v53 = vadd.f32 %v1838_v58, %v1837_v52 }
 0x1eb   : > { %v1812_v21 = vadd.f32 %v1811_v28, %v1810_v36  ;;  %v1813_v63 = vpop.f32.mrb[30].mxu0 }
 0x1ec   : > { %v1814_v35 = vpop.f32.mrb[31].mxu0  ;;  %v1471_v40 = vadd.f32 %v2900_v29, %v1432_v51  ;;  %v1433_v49 = vmul.f32 %v1839_v53, %v2895_v17 }
 0x1ed   : > { %v1424_v8 = vmul.f32 %v1812_v21, %v2895_v17  ;;  %v1815_v34 = vadd.f32 %v1814_v35, %v1813_v63 }
 0x1ee   : > { %1503 = vst [vmem:[%s2908_s24 + $0xb0] sm:$0xff] %v1471_v40  ;;  %v1472_v60 = vadd.f32 %v2900_v29, %v1433_v49  ;;  %v1840_v23 = vpop.f32.mrb[16].mxu1 }
 0x1ef   : > { %v1463_v11 = vadd.f32 %v2900_v29, %v1424_v8  ;;  %v1425_v47 = vmul.f32 %v1815_v34, %v2895_v17  ;;  %v1841_v5 = vpop.f32.mrb[17].mxu1 }
 0x1f0   : > { %1504 = vst [vmem:[%s2908_s24 + $0xb8] sm:$0xff] %v1472_v60  ;;  %v1842_v12 = vadd.f32 %v1841_v5, %v1840_v23  ;;  %v1843_v9 = vpop.f32.mrb[18].mxu1 }
 0x1f1   : > { %1495 = vst [vmem:[%s2908_s24 + $0x70] sm:$0xff] %v1463_v11  ;;  %v1526_v15 = vadd.f32 %v1525_v50, %v1463_v11  ;;  %v1464_v45 = vadd.f32 %v2900_v29, %v1425_v47  ;;  %v1844_v46 = vpop.f32.mrb[19].mxu1 }
 0x1f2   : > { %v1434_v42 = vmul.f32 %v1842_v12, %v2895_v17  ;;  %v1845_v43 = vadd.f32 %v1844_v46, %v1843_v9 }
 0x1f3   : > { %1496 = vst [vmem:[%s2908_s24 + $0x78] sm:$0xff] %v1464_v45  ;;  %v1527_v20 = vadd.f32 %v1526_v15, %v1464_v45 }
 0x1f4   : > { %v1473_v41 = vadd.f32 %v2900_v29, %v1434_v42  ;;  %v1435_v25 = vmul.f32 %v1845_v43, %v2895_v17 }
 0x1f5   : > { %v1528_v39 = vadd.f32 %v1527_v20, %v2935_v16 }
 0x1f6   : > { %1505 = vst [vmem:[%s2908_s24 + $0xc0] sm:$0xff] %v1473_v41  ;;  %v1474_v13 = vadd.f32 %v2900_v29, %v1435_v25  ;;  %v1846_v1 = vpop.f32.mrb[20].mxu1 }
 0x1f7   : > { %v1529_v54 = vadd.f32 %v1528_v39, %v2941_v30  ;;  %v1847_v27 = vpop.f32.mrb[21].mxu1 }
 0x1f8   : > { %1506 = vst [vmem:[%s2908_s24 + $0xc8] sm:$0xff] %v1474_v13  ;;  %v1848_v6 = vadd.f32 %v1847_v27, %v1846_v1  ;;  %v1849_v44 = vpop.f32.mrb[22].mxu1 }
 0x1f9   : > { %v1530_v48 = vadd.f32 %v1529_v54, %v2953_v7  ;;  %v1850_v14 = vpop.f32.mrb[23].mxu1 }
 0x1fa   : > { %v1436_v24 = vmul.f32 %v1848_v6, %v2895_v17  ;;  %v1851_v18 = vadd.f32 %v1850_v14, %v1849_v44 }
 0x1fb   : > { %v1531_v16 = vadd.f32 %v1530_v48, %v2959_v56 }
 0x1fc   : > { %v1475_v55 = vadd.f32 %v2900_v29, %v1436_v24  ;;  %v1437_v37 = vmul.f32 %v1851_v18, %v2895_v17 }
 0x1fd   : > { %v1532_v30 = vadd.f32 %v1531_v16, %v2971_v2 }
 0x1fe   : > { %1507 = vst [vmem:[%s2908_s24 + $0xd0] sm:$0xff] %v1475_v55  ;;  %v1476_v7 = vadd.f32 %v2900_v29, %v1437_v37  ;;  %v1852_v10 = vpop.f32.mrb[24].mxu1 }
 0x1ff   : > { %v1533_v61 = vadd.f32 %v1532_v30, %v2977_v62  ;;  %v1853_v26 = vpop.f32.mrb[25].mxu1 }
 0x200   : > { %1508 = vst [vmem:[%s2908_s24 + $0xd8] sm:$0xff] %v1476_v7  ;;  %v1854_v56 = vadd.f32 %v1853_v26, %v1852_v10  ;;  %v1855_v32 = vpop.f32.mrb[26].mxu1 }
 0x201   : > { %v1534_v3 = vadd.f32 %v1533_v61, %v1471_v40  ;;  %v1856_v57 = vpop.f32.mrb[27].mxu1 }
 0x202   : > { %v1438_v2 = vmul.f32 %v1854_v56, %v2895_v17  ;;  %v1857_v0 = vadd.f32 %v1856_v57, %v1855_v32 }
 0x203   : > { %v1535_v31 = vadd.f32 %v1534_v3, %v1472_v60 }
 0x204   : > { %v1477_v4 = vadd.f32 %v2900_v29, %v1438_v2  ;;  %v1439_v62 = vmul.f32 %v1857_v0, %v2895_v17 }
 0x205   : > { %v1536_v22 = vadd.f32 %v1535_v31, %v1473_v41 }
 0x206   : > { %1509 = vst [vmem:[%s2908_s24 + $0xe0] sm:$0xff] %v1477_v4  ;;  %v1478_v33 = vadd.f32 %v2900_v29, %v1439_v62  ;;  %v1858_v19 = vpop.f32.mrb[28].mxu1 }
 0x207   : > { %v1537_v38 = vadd.f32 %v1536_v22, %v1474_v13  ;;  %v1859_v59 = vpop.f32.mrb[29].mxu1 }
 0x208   : > { %1510 = vst [vmem:[%s2908_s24 + $0xe8] sm:$0xff] %v1478_v33  ;;  %v1860_v36 = vadd.f32 %v1859_v59, %v1858_v19  ;;  %v1861_v58 = vpop.f32.mrb[30].mxu1 }
 0x209   : > { %v1538_v52 = vadd.f32 %v1537_v38, %v1475_v55  ;;  %v1862_v28 = vpop.f32.mrb[31].mxu1 }
 0x20a   : > { %v1440_v51 = vmul.f32 %v1860_v36, %v2895_v17  ;;  %v1863_v53 = vadd.f32 %v1862_v28, %v1861_v58 }
 0x20b   : > { %v1539_v50 = vadd.f32 %v1538_v52, %v1476_v7 }
 0x20c   : > { %v1479_v63 = vadd.f32 %v2900_v29, %v1440_v51  ;;  %v1441_v35 = vmul.f32 %v1863_v53, %v2895_v17 }
 0x20d   : > { %v1540_v21 = vadd.f32 %v1539_v50, %v1477_v4 }
 0x20e   : > { %1511 = vst [vmem:[%s2908_s24 + $0xf0] sm:$0xff] %v1479_v63  ;;  %v1480_v49 = vadd.f32 %v2900_v29, %v1441_v35 }
 0x20f   : > { %v1541_v40 = vadd.f32 %v1540_v21, %v1478_v33 }
 0x210   : > { %1512 = vst [vmem:[%s2908_s24 + $0xf8] sm:$0xff] %v1480_v49 }
 0x211   : > { %v1542_v8 = vadd.f32 %v1541_v40, %v1479_v63 }
 0x213   : > { %v1543_v34 = vadd.f32 %v1542_v8, %v1480_v49 }
 0x215   : > { %v1544_v60 = vrot.slane %v1543_v34, 4 }
 0x217   : > { %v1545_v11 = vadd.f32 %v1544_v60, %v1543_v34 }
 0x219   : > { %v1546_v47 = vrot.slane %v1545_v11, 2 }
 0x21b   : > { %v1547_v23 = vadd.f32 %v1546_v47, %v1545_v11 }
 0x21d   : > { %v1548_v5 = vrot.slane %v1547_v23, 1 }
 0x21f   : > { %v1549_v15 = vadd.f32 %v1548_v5, %v1547_v23 }
 0x221   : > { %1550 = vst [vmem:[%s382_s26] sm:$0x1] %v1549_v15 }
 0x222 PF: > { %s20_s9 = sadd.s32 1, %s2070_s9   ;;  %s3163_s29 = smov %s2066_s30 }
 0x223   : > { %p17_p5 = scmp.ge.s32.totalorder %s20_s9, 4   ;;  %s3164_s30 = smov %s3166_s5 }
 0x225   :  { %19 = sbr.rel (!%p17_p5) target bundleno = 2 (0x2), region = 93 }

// kernel: decoder_forward.7
= control target key start
LH: loop header
LB: loop body
LE: loop exit
PB: predicated region body
PF: predicated region fallthrough
CT: control target
= control target key end

     0   :  { %s6704_s15 = smov 0   ;;  %s6706_s16 = smov 0   ;;  %s8900_s0 = inlined_call_operand.vmem [shape: bf16[2,16,16,256], index: 0, kind: input, shape index: {}, may-alias: {0,1,2}]   ;;  %s8901_s1 = inlined_call_operand.vmem [shape: bf16[2,16,16,256], index: 1, kind: input, shape index: {}, may-alias: {0,1,2}]   ;;  %s8902_s2 = inlined_call_operand.vmem [shape: bf16[2,16,16,256], index: 2, kind: input, shape index: {}, may-alias: {0,1,2}]   ;;  %s8903_s3 = inlined_call_operand.vmem [shape: bf16[3,3,256,256], index: 3, kind: input, shape index: {}]   ;;  %s8904_s4 = inlined_call_operand.vmem [shape: f32[1,256], index: 4, kind: input, shape index: {}]   ;;  %s8905_s5 = inlined_call_operand.vmem [shape: f32[1,256], index: 5, kind: input, shape index: {}]   ;;  %s8906_s6 = inlined_call_operand.vmem [shape: f32[1,256], index: 6, kind: input, shape index: {}]   ;;  %s8907_s7 = inlined_call_operand.<no memory space> [shape: f32[1], index: 7, kind: input, shape index: {}]   ;;  %s8908_s8 = inlined_call_operand.vmem [shape: f32[2,1,256], index: 8, kind: input, shape index: {}]   ;;  %s8909_s9 = inlined_call_operand.vmem [shape: bf16[2,16,16,256], index: 9, kind: output, shape index: {0}]   ;;  %s8910_s10 = inlined_call_operand.vmem [shape: f32[2,2,1,256], index: 10, kind: output, shape index: {1}]  }
   0x1   :  { %8967 = sst [smem:[#allocation19_spill]] %s8900_s0  ;;  %s6708_s17 = smov 0  }
   0x2   :  { %8968 = sst [smem:[#allocation20_spill]] %s8901_s1  ;;  %s6710_s18 = smov 0  }
   0x3   :  { %8969 = sst [smem:[#allocation21_spill]] %s8906_s6  ;;  %s6712_s19 = smov 0  }
   0x4   :  { %16 = sst [smem:[#allocation2]] %s8907_s7 }
   0x5 LB: > { %s31_s7 = sadd.s32 1, %s6635_s17  ;;  %s34_s20 = sadd.s32 1, %s6639_s18  ;;  %s6643_s19 = sphi %s6712_s19, %s22_s19   ;;  %s6639_s18 = sphi %s6710_s18, %s9041_s18   ;;  %s6635_s17 = sphi %s6708_s17, %s9040_s17   ;;  %s6631_s16 = sphi %s6706_s16, %s9039_s16   ;;  %s6627_s15 = sphi %s6704_s15, %s9038_s15  }
   0x6   : > { %p32_p0 = scmp.ge.s32.totalorder %s31_s7, 2  ;;  %p5129_p1 = scmp.ge.s32.totalorder %s6643_s19, 1 }
   0x7   : > { %p413_p2 = scmp.lt.s32.totalorder %s6643_s19, 5 }
   0x8   : > { %s9043_s7 = smov (%p32_p0, %s31_s7), 0  ;;  %s9045_s20 = smov (!%p32_p0, %s34_s20), %s6639_s18 }
   0x9   : > { %p414_p3 = pnand %p5129_p1, %p413_p2  ;;  %p36_p4 = scmp.ge.s32.totalorder %s9045_s20, 2 }
   0xb   : > { %s9047_s20 = smov (%p36_p4, %s9045_s20), 0  ;;  %417 = sbr.rel (%p414_p3) target bundleno = 811 (0x32b), region = 56 }
  0x12   : > { %s6737_s21 = sshll.u32 %s6627_s15, 3  ;;  %p503_p5 = scmp.lt.s32.totalorder %s6631_s16, 1  ;;  %v8912_v0 = vlaneseq  ;;  %v6093_v1 = vld [vmem:[%s8903_s3 + $0x404] ss:$8 sps:$4 sm:$0xff]   ;;  %v6095_v2 = vld [vmem:[%s8903_s3 + $0x400] ss:$8 sps:$4 sm:$0xff]  }
  0x13   : > { %p519_p6 = scmp.lt.s32.totalorder %s6737_s21, 15  ;;  %s6741_s22 = sadd.s32 4294967295, %s6737_s21  ;;  %v6096_v4 = vld [vmem:[%s8903_s3 + $0x414] ss:$8 sps:$4 sm:$0xff]   ;;  %3107 = vmatprep.subr.bf16.mxu0 %v6093_v1  ;;  %v6098_v6 = vld [vmem:[%s8903_s3 + $0x410] ss:$8 sps:$4 sm:$0xff]  }
  0x14   : > { %s9049_s16 = smov (!%p503_p5, %s6631_s16), 1  ;;  %v6752_v3 = vshrl.u32 %v8912_v0, 7  ;;  %s8971_s6 = sld [smem:[#allocation21_spill]]  ;;  %3108 = vmatpush1.bf16.msra.mxu0 %v6095_v2  ;;  %v6099_v9 = vld [vmem:[%s8903_s3 + $0x104] ss:$8 sps:$4 sm:$0xff]   ;;  %vm1252_vm0 = vcmask 1040384  }
  0x15   : > { %s520_s29 = scalar_select %p519_p6, %s6737_s21, 15  ;;  %3109 = vmatprep.subr.bf16.mxu0 %v6096_v4  ;;  %v6101_v10 = vld [vmem:[%s8903_s3 + $0x100] ss:$8 sps:$4 sm:$0xff]   ;;  %1729 = vmatprep.subr.bf16.mxu1 %v6099_v9  ;;  %v6102_v11 = vld [vmem:[%s8903_s3 + $0x424] ss:$8 sps:$4 sm:$0xff]   ;;  %vm2147_vm4 = vcmask 1046528  }
  0x16   : > { %8970 = vst [vmem:[#allocation3_spill] sm:$0xff] %v6752_v3  ;;  %s6765_s14 = sshll.u32 %s9049_s16, 6  ;;  %v6768_v7 = vsub.s32 0, %v6752_v3  ;;  %v6771_v8 = vsub.s32 1, %v6752_v3  ;;  %p501_p7 = scmp.gt.s32.totalorder %s6741_s22, 0  ;;  %1730 = vmatpush1.bf16.msra.mxu1 %v6101_v10 }
  0x17   : > { %s5141_s25 = sshll.u32 %s520_s29, 2  ;;  %p5132_p8 = scmp.lt.s32.totalorder %s6741_s22, 15  ;;  %v6104_v12 = vld [vmem:[%s8903_s3 + $0x420] ss:$8 sps:$4 sm:$0xff]   ;;  %vm1253_vm1 = vsmask.f32 256 }
  0x18   : > { %8972 = vst [vmem:[#allocation4_spill] sm:$0xff] %v6768_v7  ;;  %8973 = vst [vmem:[#allocation5_spill] sm:$0xff] %v6771_v8  ;;  %s6780_s28 = sadd.s32 %s5141_s25, %s6765_s14  ;;  %s8974_s1 = sld [smem:[#allocation20_spill]]  ;;  %3110 = vmatpush1.bf16.msra.mxu0 %v6098_v6  ;;  %vm1327_vm3 = vsmask.f32 7424 }
  0x19   : > { %s8911_s12 = sshll.u32 %s6780_s28, 2  ;;  %3111 = vmatprep.subr.bf16.mxu0 %v6102_v11  ;;  %p568_p9 = scmp.gt.s32.totalorder %s6627_s15, 0  ;;  %vm7286_vm2 = vmand %vm1252_vm0, %vm1253_vm1 }
  0x1a   : > { %v666_v5 = vld [vmem:[%s8971_s6] sm:$0x3]  ;;  %s502_s26 = scalar_select %p501_p7, %s6741_s22, 0 }
  0x1b   : > { %v6799_v13 = vrot.slane %v666_v5, %v6768_v7  ;;  %v6802_v14 = vrot.slane %v666_v5, %v6771_v8  ;;  %s569_s27 = scalar_select %p568_p9, 1, 0 }
  0x1c   : > { %s9051_s26 = smov (!%p5132_p8, %s502_s26), 15  ;;  %3112 = vmatpush1.bf16.msra.mxu0 %v6104_v12  ;;  %s8975_s0 = sld [smem:[#allocation19_spill]] }
  0x1d   : > { %s5137_s22 = sshll.u32 %s9051_s26, 2  ;;  %s570_s11 = scvt.s32.f32 %s569_s27 }
  0x1e   : > { %s6796_s25 = scalar_lea.vmem %s8974_s1, %s8911_s12  ;;  %s509_s30 = sadd.s32 %s6765_s14, %s5137_s22 }
  0x1f   : > { %v6805_v15 = vld [vmem:[%s6796_s25 + $0x10] sm:$0xff]  ;;  %v6808_v16 = vld [vmem:[%s6796_s25] sm:$0xff]  ;;  %v6811_v17 = vld [vmem:[%s6796_s25 + $0x18] sm:$0xff]  ;;  %s5139_s29 = sshll.u32 %s509_s30, 2  ;;  %s573_s13 = sshrl.u32 %s570_s11, 16 }
  0x20   : > { %v634_v18 = vunpack.c.l.bf16 %v6805_v15  ;;  %v635_v19 = vunpack.c.h.bf16 %v6805_v15  ;;  %v630_v20 = vunpack.c.l.bf16 %v6808_v16  ;;  %v631_v21 = vunpack.c.h.bf16 %v6808_v16  ;;  %v6821_v22 = vld [vmem:[%s6796_s25 + $0x8] sm:$0xff]  ;;  %p572_p10 = scmp.ne.f32.partialorder %s570_s11, %s570_s11  ;;  %s574_s23 = sand.u32 1, %s573_s13  ;;  %v6862_v40 = vld [vmem:[%s6796_s25 + $0x20] sm:$0xff]  ;;  %v6865_v43 = vld [vmem:[%s6796_s25 + $0x38] sm:$0xff] }
  0x21   : > { %v636_v23 = vunpack.c.l.bf16 %v6811_v17  ;;  %v637_v24 = vunpack.c.h.bf16 %v6811_v17  ;;  %v632_v25 = vunpack.c.l.bf16 %v6821_v22  ;;  %v633_v26 = vunpack.c.h.bf16 %v6821_v22  ;;  %s575_s24 = sadd.s32 32767, %s574_s23  ;;  %v6859_v39 = vld [vmem:[%s6796_s25 + $0x28] sm:$0xff]  ;;  %v6870_v46 = vld [vmem:[%s6796_s25 + $0x30] sm:$0xff]  ;;  %v6902_v2 = vld [vmem:[%s6796_s25 + $0x40] sm:$0xff]  ;;  %p561_p11 = scmp.lt.s32.totalorder %s6627_s15, 1 }
  0x22   : > { %v688_v27 = vmul.f32 %v6799_v13, %v634_v18  ;;  %v689_v28 = vmul.f32 %v6802_v14, %v635_v19  ;;  %v684_v29 = vmul.f32 %v6799_v13, %v630_v20  ;;  %v685_v30 = vmul.f32 %v6802_v14, %v631_v21  ;;  %s511_s1 = scalar_lea.vmem %s8975_s0, %s5139_s29  ;;  %s576_s22 = sadd.s32 %s575_s24, %s570_s11  ;;  %v6891_v60 = vld [vmem:[%s6796_s25 + $0x48] sm:$0xff]  ;;  %v6917_v10 = vld [vmem:[%s6796_s25 + $0x58] sm:$0xff] }
  0x23   : > { %v690_v31 = vmul.f32 %v6799_v13, %v636_v23  ;;  %v691_v32 = vmul.f32 %v6802_v14, %v637_v24  ;;  %v686_v33 = vmul.f32 %v6799_v13, %v632_v25  ;;  %v687_v34 = vmul.f32 %v6802_v14, %v633_v26  ;;  %s577_s27 = sand.u32 4294901760, %s576_s22  ;;  %v595_v41 = vld [vmem:[%s511_s1 + $0x8] sm:$0xff]  ;;  %v594_v42 = vld [vmem:[%s511_s1] sm:$0xff]  ;;  %s5747_s24 = sadd.s32 8, %s6737_s21 }
  0x24   : > { %v732_v35 = vadd.f32 %v689_v28, %v688_v27  ;;  %v726_v36 = vadd.f32 %v685_v30, %v684_v29  ;;  %s9053_s27 = smov (%p572_p10, %s577_s27), 2143289344  ;;  %v8937_v44 = vunpack.c.l.bf16 %v6859_v39  ;;  %v8939_v45 = vunpack.c.h.bf16 %v6859_v39  ;;  %p7115_p12 = scmp.lt.s32.totalorder %s5747_s24, 15  ;;  %v6198_v17 = vld [vmem:[%s8903_s3 + $0x520] ss:$8 sps:$4 sm:$0xff]  }
  0x25   : > { %v735_v37 = vadd.f32 %v691_v32, %v690_v31  ;;  %v729_v38 = vadd.f32 %v687_v34, %v686_v33  ;;  %s580_s30 = sshrl.u32 %s9053_s27, 16  ;;  %v8938_v48 = vunpack.c.l.bf16 %v6862_v40  ;;  %v8940_v49 = vunpack.c.h.bf16 %v6862_v40  ;;  %v6934_v33 = vld [vmem:[%s6796_s25 + $0x50] sm:$0xff]  ;;  %s667_s23 = sld [smem:[#allocation2]] }
  0x26   : > { %733 = vadd.xlane.f32.xlu1 %v732_v35  ;;  %727 = vadd.xlane.f32.xlu0 %v726_v36  ;;  %s596_s13 = sshll.u32 %s580_s30, 16  ;;  %v694_v52 = vmul.f32 %v6799_v13, %v8937_v44  ;;  %v695_v53 = vmul.f32 %v6802_v14, %v8939_v45  ;;  %v8933_v54 = vunpack.c.l.bf16 %v6865_v43  ;;  %v8935_v55 = vunpack.c.h.bf16 %v6865_v43  ;;  %s9055_s24 = smov (!%p7115_p12, %s5747_s24), 15 }
  0x27   : > { %s597_s12 = sor.u32 %s596_s13, %s580_s30  ;;  %v692_v61 = vmul.f32 %v6799_v13, %v8938_v48  ;;  %v693_v62 = vmul.f32 %v6802_v14, %v8940_v49  ;;  %v8934_v63 = vunpack.c.l.bf16 %v6870_v46  ;;  %v8936_v1 = vunpack.c.h.bf16 %v6870_v46  ;;  %s9057_s24 = smov (!%p7115_p12, %s9055_s24), 15  ;;  %v6186_v48 = vld [vmem:[%s8903_s3 + $0x500] ss:$8 sps:$4 sm:$0xff]  }
  0x28   : > { %v598_v47 = vstv %s597_s12  ;;  %v698_v27 = vmul.f32 %v6799_v13, %v8933_v54  ;;  %v699_v28 = vmul.f32 %v6802_v14, %v8935_v55  ;;  %v8914_v31 = vunpack.c.l.bf16 %v6891_v60  ;;  %s5148_s29 = sshll.u32 %s9057_s24, 2  ;;  %s9035_s12 = sshll.u32 %s6780_s28, 2 }
  0x29   : > { %v6874_v50 = vmul.bf16 %v598_v47, %v595_v41  ;;  %v6876_v51 = vmul.bf16 %v598_v47, %v594_v42  ;;  %v696_v29 = vmul.f32 %v6799_v13, %v8934_v63  ;;  %v697_v30 = vmul.f32 %v6802_v14, %v8936_v1  ;;  %v6944_v47 = vld [vmem:[%s6796_s25 + $0x60] sm:$0xff]  ;;  %s537_s22 = sadd.s32 %s5148_s29, %s6765_s14  ;;  %s8754_s24 = scalar_lea.vmem %s8909_s9, %s9035_s12 }
  0x2a   : > { %736 = vadd.xlane.f32.xlu1 %v735_v37  ;;  %730 = vadd.xlane.f32.xlu0 %v729_v38  ;;  %v8917_v32 = vunpack.c.h.bf16 %v6891_v60  ;;  %v741_v34 = vadd.f32 %v695_v53, %v694_v52  ;;  %v738_v35 = vadd.f32 %v693_v62, %v692_v61  ;;  %v8916_v36 = vunpack.c.l.bf16 %v6902_v2  ;;  %v6939_v38 = vld [vmem:[%s6796_s25 + $0x68] sm:$0xff]  ;;  %v6105_v61 = vld [vmem:[%s8903_s3 + $0x114] ss:$8 sps:$4 sm:$0xff]   ;;  %s9061_s15 = smov (!%p561_p11, %s6627_s15), 1  ;;  %s5157_s1 = sshll.u32 %s9049_s16, 2 }
  0x2b   : > { %v628_v56 = vunpack.c.l.bf16 %v6874_v50  ;;  %v629_v57 = vunpack.c.h.bf16 %v6874_v50  ;;  %v626_v58 = vunpack.c.l.bf16 %v6876_v51  ;;  %v627_v59 = vunpack.c.h.bf16 %v6876_v51  ;;  %1731 = vmatprep.subr.bf16.mxu1 %v6105_v61  ;;  %s5156_s28 = sshll.u32 %s9061_s15, 1 }
  0x2c   : > { %v8918_v37 = vunpack.c.h.bf16 %v6902_v2  ;;  %v8913_v41 = vunpack.c.l.bf16 %v6917_v10  ;;  %v8915_v42 = vunpack.c.h.bf16 %v6917_v10  ;;  %v702_v52 = vmul.f32 %v6799_v13, %v8914_v31  ;;  %v6983_v31 = vld [vmem:[%s6796_s25 + $0x70] sm:$0xff] }
  0x2d   : > { %v682_v4 = vmul.f32 %v6799_v13, %v628_v56  ;;  %v683_v5 = vmul.f32 %v6802_v14, %v629_v57  ;;  %v680_v6 = vmul.f32 %v6799_v13, %v626_v58  ;;  %v681_v9 = vmul.f32 %v6802_v14, %v627_v59 }
  0x2e   : > { %v703_v53 = vmul.f32 %v6802_v14, %v8917_v32  ;;  %v700_v62 = vmul.f32 %v6799_v13, %v8916_v36  ;;  %v8921_v61 = vunpack.c.h.bf16 %v6939_v38  ;;  %v8920_v0 = vunpack.c.l.bf16 %v6944_v47  ;;  %v6113_v32 = vld [vmem:[%s8903_s3 + $0x120] ss:$8 sps:$4 sm:$0xff]  }
  0x2f   : > { %v723_v11 = vadd.f32 %v683_v5, %v682_v4  ;;  %v720_v12 = vadd.f32 %v681_v9, %v680_v6  ;;  %v747_v4 = vadd.f32 %v699_v28, %v698_v27  ;;  %v744_v5 = vadd.f32 %v697_v30, %v696_v29  ;;  %v6974_v30 = vld [vmem:[%s6796_s25 + $0x78] sm:$0xff]  ;;  %s582_s25 = scalar_select %p561_p11, 1, 0 }
  0x30   : > { %v701_v6 = vmul.f32 %v6802_v14, %v8918_v37  ;;  %v8923_v9 = vunpack.c.l.bf16 %v6934_v33  ;;  %v706_v27 = vmul.f32 %v6799_v13, %v8913_v41  ;;  %v707_v28 = vmul.f32 %v6802_v14, %v8915_v42  ;;  %v6110_v42 = vld [vmem:[%s8903_s3 + $0x430] ss:$8 sps:$4 sm:$0xff]  }
  0x31   : > { %724 = vadd.xlane.f32.xlu1 %v723_v11  ;;  %721 = vadd.xlane.f32.xlu0 %v720_v12  ;;  %v8932_v11 = vunpack.c.h.bf16 %v6934_v33  ;;  %v6107_v12 = vld [vmem:[%s8903_s3 + $0x110] ss:$8 sps:$4 sm:$0xff]   ;;  %v8919_v29 = vunpack.c.l.bf16 %v6939_v38  ;;  %v8922_v41 = vunpack.c.h.bf16 %v6944_v47  ;;  %s7103_s11 = scvt.s32.f32 %s582_s25 }
  0x32   : > { %1732 = vmatpush1.bf16.msra.mxu1 %v6107_v12  ;;  %v6111_v12 = vld [vmem:[%s8903_s3 + $0x124] ss:$8 sps:$4 sm:$0xff]   ;;  %v750_v36 = vadd.f32 %v701_v6, %v700_v62  ;;  %v759_v37 = vadd.f32 %v707_v28, %v706_v27  ;;  %v711_v62 = vmul.f32 %v6802_v14, %v8921_v61  ;;  %v708_v6 = vmul.f32 %v6799_v13, %v8920_v0  ;;  %v6119_v61 = vld [vmem:[%s8903_s3 + $0x130] ss:$8 sps:$4 sm:$0xff]  }
  0x33   : > { %1733 = vmatprep.subr.bf16.mxu1 %v6111_v12  ;;  %v709_v27 = vmul.f32 %v6802_v14, %v8922_v41  ;;  %v8928_v28 = vunpack.c.l.bf16 %v6974_v30  ;;  %v8930_v12 = vunpack.c.h.bf16 %v6974_v30  ;;  %v8931_v0 = vunpack.c.h.bf16 %v6983_v31  ;;  %s586_s25 = sshrl.u32 %s7103_s11, 16  ;;  %p585_p13 = scmp.ne.f32.partialorder %s7103_s11, %s7103_s11 }
  0x34   : > { %s587_s21 = sand.u32 1, %s586_s25 }
  0x35   : > { %742 = vadd.xlane.f32.xlu1 %v741_v34  ;;  %739 = vadd.xlane.f32.xlu0 %v738_v35  ;;  %v6108_v34 = vld [vmem:[%s8903_s3 + $0x434] ss:$8 sps:$4 sm:$0xff]   ;;  %v753_v35 = vadd.f32 %v703_v53, %v702_v52  ;;  %v704_v52 = vmul.f32 %v6799_v13, %v8923_v9  ;;  %v705_v53 = vmul.f32 %v6802_v14, %v8932_v11  ;;  %s588_s26 = sadd.s32 32767, %s587_s21 }
  0x36   : > { %3113 = vmatprep.subr.bf16.mxu0 %v6108_v34  ;;  %1734 = vmatpush1.bf16.msra.mxu1 %v6113_v32  ;;  %v6116_v32 = vld [vmem:[%s8903_s3 + $0x440] ss:$8 sps:$4 sm:$0xff]   ;;  %v762_v9 = vadd.f32 %v709_v27, %v708_v6  ;;  %s589_s0 = sadd.s32 %s588_s26, %s7103_s11  ;;  %s5150_s26 = sshll.u32 %s537_s22, 2 }
  0x37   : > { %3114 = vmatpush1.bf16.msra.mxu0 %v6110_v42  ;;  %v6117_v42 = vld [vmem:[%s8903_s3 + $0x134] ss:$8 sps:$4 sm:$0xff]   ;;  %v756_v34 = vadd.f32 %v705_v53, %v704_v52  ;;  %v715_v52 = vmul.f32 %v6802_v14, %v8930_v12  ;;  %s590_s27 = sand.u32 4294901760, %s589_s0  ;;  %s539_s21 = scalar_lea.vmem %s8902_s2, %s5150_s26 }
  0x38   : > { %1735 = vmatprep.subr.bf16.mxu1 %v6117_v42  ;;  %v6129_v42 = vld [vmem:[%s8903_s3 + $0x154] ss:$8 sps:$4 sm:$0xff]   ;;  %s9059_s27 = smov (%p585_p13, %s590_s27), 2143289344  ;;  %s5151_s22 = sshll.u32 %s9049_s16, 1 }
  0x39   : > { %748 = vadd.xlane.f32.xlu1 %v747_v4  ;;  %745 = vadd.xlane.f32.xlu0 %v744_v5  ;;  %v710_v4 = vmul.f32 %v6799_v13, %v8919_v29  ;;  %v6114_v5 = vld [vmem:[%s8903_s3 + $0x444] ss:$8 sps:$4 sm:$0xff]   ;;  %v8929_v29 = vunpack.c.l.bf16 %v6983_v31  ;;  %s593_s30 = sshrl.u32 %s9059_s27, 16  ;;  %s547_s6 = scalar_lea.vmem %s8908_s8, %s5151_s22 }
  0x3a   : > { %3115 = vmatprep.subr.bf16.mxu0 %v6114_v5  ;;  %1736 = vmatpush1.bf16.msra.mxu1 %v6119_v61  ;;  %v6122_v61 = vld [vmem:[%s8903_s3 + $0x450] ss:$8 sps:$4 sm:$0xff]   ;;  %v6125_v5 = vld [vmem:[%s8903_s3 + $0x140] ss:$8 sps:$4 sm:$0xff]   ;;  %s604_s25 = sshll.u32 %s593_s30, 16  ;;  %s565_s11 = sadd.s32 %s5157_s1, %s5156_s28 }
  0x3b   : > { %3116 = vmatpush1.bf16.msra.mxu0 %v6116_v32  ;;  %v765_v41 = vadd.f32 %v711_v62, %v710_v4  ;;  %v712_v53 = vmul.f32 %v6799_v13, %v8929_v29  ;;  %v713_v4 = vmul.f32 %v6802_v14, %v8931_v0  ;;  %v6126_v62 = vld [vmem:[%s8903_s3 + $0x464] ss:$8 sps:$4 sm:$0xff]   ;;  %v6128_v32 = vld [vmem:[%s8903_s3 + $0x460] ss:$8 sps:$4 sm:$0xff]   ;;  %s605_s26 = sor.u32 %s604_s25, %s593_s30  ;;  %s566_s14 = scalar_lea.vmem %s8910_s10, %s565_s11 }
  0x3d   : > { %754 = vadd.xlane.f32.xlu1 %v753_v35  ;;  %751 = vadd.xlane.f32.xlu0 %v750_v36  ;;  %v714_v36 = vmul.f32 %v6799_v13, %v8928_v28  ;;  %v6120_v35 = vld [vmem:[%s8903_s3 + $0x454] ss:$8 sps:$4 sm:$0xff]   ;;  %v768_v27 = vadd.f32 %v713_v4, %v712_v53  ;;  %v6140_v53 = vld [vmem:[%s8903_s3 + $0x480] ss:$8 sps:$4 sm:$0xff]  }
  0x3e   : > { %3117 = vmatprep.subr.bf16.mxu0 %v6120_v35  ;;  %v6137_v35 = vld [vmem:[%s8903_s3 + $0x160] ss:$8 sps:$4 sm:$0xff]   ;;  %v6141_v4 = vld [vmem:[%s8903_s3 + $0x174] ss:$8 sps:$4 sm:$0xff]  }
  0x3f   : > { %3118 = vmatpush1.bf16.msra.mxu0 %v6122_v61  ;;  %v771_v6 = vadd.f32 %v715_v52, %v714_v36  ;;  %v6135_v36 = vld [vmem:[%s8903_s3 + $0x164] ss:$8 sps:$4 sm:$0xff]   ;;  %v6143_v61 = vld [vmem:[%s8903_s3 + $0x170] ss:$8 sps:$4 sm:$0xff]  }
  0x40   : > { %3119 = vmatprep.subr.bf16.mxu0 %v6126_v62  ;;  %v6138_v52 = vld [vmem:[%s8903_s3 + $0x484] ss:$8 sps:$4 sm:$0xff]  }
  0x41   : > { %760 = vadd.xlane.f32.xlu1 %v759_v37  ;;  %757 = vadd.xlane.f32.xlu0 %v756_v34  ;;  %v6123_v37 = vld [vmem:[%s8903_s3 + $0x144] ss:$8 sps:$4 sm:$0xff]   ;;  %v6131_v34 = vld [vmem:[%s8903_s3 + $0x150] ss:$8 sps:$4 sm:$0xff]  }
  0x42   : > { %1737 = vmatprep.subr.bf16.mxu1 %v6123_v37  ;;  %v6144_v37 = vld [vmem:[%s8903_s3 + $0x494] ss:$8 sps:$4 sm:$0xff]   ;;  %v6147_v62 = vld [vmem:[%s8903_s3 + $0x184] ss:$8 sps:$4 sm:$0xff]  }
  0x43   : > { %1738 = vmatpush1.bf16.msra.mxu1 %v6125_v5  ;;  %3120 = vmatpush1.bf16.msra.mxu0 %v6128_v32  ;;  %v6146_v5 = vld [vmem:[%s8903_s3 + $0x490] ss:$8 sps:$4 sm:$0xff]   ;;  %v6152_v32 = vld [vmem:[%s8903_s3 + $0x4a0] ss:$8 sps:$4 sm:$0xff]  }
  0x44   : > { %1739 = vmatprep.subr.bf16.mxu1 %v6129_v42  ;;  %v6153_v42 = vld [vmem:[%s8903_s3 + $0x194] ss:$8 sps:$4 sm:$0xff]  }
  0x45   : > { %766 = vadd.xlane.f32.xlu1 %v765_v41  ;;  %763 = vadd.xlane.f32.xlu0 %v762_v9  ;;  %v6132_v41 = vld [vmem:[%s8903_s3 + $0x474] ss:$8 sps:$4 sm:$0xff]   ;;  %v6134_v9 = vld [vmem:[%s8903_s3 + $0x470] ss:$8 sps:$4 sm:$0xff]  }
  0x46   : > { %3121 = vmatprep.subr.bf16.mxu0 %v6132_v41  ;;  %v6156_v41 = vld [vmem:[%s8903_s3 + $0x4b4] ss:$8 sps:$4 sm:$0xff]  }
  0x47   : > { %1740 = vmatpush1.bf16.msra.mxu1 %v6131_v34  ;;  %3122 = vmatpush1.bf16.msra.mxu0 %v6134_v9  ;;  %v6155_v34 = vld [vmem:[%s8903_s3 + $0x190] ss:$8 sps:$4 sm:$0xff]  }
  0x48   : > { %1741 = vmatprep.subr.bf16.mxu1 %v6135_v36  ;;  %3123 = vmatprep.subr.bf16.mxu0 %v6138_v52  ;;  %v6158_v9 = vld [vmem:[%s8903_s3 + $0x4b0] ss:$8 sps:$4 sm:$0xff]   ;;  %v6159_v36 = vld [vmem:[%s8903_s3 + $0x1a4] ss:$8 sps:$4 sm:$0xff]  }
  0x49   : > { %772 = vadd.xlane.f32.xlu1 %v771_v6  ;;  %769 = vadd.xlane.f32.xlu0 %v768_v27  ;;  %v6149_v6 = vld [vmem:[%s8903_s3 + $0x180] ss:$8 sps:$4 sm:$0xff]   ;;  %v6150_v27 = vld [vmem:[%s8903_s3 + $0x4a4] ss:$8 sps:$4 sm:$0xff]  }
  0x4a   : > { %v6162_v52 = vld [vmem:[%s8903_s3 + $0x4c4] ss:$8 sps:$4 sm:$0xff]  }
  0x4b   : > { %1742 = vmatpush1.bf16.msra.mxu1 %v6137_v35  ;;  %3124 = vmatpush1.bf16.msra.mxu0 %v6140_v53  ;;  %v6161_v35 = vld [vmem:[%s8903_s3 + $0x1a0] ss:$8 sps:$4 sm:$0xff]  }
  0x4c   : > { %1743 = vmatprep.subr.bf16.mxu1 %v6141_v4  ;;  %3125 = vmatprep.subr.bf16.mxu0 %v6144_v37  ;;  %v6164_v53 = vld [vmem:[%s8903_s3 + $0x4c0] ss:$8 sps:$4 sm:$0xff]   ;;  %v6165_v4 = vld [vmem:[%s8903_s3 + $0x1b4] ss:$8 sps:$4 sm:$0xff]  }
  0x4d   : > { %v6168_v37 = vld [vmem:[%s8903_s3 + $0x4d4] ss:$8 sps:$4 sm:$0xff]  }
  0x4f   : > { %1744 = vmatpush1.bf16.msra.mxu1 %v6143_v61  ;;  %3126 = vmatpush1.bf16.msra.mxu0 %v6146_v5  ;;  %v6167_v61 = vld [vmem:[%s8903_s3 + $0x1b0] ss:$8 sps:$4 sm:$0xff]  }
  0x50   : > { %1745 = vmatprep.subr.bf16.mxu1 %v6147_v62  ;;  %3127 = vmatprep.subr.bf16.mxu0 %v6150_v27  ;;  %v6170_v5 = vld [vmem:[%s8903_s3 + $0x4d0] ss:$8 sps:$4 sm:$0xff]   ;;  %v6171_v62 = vld [vmem:[%s8903_s3 + $0x1c4] ss:$8 sps:$4 sm:$0xff]   ;;  %v6173_v27 = vld [vmem:[%s8903_s3 + $0x1c0] ss:$8 sps:$4 sm:$0xff]  }
  0x53   : > { %1746 = vmatpush1.bf16.msra.mxu1 %v6149_v6  ;;  %3128 = vmatpush1.bf16.msra.mxu0 %v6152_v32  ;;  %v603_v6 = vld [vmem:[%s539_s21 + $0x8] sm:$0xff]  ;;  %v602_v32 = vld [vmem:[%s539_s21] sm:$0xff] }
  0x54   : > { %1747 = vmatprep.subr.bf16.mxu1 %v6153_v42  ;;  %3129 = vmatprep.subr.bf16.mxu0 %v6156_v41  ;;  %v6174_v42 = vld [vmem:[%s8903_s3 + $0x4e4] ss:$8 sps:$4 sm:$0xff]   ;;  %v6176_v41 = vld [vmem:[%s8903_s3 + $0x4e0] ss:$8 sps:$4 sm:$0xff]  }
  0x57   : > { %1748 = vmatpush1.bf16.msra.mxu1 %v6155_v34  ;;  %3130 = vmatpush1.bf16.msra.mxu0 %v6158_v9  ;;  %v606_v34 = vstv %s605_s26  ;;  %v6177_v9 = vld [vmem:[%s8903_s3 + $0x1d4] ss:$8 sps:$4 sm:$0xff]  }
  0x58   : > { %1749 = vmatprep.subr.bf16.mxu1 %v6159_v36  ;;  %3131 = vmatprep.subr.bf16.mxu0 %v6162_v52  ;;  %v7179_v36 = vmul.bf16 %v606_v34, %v603_v6  ;;  %v6179_v52 = vld [vmem:[%s8903_s3 + $0x1d0] ss:$8 sps:$4 sm:$0xff]  }
  0x5a   : > { %8977 = vst [vmem:[#allocation6_spill] sm:$0xff] %v7179_v36 }
  0x5b   : > { %1750 = vmatpush1.bf16.msra.mxu1 %v6161_v35  ;;  %3132 = vmatpush1.bf16.msra.mxu0 %v6164_v53  ;;  %v7181_v35 = vmul.bf16 %v606_v34, %v602_v32  ;;  %v8924_v53 = vunpack.c.l.bf16 %v7179_v36  ;;  %v6183_v34 = vld [vmem:[%s8903_s3 + $0x1e4] ss:$8 sps:$4 sm:$0xff]  }
  0x5c   : > { %1751 = vmatprep.subr.bf16.mxu1 %v6165_v4  ;;  %3133 = vmatprep.subr.bf16.mxu0 %v6168_v37  ;;  %v8926_v4 = vunpack.c.h.bf16 %v7179_v36 }
  0x5d   : > { %8978 = vst [vmem:[#allocation7_spill] sm:$0xff] %v7181_v35  ;;  %v8927_v37 = vunpack.c.h.bf16 %v7181_v35 }
  0x5e   : > { %v719_v6 = vmul.f32 %v6802_v14, %v8926_v4 }
  0x5f   : > { %1752 = vmatpush1.bf16.msra.mxu1 %v6167_v61  ;;  %3134 = vmatpush1.bf16.msra.mxu0 %v6170_v5  ;;  %v8925_v61 = vunpack.c.l.bf16 %v7181_v35  ;;  %v6180_v5 = vld [vmem:[%s8903_s3 + $0x4f4] ss:$8 sps:$4 sm:$0xff]   ;;  %v717_v32 = vmul.f32 %v6802_v14, %v8927_v37 }
  0x60   : > { %1753 = vmatprep.subr.bf16.mxu1 %v6171_v62  ;;  %3135 = vmatprep.subr.bf16.mxu0 %v6174_v42  ;;  %v718_v62 = vmul.f32 %v6799_v13, %v8924_v53  ;;  %v6182_v42 = vld [vmem:[%s8903_s3 + $0x4f0] ss:$8 sps:$4 sm:$0xff]   ;;  %v6189_v14 = vld [vmem:[%s8903_s3 + $0x1f4] ss:$8 sps:$4 sm:$0xff]  }
  0x63   : > { %1754 = vmatpush1.bf16.msra.mxu1 %v6173_v27  ;;  %3136 = vmatpush1.bf16.msra.mxu0 %v6176_v41  ;;  %v716_v27 = vmul.f32 %v6799_v13, %v8925_v61  ;;  %v6185_v41 = vld [vmem:[%s8903_s3 + $0x1e0] ss:$8 sps:$4 sm:$0xff]   ;;  %v6188_v13 = vld [vmem:[%s8903_s3 + $0x504] ss:$8 sps:$4 sm:$0xff]  }
  0x64   : > { %1755 = vmatprep.subr.bf16.mxu1 %v6177_v9  ;;  %3137 = vmatprep.subr.bf16.mxu0 %v6180_v5  ;;  %v777_v9 = vadd.f32 %v719_v6, %v718_v62  ;;  %v6191_v5 = vld [vmem:[%s8903_s3 + $0x1f0] ss:$8 sps:$4 sm:$0xff]   ;;  %v6197_v62 = vld [vmem:[%s8903_s3 + $0x4] ss:$8 sps:$4 sm:$0xff]   ;;  %v7226_v6 = vstv %s667_s23 }
  0x65   : > { %8979 = vst [vmem:[#allocation8_spill] sm:$0xff] %v7226_v6 }
  0x66   : > { %778 = vadd.xlane.f32.xlu1 %v777_v9 }
  0x67   : > { %1756 = vmatpush1.bf16.msra.mxu1 %v6179_v52  ;;  %v774_v52 = vadd.f32 %v717_v32, %v716_v27  ;;  %3138 = vmatpush1.bf16.msra.mxu0 %v6182_v42 }
  0x68   : > { %1757 = vmatprep.subr.bf16.mxu1 %v6183_v34  ;;  %3457 = vmatprep.subr.bf16.mxu0 %v6188_v13 }
  0x69   : > { %775 = vadd.xlane.f32.xlu0 %v774_v52 }
  0x6b   : > { %1758 = vmatpush1.bf16.msra.mxu1 %v6185_v41 }
  0x6c   : > { %1759 = vmatprep.subr.bf16.mxu1 %v6189_v14 }
  0x6f   : > { %1760 = vmatpush1.bf16.msra.mxu1 %v6191_v5 }
  0x70   : > { %2002 = vmatprep.subr.bf16.mxu1 %v6197_v62 }
  0xb3   : > { %v734_v27 = vpop.xlane.xlu1 %733  ;;  %v728_v32 = vpop.xlane.xlu0 %727 }
  0xb4   : > { %v785_v42 = vadd.f32 %v7226_v6, %v734_v27  ;;  %v783_v34 = vadd.f32 %v7226_v6, %v728_v32 }
  0xb6   : > { %v5162_v41 = vmul.f32 -1.442695, %v785_v42  ;;  %v5160_v9 = vmul.f32 -1.442695, %v783_v34 }
  0xb7   : > { %v737_v52 = vpop.xlane.xlu1 %736  ;;  %v731_v13 = vpop.xlane.xlu0 %730 }
  0xb8   : > { %6525 = vpow2.f32 %v5162_v41  ;;  %v786_v14 = vadd.f32 %v7226_v6, %v737_v52  ;;  %v784_v5 = vadd.f32 %v7226_v6, %v731_v13 }
  0xb9   : > { %6527 = vpow2.f32 %v5160_v9 }
  0xba   : > { %v5163_v62 = vmul.f32 -1.442695, %v786_v14  ;;  %v5161_v53 = vmul.f32 -1.442695, %v784_v5 }
  0xbc   : > { %6529 = vpow2.f32 %v5163_v62 }
  0xbd   : > { %6531 = vpow2.f32 %v5161_v53 }
  0xbe   : > { %v725_v52 = vpop.xlane.xlu1 %724  ;;  %v722_v9 = vpop.xlane.xlu0 %721 }
  0xbf   : > { %v782_v14 = vadd.f32 %v7226_v6, %v725_v52  ;;  %v781_v53 = vadd.f32 %v7226_v6, %v722_v9 }
  0xc1   : > { %v5158_v5 = vmul.f32 -1.442695, %v781_v53 }
  0xc2   : > { %v6526_v61 = vpop.eup %6525  ;;  %v743_v62 = vpop.xlane.xlu1 %742 }
  0xc3   : > { %v6528_v4 = vpop.eup %6527  ;;  %v865_v27 = vadd.f32 1.0, %v6526_v61  ;;  %v668_v61 = vld [vmem:[%s547_s6] sm:$0x3] }
  0xc4   : > { %v863_v32 = vadd.f32 1.0, %v6528_v4  ;;  %v5159_v4 = vmul.f32 -1.442695, %v782_v14 }
  0xc5   : > { %6533 = vrcp.f32 %v865_v27  ;;  %v740_v27 = vpop.xlane.xlu0 %739 }
  0xc6   : > { %v6530_v42 = vpop.eup %6529  ;;  %6535 = vrcp.f32 %v863_v32  ;;  %v788_v32 = vadd.f32 %v7226_v6, %v743_v62  ;;  %v787_v37 = vadd.f32 %v7226_v6, %v740_v27 }
  0xc7   : > { %v6532_v34 = vpop.eup %6531  ;;  %v866_v41 = vadd.f32 1.0, %v6530_v42  ;;  %v7241_v42 = vrot.slane %v668_v61, %v6768_v7 }
  0xc8   : > { %v864_v13 = vadd.f32 1.0, %v6532_v34  ;;  %v7244_v34 = vrot.slane %v668_v61, %v6771_v8  ;;  %v5165_v52 = vmul.f32 -1.442695, %v788_v32 }
  0xc9   : > { %6537 = vrcp.f32 %v866_v41  ;;  %8980 = vst [vmem:[#allocation9_spill] sm:$0xff] %v7241_v42  ;;  %v5164_v41 = vmul.f32 -1.442695, %v787_v37  ;;  %v746_v14 = vpop.xlane.xlu0 %745 }
  0xca   : > { %6539 = vrcp.f32 %v864_v13  ;;  %8981 = vst [vmem:[#allocation10_spill] sm:$0xff] %v7244_v34  ;;  %v749_v13 = vpop.xlane.xlu1 %748  ;;  %v789_v61 = vadd.f32 %v7226_v6, %v746_v14 }
  0xcb   : > { %6541 = vpow2.f32 %v5159_v4  ;;  %v790_v62 = vadd.f32 %v7226_v6, %v749_v13 }
  0xcc   : > { %6543 = vpow2.f32 %v5158_v5  ;;  %v5166_v29 = vmul.f32 -1.442695, %v789_v61 }
  0xcd   : > { %6545 = vpow2.f32 %v5165_v52  ;;  %v5167_v32 = vmul.f32 -1.442695, %v790_v62  ;;  %v752_v0 = vpop.xlane.xlu0 %751 }
  0xce   : > { %6547 = vpow2.f32 %v5164_v41  ;;  %v755_v12 = vpop.xlane.xlu1 %754 }
  0xcf   : > { %v6534_v9 = vpop.eup %6533  ;;  %6549 = vpow2.f32 %v5167_v32  ;;  %v792_v41 = vadd.f32 %v7226_v6, %v755_v12 }
  0xd0   : > { %v6536_v53 = vpop.eup %6535  ;;  %v940_v28 = vadd.f32 %v6534_v9, %v7241_v42  ;;  %v941_v4 = vadd.f32 %v6534_v9, %v7244_v34  ;;  %6551 = vpow2.f32 %v5166_v29 }
  0xd1   : > { %v936_v27 = vadd.f32 %v6536_v53, %v7241_v42  ;;  %v937_v5 = vadd.f32 %v6536_v53, %v7244_v34  ;;  %v5169_v61 = vmul.f32 -1.442695, %v792_v41 }
  0xd2   : > { %v7256_v52 = vmul.f32 %v941_v4, %v635_v19  ;;  %v7263_v14 = vmul.f32 %v940_v28, %v634_v18  ;;  %v761_v18 = vpop.xlane.xlu1 %760  ;;  %v758_v28 = vpop.xlane.xlu0 %757 }
  0xd3   : > { %v6538_v37 = vpop.eup %6537  ;;  %v977_v11 = vmul.f32 %v937_v5, %v631_v21  ;;  %v976_v13 = vmul.f32 %v936_v27, %v630_v20  ;;  %v791_v21 = vadd.f32 %v7226_v6, %v752_v0  ;;  %6553 = vpow2.f32 %v5169_v61 }
  0xd4   : > { %v6540_v9 = vpop.eup %6539  ;;  %v7269_v4 = vadd.f32 %v6538_v37, %v7241_v42  ;;  %v943_v12 = vadd.f32 %v6538_v37, %v7244_v34  ;;  %v794_v32 = vadd.f32 %v7226_v6, %v761_v18 }
  0xd5   : > { %v938_v53 = vadd.f32 %v6540_v9, %v7241_v42  ;;  %v939_v62 = vadd.f32 %v6540_v9, %v7244_v34  ;;  %v6542_v19 = vpop.eup %6541  ;;  %v1017_v16 = vmax.f32 %v977_v11, 0.0  ;;  %v5168_v15 = vmul.f32 -1.442695, %v791_v21 }
  0xd6   : > { %v6544_v20 = vpop.eup %6543  ;;  %v862_v27 = vadd.f32 1.0, %v6542_v19  ;;  %v793_v9 = vadd.f32 %v7226_v6, %v758_v28  ;;  %v1016_v11 = vmax.f32 %v976_v13, 0.0  ;;  %v5171_v21 = vmul.f32 -1.442695, %v794_v32 }
  0xd7   : > { %v979_v29 = vmul.f32 %v939_v62, %v633_v26  ;;  %v978_v0 = vmul.f32 %v938_v53, %v632_v25  ;;  %v861_v5 = vadd.f32 1.0, %v6544_v20  ;;  %v6546_v19 = vpop.eup %6545  ;;  %v7280_v26 = vmul.f32 %v943_v12, %v637_v24  ;;  %v767_v53 = vpop.xlane.xlu1 %766 }
  0xd8   : > { %6555 = vrcp.f32 %v862_v27  ;;  %v5170_v54 = vmul.f32 -1.442695, %v793_v9  ;;  %v6548_v22 = vpop.eup %6547  ;;  %v868_v25 = vadd.f32 1.0, %v6546_v19  ;;  %v764_v62 = vpop.xlane.xlu0 %763  ;;  %v796_v13 = vadd.f32 %v7226_v6, %v767_v53 }
  0xd9   : > { %v1019_v37 = vmax.f32 %v979_v29, 0.0  ;;  %v1018_v41 = vmax.f32 %v978_v0, 0.0  ;;  %6557 = vrcp.f32 %v861_v5  ;;  %v867_v18 = vadd.f32 1.0, %v6548_v22  ;;  %v6550_v5 = vpop.eup %6549 }
  0xda   : > { %6559 = vpow2.f32 %v5168_v15  ;;  %v795_v27 = vadd.f32 %v7226_v6, %v764_v62  ;;  %v5173_v24 = vmul.f32 -1.442695, %v796_v13  ;;  %v6552_v32 = vpop.eup %6551  ;;  %v870_v9 = vadd.f32 1.0, %v6550_v5 }
  0xdb   : > { %v1055_v61 = vpack.c.bf16 %v1019_v37, %v1017_v16  ;;  %v1054_v20 = vpack.c.bf16 %v1018_v41, %v1016_v11  ;;  %6561 = vpow2.f32 %v5171_v21  ;;  %v773_v41 = vpop.xlane.xlu1 %772  ;;  %v869_v21 = vadd.f32 1.0, %v6552_v32 }
  0xdc   : > { %6563 = vrcp.f32 %v868_v25  ;;  %v5172_v12 = vmul.f32 -1.442695, %v795_v27  ;;  %v770_v19 = vpop.xlane.xlu0 %769  ;;  %v798_v22 = vadd.f32 %v7226_v6, %v773_v41  ;;  %v1021_v32 = vmax.f32 %v7256_v52, 0.0 }
  0xdd   : > { %v1094_v28 = vshrl.u32 %v1055_v61, 16  ;;  %v1097_v29 = vshll.u32 %v1055_v61, 16  ;;  %v1087_v0 = vshrl.u32 %v1054_v20, 16  ;;  %6565 = vrcp.f32 %v867_v18 }
  0xde   : > { %v1090_v16 = vshll.u32 %v1054_v20, 16  ;;  %6567 = vpow2.f32 %v5170_v54  ;;  %v797_v25 = vadd.f32 %v7226_v6, %v770_v19  ;;  %v6554_v20 = vpop.eup %6553  ;;  %v5175_v13 = vmul.f32 -1.442695, %v798_v22 }
  0xdf   : > { %v1096_v37 = vrot.slane %v1094_v28, 7  ;;  %v1089_v11 = vrot.slane %v1087_v0, 7  ;;  %6569 = vpow2.f32 %v5173_v24  ;;  %v872_v28 = vadd.f32 1.0, %v6554_v20 }
  0xe0   : > { %6571 = vrcp.f32 %v870_v9  ;;  %v1023_v9 = vmax.f32 %v7280_v26, 0.0  ;;  %v5174_v52 = vmul.f32 -1.442695, %v797_v25 }
  0xe1   : > { %v1099_v53 = vor.u32 %v1097_v29, %v1096_v37  ;;  %v7294_v62 = vsel %vm7286_vm2, %v1096_v37, 0  ;;  %v1092_v61 = vor.u32 %v1090_v16, %v1089_v11  ;;  %6573 = vrcp.f32 %v869_v21 }
  0xe2   : > { %v1372_v54 = vshll.u32 %v7294_v62, 16  ;;  %v7299_v18 = vsel %vm7286_vm2, %v1089_v11, 0  ;;  %v6556_v27 = vpop.eup %6555  ;;  %6575 = vpow2.f32 %v5172_v12 }
  0xe3   : > { %8984 = vst [vmem:[#allocation11_spill] sm:$0xff] %v7299_v18  ;;  %v7303_v29 = vsel %vm7286_vm2, 0, %v1099_v53  ;;  %v7307_v0 = vsel %vm7286_vm2, 0, %v1092_v61  ;;  %v6558_v5 = vpop.eup %6557  ;;  %v7310_v24 = vadd.f32 %v6556_v27, %v7241_v42  ;;  %6577 = vrcp.f32 %v872_v28 }
  0xe4   : > { %8985 = vst [vmem:[#allocation12_spill] sm:$0xff] %v7307_v0  ;;  %v1367_v16 = vshll.u32 %v7303_v29, 16  ;;  %v6560_v37 = vpop.eup %6559  ;;  %v1365_v12 = vshrl.u32 %v7303_v29, 16  ;;  %v1374_v11 = vrot.slane %v1372_v54, 1  ;;  %v1355_v41 = vshll.u32 %v7307_v0, 16 }
  0xe5   : > { %v6562_v19 = vpop.eup %6561  ;;  %v871_v21 = vadd.f32 1.0, %v6560_v37  ;;  %v1353_v53 = vshrl.u32 %v7307_v0, 16  ;;  %v1360_v61 = vshll.u32 %v7299_v18, 16  ;;  %6579 = vpow2.f32 %v5175_v13 }
  0xe6   : > { %v1369_v22 = vrot.slane %v1367_v16, 1  ;;  %v6564_v20 = vpop.eup %6563  ;;  %v874_v63 = vadd.f32 1.0, %v6562_v19  ;;  %v1357_v55 = vrot.slane %v1355_v41, 1  ;;  %v932_v28 = vadd.f32 %v6558_v5, %v7241_v42 }
  0xe7   : > { %v6566_v26 = vpop.eup %6565  ;;  %v7321_v1 = vadd.f32 %v6564_v20, %v7241_v42  ;;  %6581 = vrcp.f32 %v871_v21  ;;  %v7324_v16 = vadd.f32 %v6564_v20, %v7244_v34  ;;  %v1362_v21 = vrot.slane %v1360_v61, 1 }
  0xe8   : > { %v1370_v54 = vor.u32 %v1369_v22, %v1365_v12  ;;  %v6568_v44 = vpop.eup %6567  ;;  %v7327_v37 = vadd.f32 %v6566_v26, %v7241_v42  ;;  %6583 = vrcp.f32 %v874_v63  ;;  %v1358_v19 = vor.u32 %v1357_v55, %v1353_v53  ;;  %v6194_v55 = vld [vmem:[%s8903_s3 + $0x514] ss:$8 sps:$4 sm:$0xff]  }
  0xe9   : > { %v6570_v41 = vpop.eup %6569  ;;  %v873_v13 = vadd.f32 1.0, %v6568_v44  ;;  %6585 = vpow2.f32 %v5174_v52  ;;  %v1057_v20 = vpack.c.bf16 %v1023_v9, %v1021_v32  ;;  %v933_v44 = vadd.f32 %v6558_v5, %v7244_v34 }
  0xea   : > { %v7330_v25 = vsel %vm1327_vm3, %v1370_v54, %v1374_v11  ;;  %v6572_v12 = vpop.eup %6571  ;;  %v876_v22 = vadd.f32 1.0, %v6570_v41  ;;  %v935_v63 = vadd.f32 %v6556_v27, %v7244_v34  ;;  %v7342_v53 = vadd.f32 %v6566_v26, %v7244_v34  ;;  %v6192_v41 = vld [vmem:[%s8903_s3 + $0x510] ss:$8 sps:$4 sm:$0xff]  }
  0xeb   : > { %3139 = vmatprep.mubr.bf16.mxu0 %v7330_v25  ;;  %v6574_v11 = vpop.eup %6573  ;;  %v7345_v61 = vadd.f32 %v6572_v12, %v7241_v42  ;;  %6587 = vrcp.f32 %v873_v13  ;;  %v7348_v52 = vsel %vm1327_vm3, %v1358_v19, %v1362_v21  ;;  %v7351_v9 = vadd.f32 %v6572_v12, %v7244_v34 }
  0xec   : > { %v6576_v32 = vpop.eup %6575  ;;  %v7354_v54 = vadd.f32 %v6574_v11, %v7241_v42  ;;  %6589 = vrcp.f32 %v876_v22  ;;  %3140 = vmatmul.mubr.bf16.vlgmr.msra.gmra.mrb[0].mxu0 %v7348_v52  ;;  %v1108_v27 = vshrl.u32 %v1057_v20, 16  ;;  %v1111_v26 = vshll.u32 %v1057_v20, 16 }
  0xed   : > { %v875_v5 = vadd.f32 1.0, %v6576_v32  ;;  %3458 = vmatpush1.bf16.msra.mxu0 %v6186_v48  ;;  %v973_v19 = vmul.f32 %v933_v44, %v627_v59  ;;  %v975_v13 = vmul.f32 %v935_v63, %v629_v57  ;;  %v6578_v21 = vpop.eup %6577  ;;  %v7365_v12 = vadd.f32 %v6574_v11, %v7244_v34  ;;  %v6200_v59 = vld [vmem:[%s8903_s3 + $0x524] ss:$8 sps:$4 sm:$0xff]  }
  0xee   : > { %v1110_v22 = vrot.slane %v1108_v27, 7  ;;  %3459 = vmatprep.subr.bf16.mxu0 %v6194_v55  ;;  %v972_v48 = vmul.f32 %v932_v28, %v626_v58  ;;  %v974_v20 = vmul.f32 %v7310_v24, %v628_v56  ;;  %v7376_v44 = vadd.f32 %v6578_v21, %v7241_v42 }
  0xef   : > { %6591 = vrcp.f32 %v875_v5  ;;  %v1013_v57 = vmax.f32 %v973_v19, 0.0  ;;  %v982_v55 = vmul.f32 %v7269_v4, %v636_v23  ;;  %v6580_v63 = vpop.eup %6579  ;;  %v7382_v51 = vadd.f32 %v6578_v21, %v7244_v34 }
  0xf0   : > { %v1113_v50 = vor.u32 %v1111_v26, %v1110_v22  ;;  %v7386_v56 = vsel %vm7286_vm2, %v1110_v22, 0  ;;  %v1015_v58 = vmax.f32 %v975_v13, 0.0  ;;  %v878_v28 = vadd.f32 1.0, %v6580_v63 }
  0xf1   : > { %8986 = vst [vmem:[#allocation13_spill] sm:$0xff] %v7386_v56  ;;  %v6582_v24 = vpop.eup %6581  ;;  %v1396_v11 = vshll.u32 %v7386_v56, 16  ;;  %3460 = vmatpush1.bf16.msra.mxu0 %v6192_v41  ;;  %v1012_v32 = vmax.f32 %v972_v48, 0.0  ;;  %v1014_v27 = vmax.f32 %v974_v20, 0.0  ;;  %v1020_v19 = vmax.f32 %v7263_v14, 0.0 }
  0xf2   : > { %v6584_v23 = vpop.eup %6583  ;;  %v7393_v4 = vadd.f32 %v6582_v24, %v7241_v42  ;;  %v7397_v5 = vsel %vm7286_vm2, 0, %v1113_v50  ;;  %v1053_v26 = vpack.c.bf16 %v1015_v58, %v1013_v57  ;;  %3461 = vmatprep.subr.bf16.mxu0 %v6200_v59  ;;  %v6206_v41 = vld [vmem:[%s8903_s3 + $0x534] ss:$8 sps:$4 sm:$0xff]   ;;  %v7404_v21 = vadd.f32 %v6582_v24, %v7244_v34  ;;  %v6204_v24 = vld [vmem:[%s8903_s3 + $0x530] ss:$8 sps:$4 sm:$0xff]  }
  0xf3   : > { %8987 = vst [vmem:[#allocation14_spill] sm:$0xff] %v7397_v5  ;;  %v6586_v13 = vpop.eup %6585  ;;  %v7407_v22 = vadd.f32 %v6584_v23, %v7241_v42  ;;  %v7410_v48 = vadd.f32 %v6584_v23, %v7244_v34  ;;  %6593 = vrcp.f32 %v878_v28  ;;  %v1389_v59 = vshrl.u32 %v7397_v5, 16 }
  0xf4   : > { %v877_v20 = vadd.f32 1.0, %v6586_v13  ;;  %v1391_v14 = vshll.u32 %v7397_v5, 16  ;;  %v1080_v57 = vshrl.u32 %v1053_v26, 16  ;;  %v1398_v50 = vrot.slane %v1396_v11, 1 }
  0xf5   : > { %v6588_v63 = vpop.eup %6587  ;;  %v1083_v58 = vshll.u32 %v1053_v26, 16  ;;  %v1052_v45 = vpack.c.bf16 %v1014_v27, %v1012_v32  ;;  %v1022_v49 = vmax.f32 %v982_v55, 0.0  ;;  %3462 = vmatpush1.bf16.msra.mxu0 %v6198_v17  ;;  %v8988_v13 = vunpack.c.h.bf16 %v6862_v40  ;;  %v6212_v55 = vld [vmem:[%s8903_s3 + $0x544] ss:$8 sps:$4 sm:$0xff]  }
  0xf6   : > { %v6590_v3 = vpop.eup %6589  ;;  %v7418_v23 = vadd.f32 %v6588_v63, %v7241_v42  ;;  %6595 = vrcp.f32 %v877_v20  ;;  %v1393_v28 = vrot.slane %v1391_v14, 1  ;;  %3463 = vmatprep.subr.bf16.mxu0 %v6206_v41  ;;  %v7429_v11 = vadd.f32 %v6588_v63, %v7244_v34 }
  0xf7   : > { %v7423_v8 = vmul.f32 %v7342_v53, %v8988_v13  ;;  %v7432_v32 = vadd.f32 %v6590_v3, %v7241_v42  ;;  %v1082_v27 = vrot.slane %v1080_v57, 7  ;;  %v1073_v17 = vshrl.u32 %v1052_v45, 16 }
  0xf8   : > { %v7435_v26 = vadd.f32 %v6590_v3, %v7244_v34  ;;  %v1394_v20 = vor.u32 %v1393_v28, %v1389_v59  ;;  %v1076_v14 = vshll.u32 %v1052_v45, 16  ;;  %v1056_v53 = vpack.c.bf16 %v1022_v49, %v1020_v19  ;;  %v6210_v3 = vld [vmem:[%s8903_s3 + $0x540] ss:$8 sps:$4 sm:$0xff]  }
  0xf9   : > { %v6592_v13 = vpop.eup %6591  ;;  %v1085_v41 = vor.u32 %v1083_v58, %v1082_v27  ;;  %v7439_v7 = vsel %vm7286_vm2, %v1082_v27, 0  ;;  %v1075_v36 = vrot.slane %v1073_v17, 7  ;;  %v8990_v63 = vunpack.c.h.bf16 %v6859_v39  ;;  %3464 = vmatpush1.bf16.msra.mxu0 %v6204_v24 }
  0xfa   : > { %8989 = vst [vmem:[#allocation15_spill] sm:$0xff] %v7439_v7  ;;  %v7448_v59 = vadd.f32 %v6592_v13, %v7241_v42  ;;  %v7451_v45 = vsel %vm1327_vm3, %v1394_v20, %v1398_v50  ;;  %v1348_v49 = vshll.u32 %v7439_v7, 16  ;;  %v1025_v19 = vmax.f32 %v7423_v8, 0.0  ;;  %3465 = vmatprep.subr.bf16.mxu0 %v6212_v55 }
  0xfb   : > { %v987_v35 = vmul.f32 %v7324_v16, %v8990_v63  ;;  %v6218_v16 = vld [vmem:[%s8903_s3 + $0x554] ss:$8 sps:$4 sm:$0xff]   ;;  %3149 = vmatprep.mubr.bf16.mxu0 %v7451_v45  ;;  %v7461_v57 = vsel %vm7286_vm2, 0, %v1085_v41  ;;  %v1078_v58 = vor.u32 %v1076_v14, %v1075_v36  ;;  %v7465_v50 = vsel %vm7286_vm2, %v1075_v36, 0  ;;  %v6216_v36 = vld [vmem:[%s8903_s3 + $0x550] ss:$8 sps:$4 sm:$0xff]  }
  0xfc   : > { %8991 = vst [vmem:[#allocation16_spill] sm:$0xff] %v7465_v50  ;;  %v1101_v24 = vshrl.u32 %v1056_v53, 16  ;;  %v7468_v28 = vadd.f32 %v6592_v13, %v7244_v34  ;;  %v1341_v8 = vshrl.u32 %v7461_v57, 16  ;;  %v1343_v55 = vshll.u32 %v7461_v57, 16 }
  0xfd   : > { %v1336_v27 = vshll.u32 %v7465_v50, 16  ;;  %v6594_v17 = vpop.eup %6593  ;;  %v1350_v20 = vrot.slane %v1348_v49, 1  ;;  %v7475_v41 = vsel %vm7286_vm2, 0, %v1078_v58  ;;  %v1104_v63 = vshll.u32 %v1056_v53, 16  ;;  %3466 = vmatpush1.bf16.msra.mxu0 %v6210_v3  ;;  %v6224_v58 = vld [vmem:[%s8903_s3 + $0x564] ss:$8 sps:$4 sm:$0xff]  }
  0xfe   : > { %8992 = vst [vmem:[#allocation17_spill] sm:$0xff] %v7475_v41  ;;  %v1103_v14 = vrot.slane %v1101_v24, 7  ;;  %v7481_v13 = vadd.f32 %v6594_v17, %v7241_v42  ;;  %v7484_v7 = vadd.f32 %v6594_v17, %v7244_v34  ;;  %v1345_v50 = vrot.slane %v1343_v55, 1  ;;  %3467 = vmatprep.subr.bf16.mxu0 %v6218_v16 }
  0xff   : > { %v1329_v49 = vshrl.u32 %v7475_v41, 16  ;;  %v1331_v53 = vshll.u32 %v7475_v41, 16  ;;  %v1338_v3 = vrot.slane %v1336_v27, 1  ;;  %v1027_v55 = vmax.f32 %v987_v35, 0.0  ;;  %v6222_v35 = vld [vmem:[%s8903_s3 + $0x560] ss:$8 sps:$4 sm:$0xff]  }
 0x100   : > { %v1106_v24 = vor.u32 %v1104_v63, %v1103_v14  ;;  %v7493_v6 = vsel %vm7286_vm2, %v1103_v14, 0  ;;  %v6596_v18 = vpop.eup %6595  ;;  %v1346_v56 = vor.u32 %v1345_v50, %v1341_v8  ;;  %v8993_v5 = vunpack.c.l.bf16 %v6862_v40  ;;  %v6195_v63 = vld [vmem:[%s8903_s3] ss:$8 sps:$4 sm:$0xff]  }
 0x101   : > { %v1384_v17 = vshll.u32 %v7493_v6, 16  ;;  %v7500_v0 = vadd.f32 %v6596_v18, %v7241_v42  ;;  %v7503_v41 = vadd.f32 %v6596_v18, %v7244_v34  ;;  %v1333_v27 = vrot.slane %v1331_v53, 1  ;;  %3468 = vmatpush1.bf16.msra.mxu0 %v6216_v36  ;;  %v6230_v18 = vld [vmem:[%s8903_s3 + $0x574] ss:$8 sps:$4 sm:$0xff]  }
 0x102   : > { %v984_v16 = vmul.f32 %v7327_v37, %v8993_v5  ;;  %v7507_v14 = vsel %vm7286_vm2, 0, %v1106_v24  ;;  %v1351_v40 = vsel %vm1327_vm3, %v1346_v56, %v1350_v20  ;;  %3469 = vmatprep.subr.bf16.mxu0 %v6224_v58  ;;  %v1059_v36 = vpack.c.bf16 %v1027_v55, %v1025_v19  ;;  %v6203_v58 = vld [vmem:[%s8903_s3 + $0x14] ss:$8 sps:$4 sm:$0xff]  }
 0x103   : > { %v1377_v37 = vshrl.u32 %v7507_v14, 16  ;;  %v1379_v5 = vshll.u32 %v7507_v14, 16  ;;  %v1386_v50 = vrot.slane %v1384_v17, 1  ;;  %1761 = vmatprep.mubr.bf16.mxu1 %v1351_v40  ;;  %v1334_v8 = vor.u32 %v1333_v27, %v1329_v49 }
 0x104   : > { %v8994_v53 = vunpack.c.l.bf16 %v6859_v39  ;;  %v1024_v20 = vmax.f32 %v984_v16, 0.0  ;;  %v8995_v17 = vunpack.c.h.bf16 %v6870_v46  ;;  %v8996_v49 = vunpack.c.h.bf16 %v6865_v43 }
 0x105   : > { %v1381_v24 = vrot.slane %v1379_v5, 1  ;;  %v8997_v19 = vunpack.c.l.bf16 %v6870_v46  ;;  %v1122_v55 = vshrl.u32 %v1059_v36, 16  ;;  %v1125_v16 = vshll.u32 %v1059_v36, 16  ;;  %3470 = vmatpush1.bf16.msra.mxu0 %v6222_v35  ;;  %v6228_v46 = vld [vmem:[%s8903_s3 + $0x570] ss:$8 sps:$4 sm:$0xff]  }
 0x106   : > { %v986_v56 = vmul.f32 %v7321_v1, %v8994_v53  ;;  %v989_v40 = vmul.f32 %v7365_v12, %v8995_v17  ;;  %v991_v27 = vmul.f32 %v7351_v9, %v8996_v49  ;;  %v1339_v1 = vsel %vm1327_vm3, %v1334_v8, %v1338_v3  ;;  %3471 = vmatprep.subr.bf16.mxu0 %v6230_v18  ;;  %v6201_v9 = vld [vmem:[%s8903_s3 + $0x10] ss:$8 sps:$4 sm:$0xff]  }
 0x107   : > { %v988_v39 = vmul.f32 %v7354_v54, %v8997_v19  ;;  %1762 = vmatmul.mubr.bf16.vlgmr.msra.gmra.mrb[0].mxu1 %v1339_v1  ;;  %v1382_v53 = vor.u32 %v1381_v24, %v1377_v37  ;;  %v8998_v12 = vunpack.c.l.bf16 %v6865_v43  ;;  %v1124_v54 = vrot.slane %v1122_v55, 7 }
 0x108   : > { %v1026_v5 = vmax.f32 %v986_v56, 0.0  ;;  %v1029_v42 = vmax.f32 %v989_v40, 0.0  ;;  %v1031_v34 = vmax.f32 %v991_v27, 0.0  ;;  %1771 = vmatprep.mubr.bf16.mxu1 %v7330_v25  ;;  %2003 = vmatpush1.bf16.msra.mxu1 %v6195_v63  ;;  %v8999_v37 = vunpack.c.h.bf16 %v6902_v2  ;;  %v6209_v25 = vld [vmem:[%s8903_s3 + $0x24] ss:$8 sps:$4 sm:$0xff]  }
 0x109   : > { %v990_v17 = vmul.f32 %v7345_v61, %v8998_v12  ;;  %v1028_v35 = vmax.f32 %v988_v39, 0.0  ;;  %v6236_v61 = vld [vmem:[%s8903_s3 + $0x584] ss:$8 sps:$4 sm:$0xff]   ;;  %v7554_v18 = vsel %vm1327_vm3, %v1382_v53, %v1386_v50  ;;  %2004 = vmatprep.subr.bf16.mxu1 %v6203_v58  ;;  %v9000_v36 = vunpack.c.h.bf16 %v6891_v60  ;;  %v6207_v50 = vld [vmem:[%s8903_s3 + $0x20] ss:$8 sps:$4 sm:$0xff]   ;;  %3472 = vmatpush1.bf16.msra.mxu0 %v6228_v46 }
 0x10a   : > { %v1058_v3 = vpack.c.bf16 %v1026_v5, %v1024_v20  ;;  %v993_v43 = vmul.f32 %v7404_v21, %v8999_v37  ;;  %v1061_v8 = vpack.c.bf16 %v1031_v34, %v1029_v42  ;;  %3150 = vmatmul.mubr.bf16.gmra.mrb[4].mxu0 %v7554_v18  ;;  %v1127_v21 = vor.u32 %v1125_v16, %v1124_v54  ;;  %v6215_v39 = vld [vmem:[%s8903_s3 + $0x34] ss:$8 sps:$4 sm:$0xff]  }
 0x10b   : > { %v1030_v63 = vmax.f32 %v990_v17, 0.0  ;;  %v995_v56 = vmul.f32 %v7382_v51, %v9000_v36  ;;  %v7565_v20 = vsel %vm7286_vm2, %v1124_v54, 0  ;;  %v6234_v51 = vld [vmem:[%s8903_s3 + $0x580] ss:$8 sps:$4 sm:$0xff]   ;;  %3473 = vmatprep.subr.bf16.mxu0 %v6236_v61  ;;  %v6242_v17 = vld [vmem:[%s8903_s3 + $0x594] ss:$8 sps:$4 sm:$0xff]  }
 0x10c   : > { %v1115_v24 = vshrl.u32 %v1058_v3, 16  ;;  %v1118_v58 = vshll.u32 %v1058_v3, 16  ;;  %v1420_v42 = vshll.u32 %v7565_v20, 16  ;;  %v1136_v34 = vshrl.u32 %v1061_v8, 16  ;;  %2005 = vmatpush1.bf16.msra.mxu1 %v6201_v9  ;;  %v6213_v54 = vld [vmem:[%s8903_s3 + $0x30] ss:$8 sps:$4 sm:$0xff]  }
 0x10d   : > { %v1139_v40 = vshll.u32 %v1061_v8, 16  ;;  %v1060_v49 = vpack.c.bf16 %v1030_v63, %v1028_v35  ;;  %v7576_v27 = vsel %vm7286_vm2, 0, %v1127_v21  ;;  %v1033_v1 = vmax.f32 %v993_v43, 0.0  ;;  %2006 = vmatprep.subr.bf16.mxu1 %v6209_v25  ;;  %3474 = vmatpush1.bf16.msra.mxu0 %v6234_v51  ;;  %v6240_v8 = vld [vmem:[%s8903_s3 + $0x590] ss:$8 sps:$4 sm:$0xff]  }
 0x10e   : > { %v1117_v19 = vrot.slane %v1115_v24, 7  ;;  %v1035_v55 = vmax.f32 %v995_v56, 0.0  ;;  %v1413_v16 = vshrl.u32 %v7576_v27, 16  ;;  %v1415_v5 = vshll.u32 %v7576_v27, 16  ;;  %v6221_v36 = vld [vmem:[%s8903_s3 + $0x44] ss:$8 sps:$4 sm:$0xff]   ;;  %3475 = vmatprep.subr.bf16.mxu0 %v6242_v17 }
 0x10f   : > { %v1422_v53 = vrot.slane %v1420_v42, 1  ;;  %v1138_v12 = vrot.slane %v1136_v34, 7  ;;  %v1129_v3 = vshrl.u32 %v1060_v49, 16  ;;  %v1132_v35 = vshll.u32 %v1060_v49, 16  ;;  %1772 = vmatmul.mubr.bf16.gmra.mrb[4].mxu1 %v7348_v52 }
 0x110   : > { %v1120_v46 = vor.u32 %v1118_v58, %v1117_v19  ;;  %v7588_v9 = vsel %vm7286_vm2, %v1117_v19, 0  ;;  %v1417_v37 = vrot.slane %v1415_v5, 1  ;;  %1781 = vmatprep.mubr.bf16.mxu1 %v7451_v45  ;;  %2007 = vmatpush1.bf16.msra.mxu1 %v6207_v50  ;;  %v1063_v21 = vpack.c.bf16 %v1035_v55, %v1033_v1  ;;  %v6248_v50 = vld [vmem:[%s8903_s3 + $0x5a4] ss:$8 sps:$4 sm:$0xff]   ;;  %v6246_v5 = vld [vmem:[%s8903_s3 + $0x5a0] ss:$8 sps:$4 sm:$0xff]  }
 0x111   : > { %v1408_v43 = vshll.u32 %v7588_v9, 16  ;;  %v1141_v61 = vor.u32 %v1139_v40, %v1138_v12  ;;  %v7597_v25 = vsel %vm7286_vm2, %v1138_v12, 0  ;;  %v1131_v56 = vrot.slane %v1129_v3, 7  ;;  %2008 = vmatprep.subr.bf16.mxu1 %v6215_v39  ;;  %3476 = vmatpush1.bf16.msra.mxu0 %v6240_v8  ;;  %v6219_v12 = vld [vmem:[%s8903_s3 + $0x40] ss:$8 sps:$4 sm:$0xff]  }
 0x112   : > { %v7605_v63 = vsel %vm7286_vm2, 0, %v1120_v46  ;;  %v1444_v52 = vshll.u32 %v7597_v25, 16  ;;  %v1418_v24 = vor.u32 %v1417_v37, %v1413_v16  ;;  %v1150_v46 = vshrl.u32 %v1063_v21, 16  ;;  %3477 = vmatprep.subr.bf16.mxu0 %v6248_v50 }
 0x113   : > { %v1401_v58 = vshrl.u32 %v7605_v63, 16  ;;  %v1403_v42 = vshll.u32 %v7605_v63, 16  ;;  %v1410_v34 = vrot.slane %v1408_v43, 1  ;;  %v7618_v40 = vsel %vm7286_vm2, 0, %v1141_v61 }
 0x114   : > { %v1446_v49 = vrot.slane %v1444_v52, 1  ;;  %v1134_v51 = vor.u32 %v1132_v35, %v1131_v56  ;;  %v7622_v19 = vsel %vm7286_vm2, %v1131_v56, 0  ;;  %v7625_v1 = vsel %vm1327_vm3, %v1418_v24, %v1422_v53  ;;  %2009 = vmatpush1.bf16.msra.mxu1 %v6213_v54  ;;  %v6254_v54 = vld [vmem:[%s8903_s3 + $0x5b4] ss:$8 sps:$4 sm:$0xff]  }
 0x115   : > { %v1405_v55 = vrot.slane %v1403_v42, 1  ;;  %v1437_v39 = vshrl.u32 %v7618_v40, 16  ;;  %v1439_v16 = vshll.u32 %v7618_v40, 16  ;;  %3159 = vmatprep.mubr.bf16.mxu0 %v7625_v1  ;;  %v1432_v17 = vshll.u32 %v7622_v19, 16  ;;  %2010 = vmatprep.subr.bf16.mxu1 %v6221_v36  ;;  %v6227_v52 = vld [vmem:[%s8903_s3 + $0x54] ss:$8 sps:$4 sm:$0xff]  }
 0x116   : > { %v7638_v53 = vsel %vm7286_vm2, 0, %v1134_v51  ;;  %v1153_v3 = vshll.u32 %v1063_v21, 16  ;;  %v1152_v56 = vrot.slane %v1150_v46, 7  ;;  %v9001_v21 = vunpack.c.l.bf16 %v6902_v2  ;;  %3478 = vmatpush1.bf16.msra.mxu0 %v6246_v5  ;;  %v6252_v2 = vld [vmem:[%s8903_s3 + $0x5b0] ss:$8 sps:$4 sm:$0xff]  }
 0x117   : > { %v1406_v35 = vor.u32 %v1405_v55, %v1401_v58  ;;  %v1441_v37 = vrot.slane %v1439_v16, 1  ;;  %v1425_v43 = vshrl.u32 %v7638_v53, 16  ;;  %v1427_v61 = vshll.u32 %v7638_v53, 16  ;;  %1782 = vmatmul.mubr.bf16.gmra.mrb[8].mxu1 %v7554_v18  ;;  %3479 = vmatprep.subr.bf16.mxu0 %v6254_v54 }
 0x118   : > { %v1434_v8 = vrot.slane %v1432_v17, 1  ;;  %v992_v24 = vmul.f32 %v7393_v4, %v9001_v21  ;;  %v9002_v36 = vunpack.c.l.bf16 %v6891_v60  ;;  %v9003_v55 = vunpack.c.h.bf16 %v6934_v33  ;;  %1791 = vmatprep.mubr.bf16.mxu1 %v7625_v1  ;;  %2011 = vmatpush1.bf16.msra.mxu1 %v6219_v12  ;;  %v6225_v17 = vld [vmem:[%s8903_s3 + $0x50] ss:$8 sps:$4 sm:$0xff]   ;;  %v6233_v12 = vld [vmem:[%s8903_s3 + $0x64] ss:$8 sps:$4 sm:$0xff]  }
 0x119   : > { %v7656_v42 = vsel %vm1327_vm3, %v1406_v35, %v1410_v34  ;;  %v1442_v50 = vor.u32 %v1441_v37, %v1437_v39  ;;  %v1429_v51 = vrot.slane %v1427_v61, 1  ;;  %v1155_v60 = vor.u32 %v1153_v3, %v1152_v56  ;;  %2012 = vmatprep.subr.bf16.mxu1 %v6227_v52 }
 0x11a   : > { %v994_v58 = vmul.f32 %v7376_v44, %v9002_v36  ;;  %v997_v16 = vmul.f32 %v7429_v11, %v9003_v55  ;;  %3160 = vmatmul.mubr.bf16.gmra.mrb[8].mxu0 %v7656_v42  ;;  %v7669_v44 = vsel %vm7286_vm2, %v1152_v56, 0  ;;  %v1032_v4 = vmax.f32 %v992_v24, 0.0  ;;  %v6260_v11 = vld [vmem:[%s8903_s3 + $0x5c4] ss:$8 sps:$4 sm:$0xff]   ;;  %v6258_v24 = vld [vmem:[%s8903_s3 + $0x5c0] ss:$8 sps:$4 sm:$0xff]  }
 0x11b   : > { %v7675_v39 = vsel %vm1327_vm3, %v1442_v50, %v1446_v49  ;;  %v1430_v5 = vor.u32 %v1429_v51, %v1425_v43  ;;  %v1468_v46 = vshll.u32 %v7669_v44, 16  ;;  %v9004_v3 = vunpack.c.h.bf16 %v6917_v10  ;;  %3480 = vmatpush1.bf16.msra.mxu0 %v6252_v2  ;;  %v6231_v51 = vld [vmem:[%s8903_s3 + $0x60] ss:$8 sps:$4 sm:$0xff]  }
 0x11c   : > { %v1034_v34 = vmax.f32 %v994_v58, 0.0  ;;  %3169 = vmatprep.mubr.bf16.mxu0 %v7675_v39  ;;  %v7687_v49 = vsel %vm7286_vm2, 0, %v1155_v60  ;;  %v1037_v43 = vmax.f32 %v997_v16, 0.0  ;;  %v9005_v61 = vunpack.c.l.bf16 %v6934_v33  ;;  %3481 = vmatprep.subr.bf16.mxu0 %v6260_v11 }
 0x11d   : > { %v999_v35 = vmul.f32 %v7410_v48, %v9004_v3  ;;  %v7696_v48 = vsel %vm1327_vm3, %v1430_v5, %v1434_v8  ;;  %v1461_v54 = vshrl.u32 %v7687_v49, 16  ;;  %v1463_v52 = vshll.u32 %v7687_v49, 16  ;;  %2013 = vmatpush1.bf16.msra.mxu1 %v6225_v17 }
 0x11e   : > { %v1062_v37 = vpack.c.bf16 %v1034_v34, %v1032_v4  ;;  %v996_v56 = vmul.f32 %v7418_v23, %v9005_v61  ;;  %v1470_v21 = vrot.slane %v1468_v46, 1  ;;  %v9006_v33 = vunpack.c.l.bf16 %v6917_v10  ;;  %v6266_v10 = vld [vmem:[%s8903_s3 + $0x5d4] ss:$8 sps:$4 sm:$0xff]   ;;  %2014 = vmatprep.subr.bf16.mxu1 %v6233_v12 }
 0x11f   : > { %v1039_v50 = vmax.f32 %v999_v35, 0.0  ;;  %v1465_v8 = vrot.slane %v1463_v52, 1  ;;  %v9007_v16 = vunpack.c.h.bf16 %v6944_v47  ;;  %v9008_v60 = vunpack.c.h.bf16 %v6939_v38  ;;  %v6239_v34 = vld [vmem:[%s8903_s3 + $0x74] ss:$8 sps:$4 sm:$0xff]   ;;  %1792 = vmatmul.mubr.bf16.gmra.mrb[12].mxu1 %v7656_v42  ;;  %3482 = vmatpush1.bf16.msra.mxu0 %v6258_v24 }
 0x120   : > { %v1143_v36 = vshrl.u32 %v1062_v37, 16  ;;  %v1146_v58 = vshll.u32 %v1062_v37, 16  ;;  %v998_v23 = vmul.f32 %v7407_v22, %v9006_v33  ;;  %v1036_v55 = vmax.f32 %v996_v56, 0.0  ;;  %v6264_v37 = vld [vmem:[%s8903_s3 + $0x5d0] ss:$8 sps:$4 sm:$0xff]   ;;  %1801 = vmatprep.mubr.bf16.mxu1 %v7675_v39  ;;  %3483 = vmatprep.subr.bf16.mxu0 %v6266_v10 }
 0x121   : > { %v1001_v2 = vmul.f32 %v7468_v28, %v9007_v16  ;;  %v1003_v4 = vmul.f32 %v7435_v26, %v9008_v60  ;;  %v1065_v11 = vpack.c.bf16 %v1039_v50, %v1037_v43  ;;  %v9009_v17 = vunpack.c.l.bf16 %v6944_v47  ;;  %2015 = vmatpush1.bf16.msra.mxu1 %v6231_v51  ;;  %v6270_v16 = vld [vmem:[%s8903_s3 + $0x5e0] ss:$8 sps:$4 sm:$0xff]  }
 0x122   : > { %v1145_v22 = vrot.slane %v1143_v36, 7  ;;  %v1038_v5 = vmax.f32 %v998_v23, 0.0  ;;  %v1466_v46 = vor.u32 %v1465_v8, %v1461_v54  ;;  %v9010_v35 = vunpack.c.l.bf16 %v6939_v38  ;;  %3170 = vmatmul.mubr.bf16.gmra.mrb[12].mxu0 %v7696_v48  ;;  %v6272_v38 = vld [vmem:[%s8903_s3 + $0x5e4] ss:$8 sps:$4 sm:$0xff]   ;;  %v6237_v54 = vld [vmem:[%s8903_s3 + $0x70] ss:$8 sps:$4 sm:$0xff]   ;;  %2016 = vmatprep.subr.bf16.mxu1 %v6239_v34 }
 0x123   : > { %v1000_v28 = vmul.f32 %v7448_v59, %v9009_v17  ;;  %v1041_v26 = vmax.f32 %v1001_v2, 0.0  ;;  %v1043_v3 = vmax.f32 %v1003_v4, 0.0  ;;  %v1164_v43 = vshrl.u32 %v1065_v11, 16  ;;  %3484 = vmatpush1.bf16.msra.mxu0 %v6264_v37 }
 0x124   : > { %v1002_v12 = vmul.f32 %v7432_v32, %v9010_v35  ;;  %v1148_v47 = vor.u32 %v1146_v58, %v1145_v22  ;;  %v7735_v59 = vsel %vm7286_vm2, %v1145_v22, 0  ;;  %v1167_v61 = vshll.u32 %v1065_v11, 16  ;;  %3485 = vmatprep.subr.bf16.mxu0 %v6272_v38  ;;  %v6278_v22 = vld [vmem:[%s8903_s3 + $0x5f4] ss:$8 sps:$4 sm:$0xff]  }
 0x125   : > { %v7741_v32 = vsel %vm1327_vm3, %v1466_v46, %v1470_v21  ;;  %v1456_v56 = vshll.u32 %v7735_v59, 16  ;;  %v1064_v52 = vpack.c.bf16 %v1038_v5, %v1036_v55  ;;  %v1067_v24 = vpack.c.bf16 %v1043_v3, %v1041_v26  ;;  %v6245_v21 = vld [vmem:[%s8903_s3 + $0x84] ss:$8 sps:$4 sm:$0xff]   ;;  %2017 = vmatpush1.bf16.msra.mxu1 %v6237_v54  ;;  %v6243_v5 = vld [vmem:[%s8903_s3 + $0x80] ss:$8 sps:$4 sm:$0xff]  }
 0x126   : > { %3179 = vmatprep.mubr.bf16.mxu0 %v7741_v32  ;;  %v7750_v36 = vsel %vm7286_vm2, 0, %v1148_v47  ;;  %v1166_v58 = vrot.slane %v1164_v43, 7  ;;  %v1040_v50 = vmax.f32 %v1000_v28, 0.0  ;;  %v1042_v33 = vmax.f32 %v1002_v12, 0.0  ;;  %2018 = vmatprep.subr.bf16.mxu1 %v6245_v21  ;;  %v6251_v26 = vld [vmem:[%s8903_s3 + $0x94] ss:$8 sps:$4 sm:$0xff]  }
 0x127   : > { %v1449_v23 = vshrl.u32 %v7750_v36, 16  ;;  %v1451_v8 = vshll.u32 %v7750_v36, 16  ;;  %v1458_v51 = vrot.slane %v1456_v56, 1  ;;  %v1157_v55 = vshrl.u32 %v1064_v52, 16  ;;  %1802 = vmatmul.mubr.bf16.gmra.mrb[16].mxu1 %v7696_v48  ;;  %3486 = vmatpush1.bf16.msra.mxu0 %v6270_v16  ;;  %v6276_v56 = vld [vmem:[%s8903_s3 + $0x5f0] ss:$8 sps:$4 sm:$0xff]  }
 0x128   : > { %v1169_v2 = vor.u32 %v1167_v61, %v1166_v58  ;;  %v7762_v60 = vsel %vm7286_vm2, %v1166_v58, 0  ;;  %v1160_v4 = vshll.u32 %v1064_v52, 16  ;;  %v1178_v10 = vshrl.u32 %v1067_v24, 16  ;;  %1811 = vmatprep.mubr.bf16.mxu1 %v7741_v32  ;;  %3487 = vmatprep.subr.bf16.mxu0 %v6278_v22  ;;  %v6284_v58 = vld [vmem:[%s8903_s3 + $0x604] ss:$8 sps:$4 sm:$0xff]  }
 0x129   : > { %v1453_v34 = vrot.slane %v1451_v8, 1  ;;  %v1492_v11 = vshll.u32 %v7762_v60, 16  ;;  %v1159_v17 = vrot.slane %v1157_v55, 7  ;;  %v1181_v28 = vshll.u32 %v1067_v24, 16  ;;  %2019 = vmatpush1.bf16.msra.mxu1 %v6243_v5  ;;  %v6257_v16 = vld [vmem:[%s8903_s3 + $0xa4] ss:$8 sps:$4 sm:$0xff]  }
 0x12a   : > { %v7773_v46 = vsel %vm7286_vm2, 0, %v1169_v2  ;;  %v1180_v3 = vrot.slane %v1178_v10, 7  ;;  %v1066_v35 = vpack.c.bf16 %v1042_v33, %v1040_v50  ;;  %v9011_v12 = vunpack.c.h.bf16 %v6983_v31  ;;  %2020 = vmatprep.subr.bf16.mxu1 %v6251_v26 }
 0x12b   : > { %v1454_v47 = vor.u32 %v1453_v34, %v1449_v23  ;;  %v1485_v43 = vshrl.u32 %v7773_v46, 16  ;;  %v1487_v61 = vshll.u32 %v7773_v46, 16  ;;  %v1494_v38 = vrot.slane %v1492_v11, 1  ;;  %v6249_v23 = vld [vmem:[%s8903_s3 + $0x90] ss:$8 sps:$4 sm:$0xff]   ;;  %3488 = vmatpush1.bf16.msra.mxu0 %v6276_v56 }
 0x12c   : > { %v7781_v37 = vmul.f32 %v7503_v41, %v9011_v12  ;;  %v1162_v54 = vor.u32 %v1160_v4, %v1159_v17  ;;  %v7792_v41 = vsel %vm7286_vm2, %v1159_v17, 0  ;;  %v1183_v52 = vor.u32 %v1181_v28, %v1180_v3  ;;  %3795 = vmatprep.subr.bf16.mxu0 %v6284_v58 }
 0x12d   : > { %v7796_v24 = vsel %vm7286_vm2, %v1180_v3, 0  ;;  %v7802_v21 = vsel %vm1327_vm3, %v1454_v47, %v1458_v51  ;;  %v1489_v50 = vrot.slane %v1487_v61, 1  ;;  %v1480_v33 = vshll.u32 %v7792_v41, 16  ;;  %2021 = vmatpush1.bf16.msra.mxu1 %v6249_v23 }
 0x12e   : > { %v1516_v8 = vshll.u32 %v7796_v24, 16  ;;  %3180 = vmatmul.mubr.bf16.gmra.mrb[16].mxu0 %v7802_v21  ;;  %v7812_v55 = vsel %vm7286_vm2, 0, %v1162_v54  ;;  %v7816_v51 = vsel %vm7286_vm2, 0, %v1183_v52  ;;  %v1171_v2 = vshrl.u32 %v1066_v35, 16  ;;  %2022 = vmatprep.subr.bf16.mxu1 %v6257_v16  ;;  %v6263_v52 = vld [vmem:[%s8903_s3 + $0xb4] ss:$8 sps:$4 sm:$0xff]  }
 0x12f   : > { %v1174_v4 = vshll.u32 %v1066_v35, 16  ;;  %v1490_v10 = vor.u32 %v1489_v50, %v1485_v43  ;;  %v1473_v22 = vshrl.u32 %v7812_v55, 16  ;;  %v1475_v34 = vshll.u32 %v7812_v55, 16  ;;  %v6255_v35 = vld [vmem:[%s8903_s3 + $0xa0] ss:$8 sps:$4 sm:$0xff]   ;;  %1812 = vmatmul.mubr.bf16.gmra.mrb[20].mxu1 %v7802_v21 }
 0x130   : > { %v1482_v11 = vrot.slane %v1480_v33, 1  ;;  %v1509_v5 = vshrl.u32 %v7816_v51, 16  ;;  %v1511_v17 = vshll.u32 %v7816_v51, 16  ;;  %v1518_v28 = vrot.slane %v1516_v8, 1 }
 0x131   : > { %v1173_v26 = vrot.slane %v1171_v2, 7  ;;  %v7826_v3 = vsel %vm1327_vm3, %v1490_v10, %v1494_v38  ;;  %v1477_v12 = vrot.slane %v1475_v34, 1  ;;  %v9012_v47 = vunpack.c.h.bf16 %v6974_v30  ;;  %2023 = vmatpush1.bf16.msra.mxu1 %v6255_v35  ;;  %v6269_v34 = vld [vmem:[%s8903_s3 + $0xc4] ss:$8 sps:$4 sm:$0xff]  }
 0x132   : > { %v1045_v61 = vmax.f32 %v7781_v37, 0.0  ;;  %3189 = vmatprep.mubr.bf16.mxu0 %v7826_v3  ;;  %v1513_v56 = vrot.slane %v1511_v17, 1  ;;  %v9013_v58 = vunpack.c.l.bf16 %v6983_v31  ;;  %v9014_v33 = vunpack.c.l.bf16 %v6974_v30  ;;  %1821 = vmatprep.mubr.bf16.mxu1 %v7826_v3 }
 0x133   : > { %v1007_v43 = vmul.f32 %v7484_v7, %v9012_v47  ;;  %v1176_v54 = vor.u32 %v1174_v4, %v1173_v26  ;;  %v7838_v38 = vsel %vm7286_vm2, %v1173_v26, 0  ;;  %v1478_v7 = vor.u32 %v1477_v12, %v1473_v22  ;;  %2024 = vmatprep.subr.bf16.mxu1 %v6263_v52 }
 0x134   : > { %v1004_v50 = vmul.f32 %v7500_v0, %v9013_v58  ;;  %v1006_v23 = vmul.f32 %v7481_v13, %v9014_v33  ;;  %v1514_v8 = vor.u32 %v1513_v56, %v1509_v5  ;;  %v1504_v30 = vshll.u32 %v7838_v38, 16  ;;  %v6261_v13 = vld [vmem:[%s8903_s3 + $0xb0] ss:$8 sps:$4 sm:$0xff]  }
 0x135   : > { %v1047_v37 = vmax.f32 %v1007_v43, 0.0  ;;  %v7853_v16 = vsel %vm7286_vm2, 0, %v1176_v54  ;;  %v7856_v31 = vsel %vm1327_vm3, %v1478_v7, %v1482_v11  ;;  %2025 = vmatpush1.bf16.msra.mxu1 %v6261_v13  ;;  %v6275_v54 = vld [vmem:[%s8903_s3 + $0xd4] ss:$8 sps:$4 sm:$0xff]   ;;  %v6273_v33 = vld [vmem:[%s8903_s3 + $0xd0] ss:$8 sps:$4 sm:$0xff]  }
 0x136   : > { %v1044_v2 = vmax.f32 %v1004_v50, 0.0  ;;  %v1497_v0 = vshrl.u32 %v7853_v16, 16  ;;  %v1499_v4 = vshll.u32 %v7853_v16, 16  ;;  %3190 = vmatmul.mubr.bf16.gmra.mrb[20].mxu0 %v7856_v31  ;;  %v7866_v10 = vsel %vm1327_vm3, %v1514_v8, %v1518_v28  ;;  %v6267_v28 = vld [vmem:[%s8903_s3 + $0xc0] ss:$8 sps:$4 sm:$0xff]   ;;  %2026 = vmatprep.subr.bf16.mxu1 %v6269_v34 }
 0x137   : > { %v1069_v22 = vpack.c.bf16 %v1047_v37, %v1045_v61  ;;  %v1046_v11 = vmax.f32 %v1006_v23, 0.0  ;;  %3199 = vmatprep.mubr.bf16.mxu0 %v7866_v10  ;;  %v1506_v47 = vrot.slane %v1504_v30, 1  ;;  %1822 = vmatmul.mubr.bf16.gmra.mrb[24].mxu1 %v7856_v31 }
 0x138   : > { %v1501_v5 = vrot.slane %v1499_v4, 1  ;;  %1831 = vmatprep.mubr.bf16.mxu1 %v7866_v10 }
 0x139   : > { %v1192_v17 = vshrl.u32 %v1069_v22, 16  ;;  %v1195_v26 = vshll.u32 %v1069_v22, 16  ;;  %v1068_v12 = vpack.c.bf16 %v1046_v11, %v1044_v2  ;;  %2027 = vmatpush1.bf16.msra.mxu1 %v6267_v28 }
 0x13a   : > { %v1502_v35 = vor.u32 %v1501_v5, %v1497_v0  ;;  %2028 = vmatprep.subr.bf16.mxu1 %v6275_v54  ;;  %v6281_v0 = vld [vmem:[%s8903_s3 + $0xe4] ss:$8 sps:$4 sm:$0xff]   ;;  %v6285_v54 = vld [vmem:[%s8903_s3 + $0xf0] ss:$8 sps:$4 sm:$0xff]  }
 0x13b   : > { %v1194_v43 = vrot.slane %v1192_v17, 7  ;;  %v1185_v61 = vshrl.u32 %v1068_v12, 16  ;;  %v1188_v56 = vshll.u32 %v1068_v12, 16  ;;  %v6287_v12 = vld [vmem:[%s8903_s3 + $0xf4] ss:$8 sps:$4 sm:$0xff]  }
 0x13c   : > { %v7885_v7 = vsel %vm1327_vm3, %v1502_v35, %v1506_v47 }
 0x13d   : > { %v1197_v52 = vor.u32 %v1195_v26, %v1194_v43  ;;  %v7881_v58 = vsel %vm7286_vm2, %v1194_v43, 0  ;;  %v1187_v50 = vrot.slane %v1185_v61, 7  ;;  %2029 = vmatpush1.bf16.msra.mxu1 %v6273_v33  ;;  %v6279_v26 = vld [vmem:[%s8903_s3 + $0xe0] ss:$8 sps:$4 sm:$0xff]   ;;  %v2157_v43 = vrot.slane %v7303_v29, 1 }
 0x13e   : > { %v2908_v37 = vshll.u32 %v7881_v58, 16  ;;  %3200 = vmatmul.mubr.bf16.gmra.mrb[24].mxu0 %v7885_v7  ;;  %2030 = vmatprep.subr.bf16.mxu1 %v6281_v0  ;;  %v9016_v0 = vld [vmem:[#allocation12_spill] sm:$0xff] }
 0x13f   : > { %v7894_v23 = vsel %vm7286_vm2, 0, %v1197_v52  ;;  %v1190_v8 = vor.u32 %v1188_v56, %v1187_v50  ;;  %v7898_v2 = vsel %vm7286_vm2, %v1187_v50, 0  ;;  %1832 = vmatmul.mubr.bf16.gmra.mrb[28].mxu1 %v7885_v7  ;;  %v2158_v52 = vrot.slane %v7294_v62, 1  ;;  %v6293_v50 = vld [vmem:[%s8903_s3 + $0x204] ss:$8 sps:$4 sm:$0xff]  }
 0x140   : > { %v2901_v4 = vshrl.u32 %v7894_v23, 16  ;;  %v2903_v30 = vshll.u32 %v7894_v23, 16  ;;  %v2896_v13 = vshll.u32 %v7898_v2, 16  ;;  %v2910_v11 = vrot.slane %v2908_v37, 1  ;;  %2034 = vmatprep.mubr.bf16.mxu1 %v7461_v57  ;;  %v6291_v62 = vld [vmem:[%s8903_s3 + $0x200] ss:$8 sps:$4 sm:$0xff]  }
 0x141   : > { %v7908_v22 = vsel %vm7286_vm2, 0, %v1190_v8  ;;  %2031 = vmatpush1.bf16.msra.mxu1 %v6279_v26  ;;  %v7937_v33 = vsel %vm2147_vm4, %v2157_v43, %v2158_v52  ;;  %v6299_v8 = vld [vmem:[%s8903_s3 + $0x214] ss:$8 sps:$4 sm:$0xff]   ;;  %v6305_v43 = vld [vmem:[%s8903_s3 + $0x224] ss:$8 sps:$4 sm:$0xff]  }
 0x142   : > { %v2905_v34 = vrot.slane %v2903_v30, 1  ;;  %v2889_v5 = vshrl.u32 %v7908_v22, 16  ;;  %v2891_v17 = vshll.u32 %v7908_v22, 16  ;;  %v2898_v28 = vrot.slane %v2896_v13, 1  ;;  %2032 = vmatprep.subr.bf16.mxu1 %v6287_v12  ;;  %v9017_v30 = vld [vmem:[#allocation14_spill] sm:$0xff] }
 0x143   : > { %v2163_v13 = vrot.slane %v9017_v30, 1  ;;  %v6282_v12 = vld [vmem:[%s8903_s3 + $0x600] ss:$8 sps:$4 sm:$0xff]   ;;  %v6296_v52 = vld [vmem:[%s8903_s3 + $0x624] ss:$8 sps:$4 sm:$0xff]  }
 0x144   : > { %v2906_v35 = vor.u32 %v2905_v34, %v2901_v4  ;;  %v2893_v47 = vrot.slane %v2891_v17, 1  ;;  %v2154_v4 = vrot.slane %v9016_v0, 1  ;;  %v9018_v34 = vld [vmem:[#allocation13_spill] sm:$0xff]  ;;  %v9020_v17 = vld [vmem:[#allocation11_spill] sm:$0xff] }
 0x145   : > { %2033 = vmatpush1.bf16.msra.mxu1 %v6285_v54  ;;  %v2155_v26 = vrot.slane %v9020_v17, 1  ;;  %v6288_v54 = vld [vmem:[%s8903_s3 + $0x610] ss:$8 sps:$4 sm:$0xff]  }
 0x146   : > { %v7922_v61 = vsel %vm1327_vm3, %v2906_v35, %v2910_v11  ;;  %v2894_v56 = vor.u32 %v2893_v47, %v2889_v5  ;;  %2405 = vmatprep.subr.bf16.mxu1 %v6293_v50  ;;  %v2164_v11 = vrot.slane %v9018_v34, 1  ;;  %v9019_v5 = vld [vmem:[#allocation17_spill] sm:$0xff]  ;;  %v6303_v50 = vld [vmem:[%s8903_s3 + $0x220] ss:$8 sps:$4 sm:$0xff]   ;;  %v2170_v34 = vrot.slane %v7565_v20, 1 }
 0x147   : > { %3209 = vmatprep.mubr.bf16.mxu0 %v7922_v61  ;;  %v6290_v35 = vld [vmem:[%s8903_s3 + $0x614] ss:$8 sps:$4 sm:$0xff]   ;;  %v6297_v47 = vld [vmem:[%s8903_s3 + $0x210] ss:$8 sps:$4 sm:$0xff]  }
 0x148   : > { %v7933_v37 = vsel %vm1327_vm3, %v2894_v56, %v2898_v28  ;;  %2035 = vmatmul.mubr.bf16.vlgmr.msra.gmra.mrb[0].mxu1 %v9019_v5  ;;  %v7962_v28 = vsel %vm2147_vm4, %v2154_v4, %v2155_v26  ;;  %v7969_v56 = vsel %vm2147_vm4, %v2163_v13, %v2164_v11  ;;  %v6311_v4 = vld [vmem:[%s8903_s3 + $0x234] ss:$8 sps:$4 sm:$0xff]   ;;  %v2169_v13 = vrot.slane %v7576_v27, 1  ;;  %v6294_v11 = vld [vmem:[%s8903_s3 + $0x620] ss:$8 sps:$4 sm:$0xff]  }
 0x149   : > { %9015 = vst [vmem:[#allocation18_spill] sm:$0xff] %v7933_v37  ;;  %3210 = vmatmul.mubr.bf16.gmra.mrb[28].mxu0 %v7933_v37  ;;  %2044 = vmatprep.mubr.bf16.mxu1 %v7303_v29  ;;  %v6309_v17 = vld [vmem:[%s8903_s3 + $0x230] ss:$8 sps:$4 sm:$0xff]   ;;  %v6317_v26 = vld [vmem:[%s8903_s3 + $0x244] ss:$8 sps:$4 sm:$0xff]  }
 0x14a   : > { %3489 = vmatprep.mubr.bf16.mxu0 %v7937_v33  ;;  %2406 = vmatpush1.bf16.msra.mxu1 %v6291_v62  ;;  %v2160_v62 = vrot.slane %v7507_v14, 1 }
 0x14b   : > { %2407 = vmatprep.subr.bf16.mxu1 %v6299_v8  ;;  %v2161_v8 = vrot.slane %v7493_v6, 1  ;;  %v6302_v6 = vld [vmem:[%s8903_s3 + $0x634] ss:$8 sps:$4 sm:$0xff]  }
 0x14d   : > { %v8000_v20 = vsel %vm2147_vm4, %v2160_v62, %v2161_v8  ;;  %v2175_v62 = vrot.slane %v7618_v40, 1  ;;  %v2176_v8 = vrot.slane %v7597_v25, 1 }
 0x14e   : > { %2408 = vmatpush1.bf16.msra.mxu1 %v6297_v47  ;;  %v6308_v47 = vld [vmem:[%s8903_s3 + $0x644] ss:$8 sps:$4 sm:$0xff]  }
 0x14f   : > { %2409 = vmatprep.subr.bf16.mxu1 %v6305_v43  ;;  %v6315_v43 = vld [vmem:[%s8903_s3 + $0x240] ss:$8 sps:$4 sm:$0xff]  }
 0x150   : > { %2045 = vmatmul.mubr.bf16.gmra.mrb[4].mxu1 %v9016_v0 }
 0x151   : > { %3490 = vmatmul.mubr.bf16.vlgmr.msra.gmra.mrb[0].mxu0 %v7962_v28  ;;  %2054 = vmatprep.mubr.bf16.mxu1 %v9017_v30 }
 0x152   : > { %3796 = vmatpush1.bf16.msra.mxu0 %v6282_v12  ;;  %3499 = vmatprep.mubr.bf16.mxu0 %v7969_v56  ;;  %v8007_v12 = vsel %vm2147_vm4, %v2169_v13, %v2170_v34  ;;  %v6321_v13 = vld [vmem:[%s8903_s3 + $0x250] ss:$8 sps:$4 sm:$0xff]   ;;  %v6329_v34 = vld [vmem:[%s8903_s3 + $0x264] ss:$8 sps:$4 sm:$0xff]  }
 0x153   : > { %3797 = vmatprep.subr.bf16.mxu0 %v6290_v35  ;;  %2410 = vmatpush1.bf16.msra.mxu1 %v6303_v50  ;;  %v6300_v35 = vld [vmem:[%s8903_s3 + $0x630] ss:$8 sps:$4 sm:$0xff]   ;;  %v6323_v50 = vld [vmem:[%s8903_s3 + $0x254] ss:$8 sps:$4 sm:$0xff]  }
 0x154   : > { %2411 = vmatprep.subr.bf16.mxu1 %v6311_v4  ;;  %v6306_v4 = vld [vmem:[%s8903_s3 + $0x640] ss:$8 sps:$4 sm:$0xff]  }
 0x156   : > { %3798 = vmatpush1.bf16.msra.mxu0 %v6288_v54  ;;  %v2166_v54 = vrot.slane %v7605_v63, 1 }
 0x157   : > { %3799 = vmatprep.subr.bf16.mxu0 %v6296_v52  ;;  %2412 = vmatpush1.bf16.msra.mxu1 %v6309_v17  ;;  %v2167_v52 = vrot.slane %v7588_v9, 1  ;;  %v6314_v9 = vld [vmem:[%s8903_s3 + $0x654] ss:$8 sps:$4 sm:$0xff]   ;;  %v6320_v17 = vld [vmem:[%s8903_s3 + $0x664] ss:$8 sps:$4 sm:$0xff]  }
 0x158   : > { %2413 = vmatprep.subr.bf16.mxu1 %v6317_v26  ;;  %2055 = vmatmul.mubr.bf16.gmra.mrb[8].mxu1 %v7507_v14  ;;  %v6327_v26 = vld [vmem:[%s8903_s3 + $0x260] ss:$8 sps:$4 sm:$0xff]  }
 0x159   : > { %3500 = vmatmul.mubr.bf16.gmra.mrb[4].mxu0 %v8000_v20  ;;  %2064 = vmatprep.mubr.bf16.mxu1 %v7576_v27  ;;  %v8038_v25 = vsel %vm2147_vm4, %v2166_v54, %v2167_v52  ;;  %v2181_v54 = vrot.slane %v7687_v49, 1  ;;  %v2182_v52 = vrot.slane %v7669_v44, 1 }
 0x15a   : > { %3800 = vmatpush1.bf16.msra.mxu0 %v6294_v11  ;;  %3509 = vmatprep.mubr.bf16.mxu0 %v8007_v12  ;;  %v8045_v11 = vsel %vm2147_vm4, %v2175_v62, %v2176_v8  ;;  %v6333_v62 = vld [vmem:[%s8903_s3 + $0x270] ss:$8 sps:$4 sm:$0xff]   ;;  %v6341_v8 = vld [vmem:[%s8903_s3 + $0x284] ss:$8 sps:$4 sm:$0xff]  }
 0x15b   : > { %3801 = vmatprep.subr.bf16.mxu0 %v6302_v6  ;;  %2414 = vmatpush1.bf16.msra.mxu1 %v6315_v43  ;;  %v6312_v6 = vld [vmem:[%s8903_s3 + $0x650] ss:$8 sps:$4 sm:$0xff]   ;;  %v6335_v43 = vld [vmem:[%s8903_s3 + $0x274] ss:$8 sps:$4 sm:$0xff]  }
 0x15c   : > { %2415 = vmatprep.subr.bf16.mxu1 %v6323_v50  ;;  %v6318_v50 = vld [vmem:[%s8903_s3 + $0x660] ss:$8 sps:$4 sm:$0xff]  }
 0x15e   : > { %3802 = vmatpush1.bf16.msra.mxu0 %v6300_v35  ;;  %v2172_v35 = vrot.slane %v7638_v53, 1 }
 0x15f   : > { %3803 = vmatprep.subr.bf16.mxu0 %v6308_v47  ;;  %2416 = vmatpush1.bf16.msra.mxu1 %v6321_v13  ;;  %v2173_v47 = vrot.slane %v7622_v19, 1  ;;  %v6326_v19 = vld [vmem:[%s8903_s3 + $0x674] ss:$8 sps:$4 sm:$0xff]   ;;  %v6332_v13 = vld [vmem:[%s8903_s3 + $0x684] ss:$8 sps:$4 sm:$0xff]  }
 0x160   : > { %2417 = vmatprep.subr.bf16.mxu1 %v6329_v34  ;;  %2065 = vmatmul.mubr.bf16.gmra.mrb[12].mxu1 %v7605_v63  ;;  %v6339_v34 = vld [vmem:[%s8903_s3 + $0x280] ss:$8 sps:$4 sm:$0xff]  }
 0x161   : > { %3510 = vmatmul.mubr.bf16.gmra.mrb[8].mxu0 %v8038_v25  ;;  %2074 = vmatprep.mubr.bf16.mxu1 %v7618_v40  ;;  %v8076_v44 = vsel %vm2147_vm4, %v2172_v35, %v2173_v47  ;;  %v2187_v35 = vrot.slane %v7773_v46, 1  ;;  %v2188_v47 = vrot.slane %v7762_v60, 1 }
 0x162   : > { %3804 = vmatpush1.bf16.msra.mxu0 %v6306_v4  ;;  %3519 = vmatprep.mubr.bf16.mxu0 %v8045_v11  ;;  %v8083_v4 = vsel %vm2147_vm4, %v2181_v54, %v2182_v52  ;;  %v6345_v54 = vld [vmem:[%s8903_s3 + $0x290] ss:$8 sps:$4 sm:$0xff]   ;;  %v6353_v52 = vld [vmem:[%s8903_s3 + $0x2a4] ss:$8 sps:$4 sm:$0xff]  }
 0x163   : > { %3805 = vmatprep.subr.bf16.mxu0 %v6314_v9  ;;  %2418 = vmatpush1.bf16.msra.mxu1 %v6327_v26  ;;  %v6324_v9 = vld [vmem:[%s8903_s3 + $0x670] ss:$8 sps:$4 sm:$0xff]   ;;  %v6347_v26 = vld [vmem:[%s8903_s3 + $0x294] ss:$8 sps:$4 sm:$0xff]  }
 0x164   : > { %2419 = vmatprep.subr.bf16.mxu1 %v6335_v43  ;;  %v6330_v43 = vld [vmem:[%s8903_s3 + $0x680] ss:$8 sps:$4 sm:$0xff]  }
 0x166   : > { %3806 = vmatpush1.bf16.msra.mxu0 %v6312_v6  ;;  %v2178_v6 = vrot.slane %v7750_v36, 1 }
 0x167   : > { %3807 = vmatprep.subr.bf16.mxu0 %v6320_v17  ;;  %2420 = vmatpush1.bf16.msra.mxu1 %v6333_v62  ;;  %v2179_v17 = vrot.slane %v7735_v59, 1  ;;  %v6338_v59 = vld [vmem:[%s8903_s3 + $0x694] ss:$8 sps:$4 sm:$0xff]   ;;  %v6344_v62 = vld [vmem:[%s8903_s3 + $0x6a4] ss:$8 sps:$4 sm:$0xff]  }
 0x168   : > { %2421 = vmatprep.subr.bf16.mxu1 %v6341_v8  ;;  %2075 = vmatmul.mubr.bf16.gmra.mrb[16].mxu1 %v7638_v53  ;;  %v6351_v8 = vld [vmem:[%s8903_s3 + $0x2a0] ss:$8 sps:$4 sm:$0xff]  }
 0x169   : > { %3520 = vmatmul.mubr.bf16.gmra.mrb[12].mxu0 %v8076_v44  ;;  %2084 = vmatprep.mubr.bf16.mxu1 %v7687_v49  ;;  %v8114_v60 = vsel %vm2147_vm4, %v2178_v6, %v2179_v17  ;;  %v2193_v6 = vrot.slane %v7816_v51, 1  ;;  %v2194_v17 = vrot.slane %v7796_v24, 1 }
 0x16a   : > { %3808 = vmatpush1.bf16.msra.mxu0 %v6318_v50  ;;  %3529 = vmatprep.mubr.bf16.mxu0 %v8083_v4  ;;  %v8121_v50 = vsel %vm2147_vm4, %v2187_v35, %v2188_v47  ;;  %v6357_v35 = vld [vmem:[%s8903_s3 + $0x2b0] ss:$8 sps:$4 sm:$0xff]   ;;  %v6365_v47 = vld [vmem:[%s8903_s3 + $0x2c4] ss:$8 sps:$4 sm:$0xff]  }
 0x16b   : > { %3809 = vmatprep.subr.bf16.mxu0 %v6326_v19  ;;  %2422 = vmatpush1.bf16.msra.mxu1 %v6339_v34  ;;  %v6336_v19 = vld [vmem:[%s8903_s3 + $0x690] ss:$8 sps:$4 sm:$0xff]   ;;  %v6359_v34 = vld [vmem:[%s8903_s3 + $0x2b4] ss:$8 sps:$4 sm:$0xff]  }
 0x16c   : > { %2423 = vmatprep.subr.bf16.mxu1 %v6347_v26  ;;  %v6342_v26 = vld [vmem:[%s8903_s3 + $0x6a0] ss:$8 sps:$4 sm:$0xff]  }
 0x16e   : > { %3810 = vmatpush1.bf16.msra.mxu0 %v6324_v9  ;;  %v2184_v9 = vrot.slane %v7812_v55, 1 }
 0x16f   : > { %3811 = vmatprep.subr.bf16.mxu0 %v6332_v13  ;;  %2424 = vmatpush1.bf16.msra.mxu1 %v6345_v54  ;;  %v2185_v13 = vrot.slane %v7792_v41, 1  ;;  %v6350_v41 = vld [vmem:[%s8903_s3 + $0x6b4] ss:$8 sps:$4 sm:$0xff]   ;;  %v6356_v54 = vld [vmem:[%s8903_s3 + $0x6c4] ss:$8 sps:$4 sm:$0xff]  }
 0x170   : > { %2425 = vmatprep.subr.bf16.mxu1 %v6353_v52  ;;  %2085 = vmatmul.mubr.bf16.gmra.mrb[20].mxu1 %v7750_v36  ;;  %v6363_v52 = vld [vmem:[%s8903_s3 + $0x2c0] ss:$8 sps:$4 sm:$0xff]  }
 0x171   : > { %3530 = vmatmul.mubr.bf16.gmra.mrb[16].mxu0 %v8114_v60  ;;  %2094 = vmatprep.mubr.bf16.mxu1 %v7773_v46  ;;  %v8152_v24 = vsel %vm2147_vm4, %v2184_v9, %v2185_v13  ;;  %v6371_v9 = vld [vmem:[%s8903_s3 + $0x2d4] ss:$8 sps:$4 sm:$0xff]   ;;  %v776_v13 = vpop.xlane.xlu0 %775 }
 0x172   : > { %3812 = vmatpush1.bf16.msra.mxu0 %v6330_v43  ;;  %3539 = vmatprep.mubr.bf16.mxu0 %v8121_v50  ;;  %v8159_v43 = vsel %vm2147_vm4, %v2193_v6, %v2194_v17  ;;  %v3260_v6 = vrot.slane %v7881_v58, 1  ;;  %v6354_v17 = vld [vmem:[%s8903_s3 + $0x6c0] ss:$8 sps:$4 sm:$0xff]   ;;  %v6369_v58 = vld [vmem:[%s8903_s3 + $0x2d0] ss:$8 sps:$4 sm:$0xff]  }
 0x173   : > { %3813 = vmatprep.subr.bf16.mxu0 %v6338_v59  ;;  %2426 = vmatpush1.bf16.msra.mxu1 %v6351_v8  ;;  %v6348_v59 = vld [vmem:[%s8903_s3 + $0x6b0] ss:$8 sps:$4 sm:$0xff]   ;;  %v2191_v8 = vrot.slane %v7838_v38, 1  ;;  %v9021_v38 = vld [vmem:[#allocation8_spill] sm:$0xff] }
 0x174   : > { %2427 = vmatprep.subr.bf16.mxu1 %v6359_v34  ;;  %v3259_v34 = vrot.slane %v7894_v23, 1 }
 0x176   : > { %3814 = vmatpush1.bf16.msra.mxu0 %v6336_v19  ;;  %v779_v19 = vpop.xlane.xlu1 %778 }
 0x177   : > { %3815 = vmatprep.subr.bf16.mxu0 %v6344_v62  ;;  %2428 = vmatpush1.bf16.msra.mxu1 %v6357_v35  ;;  %v2190_v62 = vrot.slane %v7853_v16, 1  ;;  %v799_v35 = vadd.f32 %v9021_v38, %v776_v13 }
 0x178   : > { %2429 = vmatprep.subr.bf16.mxu1 %v6365_v47  ;;  %2095 = vmatmul.mubr.bf16.gmra.mrb[24].mxu1 %v7812_v55 }
 0x179   : > { %3540 = vmatmul.mubr.bf16.gmra.mrb[20].mxu0 %v8152_v24  ;;  %2104 = vmatprep.mubr.bf16.mxu1 %v7816_v51  ;;  %v8192_v47 = vsel %vm2147_vm4, %v2190_v62, %v2191_v8  ;;  %v6360_v62 = vld [vmem:[%s8903_s3 + $0x6d0] ss:$8 sps:$4 sm:$0xff]   ;;  %v5176_v13 = vmul.f32 -1.442695, %v799_v35  ;;  %v9023_v35 = vld [vmem:[#allocation16_spill] sm:$0xff] }
 0x17a   : > { %3816 = vmatpush1.bf16.msra.mxu0 %v6342_v26  ;;  %3549 = vmatprep.mubr.bf16.mxu0 %v8159_v43  ;;  %v800_v26 = vadd.f32 %v9021_v38, %v779_v19  ;;  %v9022_v19 = vld [vmem:[#allocation15_spill] sm:$0xff] }
 0x17b   : > { %3817 = vmatprep.subr.bf16.mxu0 %v6350_v41  ;;  %v6362_v41 = vld [vmem:[%s8903_s3 + $0x6d4] ss:$8 sps:$4 sm:$0xff]   ;;  %2430 = vmatpush1.bf16.msra.mxu1 %v6363_v52  ;;  %v2151_v52 = vrot.slane %v7461_v57, 1  ;;  %v2152_v37 = vrot.slane %v9022_v19, 1  ;;  %v6375_v57 = vld [vmem:[%s8903_s3 + $0x2e0] ss:$8 sps:$4 sm:$0xff]  }
 0x17c   : > { %2431 = vmatprep.subr.bf16.mxu1 %v6371_v9  ;;  %v5177_v8 = vmul.f32 -1.442695, %v800_v26  ;;  %v6368_v9 = vld [vmem:[%s8903_s3 + $0x6e4] ss:$8 sps:$4 sm:$0xff]   ;;  %v6366_v26 = vld [vmem:[%s8903_s3 + $0x6e0] ss:$8 sps:$4 sm:$0xff]  }
 0x17d   : > { %v2153_v38 = vsel %vm2147_vm4, %v2151_v52, %v2152_v37  ;;  %v2148_v52 = vrot.slane %v9019_v5, 1  ;;  %v6372_v19 = vld [vmem:[%s8903_s3 + $0x6f0] ss:$8 sps:$4 sm:$0xff]  }
 0x17e   : > { %3818 = vmatpush1.bf16.msra.mxu0 %v6348_v59  ;;  %v6377_v59 = vld [vmem:[%s8903_s3 + $0x2e4] ss:$8 sps:$4 sm:$0xff]   ;;  %6597 = vpow2.f32 %v5177_v8  ;;  %v6387_v8 = vld [vmem:[%s8903_s3 + $0x300] ss:$8 sps:$4 sm:$0xff]  }
 0x17f   : > { %3819 = vmatprep.subr.bf16.mxu0 %v6356_v54  ;;  %v8199_v54 = vsel %vm2147_vm4, %v3259_v34, %v3260_v6  ;;  %2432 = vmatpush1.bf16.msra.mxu1 %v6369_v58  ;;  %v3256_v34 = vrot.slane %v7908_v22, 1  ;;  %v3257_v6 = vrot.slane %v7898_v2, 1  ;;  %v6374_v2 = vld [vmem:[%s8903_s3 + $0x6f4] ss:$8 sps:$4 sm:$0xff]   ;;  %6599 = vpow2.f32 %v5176_v13  ;;  %v6389_v58 = vld [vmem:[%s8903_s3 + $0x304] ss:$8 sps:$4 sm:$0xff]  }
 0x180   : > { %2433 = vmatprep.subr.bf16.mxu1 %v6377_v59  ;;  %2105 = vmatmul.mubr.bf16.gmra.mrb[28].mxu1 %v7853_v16  ;;  %v2149_v59 = vrot.slane %v9023_v35, 1  ;;  %v6386_v13 = vld [vmem:[%s8903_s3 + $0x714] ss:$8 sps:$4 sm:$0xff]  }
 0x181   : > { %3550 = vmatmul.mubr.bf16.gmra.mrb[24].mxu0 %v8192_v47  ;;  %2437 = vmatprep.mubr.bf16.mxu1 %v2153_v38  ;;  %v8230_v37 = vsel %vm2147_vm4, %v3256_v34, %v3257_v6  ;;  %v6393_v6 = vld [vmem:[%s8903_s3 + $0x310] ss:$8 sps:$4 sm:$0xff]   ;;  %v6401_v38 = vld [vmem:[%s8903_s3 + $0x324] ss:$8 sps:$4 sm:$0xff]   ;;  %v6407_v35 = vld [vmem:[%s8903_s3 + $0x334] ss:$8 sps:$4 sm:$0xff]  }
 0x182   : > { %3820 = vmatpush1.bf16.msra.mxu0 %v6354_v17  ;;  %3559 = vmatprep.mubr.bf16.mxu0 %v8199_v54  ;;  %v6383_v17 = vld [vmem:[%s8903_s3 + $0x2f4] ss:$8 sps:$4 sm:$0xff]   ;;  %v2150_v5 = vsel %vm2147_vm4, %v2148_v52, %v2149_v59  ;;  %v6390_v59 = vld [vmem:[%s8903_s3 + $0x720] ss:$8 sps:$4 sm:$0xff]  }
 0x183   : > { %3821 = vmatprep.subr.bf16.mxu0 %v6362_v41  ;;  %2434 = vmatpush1.bf16.msra.mxu1 %v6375_v57  ;;  %v6381_v41 = vld [vmem:[%s8903_s3 + $0x2f0] ss:$8 sps:$4 sm:$0xff]   ;;  %v6378_v57 = vld [vmem:[%s8903_s3 + $0x700] ss:$8 sps:$4 sm:$0xff]   ;;  %v6398_v52 = vld [vmem:[%s8903_s3 + $0x734] ss:$8 sps:$4 sm:$0xff]  }
 0x184   : > { %2435 = vmatprep.subr.bf16.mxu1 %v6383_v17 }
 0x186   : > { %3822 = vmatpush1.bf16.msra.mxu0 %v6360_v62  ;;  %v6380_v62 = vld [vmem:[%s8903_s3 + $0x704] ss:$8 sps:$4 sm:$0xff]  }
 0x187   : > { %3823 = vmatprep.subr.bf16.mxu0 %v6368_v9  ;;  %2436 = vmatpush1.bf16.msra.mxu1 %v6381_v41  ;;  %v6395_v9 = vld [vmem:[%s8903_s3 + $0x314] ss:$8 sps:$4 sm:$0xff]  }
 0x188   : > { %2743 = vmatprep.subr.bf16.mxu1 %v6389_v58  ;;  %v6598_v34 = vpop.eup %6597  ;;  %v6399_v58 = vld [vmem:[%s8903_s3 + $0x320] ss:$8 sps:$4 sm:$0xff]  }
 0x189   : > { %3560 = vmatmul.mubr.bf16.gmra.mrb[28].mxu0 %v8230_v37  ;;  %v6600_v17 = vpop.eup %6599 }
 0x18a   : > { %3824 = vmatpush1.bf16.msra.mxu0 %v6366_v26  ;;  %3827 = vmatprep.mubr.bf16.mxu0 %v9017_v30  ;;  %v880_v26 = vadd.f32 1.0, %v6598_v34  ;;  %v879_v41 = vadd.f32 1.0, %v6600_v17  ;;  %v6417_v34 = vld [vmem:[%s8903_s3 + $0x350] ss:$8 sps:$4 sm:$0xff]   ;;  %v6425_v17 = vld [vmem:[%s8903_s3 + $0x364] ss:$8 sps:$4 sm:$0xff]  }
 0x18b   : > { %3825 = vmatprep.subr.bf16.mxu0 %v6374_v2  ;;  %2438 = vmatmul.mubr.bf16.vlgmr.msra.gmra.mrb[0].mxu1 %v2150_v5  ;;  %v6392_v2 = vld [vmem:[%s8903_s3 + $0x724] ss:$8 sps:$4 sm:$0xff]   ;;  %v6411_v5 = vld [vmem:[%s8903_s3 + $0x340] ss:$8 sps:$4 sm:$0xff]  }
 0x18c   : > { %2447 = vmatprep.mubr.bf16.mxu1 %v7937_v33  ;;  %2744 = vmatpush1.bf16.msra.mxu1 %v6387_v8  ;;  %v6384_v33 = vld [vmem:[%s8903_s3 + $0x710] ss:$8 sps:$4 sm:$0xff]   ;;  %6601 = vrcp.f32 %v880_v26  ;;  %v6404_v8 = vld [vmem:[%s8903_s3 + $0x744] ss:$8 sps:$4 sm:$0xff]  }
 0x18d   : > { %2745 = vmatprep.subr.bf16.mxu1 %v6395_v9  ;;  %6603 = vrcp.f32 %v879_v41  ;;  %v6419_v9 = vld [vmem:[%s8903_s3 + $0x354] ss:$8 sps:$4 sm:$0xff]   ;;  %v6416_v26 = vld [vmem:[%s8903_s3 + $0x764] ss:$8 sps:$4 sm:$0xff]  }
 0x18e   : > { %3826 = vmatpush1.bf16.msra.mxu0 %v6372_v19  ;;  %v6405_v19 = vld [vmem:[%s8903_s3 + $0x330] ss:$8 sps:$4 sm:$0xff]   ;;  %v6431_v41 = vld [vmem:[%s8903_s3 + $0x374] ss:$8 sps:$4 sm:$0xff]  }
 0x18f   : > { %4159 = vmatprep.subr.bf16.mxu0 %v6380_v62  ;;  %v6396_v62 = vld [vmem:[%s8903_s3 + $0x730] ss:$8 sps:$4 sm:$0xff]  }
 0x190   : > { %2746 = vmatpush1.bf16.msra.mxu1 %v6393_v6 }
 0x191   : > { %3828 = vmatmul.mubr.bf16.vlgmr.msra.gmra.mrb[0].mxu0 %v7507_v14  ;;  %2747 = vmatprep.subr.bf16.mxu1 %v6401_v38 }
 0x192   : > { %4160 = vmatpush1.bf16.msra.mxu0 %v6378_v57  ;;  %3837 = vmatprep.mubr.bf16.mxu0 %v7576_v27  ;;  %v6402_v57 = vld [vmem:[%s8903_s3 + $0x740] ss:$8 sps:$4 sm:$0xff]  }
 0x193   : > { %4161 = vmatprep.subr.bf16.mxu0 %v6386_v13  ;;  %2448 = vmatmul.mubr.bf16.gmra.mrb[4].mxu1 %v7962_v28  ;;  %v6413_v28 = vld [vmem:[%s8903_s3 + $0x344] ss:$8 sps:$4 sm:$0xff]   ;;  %v6410_v13 = vld [vmem:[%s8903_s3 + $0x754] ss:$8 sps:$4 sm:$0xff]  }
 0x194   : > { %2457 = vmatprep.mubr.bf16.mxu1 %v7969_v56  ;;  %2748 = vmatpush1.bf16.msra.mxu1 %v6399_v58  ;;  %v9024_v58 = vld [vmem:[#allocation10_spill] sm:$0xff] }
 0x195   : > { %2749 = vmatprep.subr.bf16.mxu1 %v6407_v35 }
 0x196   : > { %4162 = vmatpush1.bf16.msra.mxu0 %v6384_v33  ;;  %v6602_v6 = vpop.eup %6601  ;;  %v6408_v33 = vld [vmem:[%s8903_s3 + $0x750] ss:$8 sps:$4 sm:$0xff]  }
 0x197   : > { %4163 = vmatprep.subr.bf16.mxu0 %v6392_v2  ;;  %v6604_v38 = vpop.eup %6603  ;;  %v6423_v2 = vld [vmem:[%s8903_s3 + $0x360] ss:$8 sps:$4 sm:$0xff]  }
 0x198   : > { %2750 = vmatpush1.bf16.msra.mxu1 %v6405_v19  ;;  %v969_v35 = vadd.f32 %v6604_v38, %v9024_v58  ;;  %v6422_v19 = vld [vmem:[%s8903_s3 + $0x774] ss:$8 sps:$4 sm:$0xff]  }
 0x199   : > { %3838 = vmatmul.mubr.bf16.gmra.mrb[4].mxu0 %v7605_v63  ;;  %2751 = vmatprep.subr.bf16.mxu1 %v6413_v28  ;;  %v6429_v28 = vld [vmem:[%s8903_s3 + $0x370] ss:$8 sps:$4 sm:$0xff]  }
 0x19a   : > { %4164 = vmatpush1.bf16.msra.mxu0 %v6390_v59  ;;  %3847 = vmatprep.mubr.bf16.mxu0 %v7618_v40  ;;  %v971_v59 = vadd.f32 %v6602_v6, %v9024_v58 }
 0x19b   : > { %4165 = vmatprep.subr.bf16.mxu0 %v6398_v52  ;;  %2458 = vmatmul.mubr.bf16.gmra.mrb[8].mxu1 %v8000_v20  ;;  %v6414_v52 = vld [vmem:[%s8903_s3 + $0x760] ss:$8 sps:$4 sm:$0xff]  }
 0x19c   : > { %2467 = vmatprep.mubr.bf16.mxu1 %v8007_v12  ;;  %2752 = vmatpush1.bf16.msra.mxu1 %v6411_v5 }
 0x19d   : > { %2753 = vmatprep.subr.bf16.mxu1 %v6419_v9 }
 0x19e   : > { %4166 = vmatpush1.bf16.msra.mxu0 %v6396_v62  ;;  %v6437_v62 = vld [vmem:[%s8903_s3 + $0x384] ss:$8 sps:$4 sm:$0xff]  }
 0x19f   : > { %4167 = vmatprep.subr.bf16.mxu0 %v6404_v8  ;;  %v9025_v8 = vld [vmem:[#allocation7_spill] sm:$0xff] }
 0x1a0   : > { %2754 = vmatpush1.bf16.msra.mxu1 %v6417_v34  ;;  %v9026_v5 = vunpack.c.h.bf16 %v9025_v8 }
 0x1a1   : > { %3848 = vmatmul.mubr.bf16.gmra.mrb[8].mxu0 %v7638_v53  ;;  %2755 = vmatprep.subr.bf16.mxu1 %v6425_v17  ;;  %v6420_v17 = vld [vmem:[%s8903_s3 + $0x770] ss:$8 sps:$4 sm:$0xff]  }
 0x1a2   : > { %4168 = vmatpush1.bf16.msra.mxu0 %v6402_v57  ;;  %3857 = vmatprep.mubr.bf16.mxu0 %v7687_v49  ;;  %v1009_v9 = vmul.f32 %v969_v35, %v9026_v5  ;;  %v9027_v57 = vld [vmem:[#allocation6_spill] sm:$0xff] }
 0x1a3   : > { %4169 = vmatprep.subr.bf16.mxu0 %v6410_v13  ;;  %2468 = vmatmul.mubr.bf16.gmra.mrb[12].mxu1 %v8038_v25  ;;  %v9028_v13 = vunpack.c.h.bf16 %v9027_v57  ;;  %v6443_v35 = vld [vmem:[%s8903_s3 + $0x394] ss:$8 sps:$4 sm:$0xff]   ;;  %v9031_v5 = vunpack.c.l.bf16 %v9027_v57  ;;  %v6447_v57 = vld [vmem:[%s8903_s3 + $0x3a0] ss:$8 sps:$4 sm:$0xff]  }
 0x1a4   : > { %2477 = vmatprep.mubr.bf16.mxu1 %v8045_v11  ;;  %2756 = vmatpush1.bf16.msra.mxu1 %v6423_v2  ;;  %v9029_v2 = vld [vmem:[#allocation9_spill] sm:$0xff] }
 0x1a5   : > { %2757 = vmatprep.subr.bf16.mxu1 %v6431_v41  ;;  %v1011_v34 = vmul.f32 %v971_v59, %v9028_v13  ;;  %v968_v41 = vadd.f32 %v6604_v38, %v9029_v2  ;;  %v970_v58 = vadd.f32 %v6602_v6, %v9029_v2  ;;  %v1049_v59 = vmax.f32 %v1009_v9, 0.0  ;;  %v6434_v38 = vld [vmem:[%s8903_s3 + $0x794] ss:$8 sps:$4 sm:$0xff]   ;;  %v6441_v6 = vld [vmem:[%s8903_s3 + $0x390] ss:$8 sps:$4 sm:$0xff]  }
 0x1a6   : > { %4170 = vmatpush1.bf16.msra.mxu0 %v6408_v33  ;;  %v6428_v33 = vld [vmem:[%s8903_s3 + $0x784] ss:$8 sps:$4 sm:$0xff]   ;;  %v6455_v2 = vld [vmem:[%s8903_s3 + $0x3b4] ss:$8 sps:$4 sm:$0xff]  }
 0x1a7   : > { %4171 = vmatprep.subr.bf16.mxu0 %v6416_v26  ;;  %v6435_v26 = vld [vmem:[%s8903_s3 + $0x380] ss:$8 sps:$4 sm:$0xff]   ;;  %v1010_v9 = vmul.f32 %v970_v58, %v9031_v5  ;;  %v6449_v13 = vld [vmem:[%s8903_s3 + $0x3a4] ss:$8 sps:$4 sm:$0xff]  }
 0x1a8   : > { %2758 = vmatpush1.bf16.msra.mxu1 %v6429_v28  ;;  %v9030_v28 = vunpack.c.l.bf16 %v9025_v8  ;;  %v6440_v8 = vld [vmem:[%s8903_s3 + $0x7a4] ss:$8 sps:$4 sm:$0xff]   ;;  %v6438_v58 = vld [vmem:[%s8903_s3 + $0x7a0] ss:$8 sps:$4 sm:$0xff]  }
 0x1a9   : > { %3858 = vmatmul.mubr.bf16.gmra.mrb[12].mxu0 %v7750_v36  ;;  %2759 = vmatprep.subr.bf16.mxu1 %v6437_v62  ;;  %v6459_v5 = vld [vmem:[%s8903_s3 + $0x3c0] ss:$8 sps:$4 sm:$0xff]  }
 0x1aa   : > { %4172 = vmatpush1.bf16.msra.mxu0 %v6414_v52  ;;  %3867 = vmatprep.mubr.bf16.mxu0 %v7773_v46  ;;  %v1051_v52 = vmax.f32 %v1011_v34, 0.0  ;;  %v1008_v62 = vmul.f32 %v968_v41, %v9030_v28  ;;  %v6444_v28 = vld [vmem:[%s8903_s3 + $0x7b0] ss:$8 sps:$4 sm:$0xff]  }
 0x1ab   : > { %4173 = vmatprep.subr.bf16.mxu0 %v6422_v19  ;;  %v6426_v19 = vld [vmem:[%s8903_s3 + $0x780] ss:$8 sps:$4 sm:$0xff]   ;;  %2478 = vmatmul.mubr.bf16.gmra.mrb[16].mxu1 %v8076_v44 }
 0x1ac   : > { %2487 = vmatprep.mubr.bf16.mxu1 %v8083_v4  ;;  %2760 = vmatpush1.bf16.msra.mxu1 %v6435_v26  ;;  %v1071_v34 = vpack.c.bf16 %v1051_v52, %v1049_v59  ;;  %v1050_v26 = vmax.f32 %v1010_v9, 0.0  ;;  %v6453_v59 = vld [vmem:[%s8903_s3 + $0x3b0] ss:$8 sps:$4 sm:$0xff]  }
 0x1ad   : > { %2761 = vmatprep.subr.bf16.mxu1 %v6443_v35  ;;  %v6446_v35 = vld [vmem:[%s8903_s3 + $0x7b4] ss:$8 sps:$4 sm:$0xff]  }
 0x1ae   : > { %4174 = vmatpush1.bf16.msra.mxu0 %v6420_v17  ;;  %v6432_v17 = vld [vmem:[%s8903_s3 + $0x790] ss:$8 sps:$4 sm:$0xff]   ;;  %v1206_v41 = vshrl.u32 %v1071_v34, 16 }
 0x1af   : > { %4175 = vmatprep.subr.bf16.mxu0 %v6428_v33  ;;  %v1048_v33 = vmax.f32 %v1008_v62, 0.0  ;;  %v6452_v62 = vld [vmem:[%s8903_s3 + $0x7c4] ss:$8 sps:$4 sm:$0xff]  }
 0x1b0   : > { %2762 = vmatpush1.bf16.msra.mxu1 %v6441_v6  ;;  %v1209_v6 = vshll.u32 %v1071_v34, 16  ;;  %v6467_v34 = vld [vmem:[%s8903_s3 + $0x3d4] ss:$8 sps:$4 sm:$0xff]  }
 0x1b1   : > { %3868 = vmatmul.mubr.bf16.gmra.mrb[16].mxu0 %v7812_v55  ;;  %2763 = vmatprep.subr.bf16.mxu1 %v6449_v13  ;;  %v1070_v52 = vpack.c.bf16 %v1050_v26, %v1048_v33  ;;  %v6465_v26 = vld [vmem:[%s8903_s3 + $0x3d0] ss:$8 sps:$4 sm:$0xff]  }
 0x1b2   : > { %4176 = vmatpush1.bf16.msra.mxu0 %v6426_v19  ;;  %3877 = vmatprep.mubr.bf16.mxu0 %v7816_v51  ;;  %v6461_v19 = vld [vmem:[%s8903_s3 + $0x3c4] ss:$8 sps:$4 sm:$0xff]  }
 0x1b3   : > { %4177 = vmatprep.subr.bf16.mxu0 %v6434_v38  ;;  %2488 = vmatmul.mubr.bf16.gmra.mrb[20].mxu1 %v8114_v60  ;;  %v8418_v38 = vrot.slane %v1206_v41, 7  ;;  %v1199_v9 = vshrl.u32 %v1070_v52, 16  ;;  %v1202_v33 = vshll.u32 %v1070_v52, 16  ;;  %v6473_v41 = vld [vmem:[%s8903_s3 + $0x3e4] ss:$8 sps:$4 sm:$0xff]  }
 0x1b4   : > { %2497 = vmatprep.mubr.bf16.mxu1 %v8121_v50  ;;  %2764 = vmatpush1.bf16.msra.mxu1 %v6447_v57  ;;  %v6471_v52 = vld [vmem:[%s8903_s3 + $0x3e0] ss:$8 sps:$4 sm:$0xff]  }
 0x1b5   : > { %2765 = vmatprep.subr.bf16.mxu1 %v6455_v2  ;;  %v1211_v13 = vor.u32 %v1209_v6, %v8418_v38  ;;  %v8442_v57 = vrot.slane %v1199_v9, 7  ;;  %v6462_v6 = vld [vmem:[%s8903_s3 + $0x7e0] ss:$8 sps:$4 sm:$0xff]   ;;  %v6468_v9 = vld [vmem:[%s8903_s3 + $0x7f0] ss:$8 sps:$4 sm:$0xff]  }
 0x1b6   : > { %4178 = vmatpush1.bf16.msra.mxu0 %v6432_v17  ;;  %v6450_v17 = vld [vmem:[%s8903_s3 + $0x7c0] ss:$8 sps:$4 sm:$0xff]  }
 0x1b7   : > { %4179 = vmatprep.subr.bf16.mxu0 %v6440_v8  ;;  %v6458_v8 = vld [vmem:[%s8903_s3 + $0x7d4] ss:$8 sps:$4 sm:$0xff]   ;;  %v8450_v2 = vsel %vm7286_vm2, 0, %v1211_v13  ;;  %v6474_v13 = vld [vmem:[%s8903_s3 + $0x800] ss:$8 sps:$4 sm:$0xff]  }
 0x1b8   : > { %2766 = vmatpush1.bf16.msra.mxu1 %v6453_v59  ;;  %v1204_v59 = vor.u32 %v1202_v33, %v8442_v57 }
 0x1b9   : > { %3878 = vmatmul.mubr.bf16.gmra.mrb[20].mxu0 %v7853_v16  ;;  %2767 = vmatprep.subr.bf16.mxu1 %v6461_v19  ;;  %v6479_v19 = vld [vmem:[%s8903_s3 + $0x3f4] ss:$8 sps:$4 sm:$0xff]  }
 0x1ba   : > { %4180 = vmatpush1.bf16.msra.mxu0 %v6438_v58  ;;  %3887 = vmatprep.mubr.bf16.mxu0 %v7894_v23  ;;  %v6456_v58 = vld [vmem:[%s8903_s3 + $0x7d0] ss:$8 sps:$4 sm:$0xff]  }
 0x1bb   : > { %4181 = vmatprep.subr.bf16.mxu0 %v6446_v35  ;;  %2498 = vmatmul.mubr.bf16.gmra.mrb[24].mxu1 %v8152_v24  ;;  %v6464_v35 = vld [vmem:[%s8903_s3 + $0x7e4] ss:$8 sps:$4 sm:$0xff]  }
 0x1bc   : > { %2507 = vmatprep.mubr.bf16.mxu1 %v8159_v43  ;;  %2768 = vmatpush1.bf16.msra.mxu1 %v6459_v5  ;;  %v6477_v5 = vld [vmem:[%s8903_s3 + $0x3f0] ss:$8 sps:$4 sm:$0xff]  }
 0x1bd   : > { %2769 = vmatprep.subr.bf16.mxu1 %v6467_v34  ;;  %v6480_v34 = vld [vmem:[%s8903_s3 + $0x810] ss:$8 sps:$4 sm:$0xff]  }
 0x1be   : > { %4182 = vmatpush1.bf16.msra.mxu0 %v6444_v28  ;;  %v6470_v28 = vld [vmem:[%s8903_s3 + $0x7f4] ss:$8 sps:$4 sm:$0xff]  }
 0x1bf   : > { %4183 = vmatprep.subr.bf16.mxu0 %v6452_v62  ;;  %v8479_v62 = vsel %vm7286_vm2, 0, %v1204_v59 }
 0x1c0   : > { %2770 = vmatpush1.bf16.msra.mxu1 %v6465_v26  ;;  %v3941_v59 = vshrl.u32 %v8479_v62, 16 }
 0x1c1   : > { %3888 = vmatmul.mubr.bf16.gmra.mrb[24].mxu0 %v7908_v22  ;;  %2771 = vmatprep.subr.bf16.mxu1 %v6473_v41 }
 0x1c2   : > { %4184 = vmatpush1.bf16.msra.mxu0 %v6450_v17  ;;  %3897 = vmatprep.mubr.bf16.mxu0 %v8450_v2  ;;  %v6485_v17 = vld [vmem:[%s8903_s3 + $0x824] ss:$8 sps:$4 sm:$0xff]  }
 0x1c3   : > { %4185 = vmatprep.subr.bf16.mxu0 %v6458_v8  ;;  %2508 = vmatmul.mubr.bf16.gmra.mrb[28].mxu1 %v8192_v47  ;;  %v3953_v8 = vshrl.u32 %v8450_v2, 16 }
 0x1c4   : > { %2775 = vmatprep.mubr.bf16.mxu1 %v7303_v29  ;;  %2772 = vmatpush1.bf16.msra.mxu1 %v6471_v52  ;;  %v6476_v29 = vld [vmem:[%s8903_s3 + $0x804] ss:$8 sps:$4 sm:$0xff]  }
 0x1c5   : > { %2773 = vmatprep.subr.bf16.mxu1 %v6479_v19 }
 0x1c6   : > { %4186 = vmatpush1.bf16.msra.mxu0 %v6456_v58  ;;  %v1293_v58 = vsel %vm7286_vm2, %v8442_v57, 0  ;;  %v9032_v57 = vld [vmem:[#allocation18_spill] sm:$0xff] }
 0x1c7   : > { %4187 = vmatprep.subr.bf16.mxu0 %v6464_v35  ;;  %v6518_v35 = vld [vmem:[%s8903_s3 + $0x8d4] ss:$8 sps:$4 sm:$0xff]   ;;  %v3948_v15 = vshll.u32 %v1293_v58, 16 }
 0x1c8   : > { %2774 = vmatpush1.bf16.msra.mxu1 %v6477_v5  ;;  %v6519_v5 = vld [vmem:[%s8903_s3 + $0x8e0] ss:$8 sps:$4 sm:$0xff]  }
 0x1c9   : > { %3898 = vmatmul.mubr.bf16.gmra.mrb[28].mxu0 %v8479_v62  ;;  %5764 = vmatprep.subr.bf16.mxu1 %v6476_v29 }
 0x1ca   : > { %4188 = vmatpush1.bf16.msra.mxu0 %v6462_v6  ;;  %4191 = vmatprep.mubr.bf16.mxu0 %v7451_v45  ;;  %v6482_v45 = vld [vmem:[%s8903_s3 + $0x814] ss:$8 sps:$4 sm:$0xff]   ;;  %v6516_v6 = vld [vmem:[%s8903_s3 + $0x8d0] ss:$8 sps:$4 sm:$0xff]  }
 0x1cb   : > { %4189 = vmatprep.subr.bf16.mxu0 %v6470_v28  ;;  %2776 = vmatmul.mubr.bf16.vlgmr.msra.gmra.mrb[0].mxu1 %v9016_v0  ;;  %v6486_v0 = vld [vmem:[%s8903_s3 + $0x830] ss:$8 sps:$4 sm:$0xff]  }
 0x1cc   : > { %2785 = vmatprep.mubr.bf16.mxu1 %v9017_v30  ;;  %5780 = vmatpush1.bf16.msra.mxu1 %v6474_v13  ;;  %v6491_v30 = vld [vmem:[%s8903_s3 + $0x844] ss:$8 sps:$4 sm:$0xff]  }
 0x1cd   : > { %5765 = vmatprep.subr.bf16.mxu1 %v6482_v45 }
 0x1ce   : > { %4190 = vmatpush1.bf16.msra.mxu0 %v6468_v9  ;;  %v6524_v9 = vld [vmem:[%s8903_s3 + $0x8f4] ss:$8 sps:$4 sm:$0xff]  }
 0x1cf   : > { %4509 = vmatprep.subr.bf16.mxu0 %v6476_v29 }
 0x1d0   : > { %5781 = vmatpush1.bf16.msra.mxu1 %v6480_v34 }
 0x1d1   : > { %4192 = vmatmul.mubr.bf16.vlgmr.msra.gmra.mrb[0].mxu0 %v7554_v18  ;;  %5766 = vmatprep.subr.bf16.mxu1 %v6485_v17  ;;  %v6483_v18 = vld [vmem:[%s8903_s3 + $0x820] ss:$8 sps:$4 sm:$0xff]  }
 0x1d2   : > { %4510 = vmatpush1.bf16.msra.mxu0 %v6474_v13  ;;  %4201 = vmatprep.mubr.bf16.mxu0 %v7625_v1  ;;  %v6488_v1 = vld [vmem:[%s8903_s3 + $0x834] ss:$8 sps:$4 sm:$0xff]   ;;  %v6522_v13 = vld [vmem:[%s8903_s3 + $0x8f0] ss:$8 sps:$4 sm:$0xff]  }
 0x1d3   : > { %4511 = vmatprep.subr.bf16.mxu0 %v6482_v45  ;;  %2786 = vmatmul.mubr.bf16.gmra.mrb[4].mxu1 %v7507_v14  ;;  %v6489_v14 = vld [vmem:[%s8903_s3 + $0x840] ss:$8 sps:$4 sm:$0xff]  }
 0x1d4   : > { %2795 = vmatprep.mubr.bf16.mxu1 %v7576_v27  ;;  %5782 = vmatpush1.bf16.msra.mxu1 %v6483_v18  ;;  %v6494_v27 = vld [vmem:[%s8903_s3 + $0x854] ss:$8 sps:$4 sm:$0xff]  }
 0x1d5   : > { %5767 = vmatprep.subr.bf16.mxu1 %v6488_v1 }
 0x1d6   : > { %4512 = vmatpush1.bf16.msra.mxu0 %v6480_v34 }
 0x1d7   : > { %4513 = vmatprep.subr.bf16.mxu0 %v6485_v17 }
 0x1d8   : > { %5783 = vmatpush1.bf16.msra.mxu1 %v6486_v0 }
 0x1d9   : > { %4202 = vmatmul.mubr.bf16.gmra.mrb[4].mxu0 %v7656_v42  ;;  %5768 = vmatprep.subr.bf16.mxu1 %v6491_v30  ;;  %v6492_v42 = vld [vmem:[%s8903_s3 + $0x850] ss:$8 sps:$4 sm:$0xff]  }
 0x1da   : > { %4514 = vmatpush1.bf16.msra.mxu0 %v6483_v18  ;;  %4211 = vmatprep.mubr.bf16.mxu0 %v7675_v39  ;;  %v6497_v39 = vld [vmem:[%s8903_s3 + $0x864] ss:$8 sps:$4 sm:$0xff]  }
 0x1db   : > { %4515 = vmatprep.subr.bf16.mxu0 %v6488_v1  ;;  %2796 = vmatmul.mubr.bf16.gmra.mrb[8].mxu1 %v7605_v63  ;;  %v6495_v63 = vld [vmem:[%s8903_s3 + $0x860] ss:$8 sps:$4 sm:$0xff]  }
 0x1dc   : > { %2805 = vmatprep.mubr.bf16.mxu1 %v7618_v40  ;;  %5784 = vmatpush1.bf16.msra.mxu1 %v6489_v14  ;;  %v6500_v40 = vld [vmem:[%s8903_s3 + $0x874] ss:$8 sps:$4 sm:$0xff]  }
 0x1dd   : > { %5769 = vmatprep.subr.bf16.mxu1 %v6494_v27 }
 0x1de   : > { %4516 = vmatpush1.bf16.msra.mxu0 %v6486_v0 }
 0x1df   : > { %4517 = vmatprep.subr.bf16.mxu0 %v6491_v30 }
 0x1e0   : > { %5785 = vmatpush1.bf16.msra.mxu1 %v6492_v42 }
 0x1e1   : > { %4212 = vmatmul.mubr.bf16.gmra.mrb[8].mxu0 %v7696_v48  ;;  %5770 = vmatprep.subr.bf16.mxu1 %v6497_v39  ;;  %v6498_v48 = vld [vmem:[%s8903_s3 + $0x870] ss:$8 sps:$4 sm:$0xff]  }
 0x1e2   : > { %4518 = vmatpush1.bf16.msra.mxu0 %v6489_v14  ;;  %4221 = vmatprep.mubr.bf16.mxu0 %v7741_v32  ;;  %v6503_v32 = vld [vmem:[%s8903_s3 + $0x884] ss:$8 sps:$4 sm:$0xff]  }
 0x1e3   : > { %4519 = vmatprep.subr.bf16.mxu0 %v6494_v27  ;;  %2806 = vmatmul.mubr.bf16.gmra.mrb[12].mxu1 %v7638_v53  ;;  %v6501_v53 = vld [vmem:[%s8903_s3 + $0x880] ss:$8 sps:$4 sm:$0xff]  }
 0x1e4   : > { %2815 = vmatprep.mubr.bf16.mxu1 %v7687_v49  ;;  %5786 = vmatpush1.bf16.msra.mxu1 %v6495_v63  ;;  %v6506_v49 = vld [vmem:[%s8903_s3 + $0x894] ss:$8 sps:$4 sm:$0xff]  }
 0x1e5   : > { %5771 = vmatprep.subr.bf16.mxu1 %v6500_v40 }
 0x1e6   : > { %4520 = vmatpush1.bf16.msra.mxu0 %v6492_v42 }
 0x1e7   : > { %4521 = vmatprep.subr.bf16.mxu0 %v6497_v39 }
 0x1e8   : > { %5787 = vmatpush1.bf16.msra.mxu1 %v6498_v48 }
 0x1e9   : > { %4222 = vmatmul.mubr.bf16.gmra.mrb[12].mxu0 %v7802_v21  ;;  %5772 = vmatprep.subr.bf16.mxu1 %v6503_v32  ;;  %v6504_v21 = vld [vmem:[%s8903_s3 + $0x890] ss:$8 sps:$4 sm:$0xff]  }
 0x1ea   : > { %4522 = vmatpush1.bf16.msra.mxu0 %v6495_v63  ;;  %4231 = vmatprep.mubr.bf16.mxu0 %v7826_v3  ;;  %v6509_v3 = vld [vmem:[%s8903_s3 + $0x8a4] ss:$8 sps:$4 sm:$0xff]  }
 0x1eb   : > { %4523 = vmatprep.subr.bf16.mxu0 %v6500_v40  ;;  %2816 = vmatmul.mubr.bf16.gmra.mrb[16].mxu1 %v7750_v36  ;;  %v3955_v36 = vshll.u32 %v8450_v2, 16 }
 0x1ec   : > { %2825 = vmatprep.mubr.bf16.mxu1 %v7773_v46  ;;  %5788 = vmatpush1.bf16.msra.mxu1 %v6501_v53  ;;  %v6507_v46 = vld [vmem:[%s8903_s3 + $0x8a0] ss:$8 sps:$4 sm:$0xff]  }
 0x1ed   : > { %5773 = vmatprep.subr.bf16.mxu1 %v6506_v49  ;;  %v3957_v33 = vrot.slane %v3955_v36, 1 }
 0x1ee   : > { %4524 = vmatpush1.bf16.msra.mxu0 %v6498_v48 }
 0x1ef   : > { %4525 = vmatprep.subr.bf16.mxu0 %v6503_v32  ;;  %v3958_v41 = vor.u32 %v3957_v33, %v3953_v8 }
 0x1f0   : > { %5789 = vmatpush1.bf16.msra.mxu1 %v6504_v21 }
 0x1f1   : > { %4232 = vmatmul.mubr.bf16.gmra.mrb[16].mxu0 %v7856_v31  ;;  %5774 = vmatprep.subr.bf16.mxu1 %v6509_v3  ;;  %v8579_v31 = vsel %vm7286_vm2, %v8418_v38, 0  ;;  %v6510_v38 = vld [vmem:[%s8903_s3 + $0x8b0] ss:$8 sps:$4 sm:$0xff]  }
 0x1f2   : > { %4526 = vmatpush1.bf16.msra.mxu0 %v6501_v53  ;;  %4241 = vmatprep.mubr.bf16.mxu0 %v7866_v10  ;;  %v6512_v10 = vld [vmem:[%s8903_s3 + $0x8b4] ss:$8 sps:$4 sm:$0xff]   ;;  %v3960_v26 = vshll.u32 %v8579_v31, 16 }
 0x1f3   : > { %4527 = vmatprep.subr.bf16.mxu0 %v6506_v49  ;;  %2826 = vmatmul.mubr.bf16.gmra.mrb[20].mxu1 %v7812_v55  ;;  %v6515_v55 = vld [vmem:[%s8903_s3 + $0x8c4] ss:$8 sps:$4 sm:$0xff]  }
 0x1f4   : > { %2835 = vmatprep.mubr.bf16.mxu1 %v7816_v51  ;;  %5790 = vmatpush1.bf16.msra.mxu1 %v6507_v46  ;;  %v3943_v51 = vshll.u32 %v8479_v62, 16 }
 0x1f5   : > { %5775 = vmatprep.subr.bf16.mxu1 %v6512_v10 }
 0x1f6   : > { %4528 = vmatpush1.bf16.msra.mxu0 %v6504_v21  ;;  %v3945_v52 = vrot.slane %v3943_v51, 1 }
 0x1f7   : > { %4529 = vmatprep.subr.bf16.mxu0 %v6509_v3 }
 0x1f8   : > { %5791 = vmatpush1.bf16.msra.mxu1 %v6510_v38  ;;  %v3946_v28 = vor.u32 %v3945_v52, %v3941_v59 }
 0x1f9   : > { %4242 = vmatmul.mubr.bf16.gmra.mrb[20].mxu0 %v7885_v7  ;;  %v3962_v7 = vrot.slane %v3960_v26, 1  ;;  %5776 = vmatprep.subr.bf16.mxu1 %v6515_v55 }
 0x1fa   : > { %4530 = vmatpush1.bf16.msra.mxu0 %v6507_v46  ;;  %4251 = vmatprep.mubr.bf16.mxu0 %v7922_v61  ;;  %v6513_v61 = vld [vmem:[%s8903_s3 + $0x8c0] ss:$8 sps:$4 sm:$0xff]  }
 0x1fb   : > { %4531 = vmatprep.subr.bf16.mxu0 %v6512_v10  ;;  %2836 = vmatmul.mubr.bf16.gmra.mrb[24].mxu1 %v7853_v16  ;;  %v3963_v19 = vsel %vm1327_vm3, %v3958_v41, %v3962_v7  ;;  %v6521_v16 = vld [vmem:[%s8903_s3 + $0x8e4] ss:$8 sps:$4 sm:$0xff]  }
 0x1fc   : > { %2845 = vmatprep.mubr.bf16.mxu1 %v7894_v23  ;;  %5792 = vmatpush1.bf16.msra.mxu1 %v6513_v61  ;;  %v3950_v23 = vrot.slane %v3948_v15, 1 }
 0x1fd   : > { %5777 = vmatprep.subr.bf16.mxu1 %v6518_v35 }
 0x1fe   : > { %4532 = vmatpush1.bf16.msra.mxu0 %v6510_v38  ;;  %v3951_v29 = vsel %vm1327_vm3, %v3946_v28, %v3950_v23 }
 0x1ff   : > { %4533 = vmatprep.subr.bf16.mxu0 %v6515_v55 }
 0x200   : > { %5793 = vmatpush1.bf16.msra.mxu1 %v6516_v6 }
 0x201   : > { %4252 = vmatmul.mubr.bf16.gmra.mrb[24].mxu0 %v9032_v57  ;;  %5778 = vmatprep.subr.bf16.mxu1 %v6521_v16 }
 0x202   : > { %4534 = vmatpush1.bf16.msra.mxu0 %v6513_v61  ;;  %4261 = vmatprep.mubr.bf16.mxu0 %v3963_v19 }
 0x203   : > { %4535 = vmatprep.subr.bf16.mxu0 %v6518_v35  ;;  %2846 = vmatmul.mubr.bf16.gmra.mrb[28].mxu1 %v7908_v22  ;;  %v4311_v22 = vrot.slane %v8450_v2, 1 }
 0x204   : > { %5794 = vmatpush1.bf16.msra.mxu1 %v6519_v5  ;;  %4581 = vmatprep.mubr.bf16.mxu1 %v8121_v50 }
 0x205   : > { %5779 = vmatprep.subr.bf16.mxu1 %v6524_v9 }
 0x206   : > { %4536 = vmatpush1.bf16.msra.mxu0 %v6516_v6 }
 0x207   : > { %4537 = vmatprep.subr.bf16.mxu0 %v6521_v16 }
 0x208   : > { %5795 = vmatpush1.bf16.msra.mxu1 %v6522_v13 }
 0x209   : > { %4262 = vmatmul.mubr.bf16.gmra.mrb[28].mxu0 %v3951_v29 }
 0x20a   : > { %4538 = vmatpush1.bf16.msra.mxu0 %v6519_v5  ;;  %4541 = vmatprep.mubr.bf16.mxu0 %v7969_v56  ;;  %v4312_v56 = vrot.slane %v8579_v31, 1 }
 0x20b   : > { %4539 = vmatprep.subr.bf16.mxu0 %v6524_v9  ;;  %4582 = vmatmul.mubr.bf16.vlgmr.msra.gmra.mrb[32].mxu1 %v8152_v24 }
 0x20c   : > { %4591 = vmatprep.mubr.bf16.mxu1 %v8159_v43  ;;  %v4313_v50 = vsel %vm2147_vm4, %v4311_v22, %v4312_v56 }
 0x20e   : > { %4540 = vmatpush1.bf16.msra.mxu0 %v6522_v13 }
 0x211   : > { %4542 = vmatmul.mubr.bf16.vlgmr.msra.gmra.mrb[0].mxu0 %v8000_v20  ;;  %v4308_v20 = vrot.slane %v8479_v62, 1 }
 0x212   : > { %4551 = vmatprep.mubr.bf16.mxu0 %v8007_v12  ;;  %v4309_v12 = vrot.slane %v1293_v58, 1 }
 0x213   : > { %4592 = vmatmul.mubr.bf16.gmra.mrb[36].mxu1 %v8192_v47 }
 0x214   : > { %4601 = vmatprep.mubr.bf16.mxu1 %v8199_v54 }
 0x219   : > { %4552 = vmatmul.mubr.bf16.gmra.mrb[4].mxu0 %v8038_v25  ;;  %v4310_v25 = vsel %vm2147_vm4, %v4308_v20, %v4309_v12 }
 0x21a   : > { %4561 = vmatprep.mubr.bf16.mxu0 %v8045_v11 }
 0x21b   : > { %4602 = vmatmul.mubr.bf16.gmra.mrb[40].mxu1 %v8230_v37 }
 0x21c   : > { %4611 = vmatprep.mubr.bf16.mxu1 %v4313_v50 }
 0x221   : > { %4562 = vmatmul.mubr.bf16.gmra.mrb[8].mxu0 %v8076_v44 }
 0x222   : > { %4571 = vmatprep.mubr.bf16.mxu0 %v8083_v4 }
 0x223   : > { %4612 = vmatmul.mubr.bf16.gmra.mrb[44].mxu1 %v4310_v25 }
 0x229   : > { %4572 = vmatmul.mubr.bf16.gmra.mrb[12].mxu0 %v8114_v60 }
 0x29e   : > { %v8647_v11 = vpop.f32.mrb[0].mxu1 }
 0x29f   : > { %v8649_v24 = vpop.f32.mrb[1].mxu1 }
 0x2a0   : > { %v8651_v43 = vpop.f32.mrb[2].mxu1 }
 0x2a1   : > { %v8653_v47 = vpop.f32.mrb[3].mxu1 }
 0x2a6   : > { %v8655_v54 = vpop.f32.mrb[4].mxu1 }
 0x2a7   : > { %v8657_v44 = vpop.f32.mrb[5].mxu1 }
 0x2a8   : > { %v8659_v4 = vpop.f32.mrb[6].mxu1 }
 0x2a9   : > { %v8661_v37 = vpop.f32.mrb[7].mxu1 }
 0x2ae   : > { %v8663_v2 = vpop.f32.mrb[8].mxu1 }
 0x2af   : > { %v8665_v62 = vpop.f32.mrb[9].mxu1 }
 0x2b0   : > { %v8667_v60 = vpop.f32.mrb[10].mxu1 }
 0x2b1   : > { %v8669_v45 = vpop.f32.mrb[11].mxu1 }
 0x2b6   : > { %v8671_v34 = vpop.f32.mrb[12].mxu1 }
 0x2b7   : > { %v8673_v17 = vpop.f32.mrb[13].mxu1 }
 0x2b8   : > { %v8675_v18 = vpop.f32.mrb[14].mxu1 }
 0x2b9   : > { %v8677_v1 = vpop.f32.mrb[15].mxu1 }
 0x2be   : > { %v2817_v0 = vpop.f32.mrb[16].mxu1 }
 0x2bf   : > { %v2819_v30 = vpop.f32.mrb[17].mxu1 }
 0x2c0   : > { %v2821_v27 = vpop.f32.mrb[18].mxu1 }
 0x2c1   : > { %v2823_v63 = vpop.f32.mrb[19].mxu1 }
 0x2c4   : > { %v4233_v14 = vpop.f32.mrb[16].mxu0 }
 0x2c5   : > { %v4235_v42 = vpop.f32.mrb[17].mxu0  ;;  %v5812_v39 = vadd.f32 %v4233_v14, %v2817_v0  ;;  %v4654_v0 = vld [vmem:[%s8904_s4] sm:$0x3] }
 0x2c6   : > { %v4237_v40 = vpop.f32.mrb[18].mxu0  ;;  %v5814_v48 = vadd.f32 %v4235_v42, %v2819_v30  ;;  %v2827_v21 = vpop.f32.mrb[20].mxu1  ;;  %v4698_v30 = vld [vmem:[%s8905_s5] sm:$0x3] }
 0x2c7   : > { %v4239_v32 = vpop.f32.mrb[19].mxu0  ;;  %v5816_v53 = vadd.f32 %v4237_v40, %v2821_v27  ;;  %v2829_v3 = vpop.f32.mrb[21].mxu1  ;;  %v9033_v27 = vld [vmem:[#allocation4_spill] sm:$0xff] }
 0x2c8   : > { %v5818_v49 = vadd.f32 %v4239_v32, %v2823_v63  ;;  %v2831_v46 = vpop.f32.mrb[22].mxu1  ;;  %v8710_v42 = vrot.slane %v4654_v0, %v9033_v27 }
 0x2c9   : > { %v2833_v8 = vpop.f32.mrb[23].mxu1 }
 0x2cc   : > { %v4243_v36 = vpop.f32.mrb[20].mxu0 }
 0x2cd   : > { %v4245_v31 = vpop.f32.mrb[21].mxu0  ;;  %v8679_v10 = vadd.f32 %v4243_v36, %v2827_v21  ;;  %v9034_v21 = vld [vmem:[#allocation5_spill] sm:$0xff] }
 0x2ce   : > { %v4247_v33 = vpop.f32.mrb[22].mxu0  ;;  %v8681_v26 = vadd.f32 %v4245_v31, %v2829_v3  ;;  %v2837_v41 = vpop.f32.mrb[24].mxu1  ;;  %v8713_v3 = vrot.slane %v4654_v0, %v9034_v21 }
 0x2cf   : > { %v4249_v38 = vpop.f32.mrb[23].mxu0  ;;  %v8683_v55 = vadd.f32 %v4247_v33, %v2831_v46  ;;  %v2839_v7 = vpop.f32.mrb[25].mxu1 }
 0x2d0   : > { %v8685_v51 = vadd.f32 %v4249_v38, %v2833_v8  ;;  %v2841_v61 = vpop.f32.mrb[26].mxu1  ;;  %v8717_v8 = vrot.slane %v4698_v30, %v9033_v27 }
 0x2d1   : > { %v2843_v52 = vpop.f32.mrb[27].mxu1 }
 0x2d4   : > { %v4253_v58 = vpop.f32.mrb[24].mxu0 }
 0x2d5   : > { %v4255_v35 = vpop.f32.mrb[25].mxu0  ;;  %v8687_v59 = vadd.f32 %v4253_v58, %v2837_v41 }
 0x2d6   : > { %v4257_v15 = vpop.f32.mrb[26].mxu0  ;;  %v8689_v57 = vadd.f32 %v4255_v35, %v2839_v7  ;;  %v2847_v28 = vpop.f32.mrb[28].mxu1 }
 0x2d7   : > { %v4259_v19 = vpop.f32.mrb[27].mxu0  ;;  %v8691_v6 = vadd.f32 %v4257_v15, %v2841_v61  ;;  %v2849_v23 = vpop.f32.mrb[29].mxu1 }
 0x2d8   : > { %v8693_v16 = vadd.f32 %v4259_v19, %v2843_v52  ;;  %v2851_v9 = vpop.f32.mrb[30].mxu1 }
 0x2d9   : > { %v2853_v22 = vpop.f32.mrb[31].mxu1 }
 0x2dc   : > { %v4263_v5 = vpop.f32.mrb[28].mxu0 }
 0x2dd   : > { %v4265_v29 = vpop.f32.mrb[29].mxu0  ;;  %v8695_v13 = vadd.f32 %v4263_v5, %v2847_v28 }
 0x2de   : > { %v4267_v56 = vpop.f32.mrb[30].mxu0  ;;  %v8697_v50 = vadd.f32 %v4265_v29, %v2849_v23  ;;  %v4583_v14 = vpop.f32.mrb[32].mxu1 }
 0x2df   : > { %v4269_v20 = vpop.f32.mrb[31].mxu0  ;;  %v8699_v12 = vadd.f32 %v4267_v56, %v2851_v9  ;;  %v5813_v63 = vadd.f32 %v5812_v39, %v4583_v14  ;;  %v4585_v40 = vpop.f32.mrb[33].mxu1  ;;  %v8722_v39 = vrot.slane %v4698_v30, %v9034_v21 }
 0x2e0   : > { %v8701_v25 = vadd.f32 %v4269_v20, %v2853_v22  ;;  %v5815_v36 = vadd.f32 %v5814_v48, %v4585_v40  ;;  %v4587_v46 = vpop.f32.mrb[34].mxu1 }
 0x2e1   : > { %v4682_v38 = vmul.f32 %v5813_v63, %v8710_v42  ;;  %v5817_v41 = vadd.f32 %v5816_v53, %v4587_v46  ;;  %v4589_v7 = vpop.f32.mrb[35].mxu1 }
 0x2e2   : > { %v4683_v35 = vmul.f32 %v5815_v36, %v8713_v3  ;;  %v5819_v48 = vadd.f32 %v5818_v49, %v4589_v7 }
 0x2e3   : > { %v8728_v19 = vadd.f32 %v8717_v8, %v4682_v38  ;;  %v4684_v53 = vmul.f32 %v5817_v41, %v8710_v42 }
 0x2e4   : > { %v4543_v32 = vpop.f32.mrb[0].mxu0  ;;  %v8734_v23 = vadd.f32 %v8722_v39, %v4683_v35  ;;  %v4685_v49 = vmul.f32 %v5819_v48, %v8713_v3 }
 0x2e5   : > { %v5796_v31 = vadd.f32 %v4543_v32, %v8647_v11  ;;  %v4545_v33 = vpop.f32.mrb[1].mxu0  ;;  %v8740_v9 = vadd.f32 %v8717_v8, %v4684_v53 }
 0x2e6   : > { %v5797_v58 = vadd.f32 %v4545_v33, %v8649_v24  ;;  %v4547_v61 = vpop.f32.mrb[2].mxu0  ;;  %v5756_v56 = vpack.c.bf16 %v8734_v23, %v8728_v19  ;;  %v4593_v20 = vpop.f32.mrb[36].mxu1 }
 0x2e7   : > { %v4666_v52 = vmul.f32 %v5796_v31, %v8710_v42  ;;  %v5798_v11 = vadd.f32 %v4547_v61, %v8651_v43  ;;  %v4549_v15 = vpop.f32.mrb[3].mxu0  ;;  %v5821_v30 = vadd.f32 %v8679_v10, %v4593_v20  ;;  %v4595_v14 = vpop.f32.mrb[37].mxu1 }
 0x2e8   : > { %v4667_v24 = vmul.f32 %v5797_v58, %v8713_v3  ;;  %v5799_v28 = vadd.f32 %v4549_v15, %v8653_v47  ;;  %v8747_v47 = vadd.f32 %v8722_v39, %v4685_v49  ;;  %4846 = vst [vmem:[%s8754_s24 + $0x40] sm:$0xff] %v5756_v56  ;;  %v5823_v21 = vadd.f32 %v8681_v26, %v4595_v14  ;;  %v4597_v36 = vpop.f32.mrb[38].mxu1 }
 0x2e9   : > { %v4710_v5 = vadd.f32 %v8717_v8, %v4666_v52  ;;  %v4668_v43 = vmul.f32 %v5798_v11, %v8710_v42  ;;  %v4686_v10 = vmul.f32 %v5821_v30, %v8710_v42  ;;  %v5825_v38 = vadd.f32 %v8683_v55, %v4597_v36  ;;  %v4599_v41 = vpop.f32.mrb[39].mxu1 }
 0x2ea   : > { %v4711_v29 = vadd.f32 %v8722_v39, %v4667_v24  ;;  %v4669_v22 = vmul.f32 %v5799_v28, %v8713_v3  ;;  %v5757_v32 = vpack.c.bf16 %v8747_v47, %v8740_v9  ;;  %v4687_v26 = vmul.f32 %v5823_v21, %v8713_v3 }
 0x2eb   : > { %v4712_v0 = vadd.f32 %v8717_v8, %v4668_v43  ;;  %v8773_v11 = vadd.f32 %v8717_v8, %v4686_v10  ;;  %v4688_v55 = vmul.f32 %v5825_v38, %v8710_v42  ;;  %v5827_v24 = vadd.f32 %v8685_v51, %v4599_v41 }
 0x2ec   : > { %v5748_v27 = vpack.c.bf16 %v4711_v29, %v4710_v5  ;;  %v4713_v63 = vadd.f32 %v8722_v39, %v4669_v22  ;;  %v4553_v40 = vpop.f32.mrb[4].mxu0  ;;  %4847 = vst [vmem:[%s8754_s24 + $0x48] sm:$0xff] %v5757_v32 }
 0x2ed   : > { %v4854_v46 = vadd.f32 %v4712_v0, %v4710_v5  ;;  %v5800_v31 = vadd.f32 %v4553_v40, %v8655_v54  ;;  %v4555_v33 = vpop.f32.mrb[5].mxu0  ;;  %v8786_v49 = vadd.f32 %v8717_v8, %v4688_v55 }
 0x2ee   : > { %4838 = vst [vmem:[%s8754_s24] sm:$0xff] %v5748_v27  ;;  %v5749_v7 = vpack.c.bf16 %v4713_v63, %v4712_v0  ;;  %v4875_v58 = vadd.f32 %v4713_v63, %v4711_v29  ;;  %v5801_v61 = vadd.f32 %v4555_v33, %v8657_v44  ;;  %v4557_v35 = vpop.f32.mrb[6].mxu0  ;;  %v8780_v44 = vadd.f32 %v8722_v39, %v4687_v26  ;;  %v4603_v22 = vpop.f32.mrb[40].mxu1 }
 0x2ef   : > { %v4670_v48 = vmul.f32 %v5800_v31, %v8710_v42  ;;  %v5802_v54 = vadd.f32 %v4557_v35, %v8659_v4  ;;  %v4559_v52 = vpop.f32.mrb[7].mxu0  ;;  %v4689_v29 = vmul.f32 %v5827_v24, %v8713_v3  ;;  %v5829_v20 = vadd.f32 %v8687_v59, %v4603_v22  ;;  %v4605_v0 = vpop.f32.mrb[41].mxu1 }
 0x2f0   : > { %4839 = vst [vmem:[%s8754_s24 + $0x8] sm:$0xff] %v5749_v7  ;;  %v4671_v15 = vmul.f32 %v5801_v61, %v8713_v3  ;;  %v5803_v53 = vadd.f32 %v4559_v52, %v8661_v37  ;;  %v5758_v37 = vpack.c.bf16 %v8780_v44, %v8773_v11  ;;  %v4607_v32 = vpop.f32.mrb[42].mxu1  ;;  %v5831_v59 = vadd.f32 %v8689_v57, %v4605_v0 }
 0x2f1   : > { %v4714_v28 = vadd.f32 %v8717_v8, %v4670_v48  ;;  %v4672_v4 = vmul.f32 %v5802_v54, %v8710_v42  ;;  %v8798_v40 = vadd.f32 %v8722_v39, %v4689_v29  ;;  %v4690_v31 = vmul.f32 %v5829_v20, %v8710_v42  ;;  %v4609_v33 = vpop.f32.mrb[43].mxu1 }
 0x2f2   : > { %v4715_v5 = vadd.f32 %v8722_v39, %v4671_v15  ;;  %v4673_v43 = vmul.f32 %v5803_v53, %v8713_v3  ;;  %4848 = vst [vmem:[%s8754_s24 + $0x50] sm:$0xff] %v5758_v37  ;;  %v4691_v57 = vmul.f32 %v5831_v59, %v8713_v3  ;;  %v5833_v52 = vadd.f32 %v8691_v6, %v4607_v32 }
 0x2f3   : > { %v4855_v56 = vadd.f32 %v4854_v46, %v4714_v28  ;;  %v4716_v51 = vadd.f32 %v8717_v8, %v4672_v4  ;;  %v5759_v41 = vpack.c.bf16 %v8798_v40, %v8786_v49  ;;  %v8810_v26 = vadd.f32 %v8717_v8, %v4690_v31 }
 0x2f4   : > { %v5750_v30 = vpack.c.bf16 %v4715_v5, %v4714_v28  ;;  %v4876_v14 = vadd.f32 %v4875_v58, %v4715_v5  ;;  %v4717_v27 = vadd.f32 %v8722_v39, %v4673_v43  ;;  %v4563_v63 = vpop.f32.mrb[8].mxu0  ;;  %v8822_v15 = vadd.f32 %v8722_v39, %v4691_v57 }
 0x2f5   : > { %v4856_v21 = vadd.f32 %v4855_v56, %v4716_v51  ;;  %v5804_v36 = vadd.f32 %v4563_v63, %v8663_v2  ;;  %v4565_v46 = vpop.f32.mrb[9].mxu0  ;;  %4849 = vst [vmem:[%s8754_s24 + $0x58] sm:$0xff] %v5759_v41  ;;  %v4692_v28 = vmul.f32 %v5833_v52, %v8710_v42 }
 0x2f6   : > { %4840 = vst [vmem:[%s8754_s24 + $0x10] sm:$0xff] %v5750_v30  ;;  %v5751_v10 = vpack.c.bf16 %v4717_v27, %v4716_v51  ;;  %v4877_v38 = vadd.f32 %v4876_v14, %v4717_v27  ;;  %v5805_v7 = vadd.f32 %v4565_v46, %v8665_v62  ;;  %v4567_v58 = vpop.f32.mrb[10].mxu0  ;;  %v5835_v62 = vadd.f32 %v8693_v16, %v4609_v33  ;;  %v4613_v4 = vpop.f32.mrb[44].mxu1 }
 0x2f7   : > { %v4674_v61 = vmul.f32 %v5804_v36, %v8710_v42  ;;  %v5806_v2 = vadd.f32 %v4567_v58, %v8667_v60  ;;  %v4569_v35 = vpop.f32.mrb[11].mxu0  ;;  %v5760_v5 = vpack.c.bf16 %v8822_v15, %v8810_v26  ;;  %v5837_v43 = vadd.f32 %v8695_v13, %v4613_v4  ;;  %v4615_v37 = vpop.f32.mrb[45].mxu1 }
 0x2f8   : > { %4841 = vst [vmem:[%s8754_s24 + $0x18] sm:$0xff] %v5751_v10  ;;  %v4675_v48 = vmul.f32 %v5805_v7, %v8713_v3  ;;  %v5807_v54 = vadd.f32 %v4569_v35, %v8669_v45  ;;  %v4693_v45 = vmul.f32 %v5835_v62, %v8713_v3  ;;  %v4736_v51 = vadd.f32 %v8717_v8, %v4692_v28  ;;  %v4617_v0 = vpop.f32.mrb[46].mxu1 }
 0x2f9   : > { %v4718_v55 = vadd.f32 %v8717_v8, %v4674_v61  ;;  %v4676_v60 = vmul.f32 %v5806_v2, %v8710_v42  ;;  %4850 = vst [vmem:[%s8754_s24 + $0x60] sm:$0xff] %v5760_v5  ;;  %v4694_v32 = vmul.f32 %v5837_v43, %v8710_v42  ;;  %v4619_v13 = vpop.f32.mrb[47].mxu1  ;;  %v5839_v59 = vadd.f32 %v8697_v50, %v4615_v37 }
 0x2fa   : > { %v4719_v53 = vadd.f32 %v8722_v39, %v4675_v48  ;;  %v4677_v24 = vmul.f32 %v5807_v54, %v8713_v3  ;;  %v4737_v27 = vadd.f32 %v8722_v39, %v4693_v45 }
 0x2fb   : > { %v4857_v6 = vadd.f32 %v4856_v21, %v4718_v55  ;;  %v4720_v16 = vadd.f32 %v8717_v8, %v4676_v60  ;;  %v4738_v41 = vadd.f32 %v8717_v8, %v4694_v32  ;;  %v4695_v61 = vmul.f32 %v5839_v59, %v8713_v3 }
 0x2fc   : > { %v5752_v29 = vpack.c.bf16 %v4719_v53, %v4718_v55  ;;  %v4878_v22 = vadd.f32 %v4877_v38, %v4719_v53  ;;  %v4721_v56 = vadd.f32 %v8722_v39, %v4677_v24  ;;  %v4573_v20 = vpop.f32.mrb[12].mxu0  ;;  %v5761_v10 = vpack.c.bf16 %v4737_v27, %v4736_v51 }
 0x2fd   : > { %v4858_v30 = vadd.f32 %v4857_v6, %v4720_v16  ;;  %v5808_v14 = vadd.f32 %v4573_v20, %v8671_v34  ;;  %v4575_v63 = vpop.f32.mrb[13].mxu0  ;;  %v4739_v48 = vadd.f32 %v8722_v39, %v4695_v61 }
 0x2fe   : > { %4842 = vst [vmem:[%s8754_s24 + $0x20] sm:$0xff] %v5752_v29  ;;  %v5753_v21 = vpack.c.bf16 %v4721_v56, %v4720_v16  ;;  %v4879_v36 = vadd.f32 %v4878_v22, %v4721_v56  ;;  %v5809_v46 = vadd.f32 %v4575_v63, %v8673_v17  ;;  %v4577_v31 = vpop.f32.mrb[14].mxu0  ;;  %v5841_v17 = vadd.f32 %v8699_v12, %v4617_v0 }
 0x2ff   : > { %v4678_v33 = vmul.f32 %v5808_v14, %v8710_v42  ;;  %v5810_v34 = vadd.f32 %v4577_v31, %v8675_v18  ;;  %v4579_v38 = vpop.f32.mrb[15].mxu0  ;;  %4851 = vst [vmem:[%s8754_s24 + $0x68] sm:$0xff] %v5761_v10  ;;  %v5843_v18 = vadd.f32 %v8701_v25, %v4619_v13  ;;  %v5762_v60 = vpack.c.bf16 %v4739_v48, %v4738_v41 }
 0x300   : > { %4843 = vst [vmem:[%s8754_s24 + $0x28] sm:$0xff] %v5753_v21  ;;  %v4679_v7 = vmul.f32 %v5809_v46, %v8713_v3  ;;  %v5811_v58 = vadd.f32 %v4579_v38, %v8677_v1  ;;  %v4696_v1 = vmul.f32 %v5841_v17, %v8710_v42 }
 0x301   : > { %v4722_v2 = vadd.f32 %v8717_v8, %v4678_v33  ;;  %v4680_v50 = vmul.f32 %v5810_v34, %v8710_v42  ;;  %v4697_v52 = vmul.f32 %v5843_v18, %v8713_v3  ;;  %4852 = vst [vmem:[%s8754_s24 + $0x70] sm:$0xff] %v5762_v60  ;;  %v9037_v33 = vlaneseq }
 0x302   : > { %v4723_v35 = vadd.f32 %v8722_v39, %v4679_v7  ;;  %v4681_v57 = vmul.f32 %v5811_v58, %v8713_v3  ;;  %v4740_v24 = vadd.f32 %v8717_v8, %v4696_v1 }
 0x303   : > { %v4859_v54 = vadd.f32 %v4858_v30, %v4722_v2  ;;  %v4724_v12 = vadd.f32 %v8717_v8, %v4680_v50  ;;  %v4741_v28 = vadd.f32 %v8722_v39, %v4697_v52  ;;  %vm4916_vm5 = vcmp.lt.s32.totalorder %v9037_v33, 256 }
 0x304   : > { %v5754_v62 = vpack.c.bf16 %v4723_v35, %v4722_v2  ;;  %v4880_v55 = vadd.f32 %v4879_v36, %v4723_v35  ;;  %v4725_v25 = vadd.f32 %v8722_v39, %v4681_v57  ;;  %v9036_v36 = vld [vmem:[#allocation3_spill] sm:$0xff] }
 0x305   : > { %v4860_v53 = vadd.f32 %v4859_v54, %v4724_v12  ;;  %v5763_v6 = vpack.c.bf16 %v4741_v28, %v4740_v24 }
 0x306   : > { %4844 = vst [vmem:[%s8754_s24 + $0x30] sm:$0xff] %v5754_v62  ;;  %v5755_v45 = vpack.c.bf16 %v4725_v25, %v4724_v12  ;;  %v4881_v42 = vadd.f32 %v4880_v55, %v4725_v25 }
 0x307   : > { %v4861_v4 = vadd.f32 %v4860_v53, %v8728_v19  ;;  %4853 = vst [vmem:[%s8754_s24 + $0x78] sm:$0xff] %v5763_v6 }
 0x308   : > { %4845 = vst [vmem:[%s8754_s24 + $0x38] sm:$0xff] %v5755_v45  ;;  %v4882_v3 = vadd.f32 %v4881_v42, %v8734_v23 }
 0x309   : > { %v4862_v16 = vadd.f32 %v4861_v4, %v8740_v9 }
 0x30a   : > { %v4883_v5 = vadd.f32 %v4882_v3, %v8747_v47 }
 0x30b   : > { %v4863_v43 = vadd.f32 %v4862_v16, %v8773_v11 }
 0x30c   : > { %v4884_v8 = vadd.f32 %v4883_v5, %v8780_v44 }
 0x30d   : > { %v4864_v39 = vadd.f32 %v4863_v43, %v8786_v49  ;;  %v6645_v49 = vmov 1966171168  }
 0x30e   : > { %v4885_v37 = vadd.f32 %v4884_v8, %v8798_v40  ;;  %v4900_v14 = vunpack.c.l.s4 %v6645_v49 }
 0x30f   : > { %v4865_v29 = vadd.f32 %v4864_v39, %v8810_v26 }
 0x310   : > { %v4886_v19 = vadd.f32 %v4885_v37, %v8822_v15  ;;  %v4901_v15 = vunpack.c.0.s8 %v4900_v14 }
 0x311   : > { %v4866_v23 = vadd.f32 %v4865_v29, %v4736_v51 }
 0x312   : > { %v4887_v22 = vadd.f32 %v4886_v19, %v4737_v27  ;;  %v4904_v46 = vsub.s32 %v4901_v15, %v9036_v36 }
 0x313   : > { %v4867_v9 = vadd.f32 %v4866_v23, %v4738_v41 }
 0x314   : > { %v4888_v56 = vadd.f32 %v4887_v22, %v4739_v48 }
 0x315   : > { %v4868_v20 = vadd.f32 %v4867_v9, %v4740_v24 }
 0x316   : > { %v4889_v47 = vadd.f32 %v4888_v56, %v4741_v28 }
 0x317   : > { %v4869_v11 = vrot.slane %v4868_v20, 4 }
 0x318   : > { %v4890_v0 = vrot.slane %v4889_v47, 4 }
 0x319   : > { %v4870_v44 = vadd.f32 %v4869_v11, %v4868_v20 }
 0x31a   : > { %v4891_v30 = vadd.f32 %v4890_v0, %v4889_v47 }
 0x31b   : > { %v4871_v40 = vrot.slane %v4870_v44, 2 }
 0x31c   : > { %v4892_v63 = vrot.slane %v4891_v30, 2 }
 0x31d   : > { %v4872_v26 = vadd.f32 %v4871_v40, %v4870_v44 }
 0x31e   : > { %v4893_v32 = vadd.f32 %v4892_v63, %v4891_v30 }
 0x31f   : > { %v4873_v51 = vrot.slane %v4872_v26, 1 }
 0x320   : > { %v4894_v27 = vrot.slane %v4893_v32, 1 }
 0x321   : > { %v4874_v13 = vadd.f32 %v4873_v51, %v4872_v26 }
 0x322   : > { %v4895_v21 = vadd.f32 %v4894_v27, %v4893_v32 }
 0x324   : > { %v4898_v31 = vcombine.low %v4874_v13, %v4895_v21 }
 0x326   : > { %v4905_v59 = vrot.slane %v4898_v31, %v4904_v46 }
 0x328   : > { %v4912_v10 = vrot.slane %v4905_v59, %v4904_v46 }
 0x32a   : > { %4918 = vst.msk [vmem:[%s566_s14] sm:$0x3] %vm4916_vm5, %v4912_v10 }
 0x32b PF: > { %s22_s19 = sadd.s32 1, %s6643_s19   ;;  %s9038_s15 = smov %s6635_s17 }
 0x32c   : > { %p19_p0 = scmp.ge.s32.totalorder %s22_s19, 6   ;;  %s9039_s16 = smov %s6639_s18 }
 0x32d   : > { %s9040_s17 = smov %s9043_s7  ;;  %s9041_s18 = smov %s9047_s20 }
 0x32e   :  { %21 = sbr.rel (!%p19_p0) target bundleno = 5 (0x5), region = 115 }

// kernel: decoder_forward.6
= control target key start
LH: loop header
LB: loop body
LE: loop exit
PB: predicated region body
PF: predicated region fallthrough
CT: control target
= control target key end

     0   :  { %s10361_s15 = smov 0   ;;  %s10363_s16 = smov 0   ;;  %s13105_s0 = inlined_call_operand.vmem [shape: bf16[2,16,16,256], index: 0, kind: input, shape index: {}, may-alias: {0,1,2}]   ;;  %s13106_s1 = inlined_call_operand.vmem [shape: bf16[2,16,16,256], index: 1, kind: input, shape index: {}, may-alias: {0,1,2}]   ;;  %s13107_s2 = inlined_call_operand.vmem [shape: bf16[2,16,16,256], index: 2, kind: input, shape index: {}, may-alias: {0,1,2}]   ;;  %s13108_s3 = inlined_call_operand.vmem [shape: bf16[3,3,256,256], index: 3, kind: input, shape index: {}]   ;;  %s13109_s4 = inlined_call_operand.vmem [shape: bf16[2,16,16,128], index: 4, kind: input, shape index: {}, may-alias: {4,5,6}]   ;;  %s13110_s5 = inlined_call_operand.vmem [shape: bf16[2,16,16,128], index: 5, kind: input, shape index: {}, may-alias: {4,5,6}]   ;;  %s13111_s6 = inlined_call_operand.vmem [shape: bf16[2,16,16,128], index: 6, kind: input, shape index: {}, may-alias: {4,5,6}]   ;;  %s13112_s7 = inlined_call_operand.vmem [shape: bf16[3,3,128,256], index: 7, kind: input, shape index: {}]   ;;  %s13113_s8 = inlined_call_operand.vmem [shape: f32[1,256], index: 8, kind: input, shape index: {}]   ;;  %s13114_s9 = inlined_call_operand.vmem [shape: f32[1,256], index: 9, kind: input, shape index: {}]   ;;  %s13115_s10 = inlined_call_operand.vmem [shape: f32[1,128], index: 10, kind: input, shape index: {}]   ;;  %s13116_s11 = inlined_call_operand.<no memory space> [shape: f32[1], index: 11, kind: input, shape index: {}]   ;;  %s13117_s12 = inlined_call_operand.vmem [shape: f32[2,1,128], index: 12, kind: input, shape index: {}]   ;;  %s13118_s13 = inlined_call_operand.vmem [shape: bf16[2,16,16,256], index: 13, kind: output, shape index: {0}]   ;;  %s13119_s14 = inlined_call_operand.vmem [shape: f32[2,2,1,256], index: 14, kind: output, shape index: {1}]  }
   0x1   :  { %13188 = sst [smem:[#allocation33_spill]] %s13107_s2  ;;  %s10365_s17 = smov 0  }
   0x2   :  { %13189 = sst [smem:[#allocation34_spill]] %s13110_s5  ;;  %s10367_s18 = smov 0  }
   0x3   :  { %13190 = sst [smem:[#allocation35_spill]] %s13113_s8  ;;  %s10369_s19 = smov 0  }
   0x4   :  { %13191 = sst [smem:[#allocation36_spill]] %s13114_s9 }
   0x5   :  { %13192 = sst [smem:[#allocation37_spill]] %s13118_s13 }
   0x6   :  { %13193 = sst [smem:[#allocation38_spill]] %s13119_s14 }
   0x7   :  { %20 = sst [smem:[#allocation2]] %s13116_s11 }
   0x8 LB: > { %13194 = sst [smem:[#allocation3_spill]] %s10271_s17  ;;  %s35_s11 = sadd.s32 1, %s10271_s17  ;;  %s10279_s19 = sphi %s10369_s19, %s26_s19   ;;  %s10275_s18 = sphi %s10367_s18, %s13290_s18   ;;  %s10271_s17 = sphi %s10365_s17, %s13289_s17   ;;  %s10267_s16 = sphi %s10363_s16, %s13288_s16   ;;  %s10263_s15 = sphi %s10361_s15, %s13287_s15  }
   0x9   : > { %13195 = sst [smem:[#allocation4_spill]] %s10275_s18  ;;  %s38_s20 = sadd.s32 1, %s10275_s18 }
   0xa   : > { %13196 = sst [smem:[#allocation5_spill]] %s10279_s19  ;;  %p36_p0 = scmp.ge.s32.totalorder %s35_s11, 2 }
   0xb   : > { %p7904_p1 = scmp.ge.s32.totalorder %s10279_s19, 1  ;;  %p594_p2 = scmp.lt.s32.totalorder %s10279_s19, 5 }
   0xc   : > { %s13292_s11 = smov (%p36_p0, %s35_s11), 0  ;;  %s13294_s20 = smov (!%p36_p0, %s38_s20), %s10275_s18 }
   0xd   : > { %13197 = sst [smem:[#allocation6_spill]] %s13292_s11  ;;  %p595_p3 = pnand %p7904_p1, %p594_p2 }
   0xe   : > { %p40_p4 = scmp.ge.s32.totalorder %s13294_s20, 2 }
   0xf   : > { %598 = sbr.rel (%p595_p3) target bundleno = 1055 (0x41f), region = 72 }
  0x10   : > { %s13296_s20 = smov (%p40_p4, %s13294_s20), 0 }
  0x11   : > { %13198 = sst [smem:[#allocation7_spill]] %s13296_s20 }
  0x16   : > { %v9486_v0 = vld [vmem:[%s13108_s3 + $0x104] ss:$8 sps:$4 sm:$0xff]   ;;  %s10397_s23 = sshll.u32 %s10263_s15, 3  ;;  %p727_p5 = scmp.lt.s32.totalorder %s10267_s16, 1  ;;  %v9488_v1 = vld [vmem:[%s13108_s3 + $0x100] ss:$8 sps:$4 sm:$0xff]  }
  0x17   : > { %p743_p6 = scmp.lt.s32.totalorder %s10397_s23, 15  ;;  %s7906_s26 = sadd.s32 4294967295, %s10397_s23  ;;  %1631 = vmatprep.subr.bf16.mxu1 %v9486_v0  ;;  %v9489_v2 = vld [vmem:[%s13108_s3 + $0x114] ss:$8 sps:$4 sm:$0xff]   ;;  %v9491_v3 = vld [vmem:[%s13108_s3 + $0x110] ss:$8 sps:$4 sm:$0xff]  }
  0x18   : > { %s13298_s16 = smov (!%p727_p5, %s10267_s16), 1  ;;  %1632 = vmatpush1.bf16.msra.mxu1 %v9488_v1  ;;  %v9492_v4 = vld [vmem:[%s13108_s3 + $0x124] ss:$8 sps:$4 sm:$0xff]   ;;  %p725_p7 = scmp.gt.s32.totalorder %s7906_s26, 0  ;;  %v9494_v5 = vld [vmem:[%s13108_s3 + $0x120] ss:$8 sps:$4 sm:$0xff]  }
  0x19   : > { %s10413_s21 = scalar_select %p743_p6, %s10397_s23, 15  ;;  %1633 = vmatprep.subr.bf16.mxu1 %v9489_v2  ;;  %v9495_v6 = vld [vmem:[%s13108_s3 + $0x134] ss:$8 sps:$4 sm:$0xff]   ;;  %v10440_v8 = vld [vmem:[%s13115_s10] ss:$0 sm:$0xff]  ;;  %vm1154_vm0 = vcmask 1040384  }
  0x1a   : > { %s10419_s25 = sshll.u32 %s13298_s16, 5  ;;  %p7907_p8 = scmp.lt.s32.totalorder %s7906_s26, 15  ;;  %v9497_v11 = vld [vmem:[%s13108_s3 + $0x130] ss:$8 sps:$4 sm:$0xff]   ;;  %v9498_v12 = vld [vmem:[%s13108_s3 + $0x144] ss:$8 sps:$4 sm:$0xff]  }
  0x1b   : > { %s7937_s27 = sshll.u32 %s10413_s21, 1  ;;  %s13199_s5 = sld [smem:[#allocation34_spill]]  ;;  %v9500_v16 = vld [vmem:[%s13108_s3 + $0x140] ss:$8 sps:$4 sm:$0xff]   ;;  %v9501_v18 = vld [vmem:[%s13108_s3 + $0x154] ss:$8 sps:$4 sm:$0xff]  }
  0x1c   : > { %s792_s28 = sadd.s32 %s7937_s27, %s10419_s25  ;;  %1634 = vmatpush1.bf16.msra.mxu1 %v9491_v3  ;;  %s13300_s26 = smov (!%p725_p7, %s7906_s26), 0  ;;  %v9503_v21 = vld [vmem:[%s13108_s3 + $0x150] ss:$8 sps:$4 sm:$0xff]   ;;  %v9504_v23 = vld [vmem:[%s13108_s3 + $0x164] ss:$8 sps:$4 sm:$0xff]   ;;  %vm2049_vm4 = vcmask 1046528  }
  0x1d   : > { %s7939_s29 = sshll.u32 %s792_s28, 2  ;;  %1635 = vmatprep.subr.bf16.mxu1 %v9492_v4  ;;  %s13302_s26 = smov (!%p7907_p8, %s13300_s26), 15  ;;  %v9506_v27 = vld [vmem:[%s13108_s3 + $0x160] ss:$8 sps:$4 sm:$0xff]   ;;  %v9507_v28 = vld [vmem:[%s13108_s3 + $0x174] ss:$8 sps:$4 sm:$0xff]  }
  0x1e   : > { %s7933_s30 = sshll.u32 %s13302_s26, 1  ;;  %p836_p9 = scmp.gt.s32.totalorder %s10263_s15, 0  ;;  %v9509_v30 = vld [vmem:[%s13108_s3 + $0x170] ss:$8 sps:$4 sm:$0xff]   ;;  %v9510_v31 = vld [vmem:[%s13108_s3 + $0x184] ss:$8 sps:$4 sm:$0xff]  }
  0x1f   : > { %s10464_s27 = sshll.u32 %s13298_s16, 6  ;;  %s7916_s11 = sshll.u32 %s10413_s21, 2  ;;  %v9512_v42 = vld [vmem:[%s13108_s3 + $0x180] ss:$8 sps:$4 sm:$0xff]   ;;  %v9513_v47 = vld [vmem:[%s13108_s3 + $0x194] ss:$8 sps:$4 sm:$0xff]  }
  0x20   : > { %1636 = vmatpush1.bf16.msra.mxu1 %v9494_v5  ;;  %s778_s28 = sadd.s32 %s10419_s25, %s7933_s30  ;;  %v9515_v54 = vld [vmem:[%s13108_s3 + $0x190] ss:$8 sps:$4 sm:$0xff]   ;;  %vm1155_vm1 = vsmask.f32 256  ;;  %v9516_v56 = vld [vmem:[%s13108_s3 + $0x1a4] ss:$8 sps:$4 sm:$0xff]  }
  0x21   : > { %s10432_s17 = scalar_lea.vmem %s13199_s5, %s7939_s29  ;;  %1637 = vmatprep.subr.bf16.mxu1 %v9495_v6  ;;  %s7912_s29 = sshll.u32 %s13302_s26, 2  ;;  %v9518_v2 = vld [vmem:[%s13108_s3 + $0x1a0] ss:$8 sps:$4 sm:$0xff]   ;;  %vm10576_vm2 = vmand %vm1154_vm0, %vm1155_vm1  ;;  %v9519_v6 = vld [vmem:[%s13108_s3 + $0x1b4] ss:$8 sps:$4 sm:$0xff]  }
  0x22   : > { %v10435_v7 = vld [vmem:[%s10432_s17] sm:$0xff]   ;;  %v10458_v15 = vld [vmem:[%s10432_s17 + $0x8] sm:$0xff]   ;;  %s837_s5 = scalar_select %p836_p9, 1, 0  ;;  %v10479_v20 = vld [vmem:[%s10432_s17 + $0x10] sm:$0xff]  }
  0x23   : > { %v13136_v9 = vunpack.c.l.bf16 %v10435_v7  ;;  %v13135_v10 = vunpack.c.h.bf16 %v10435_v7  ;;  %v13134_v17 = vunpack.c.h.bf16 %v10458_v15  ;;  %s10473_s19 = sadd.s32 %s10464_s27, %s7912_s29  ;;  %v13132_v22 = vunpack.c.h.bf16 %v10479_v20  ;;  %s10486_s26 = sadd.s32 %s7916_s11, %s10464_s27  ;;  %v10493_v24 = vld [vmem:[%s10432_s17 + $0x18] sm:$0xff]   ;;  %v10510_v29 = vld [vmem:[%s10432_s17 + $0x20] sm:$0xff]   ;;  %v10527_v34 = vld [vmem:[%s10432_s17 + $0x28] sm:$0xff]  }
  0x24   : > { %1638 = vmatpush1.bf16.msra.mxu1 %v9497_v11  ;;  %s838_s21 = scvt.s32.f32 %s837_s5  ;;  %s7935_s30 = sshll.u32 %s778_s28, 2  ;;  %v13130_v26 = vunpack.c.h.bf16 %v10493_v24  ;;  %v13128_v33 = vunpack.c.h.bf16 %v10510_v29  ;;  %v13126_v39 = vunpack.c.h.bf16 %v10527_v34  ;;  %v13133_v63 = vunpack.c.l.bf16 %v10458_v15  ;;  %v10569_v1 = vld [vmem:[%s10432_s17 + $0x30] sm:$0xff]  }
  0x25   : > { %v4611_v13 = vmul.f32 %v13136_v9, %v10440_v8  ;;  %v4612_v14 = vmul.f32 %v13135_v10, %v10440_v8  ;;  %1639 = vmatprep.subr.bf16.mxu1 %v9498_v12  ;;  %v4614_v19 = vmul.f32 %v13134_v17, %v10440_v8  ;;  %s7914_s14 = sshll.u32 %s10473_s19, 2  ;;  %v4616_v25 = vmul.f32 %v13132_v22, %v10440_v8  ;;  %s780_s20 = scalar_lea.vmem %s13109_s4, %s7935_s30 }
  0x26   : > { %s841_s29 = sshrl.u32 %s838_s21, 16  ;;  %p840_p10 = scmp.ne.f32.partialorder %s838_s21, %s838_s21  ;;  %v4618_v32 = vmul.f32 %v13130_v26, %v10440_v8  ;;  %v4556_v35 = vld [vmem:[%s780_s20] sm:$0xf]  ;;  %v4557_v36 = vld [vmem:[%s780_s20 + $0x4] sm:$0xf]  ;;  %v4620_v40 = vmul.f32 %v13128_v33, %v10440_v8  ;;  %v4622_v48 = vmul.f32 %v13126_v39, %v10440_v8  ;;  %v13131_v11 = vunpack.c.l.bf16 %v10479_v20 }
  0x27   : > { %4633 = vadd.xlane.f32.xlu1 %v4611_v13  ;;  %s842_s5 = sand.u32 1, %s841_s29  ;;  %s735_s2 = scalar_lea.vmem %s13105_s0, %s7914_s14  ;;  %vm1229_vm3 = vsmask.f32 7424 }
  0x28   : > { %1640 = vmatpush1.bf16.msra.mxu1 %v9500_v16  ;;  %s843_s28 = sadd.s32 32767, %s842_s5  ;;  %s13200_s8 = sshll.u32 %s10486_s26, 2  ;;  %v862_v37 = vld [vmem:[%s735_s2] sm:$0xff]  ;;  %v863_v38 = vld [vmem:[%s735_s2 + $0x8] sm:$0xff] }
  0x29   : > { %1641 = vmatprep.subr.bf16.mxu1 %v9501_v18  ;;  %s844_s29 = sadd.s32 %s843_s28, %s838_s21  ;;  %s10534_s14 = scalar_lea.vmem %s13106_s1, %s13200_s8 }
  0x2a   : > { %s845_s5 = sand.u32 4294901760, %s844_s29  ;;  %v9540_v49 = vld [vmem:[%s10534_s14 + $0x4] ss:$8 sps:$4 sm:$0xff]   ;;  %v10563_v61 = vld [vmem:[%s10534_s14] ss:$8 sps:$4 sm:$0xff]   ;;  %p829_p11 = scmp.lt.s32.totalorder %s10263_s15, 1 }
  0x2b   : > { %4635 = vadd.xlane.f32.xlu1 %v4612_v14  ;;  %s13304_s5 = smov (%p840_p10, %s845_s5), 2143289344  ;;  %v996_v60 = vshrl.u32 %v9540_v49, 16  ;;  %v999_v18 = vshll.u32 %v9540_v49, 16  ;;  %s8840_s29 = sadd.s32 8, %s10397_s23 }
  0x2c   : > { %1642 = vmatpush1.bf16.msra.mxu1 %v9503_v21  ;;  %s848_s21 = sshrl.u32 %s13304_s5, 16  ;;  %v4613_v21 = vmul.f32 %v13133_v63, %v10440_v8  ;;  %p753_p12 = scmp.lt.s32.totalorder %s8840_s29, 15 }
  0x2d   : > { %1643 = vmatprep.subr.bf16.mxu1 %v9504_v23  ;;  %s864_s11 = sshll.u32 %s848_s21, 16  ;;  %v998_v16 = vrot.slane %v996_v60, 7  ;;  %s13312_s15 = smov (!%p829_p11, %s10263_s15), 1 }
  0x2e   : > { %s865_s19 = sor.u32 %s864_s11, %s848_s21  ;;  %s11227_s21 = scalar_lea.vmem %s13117_s12, %s13298_s16 }
  0x2f   : > { %4639 = vadd.xlane.f32.xlu1 %v4614_v19  ;;  %v866_v41 = vstv %s865_s19  ;;  %v13124_v19 = vunpack.c.h.bf16 %v10569_v1  ;;  %s13306_s29 = smov (!%p753_p12, %s8840_s29), 15 }
  0x30   : > { %1644 = vmatpush1.bf16.msra.mxu1 %v9506_v27  ;;  %v4558_v43 = vmul.bf16 %v4556_v35, %v866_v41  ;;  %v868_v44 = vmul.bf16 %v866_v41, %v862_v37  ;;  %v869_v45 = vmul.bf16 %v866_v41, %v863_v38  ;;  %v4559_v46 = vmul.bf16 %v4557_v36, %v866_v41  ;;  %v9549_v27 = vld [vmem:[%s10534_s14 + $0x14] ss:$8 sps:$4 sm:$0xff]   ;;  %v9522_v36 = vld [vmem:[%s13108_s3 + $0x1c4] ss:$8 sps:$4 sm:$0xff]   ;;  %v9524_v37 = vld [vmem:[%s13108_s3 + $0x1c0] ss:$8 sps:$4 sm:$0xff]  }
  0x31   : > { %1645 = vmatprep.subr.bf16.mxu1 %v9507_v28  ;;  %v9521_v28 = vld [vmem:[%s13108_s3 + $0x1b0] ss:$8 sps:$4 sm:$0xff]   ;;  %v4615_v35 = vmul.f32 %v13131_v11, %v10440_v8  ;;  %v1001_v41 = vor.u32 %v999_v18, %v998_v16  ;;  %s13308_s29 = smov (!%p753_p12, %s13306_s29), 15 }
  0x32   : > { %v10550_v50 = vunpack.c.l.bf16 %v4558_v43  ;;  %v10552_v51 = vunpack.c.l.bf16 %v4559_v46  ;;  %v7954_v52 = vcombine.high %v868_v44, %v869_v45  ;;  %v7953_v53 = vcombine.low %v868_v44, %v869_v45  ;;  %v9525_v43 = vld [vmem:[%s13108_s3 + $0x1d4] ss:$8 sps:$4 sm:$0xff]  }
  0x33   : > { %4643 = vadd.xlane.f32.xlu1 %v4616_v25  ;;  %v989_v25 = vshrl.u32 %v10563_v61, 16  ;;  %v13129_v44 = vunpack.c.l.bf16 %v10493_v24  ;;  %v992_v46 = vshll.u32 %v10563_v61, 16 }
  0x34   : > { %1646 = vmatpush1.bf16.msra.mxu1 %v9509_v30  ;;  %v4609_v55 = vmul.f32 %v10440_v8, %v10550_v50  ;;  %v982_v57 = vshrl.u32 %v7954_v52, 16  ;;  %v985_v58 = vshll.u32 %v7954_v52, 16  ;;  %v975_v59 = vshrl.u32 %v7953_v53, 16  ;;  %v9551_v52 = vld [vmem:[%s10534_s14 + $0x10] ss:$8 sps:$4 sm:$0xff]  }
  0x35   : > { %1647 = vmatprep.subr.bf16.mxu1 %v9510_v31  ;;  %v4610_v62 = vmul.f32 %v10440_v8, %v10552_v51  ;;  %v978_v5 = vshll.u32 %v7953_v53, 16  ;;  %v991_v45 = vrot.slane %v989_v25, 7  ;;  %v13125_v25 = vunpack.c.l.bf16 %v10527_v34 }
  0x36   : > { %4629 = vadd.xlane.f32.xlu0 %v4609_v55  ;;  %v984_v0 = vrot.slane %v982_v57, 7  ;;  %v977_v4 = vrot.slane %v975_v59, 7  ;;  %v9558_v55 = vld [vmem:[%s10534_s14 + $0x24] ss:$8 sps:$4 sm:$0xff]   ;;  %v4617_v59 = vmul.f32 %v13129_v44, %v10440_v8 }
  0x37   : > { %4647 = vadd.xlane.f32.xlu1 %v4618_v32  ;;  %v994_v61 = vor.u32 %v992_v46, %v991_v45  ;;  %v1024_v18 = vshrl.u32 %v9558_v55, 16  ;;  %v10678_v46 = vld [vmem:[%s10534_s14 + $0x34] ss:$8 sps:$4 sm:$0xff]  }
  0x38   : > { %1648 = vmatpush1.bf16.msra.mxu1 %v9512_v42  ;;  %v987_v12 = vor.u32 %v985_v58, %v984_v0  ;;  %v10586_v13 = vsel %vm10576_vm2, %v984_v0, 0  ;;  %v980_v32 = vor.u32 %v978_v5, %v977_v4  ;;  %v4624_v42 = vmul.f32 %v13124_v19, %v10440_v8  ;;  %v9528_v5 = vld [vmem:[%s13108_s3 + $0x1e4] ss:$8 sps:$4 sm:$0xff]  }
  0x39   : > { %1649 = vmatprep.subr.bf16.mxu1 %v9513_v47  ;;  %v1250_v14 = vshll.u32 %v10586_v13, 16  ;;  %v1010_v47 = vshrl.u32 %v9549_v27, 16  ;;  %v10631_v58 = vsel %vm10576_vm2, 0, %v1001_v41  ;;  %v10642_v0 = vsel %vm10576_vm2, %v977_v4, 0 }
  0x3a   : > { %4631 = vadd.xlane.f32.xlu0 %v4610_v62  ;;  %v10595_v23 = vsel %vm10576_vm2, 0, %v987_v12  ;;  %v10623_v49 = vsel %vm10576_vm2, 0, %v980_v32  ;;  %v9527_v62 = vld [vmem:[%s13108_s3 + $0x1d0] ss:$8 sps:$4 sm:$0xff]   ;;  %v1269_v12 = vshll.u32 %v10631_v58, 16 }
  0x3b   : > { %4651 = vadd.xlane.f32.xlu1 %v4620_v40  ;;  %v1243_v30 = vshrl.u32 %v10595_v23, 16  ;;  %v1245_v31 = vshll.u32 %v10595_v23, 16  ;;  %v1252_v40 = vrot.slane %v1250_v14, 1  ;;  %v1012_v53 = vrot.slane %v1010_v47, 7  ;;  %v9531_v32 = vld [vmem:[%s13108_s3 + $0x1f4] ss:$8 sps:$4 sm:$0xff]  }
  0x3c   : > { %1650 = vmatpush1.bf16.msra.mxu1 %v9515_v54  ;;  %v1013_v54 = vshll.u32 %v9549_v27, 16  ;;  %v1233_v60 = vshll.u32 %v10623_v49, 16  ;;  %v10660_v27 = vld [vmem:[%s10534_s14 + $0x20] ss:$8 sps:$4 sm:$0xff]   ;;  %v4621_v47 = vmul.f32 %v13125_v25, %v10440_v8 }
  0x3d   : > { %1651 = vmatprep.subr.bf16.mxu1 %v9516_v56  ;;  %v1247_v38 = vrot.slane %v1245_v31, 1  ;;  %v13127_v56 = vunpack.c.l.bf16 %v10510_v29  ;;  %v10666_v31 = vsel %vm10576_vm2, 0, %v994_v61  ;;  %v10695_v61 = vsel %vm10576_vm2, %v1012_v53, 0 }
  0x3e   : > { %4637 = vadd.xlane.f32.xlu0 %v4613_v21  ;;  %v1015_v14 = vor.u32 %v1013_v54, %v1012_v53  ;;  %v9530_v21 = vld [vmem:[%s13108_s3 + $0x1e0] ss:$8 sps:$4 sm:$0xff]  }
  0x3f   : > { %4655 = vadd.xlane.f32.xlu1 %v4622_v48  ;;  %v1248_v48 = vor.u32 %v1247_v38, %v1243_v30  ;;  %v4619_v4 = vmul.f32 %v13127_v56, %v10440_v8  ;;  %v1238_v30 = vshll.u32 %v10642_v0, 16  ;;  %v1006_v38 = vshll.u32 %v9551_v52, 16 }
  0x40   : > { %1652 = vmatpush1.bf16.msra.mxu1 %v9518_v2  ;;  %v1003_v2 = vshrl.u32 %v9551_v52, 16  ;;  %v10675_v41 = vsel %vm10576_vm2, 0, %v1015_v14  ;;  %v1257_v52 = vshll.u32 %v10666_v31, 16 }
  0x41   : > { %1653 = vmatprep.subr.bf16.mxu1 %v9519_v6  ;;  %v1253_v57 = vsel %vm1229_vm3, %v1248_v48, %v1252_v40  ;;  %v10649_v6 = vsel %vm10576_vm2, %v998_v16, 0  ;;  %v1231_v16 = vshrl.u32 %v10623_v49, 16  ;;  %v1271_v40 = vrot.slane %v1269_v12, 1 }
  0x42   : > { %4641 = vadd.xlane.f32.xlu0 %v4615_v35  ;;  %1663 = vmatprep.mubr.bf16.mxu1 %v1253_v57  ;;  %v1267_v35 = vshrl.u32 %v10631_v58, 16  ;;  %v10685_v48 = vsel %vm10576_vm2, %v991_v45, 0  ;;  %v1240_v57 = vrot.slane %v1238_v30, 1  ;;  %v1293_v45 = vshll.u32 %v10675_v41, 16 }
  0x43   : > { %4659 = vadd.xlane.f32.xlu1 %v4624_v42  ;;  %v1026_v42 = vrot.slane %v1024_v18, 7  ;;  %v1255_v18 = vshrl.u32 %v10666_v31, 16 }
  0x44   : > { %1654 = vmatpush1.bf16.msra.mxu1 %v9521_v28  ;;  %v1235_v28 = vrot.slane %v1233_v60, 1  ;;  %v1017_v60 = vshrl.u32 %v10660_v27, 16 }
  0x45   : > { %1655 = vmatprep.subr.bf16.mxu1 %v9522_v36  ;;  %v1274_v36 = vshll.u32 %v10649_v6, 16 }
  0x46   : > { %4645 = vadd.xlane.f32.xlu0 %v4617_v59  ;;  %v1236_v54 = vor.u32 %v1235_v28, %v1231_v16  ;;  %v13123_v59 = vunpack.c.l.bf16 %v10569_v1  ;;  %v1038_v16 = vshrl.u32 %v10678_v46, 16  ;;  %v9534_v28 = vld [vmem:[%s13108_s3] ss:$8 sps:$4 sm:$0xff]  }
  0x47   : > { %v1276_v12 = vrot.slane %v1274_v36, 1  ;;  %v9539_v36 = vld [vmem:[%s13108_s3 + $0x14] ss:$8 sps:$4 sm:$0xff]  }
  0x48   : > { %1656 = vmatpush1.bf16.msra.mxu1 %v9524_v37  ;;  %v1005_v37 = vrot.slane %v1003_v2, 7  ;;  %v9536_v2 = vld [vmem:[%s13108_s3 + $0x4] ss:$8 sps:$4 sm:$0xff]   ;;  %v1241_v53 = vsel %vm1229_vm3, %v1236_v54, %v1240_v57  ;;  %v4623_v30 = vmul.f32 %v13123_v59, %v10440_v8  ;;  %v9569_v54 = vld [vmem:[%s10534_s14 + $0x30] ss:$8 sps:$4 sm:$0xff]   ;;  %v1040_v59 = vrot.slane %v1038_v16, 7 }
  0x49   : > { %1657 = vmatprep.subr.bf16.mxu1 %v9525_v43  ;;  %v1027_v43 = vshll.u32 %v9558_v55, 16  ;;  %v9533_v55 = vld [vmem:[%s13108_s3 + $0x1f0] ss:$8 sps:$4 sm:$0xff]   ;;  %v9576_v57 = vld [vmem:[%s10534_s14 + $0x44] ss:$8 sps:$4 sm:$0xff]   ;;  %v1034_v19 = vshll.u32 %v9569_v54, 16 }
  0x4a   : > { %4649 = vadd.xlane.f32.xlu0 %v4619_v4  ;;  %v1262_v4 = vshll.u32 %v10685_v48, 16 }
  0x4b   : > { %v1029_v14 = vor.u32 %v1027_v43, %v1026_v42 }
  0x4c   : > { %1658 = vmatpush1.bf16.msra.mxu1 %v9527_v62  ;;  %v1008_v62 = vor.u32 %v1006_v38, %v1005_v37  ;;  %v1291_v38 = vshrl.u32 %v10675_v41, 16 }
  0x4d   : > { %1659 = vmatprep.subr.bf16.mxu1 %v9528_v5  ;;  %v1272_v5 = vor.u32 %v1271_v40, %v1267_v35  ;;  %v1019_v35 = vrot.slane %v1017_v60, 7  ;;  %v1295_v40 = vrot.slane %v1293_v45, 1  ;;  %v1041_v45 = vshll.u32 %v10678_v46, 16 }
  0x4e   : > { %4653 = vadd.xlane.f32.xlu0 %v4621_v47  ;;  %v10718_v43 = vsel %vm10576_vm2, 0, %v1008_v62  ;;  %v1020_v47 = vshll.u32 %v10660_v27, 16  ;;  %v10733_v27 = vsel %vm10576_vm2, %v1005_v37, 0  ;;  %v9545_v37 = vld [vmem:[%s13108_s3 + $0x24] ss:$8 sps:$4 sm:$0xff]  }
  0x4f   : > { %v10722_v8 = vsel %vm1229_vm3, %v1272_v5, %v1276_v12  ;;  %v1281_v62 = vshll.u32 %v10718_v43, 16  ;;  %v1296_v5 = vor.u32 %v1295_v40, %v1291_v38 }
  0x50   : > { %1660 = vmatpush1.bf16.msra.mxu1 %v9530_v21  ;;  %v1259_v21 = vrot.slane %v1257_v52, 1  ;;  %v10726_v52 = vsel %vm10576_vm2, 0, %v1029_v14  ;;  %v1022_v46 = vor.u32 %v1020_v47, %v1019_v35 }
  0x51   : > { %1661 = vmatprep.subr.bf16.mxu1 %v9531_v32  ;;  %v1298_v32 = vshll.u32 %v10695_v61, 16  ;;  %v1317_v14 = vshll.u32 %v10726_v52, 16  ;;  %v1315_v38 = vshrl.u32 %v10726_v52, 16 }
  0x52   : > { %v1260_v60 = vor.u32 %v1259_v21, %v1255_v18  ;;  %4657 = vadd.xlane.f32.xlu0 %v4623_v30  ;;  %v10746_v18 = vsel %vm10576_vm2, %v1026_v42, 0  ;;  %v1031_v21 = vshrl.u32 %v9569_v54, 16  ;;  %v1279_v30 = vshrl.u32 %v10718_v43, 16 }
  0x53   : > { %v1300_v12 = vrot.slane %v1298_v32, 1  ;;  %v1283_v32 = vrot.slane %v1281_v62, 1  ;;  %v1319_v40 = vrot.slane %v1317_v14, 1  ;;  %v1322_v47 = vshll.u32 %v10746_v18, 16 }
  0x54   : > { %1662 = vmatpush1.bf16.msra.mxu1 %v9533_v55  ;;  %v1264_v55 = vrot.slane %v1262_v4, 1  ;;  %v1052_v4 = vshrl.u32 %v9576_v57, 16  ;;  %v1033_v62 = vrot.slane %v1031_v21, 7  ;;  %v10782_v21 = vsel %vm10576_vm2, %v1019_v35, 0 }
  0x55   : > { %1904 = vmatprep.subr.bf16.mxu1 %v9536_v2  ;;  %v9537_v2 = vld [vmem:[%s13108_s3 + $0x10] ss:$8 sps:$4 sm:$0xff]   ;;  %v10758_v42 = vsel %vm1229_vm3, %v1296_v5, %v1300_v12  ;;  %v9585_v12 = vld [vmem:[%s10534_s14 + $0x54] ss:$8 sps:$4 sm:$0xff]   ;;  %v1284_v14 = vor.u32 %v1283_v32, %v1279_v30  ;;  %v1320_v54 = vor.u32 %v1319_v40, %v1315_v38  ;;  %v9552_v38 = vld [vmem:[%s13108_s3 + $0x40] ss:$8 sps:$4 sm:$0xff]  }
  0x56   : > { %v10749_v16 = vsel %vm1229_vm3, %v1260_v60, %v1264_v55  ;;  %13203 = vst [vmem:[#allocation8_spill] sm:$0xff] %v10758_v42  ;;  %v10763_v60 = vsel %vm10576_vm2, 0, %v1022_v46  ;;  %v9578_v55 = vld [vmem:[%s10534_s14 + $0x40] ss:$8 sps:$4 sm:$0xff]   ;;  %v1054_v25 = vrot.slane %v1052_v4, 7  ;;  %v1036_v32 = vor.u32 %v1034_v19, %v1033_v62 }
  0x57   : > { %1664 = vmatmul.mubr.bf16.vlgmr.msra.gmra.mrb[0].mxu1 %v1241_v53  ;;  %v9543_v53 = vld [vmem:[%s13108_s3 + $0x20] ss:$8 sps:$4 sm:$0xff]   ;;  %v1305_v39 = vshll.u32 %v10763_v60, 16  ;;  %v1045_v4 = vshrl.u32 %v9578_v55, 16  ;;  %v1066_v35 = vshrl.u32 %v9585_v12, 16  ;;  %v1310_v56 = vshll.u32 %v10782_v21, 16 }
  0x58   : > { %1905 = vmatpush1.bf16.msra.mxu1 %v9534_v28  ;;  %1673 = vmatprep.mubr.bf16.mxu1 %v10722_v8  ;;  %v1043_v28 = vor.u32 %v1041_v45, %v1040_v59  ;;  %v9548_v45 = vld [vmem:[%s13108_s3 + $0x34] ss:$8 sps:$4 sm:$0xff]   ;;  %v10804_v19 = vld [vmem:[%s10534_s14 + $0x50] ss:$8 sps:$4 sm:$0xff]   ;;  %v10813_v11 = vsel %vm10576_vm2, 0, %v1036_v32  ;;  %v1069_v22 = vshll.u32 %v9585_v12, 16 }
  0x59   : > { %1906 = vmatprep.subr.bf16.mxu1 %v9539_v36  ;;  %v1286_v36 = vshll.u32 %v10733_v27, 16  ;;  %v10832_v12 = vsel %vm10576_vm2, %v1054_v25, 0  ;;  %v1062_v9 = vshll.u32 %v10804_v19, 16 }
  0x5a   : > { %v10771_v5 = vsel %vm10576_vm2, 0, %v1043_v28  ;;  %v9554_v28 = vld [vmem:[%s13108_s3 + $0x44] ss:$8 sps:$4 sm:$0xff]  }
  0x5b   : > { %v1288_v46 = vrot.slane %v1286_v36, 1  ;;  %v1341_v30 = vshll.u32 %v10771_v5, 16  ;;  %v1339_v44 = vshrl.u32 %v10771_v5, 16 }
  0x5c   : > { %1907 = vmatpush1.bf16.msra.mxu1 %v9537_v2  ;;  %v1055_v2 = vshll.u32 %v9576_v57, 16  ;;  %v1324_v57 = vrot.slane %v1322_v47, 1  ;;  %v9557_v47 = vld [vmem:[%s13108_s3 + $0x54] ss:$8 sps:$4 sm:$0xff]  }
  0x5d   : > { %1908 = vmatprep.subr.bf16.mxu1 %v9545_v37  ;;  %v9546_v37 = vld [vmem:[%s13108_s3 + $0x30] ss:$8 sps:$4 sm:$0xff]   ;;  %v10796_v40 = vsel %vm1229_vm3, %v1284_v14, %v1288_v46  ;;  %v1047_v14 = vrot.slane %v1045_v4, 7  ;;  %v1048_v46 = vshll.u32 %v9578_v55, 16  ;;  %v1343_v26 = vrot.slane %v1341_v30, 1 }
  0x5e   : > { %v1057_v36 = vor.u32 %v1055_v2, %v1054_v25  ;;  %13204 = vst [vmem:[#allocation9_spill] sm:$0xff] %v10796_v40  ;;  %v10807_v2 = vsel %vm1229_vm3, %v1320_v54, %v1324_v57  ;;  %v9594_v54 = vld [vmem:[%s10534_s14 + $0x64] ss:$8 sps:$4 sm:$0xff]   ;;  %v9555_v55 = vld [vmem:[%s13108_s3 + $0x50] ss:$8 sps:$4 sm:$0xff]   ;;  %v1312_v4 = vrot.slane %v1310_v56, 1 }
  0x5f   : > { %1674 = vmatmul.mubr.bf16.gmra.mrb[4].mxu1 %v10749_v16  ;;  %13205 = vst [vmem:[#allocation10_spill] sm:$0xff] %v10807_v2  ;;  %v1329_v30 = vshll.u32 %v10813_v11, 16  ;;  %v9563_v56 = vld [vmem:[%s13108_s3 + $0x64] ss:$8 sps:$4 sm:$0xff]   ;;  %v1080_v25 = vshrl.u32 %v9594_v54, 16 }
  0x60   : > { %1909 = vmatpush1.bf16.msra.mxu1 %v9543_v53  ;;  %1683 = vmatprep.mubr.bf16.mxu1 %v10758_v42  ;;  %v10789_v53 = vsel %vm10576_vm2, %v1040_v59, 0  ;;  %v1307_v59 = vrot.slane %v1305_v39, 1  ;;  %v10817_v39 = vsel %vm10576_vm2, 0, %v1057_v36  ;;  %v1050_v36 = vor.u32 %v1048_v46, %v1047_v14 }
  0x61   : > { %1910 = vmatprep.subr.bf16.mxu1 %v9548_v45  ;;  %v1303_v45 = vshrl.u32 %v10763_v60, 16  ;;  %v1346_v33 = vshll.u32 %v10789_v53, 16  ;;  %v1365_v32 = vshll.u32 %v10817_v39, 16  ;;  %v1327_v46 = vshrl.u32 %v10813_v11, 16 }
  0x62   : > { %v1363_v17 = vshrl.u32 %v10817_v39, 16  ;;  %v10854_v10 = vsel %vm10576_vm2, 0, %v1050_v36  ;;  %v1083_v36 = vshll.u32 %v9594_v54, 16 }
  0x63   : > { %v1308_v57 = vor.u32 %v1307_v59, %v1303_v45  ;;  %v9561_v45 = vld [vmem:[%s13108_s3 + $0x60] ss:$8 sps:$4 sm:$0xff]  }
  0x64   : > { %1911 = vmatpush1.bf16.msra.mxu1 %v9546_v37  ;;  %v1068_v37 = vrot.slane %v1066_v35, 7  ;;  %v1344_v35 = vor.u32 %v1343_v26, %v1339_v44  ;;  %v1331_v44 = vrot.slane %v1329_v30, 1 }
  0x65   : > { %1912 = vmatprep.subr.bf16.mxu1 %v9554_v28  ;;  %v10826_v28 = vsel %vm10576_vm2, %v1033_v62, 0  ;;  %v1348_v62 = vrot.slane %v1346_v33, 1  ;;  %v10843_v63 = vsel %vm1229_vm3, %v1308_v57, %v1312_v4  ;;  %v1370_v33 = vshll.u32 %v10832_v12, 16 }
  0x66   : > { %v1071_v59 = vor.u32 %v1069_v22, %v1068_v37  ;;  %13206 = vst [vmem:[#allocation11_spill] sm:$0xff] %v10843_v63  ;;  %v1334_v26 = vshll.u32 %v10826_v28, 16  ;;  %v1367_v22 = vrot.slane %v1365_v32, 1  ;;  %v1082_v32 = vrot.slane %v1080_v25, 7 }
  0x67   : > { %1684 = vmatmul.mubr.bf16.gmra.mrb[8].mxu1 %v10796_v40  ;;  %v10857_v57 = vsel %vm1229_vm3, %v1344_v35, %v1348_v62  ;;  %v9572_v35 = vld [vmem:[%s13108_s3 + $0x84] ss:$8 sps:$4 sm:$0xff]   ;;  %v1353_v62 = vshll.u32 %v10854_v10, 16  ;;  %v1372_v25 = vrot.slane %v1370_v33, 1  ;;  %v10882_v54 = vsel %vm10576_vm2, %v1068_v37, 0 }
  0x68   : > { %1913 = vmatpush1.bf16.msra.mxu1 %v9552_v38  ;;  %1693 = vmatprep.mubr.bf16.mxu1 %v10807_v2  ;;  %v1059_v38 = vshrl.u32 %v10804_v19, 16  ;;  %13207 = vst [vmem:[#allocation12_spill] sm:$0xff] %v10857_v57  ;;  %v10861_v2 = vld [vmem:[%s10534_s14 + $0x60] ss:$8 sps:$4 sm:$0xff]   ;;  %v10868_v30 = vsel %vm10576_vm2, 0, %v1071_v59  ;;  %v10876_v19 = vsel %vm10576_vm2, %v1047_v14, 0  ;;  %v1368_v59 = vor.u32 %v1367_v22, %v1363_v17 }
  0x69   : > { %1914 = vmatprep.subr.bf16.mxu1 %v9557_v47  ;;  %v9566_v47 = vld [vmem:[%s13108_s3 + $0x74] ss:$8 sps:$4 sm:$0xff]   ;;  %v1389_v14 = vshll.u32 %v10868_v30, 16  ;;  %v1073_v40 = vshrl.u32 %v10861_v2, 16  ;;  %v9570_v17 = vld [vmem:[%s13108_s3 + $0x80] ss:$8 sps:$4 sm:$0xff]   ;;  %v1085_v33 = vor.u32 %v1083_v36, %v1082_v32 }
  0x6a   : > { %v1061_v4 = vrot.slane %v1059_v38, 7  ;;  %v1332_v38 = vor.u32 %v1331_v44, %v1327_v46  ;;  %v1351_v37 = vshrl.u32 %v10854_v10, 16  ;;  %v1358_v46 = vshll.u32 %v10876_v19, 16  ;;  %v9650_v44 = vld [vmem:[%s13112_s7 + $0x10] ss:$8 sps:$4 sm:$0xff]  }
  0x6b   : > { %v10910_v36 = vsel %vm1229_vm3, %v1368_v59, %v1372_v25  ;;  %v10924_v59 = vsel %vm10576_vm2, 0, %v1085_v33 }
  0x6c   : > { %1915 = vmatpush1.bf16.msra.mxu1 %v9555_v55  ;;  %v9564_v55 = vld [vmem:[%s13108_s3 + $0x70] ss:$8 sps:$4 sm:$0xff]   ;;  %13209 = vst [vmem:[#allocation14_spill] sm:$0xff] %v10910_v36  ;;  %v1360_v25 = vrot.slane %v1358_v46, 1 }
  0x6d   : > { %1916 = vmatprep.subr.bf16.mxu1 %v9563_v56  ;;  %v1336_v56 = vrot.slane %v1334_v26, 1  ;;  %v9642_v26 = vld [vmem:[%s13112_s7 + $0x4] ss:$8 sps:$4 sm:$0xff]  }
  0x6e   : > { %5092 = vmatprep.subr.bf16.mxu0 %v9642_v26  ;;  %v1394_v26 = vshll.u32 %v10882_v54, 16 }
  0x6f   : > { %1694 = vmatmul.mubr.bf16.gmra.mrb[12].mxu1 %v10843_v63  ;;  %v1064_v63 = vor.u32 %v1062_v9, %v1061_v4  ;;  %v9648_v9 = vld [vmem:[%s13112_s7 + $0x14] ss:$8 sps:$4 sm:$0xff]   ;;  %v10904_v22 = vsel %vm1229_vm3, %v1332_v38, %v1336_v56  ;;  %v1076_v56 = vshll.u32 %v10861_v2, 16  ;;  %v9573_v38 = vld [vmem:[%s13108_s3 + $0x90] ss:$8 sps:$4 sm:$0xff]  }
  0x70   : > { %1917 = vmatpush1.bf16.msra.mxu1 %v9561_v45  ;;  %1703 = vmatprep.mubr.bf16.mxu1 %v10857_v57  ;;  %v9644_v45 = vld [vmem:[%s13112_s7] ss:$8 sps:$4 sm:$0xff]   ;;  %13208 = vst [vmem:[#allocation13_spill] sm:$0xff] %v10904_v22  ;;  %v9575_v57 = vld [vmem:[%s13108_s3 + $0x94] ss:$8 sps:$4 sm:$0xff]  }
  0x71   : > { %1918 = vmatprep.subr.bf16.mxu1 %v9566_v47  ;;  %v1355_v47 = vrot.slane %v1353_v62, 1  ;;  %5093 = vmatpush1.bf16.msra.mxu0 %v9644_v45  ;;  %v1387_v62 = vshrl.u32 %v10868_v30, 16  ;;  %v1391_v45 = vrot.slane %v1389_v14, 1  ;;  %v10916_v42 = vsel %vm10576_vm2, 0, %v1064_v63  ;;  %v9656_v2 = vld [vmem:[%s13112_s7 + $0x20] ss:$8 sps:$4 sm:$0xff]  }
  0x72   : > { %5094 = vmatprep.subr.bf16.mxu0 %v9648_v9  ;;  %v1396_v14 = vrot.slane %v1394_v26, 1  ;;  %v1377_v33 = vshll.u32 %v10916_v42, 16  ;;  %v13147_v26 = vmov 0  }
  0x73   : > { %v1356_v63 = vor.u32 %v1355_v47, %v1351_v37  ;;  %v9660_v37 = vld [vmem:[%s13112_s7 + $0x34] ss:$8 sps:$4 sm:$0xff]   ;;  %v1392_v46 = vor.u32 %v1391_v45, %v1387_v62  ;;  %v10947_v47 = vsel %vm10576_vm2, %v1082_v32, 0  ;;  %5124 = vmatprep.mubr.bf16.mxu0 %v13147_v26  ;;  %v9662_v45 = vld [vmem:[%s13112_s7 + $0x30] ss:$8 sps:$4 sm:$0xff]   ;;  %v1411_v26 = vshrl.u32 %v10924_v59, 16 }
  0x74   : > { %1919 = vmatpush1.bf16.msra.mxu1 %v9564_v55  ;;  %v1075_v55 = vrot.slane %v1073_v40, 7  ;;  %v10932_v40 = vsel %vm10576_vm2, %v1061_v4, 0  ;;  %v9581_v4 = vld [vmem:[%s13108_s3 + $0xa4] ss:$8 sps:$4 sm:$0xff]   ;;  %v9584_v62 = vld [vmem:[%s13108_s3 + $0xb4] ss:$8 sps:$4 sm:$0xff]  }
  0x75   : > { %1920 = vmatprep.subr.bf16.mxu1 %v9572_v35  ;;  %v9654_v35 = vld [vmem:[%s13112_s7 + $0x24] ss:$8 sps:$4 sm:$0xff]   ;;  %5095 = vmatpush1.bf16.msra.mxu0 %v9650_v44  ;;  %v9579_v44 = vld [vmem:[%s13108_s3 + $0xa0] ss:$8 sps:$4 sm:$0xff]   ;;  %v1382_v32 = vshll.u32 %v10932_v40, 16 }
  0x76   : > { %v1078_v9 = vor.u32 %v1076_v56, %v1075_v55  ;;  %5096 = vmatprep.subr.bf16.mxu0 %v9654_v35  ;;  %v1375_v56 = vshrl.u32 %v10916_v42, 16  ;;  %v1379_v35 = vrot.slane %v1377_v33, 1  ;;  %v9582_v33 = vld [vmem:[%s13108_s3 + $0xb0] ss:$8 sps:$4 sm:$0xff]  }
  0x77   : > { %1704 = vmatmul.mubr.bf16.gmra.mrb[16].mxu1 %v10904_v22 }
  0x78   : > { %1921 = vmatpush1.bf16.msra.mxu1 %v9570_v17  ;;  %1713 = vmatprep.mubr.bf16.mxu1 %v10910_v36  ;;  %v1413_v17 = vshll.u32 %v10924_v59, 16 }
  0x79   : > { %1922 = vmatprep.subr.bf16.mxu1 %v9575_v57  ;;  %v10955_v57 = vsel %vm1229_vm3, %v1356_v63, %v1360_v25  ;;  %5097 = vmatpush1.bf16.msra.mxu0 %v9656_v2  ;;  %v1418_v63 = vshll.u32 %v10947_v47, 16  ;;  %v10968_v25 = vsel %vm1229_vm3, %v1392_v46, %v1396_v14  ;;  %v10972_v2 = vsel %vm10576_vm2, 0, %v1078_v9  ;;  %v9668_v14 = vld [vmem:[%s13112_s7 + $0x40] ss:$8 sps:$4 sm:$0xff]   ;;  %v9590_v9 = vld [vmem:[%s13108_s3 + $0xc4] ss:$8 sps:$4 sm:$0xff]  }
  0x7a   : > { %13210 = vst [vmem:[#allocation15_spill] sm:$0xff] %v10955_v57  ;;  %5098 = vmatprep.subr.bf16.mxu0 %v9660_v37  ;;  %13211 = vst [vmem:[#allocation16_spill] sm:$0xff] %v10968_v25  ;;  %v1415_v36 = vrot.slane %v1413_v17, 1  ;;  %v1380_v37 = vor.u32 %v1379_v35, %v1375_v56  ;;  %v1401_v46 = vshll.u32 %v10972_v2, 16  ;;  %v9672_v17 = vld [vmem:[%s13112_s7 + $0x54] ss:$8 sps:$4 sm:$0xff]  }
  0x7b   : > { %v9593_v56 = vld [vmem:[%s13108_s3 + $0xd4] ss:$8 sps:$4 sm:$0xff]  }
  0x7c   : > { %1923 = vmatpush1.bf16.msra.mxu1 %v9573_v38  ;;  %v9666_v38 = vld [vmem:[%s13112_s7 + $0x44] ss:$8 sps:$4 sm:$0xff]  }
  0x7d   : > { %1924 = vmatprep.subr.bf16.mxu1 %v9581_v4  ;;  %5099 = vmatpush1.bf16.msra.mxu0 %v9662_v45  ;;  %v1384_v4 = vrot.slane %v1382_v32, 1  ;;  %v1416_v45 = vor.u32 %v1415_v36, %v1411_v26  ;;  %v9588_v32 = vld [vmem:[%s13108_s3 + $0xc0] ss:$8 sps:$4 sm:$0xff]   ;;  %v1403_v26 = vrot.slane %v1401_v46, 1  ;;  %v9599_v46 = vld [vmem:[%s13108_s3 + $0xe4] ss:$8 sps:$4 sm:$0xff]  }
  0x7e   : > { %5100 = vmatprep.subr.bf16.mxu0 %v9666_v38  ;;  %v9678_v38 = vld [vmem:[%s13112_s7 + $0x64] ss:$8 sps:$4 sm:$0xff]  }
  0x7f   : > { %1714 = vmatmul.mubr.bf16.gmra.mrb[20].mxu1 %v10955_v57  ;;  %v1420_v57 = vrot.slane %v1418_v63, 1  ;;  %v11006_v36 = vsel %vm1229_vm3, %v1380_v37, %v1384_v4  ;;  %v9684_v4 = vld [vmem:[%s13112_s7 + $0x74] ss:$8 sps:$4 sm:$0xff]  }
  0x80   : > { %1925 = vmatpush1.bf16.msra.mxu1 %v9579_v44  ;;  %1723 = vmatprep.mubr.bf16.mxu1 %v10968_v25  ;;  %v10994_v44 = vsel %vm10576_vm2, %v1075_v55, 0  ;;  %13212 = vst [vmem:[#allocation17_spill] sm:$0xff] %v11006_v36  ;;  %v1399_v55 = vshrl.u32 %v10972_v2, 16 }
  0x81   : > { %1926 = vmatprep.subr.bf16.mxu1 %v9584_v62  ;;  %5101 = vmatpush1.bf16.msra.mxu0 %v9668_v14  ;;  %v9674_v62 = vld [vmem:[%s13112_s7 + $0x50] ss:$8 sps:$4 sm:$0xff]   ;;  %v1406_v35 = vshll.u32 %v10994_v44, 16  ;;  %v11011_v63 = vsel %vm1229_vm3, %v1416_v45, %v1420_v57  ;;  %v9680_v14 = vld [vmem:[%s13112_s7 + $0x60] ss:$8 sps:$4 sm:$0xff]  }
  0x82   : > { %5102 = vmatprep.subr.bf16.mxu0 %v9672_v17  ;;  %13213 = vst [vmem:[#allocation18_spill] sm:$0xff] %v11011_v63  ;;  %v1404_v57 = vor.u32 %v1403_v26, %v1399_v55  ;;  %v9597_v17 = vld [vmem:[%s13108_s3 + $0xe0] ss:$8 sps:$4 sm:$0xff]   ;;  %v9605_v55 = vld [vmem:[%s13108_s3 + $0x204] ss:$8 sps:$4 sm:$0xff]  }
  0x83   : > { %v1408_v37 = vrot.slane %v1406_v35, 1  ;;  %v9603_v26 = vld [vmem:[%s13108_s3 + $0x200] ss:$8 sps:$4 sm:$0xff]   ;;  %v9608_v35 = vld [vmem:[%s13108_s3 + $0x214] ss:$8 sps:$4 sm:$0xff]  }
  0x84   : > { %1927 = vmatpush1.bf16.msra.mxu1 %v9582_v33  ;;  %v9591_v33 = vld [vmem:[%s13108_s3 + $0xd0] ss:$8 sps:$4 sm:$0xff]  }
  0x85   : > { %1928 = vmatprep.subr.bf16.mxu1 %v9590_v9  ;;  %5103 = vmatpush1.bf16.msra.mxu0 %v9674_v62  ;;  %v9686_v9 = vld [vmem:[%s13112_s7 + $0x70] ss:$8 sps:$4 sm:$0xff]   ;;  %v11037_v45 = vsel %vm1229_vm3, %v1404_v57, %v1408_v37  ;;  %v9614_v57 = vld [vmem:[%s13108_s3 + $0x234] ss:$8 sps:$4 sm:$0xff]  }
  0x86   : > { %5104 = vmatprep.subr.bf16.mxu0 %v9678_v38  ;;  %13214 = vst [vmem:[#allocation19_spill] sm:$0xff] %v11037_v45  ;;  %v9600_v62 = vld [vmem:[%s13108_s3 + $0xf0] ss:$8 sps:$4 sm:$0xff]  }
  0x87   : > { %1724 = vmatmul.mubr.bf16.gmra.mrb[24].mxu1 %v11006_v36  ;;  %v9606_v38 = vld [vmem:[%s13108_s3 + $0x210] ss:$8 sps:$4 sm:$0xff]  }
  0x88   : > { %1929 = vmatpush1.bf16.msra.mxu1 %v9588_v32  ;;  %1733 = vmatprep.mubr.bf16.mxu1 %v11011_v63  ;;  %v9602_v32 = vld [vmem:[%s13108_s3 + $0xf4] ss:$8 sps:$4 sm:$0xff]   ;;  %v9612_v37 = vld [vmem:[%s13108_s3 + $0x230] ss:$8 sps:$4 sm:$0xff]  }
  0x89   : > { %1930 = vmatprep.subr.bf16.mxu1 %v9593_v56  ;;  %5105 = vmatpush1.bf16.msra.mxu0 %v9680_v14  ;;  %v9692_v56 = vld [vmem:[%s13112_s7 + $0x84] ss:$8 sps:$4 sm:$0xff]   ;;  %v9609_v14 = vld [vmem:[%s13108_s3 + $0x220] ss:$8 sps:$4 sm:$0xff]  }
  0x8a   : > { %5106 = vmatprep.subr.bf16.mxu0 %v9684_v4  ;;  %v9617_v4 = vld [vmem:[%s13108_s3 + $0x244] ss:$8 sps:$4 sm:$0xff]  }
  0x8c   : > { %1931 = vmatpush1.bf16.msra.mxu1 %v9591_v33  ;;  %v9611_v33 = vld [vmem:[%s13108_s3 + $0x224] ss:$8 sps:$4 sm:$0xff]  }
  0x8d   : > { %1932 = vmatprep.subr.bf16.mxu1 %v9599_v46  ;;  %5107 = vmatpush1.bf16.msra.mxu0 %v9686_v9  ;;  %v9615_v46 = vld [vmem:[%s13108_s3 + $0x240] ss:$8 sps:$4 sm:$0xff]   ;;  %v9618_v9 = vld [vmem:[%s13108_s3 + $0x250] ss:$8 sps:$4 sm:$0xff]  }
  0x8e   : > { %5438 = vmatprep.subr.bf16.mxu0 %v9692_v56  ;;  %v9621_v56 = vld [vmem:[%s13108_s3 + $0x260] ss:$8 sps:$4 sm:$0xff]  }
  0x8f   : > { %1734 = vmatmul.mubr.bf16.gmra.mrb[28].mxu1 %v11037_v45 }
  0x90   : > { %1933 = vmatpush1.bf16.msra.mxu1 %v9597_v17  ;;  %1936 = vmatprep.mubr.bf16.mxu1 %v10595_v23  ;;  %v9620_v17 = vld [vmem:[%s13108_s3 + $0x254] ss:$8 sps:$4 sm:$0xff]  }
  0x91   : > { %1934 = vmatprep.subr.bf16.mxu1 %v9602_v32  ;;  %v9623_v32 = vld [vmem:[%s13108_s3 + $0x264] ss:$8 sps:$4 sm:$0xff]  }
  0x94   : > { %1935 = vmatpush1.bf16.msra.mxu1 %v9600_v62  ;;  %v9626_v62 = vld [vmem:[%s13108_s3 + $0x274] ss:$8 sps:$4 sm:$0xff]  }
  0x95   : > { %2307 = vmatprep.subr.bf16.mxu1 %v9605_v55  ;;  %v11102_v55 = vld [vmem:[%s10432_s17 + $0x38] sm:$0xff]   ;;  %s4601_s17 = sld [smem:[#allocation2]] }
  0x96   : > { %13215 = vst [vmem:[#allocation20_spill] sm:$0xff] %v11102_v55 }
  0x97   : > { %1937 = vmatmul.mubr.bf16.vlgmr.msra.gmra.mrb[0].mxu1 %v10623_v49 }
  0x98   : > { %2308 = vmatpush1.bf16.msra.mxu1 %v9603_v26  ;;  %1946 = vmatprep.mubr.bf16.mxu1 %v10631_v58  ;;  %v13153_v26 = vunpack.c.h.bf16 %v11102_v55 }
  0x99   : > { %2309 = vmatprep.subr.bf16.mxu1 %v9608_v35  ;;  %v13154_v35 = vunpack.c.l.bf16 %v11102_v55 }
  0x9c   : > { %2310 = vmatpush1.bf16.msra.mxu1 %v9606_v38  ;;  %v9624_v38 = vld [vmem:[%s13108_s3 + $0x270] ss:$8 sps:$4 sm:$0xff]  }
  0x9d   : > { %2311 = vmatprep.subr.bf16.mxu1 %v9611_v33  ;;  %v9629_v33 = vld [vmem:[%s13108_s3 + $0x284] ss:$8 sps:$4 sm:$0xff]  }
  0x9f   : > { %1947 = vmatmul.mubr.bf16.gmra.mrb[4].mxu1 %v10666_v31 }
  0xa0   : > { %2312 = vmatpush1.bf16.msra.mxu1 %v9609_v14  ;;  %1956 = vmatprep.mubr.bf16.mxu1 %v10675_v41  ;;  %v10238_v14 = vld [vmem:[%s13115_s10] ss:$0 sm:$0xff] }
  0xa1   : > { %2313 = vmatprep.subr.bf16.mxu1 %v9614_v57  ;;  %v4626_v57 = vmul.f32 %v10238_v14, %v13153_v26 }
  0xa3   : > { %4663 = vadd.xlane.f32.xlu1 %v4626_v57  ;;  %v9638_v57 = vld [vmem:[%s13108_s3 + $0x2b4] ss:$8 sps:$4 sm:$0xff]  }
  0xa4   : > { %2314 = vmatpush1.bf16.msra.mxu1 %v9612_v37  ;;  %v4625_v37 = vmul.f32 %v10238_v14, %v13154_v35 }
  0xa5   : > { %2315 = vmatprep.subr.bf16.mxu1 %v9617_v4  ;;  %v9627_v4 = vld [vmem:[%s13108_s3 + $0x280] ss:$8 sps:$4 sm:$0xff]  }
  0xa6   : > { %4661 = vadd.xlane.f32.xlu0 %v4625_v37 }
  0xa7   : > { %1957 = vmatmul.mubr.bf16.gmra.mrb[8].mxu1 %v10718_v43 }
  0xa8   : > { %2316 = vmatpush1.bf16.msra.mxu1 %v9615_v46  ;;  %1966 = vmatprep.mubr.bf16.mxu1 %v10726_v52 }
  0xa9   : > { %2317 = vmatprep.subr.bf16.mxu1 %v9620_v17  ;;  %v9632_v17 = vld [vmem:[%s13108_s3 + $0x294] ss:$8 sps:$4 sm:$0xff]  }
  0xac   : > { %2318 = vmatpush1.bf16.msra.mxu1 %v9618_v9  ;;  %v9630_v9 = vld [vmem:[%s13108_s3 + $0x290] ss:$8 sps:$4 sm:$0xff]  }
  0xad   : > { %2319 = vmatprep.subr.bf16.mxu1 %v9623_v32 }
  0xaf   : > { %1967 = vmatmul.mubr.bf16.gmra.mrb[12].mxu1 %v10763_v60 }
  0xb0   : > { %2320 = vmatpush1.bf16.msra.mxu1 %v9621_v56  ;;  %1976 = vmatprep.mubr.bf16.mxu1 %v10771_v5  ;;  %v11132_v56 = vstv %s4601_s17  ;;  %s850_s17 = scalar_select %p829_p11, 1, 0 }
  0xb1   : > { %2321 = vmatprep.subr.bf16.mxu1 %v9626_v62  ;;  %13216 = vst [vmem:[#allocation21_spill] sm:$0xff] %v11132_v56  ;;  %v9635_v62 = vld [vmem:[%s13108_s3 + $0x2a4] ss:$8 sps:$4 sm:$0xff]  }
  0xb2   : > { %s11871_s18 = scvt.s32.f32 %s850_s17  ;;  %s7944_s17 = sshll.u32 %s13308_s29, 1 }
  0xb4   : > { %v4634_v46 = vpop.xlane.xlu1 %4633  ;;  %2322 = vmatpush1.bf16.msra.mxu1 %v9624_v38  ;;  %s854_s22 = sshrl.u32 %s11871_s18, 16  ;;  %p853_p13 = scmp.ne.f32.partialorder %s11871_s18, %s11871_s18 }
  0xb5   : > { %2323 = vmatprep.subr.bf16.mxu1 %v9629_v33  ;;  %v4672_v38 = vadd.f32 %v11132_v56, %v4634_v46  ;;  %v9633_v33 = vld [vmem:[%s13108_s3 + $0x2a0] ss:$8 sps:$4 sm:$0xff]   ;;  %v9636_v46 = vld [vmem:[%s13108_s3 + $0x2b0] ss:$8 sps:$4 sm:$0xff]   ;;  %s855_s8 = sand.u32 1, %s854_s22 }
  0xb6   : > { %s856_s11 = sadd.s32 32767, %s855_s8 }
  0xb7   : > { %1977 = vmatmul.mubr.bf16.gmra.mrb[16].mxu1 %v10813_v11  ;;  %v8520_v37 = vmul.f32 -1.442695, %v4672_v38  ;;  %v9647_v38 = vld [vmem:[%s13108_s3 + $0x2d4] ss:$8 sps:$4 sm:$0xff]   ;;  %s857_s20 = sadd.s32 %s856_s11, %s11871_s18  ;;  %s13284_s18 = sld [smem:[#allocation37_spill]] }
  0xb8   : > { %2324 = vmatpush1.bf16.msra.mxu1 %v9627_v4  ;;  %v4636_v32 = vpop.xlane.xlu1 %4635  ;;  %1986 = vmatprep.mubr.bf16.mxu1 %v10817_v39  ;;  %s858_s13 = sand.u32 4294901760, %s857_s20  ;;  %s13285_s20 = sld [smem:[#allocation38_spill]] }
  0xb9   : > { %2325 = vmatprep.subr.bf16.mxu1 %v9632_v17  ;;  %v4673_v14 = vadd.f32 %v11132_v56, %v4636_v32  ;;  %v9641_v32 = vld [vmem:[%s13108_s3 + $0x2c4] ss:$8 sps:$4 sm:$0xff]   ;;  %10158 = vpow2.f32 %v8520_v37  ;;  %v9645_v37 = vld [vmem:[%s13108_s3 + $0x2d0] ss:$8 sps:$4 sm:$0xff]   ;;  %s13310_s13 = smov (%p853_p13, %s858_s13), 2143289344 }
  0xba   : > { %s861_s8 = sshrl.u32 %s13310_s13, 16  ;;  %s13254_s13 = sld [smem:[#allocation33_spill]] }
  0xbb   : > { %v8521_v4 = vmul.f32 -1.442695, %v4673_v14  ;;  %s872_s9 = sshll.u32 %s861_s8, 16 }
  0xbc   : > { %2326 = vmatpush1.bf16.msra.mxu1 %v9630_v9  ;;  %v4640_v17 = vpop.xlane.xlu1 %4639  ;;  %v9639_v9 = vld [vmem:[%s13108_s3 + $0x2c0] ss:$8 sps:$4 sm:$0xff]   ;;  %s873_s11 = sor.u32 %s872_s9, %s861_s8  ;;  %s7923_s9 = sshll.u32 %s13308_s29, 2 }
  0xbd   : > { %2327 = vmatprep.subr.bf16.mxu1 %v9635_v62  ;;  %10160 = vpow2.f32 %v8521_v4  ;;  %v4675_v62 = vadd.f32 %v11132_v56, %v4640_v17  ;;  %v2053_v17 = vrot.slane %v10595_v23, 1  ;;  %s761_s29 = sadd.s32 %s7923_s9, %s10464_s27  ;;  %s13281_s8 = sld [smem:[#allocation35_spill]] }
  0xbe   : > { %s7925_s23 = sshll.u32 %s761_s29, 2 }
  0xbf   : > { %1987 = vmatmul.mubr.bf16.gmra.mrb[20].mxu1 %v10854_v10 }
  0xc0   : > { %2328 = vmatpush1.bf16.msra.mxu1 %v9633_v33  ;;  %1996 = vmatprep.mubr.bf16.mxu1 %v10868_v30  ;;  %v8523_v33 = vmul.f32 -1.442695, %v4675_v62  ;;  %v4644_v14 = vpop.xlane.xlu1 %4643  ;;  %s763_s19 = scalar_lea.vmem %s13254_s13, %s7925_s23 }
  0xc1   : > { %2329 = vmatprep.subr.bf16.mxu1 %v9638_v57  ;;  %v4677_v62 = vadd.f32 %v11132_v56, %v4644_v14 }
  0xc2   : > { %10162 = vpow2.f32 %v8523_v33  ;;  %v2051_v33 = vrot.slane %v10642_v0, 1  ;;  %v9665_v0 = vld [vmem:[%s13108_s3 + $0x304] ss:$8 sps:$4 sm:$0xff]  }
  0xc3   : > { %v4630_v57 = vpop.xlane.xlu0 %4629  ;;  %v8525_v63 = vmul.f32 -1.442695, %v4677_v62 }
  0xc4   : > { %2330 = vmatpush1.bf16.msra.mxu1 %v9636_v46  ;;  %v4670_v4 = vadd.f32 %v11132_v56, %v4630_v57  ;;  %v9653_v46 = vld [vmem:[%s13108_s3 + $0x2e4] ss:$8 sps:$4 sm:$0xff]   ;;  %v10159_v57 = vpop.eup %10158  ;;  %v4648_v45 = vpop.xlane.xlu1 %4647 }
  0xc5   : > { %2331 = vmatprep.subr.bf16.mxu1 %v9641_v32  ;;  %v2054_v32 = vrot.slane %v10586_v13, 1  ;;  %v4752_v14 = vadd.f32 1.0, %v10159_v57 }
  0xc6   : > { %v8518_v26 = vmul.f32 -1.442695, %v4670_v4 }
  0xc7   : > { %1997 = vmatmul.mubr.bf16.gmra.mrb[24].mxu1 %v10916_v42  ;;  %v4632_v35 = vpop.xlane.xlu0 %4631  ;;  %v10161_v55 = vpop.eup %10160  ;;  %v2055_v23 = vsel %vm2049_vm4, %v2053_v17, %v2054_v32  ;;  %v2060_v17 = vrot.slane %v10649_v6, 1  ;;  %v9663_v32 = vld [vmem:[%s13108_s3 + $0x300] ss:$8 sps:$4 sm:$0xff]   ;;  %v9671_v6 = vld [vmem:[%s13108_s3 + $0x314] ss:$8 sps:$4 sm:$0xff]  }
  0xc8   : > { %2332 = vmatpush1.bf16.msra.mxu1 %v9639_v9  ;;  %2006 = vmatprep.mubr.bf16.mxu1 %v10924_v59  ;;  %v9651_v9 = vld [vmem:[%s13108_s3 + $0x2e0] ss:$8 sps:$4 sm:$0xff]   ;;  %10164 = vpow2.f32 %v8518_v26  ;;  %v4671_v13 = vadd.f32 %v11132_v56, %v4632_v35  ;;  %v4753_v4 = vadd.f32 1.0, %v10161_v55  ;;  %v9657_v26 = vld [vmem:[%s13108_s3 + $0x2f0] ss:$8 sps:$4 sm:$0xff]   ;;  %v2050_v35 = vrot.slane %v10623_v49, 1 }
  0xc9   : > { %2333 = vmatprep.subr.bf16.mxu1 %v9647_v38  ;;  %v9659_v38 = vld [vmem:[%s13108_s3 + $0x2f4] ss:$8 sps:$4 sm:$0xff]   ;;  %v2059_v55 = vrot.slane %v10631_v58, 1 }
  0xca   : > { %v8519_v36 = vmul.f32 -1.442695, %v4671_v13 }
  0xcb   : > { %v4638_v25 = vpop.xlane.xlu0 %4637 }
  0xcc   : > { %2334 = vmatpush1.bf16.msra.mxu1 %v9645_v37  ;;  %v4679_v37 = vadd.f32 %v11132_v56, %v4648_v45  ;;  %10166 = vpow2.f32 %v8519_v36  ;;  %v10163_v62 = vpop.eup %10162 }
  0xcd   : > { %2335 = vmatprep.subr.bf16.mxu1 %v9653_v46  ;;  %v4674_v46 = vadd.f32 %v11132_v56, %v4638_v25  ;;  %10168 = vpow2.f32 %v8525_v63  ;;  %v2052_v25 = vsel %vm2049_vm4, %v2050_v35, %v2051_v33  ;;  %v11202_v63 = vsel %vm2049_vm4, %v2059_v55, %v2060_v17  ;;  %v9669_v35 = vld [vmem:[%s13108_s3 + $0x310] ss:$8 sps:$4 sm:$0xff]  }
  0xce   : > { %10170 = vrcp.f32 %v4752_v14  ;;  %v8527_v45 = vmul.f32 -1.442695, %v4679_v37  ;;  %v2057_v37 = vrot.slane %v10685_v48, 1  ;;  %v2065_v55 = vrot.slane %v10675_v41, 1 }
  0xcf   : > { %2007 = vmatmul.mubr.bf16.gmra.mrb[28].mxu1 %v10972_v2  ;;  %v8522_v49 = vmul.f32 -1.442695, %v4674_v46  ;;  %10172 = vrcp.f32 %v4753_v4  ;;  %v4642_v36 = vpop.xlane.xlu0 %4641  ;;  %v4755_v4 = vadd.f32 1.0, %v10163_v62  ;;  %v2066_v17 = vrot.slane %v10695_v61, 1 }
  0xd0   : > { %2336 = vmatpush1.bf16.msra.mxu1 %v9651_v9  ;;  %2339 = vmatprep.mubr.bf16.mxu1 %v2055_v23  ;;  %v4652_v9 = vpop.xlane.xlu1 %4651  ;;  %v2056_v23 = vrot.slane %v10666_v31, 1 }
  0xd1   : > { %2337 = vmatprep.subr.bf16.mxu1 %v9659_v38  ;;  %10174 = vpow2.f32 %v8522_v49  ;;  %v4676_v38 = vadd.f32 %v11132_v56, %v4642_v36  ;;  %v4681_v14 = vadd.f32 %v11132_v56, %v4652_v9 }
  0xd2   : > { %v10165_v57 = vpop.eup %10164  ;;  %10176 = vpow2.f32 %v8527_v45  ;;  %v11230_v9 = vsel %vm2049_vm4, %v2056_v23, %v2057_v37  ;;  %v2062_v23 = vrot.slane %v10718_v43, 1  ;;  %v9681_v37 = vld [vmem:[%s13108_s3 + $0x330] ss:$8 sps:$4 sm:$0xff]  }
  0xd3   : > { %v8524_v13 = vmul.f32 -1.442695, %v4676_v38  ;;  %v4750_v33 = vadd.f32 1.0, %v10165_v57  ;;  %v8529_v48 = vmul.f32 -1.442695, %v4681_v14  ;;  %v11234_v57 = vsel %vm2049_vm4, %v2065_v55, %v2066_v17 }
  0xd4   : > { %2338 = vmatpush1.bf16.msra.mxu1 %v9657_v26  ;;  %v4646_v26 = vpop.xlane.xlu0 %4645  ;;  %13217 = vst [vmem:[#allocation22_spill] sm:$0xff] %v11234_v57  ;;  %v4656_v14 = vpop.xlane.xlu1 %4655  ;;  %v9689_v17 = vld [vmem:[%s13108_s3 + $0x344] ss:$8 sps:$4 sm:$0xff]  }
  0xd5   : > { %2645 = vmatprep.subr.bf16.mxu1 %v9665_v0  ;;  %10178 = vpow2.f32 %v8524_v13  ;;  %v4678_v46 = vadd.f32 %v11132_v56, %v4646_v26  ;;  %v9677_v0 = vld [vmem:[%s13108_s3 + $0x324] ss:$8 sps:$4 sm:$0xff]   ;;  %v11237_v26 = vld [vmem:[%s11227_s21] ss:$0 sm:$0xff] }
  0xd6   : > { %10180 = vrcp.f32 %v4750_v33  ;;  %v10167_v49 = vpop.eup %10166 }
  0xd7   : > { %2340 = vmatmul.mubr.bf16.vlgmr.msra.gmra.mrb[0].mxu1 %v2052_v25  ;;  %v8526_v36 = vmul.f32 -1.442695, %v4678_v46  ;;  %v9683_v25 = vld [vmem:[%s13108_s3 + $0x334] ss:$8 sps:$4 sm:$0xff]   ;;  %v10169_v45 = vpop.eup %10168  ;;  %v4751_v61 = vadd.f32 1.0, %v10167_v49  ;;  %10182 = vrcp.f32 %v4755_v4  ;;  %v2063_v46 = vrot.slane %v10733_v27, 1 }
  0xd8   : > { %2646 = vmatpush1.bf16.msra.mxu1 %v9663_v32  ;;  %2349 = vmatprep.mubr.bf16.mxu1 %v11202_v63  ;;  %v9675_v32 = vld [vmem:[%s13108_s3 + $0x320] ss:$8 sps:$4 sm:$0xff]   ;;  %v4650_v62 = vpop.xlane.xlu0 %4649  ;;  %v10171_v38 = vpop.eup %10170  ;;  %v4683_v49 = vadd.f32 %v11132_v56, %v4656_v14 }
  0xd9   : > { %2647 = vmatprep.subr.bf16.mxu1 %v9671_v6  ;;  %10184 = vpow2.f32 %v8526_v36  ;;  %v4680_v6 = vadd.f32 %v11132_v56, %v4650_v62  ;;  %v10173_v13 = vpop.eup %10172  ;;  %v11258_v14 = vsel %vm2049_vm4, %v2062_v23, %v2063_v46  ;;  %v13220_v46 = vunpack.c.h.bf16 %v10435_v7 }
  0xda   : > { %10186 = vrcp.f32 %v4751_v61  ;;  %v4819_v61 = vadd.f32 %v10173_v13, %v11237_v26  ;;  %v8531_v13 = vmul.f32 -1.442695, %v4683_v49 }
  0xdb   : > { %v10175_v33 = vpop.eup %10174  ;;  %10188 = vpow2.f32 %v8529_v48  ;;  %v8528_v55 = vmul.f32 -1.442695, %v4680_v6 }
  0xdc   : > { %2648 = vmatpush1.bf16.msra.mxu1 %v9669_v35  ;;  %v4754_v4 = vadd.f32 1.0, %v10175_v33  ;;  %v4757_v35 = vadd.f32 1.0, %v10169_v45  ;;  %v4654_v36 = vpop.xlane.xlu0 %4653  ;;  %v10177_v48 = vpop.eup %10176  ;;  %v4818_v45 = vadd.f32 %v10171_v38, %v11237_v26  ;;  %v9695_v38 = vld [vmem:[%s13108_s3 + $0x354] ss:$8 sps:$4 sm:$0xff]  }
  0xdd   : > { %2649 = vmatprep.subr.bf16.mxu1 %v9677_v0  ;;  %v2071_v0 = vrot.slane %v10726_v52, 1 }
  0xde   : > { %10190 = vrcp.f32 %v4754_v4 }
  0xdf   : > { %2350 = vmatmul.mubr.bf16.gmra.mrb[4].mxu1 %v11230_v9  ;;  %v10179_v27 = vpop.eup %10178  ;;  %10192 = vrcp.f32 %v4757_v35 }
  0xe0   : > { %2650 = vmatpush1.bf16.msra.mxu1 %v9675_v32  ;;  %2359 = vmatprep.mubr.bf16.mxu1 %v11234_v57  ;;  %v2072_v32 = vrot.slane %v10746_v18, 1  ;;  %v10181_v62 = vpop.eup %10180  ;;  %v4756_v6 = vadd.f32 1.0, %v10179_v27  ;;  %v4682_v18 = vadd.f32 %v11132_v56, %v4654_v36  ;;  %10194 = vpow2.f32 %v8528_v55 }
  0xe1   : > { %2651 = vmatprep.subr.bf16.mxu1 %v9683_v25  ;;  %v9687_v25 = vld [vmem:[%s13108_s3 + $0x340] ss:$8 sps:$4 sm:$0xff]   ;;  %v4816_v33 = vadd.f32 %v10181_v62, %v11237_v26  ;;  %v10183_v35 = vpop.eup %10182  ;;  %v4839_v36 = vmul.f32 %v13220_v46, %v4819_v61  ;;  %v4759_v57 = vadd.f32 1.0, %v10177_v48  ;;  %v2068_v55 = vrot.slane %v10763_v60, 1 }
  0xe2   : > { %v11266_v4 = vsel %vm2049_vm4, %v2071_v0, %v2072_v32  ;;  %10196 = vrcp.f32 %v4756_v6  ;;  %v8530_v62 = vmul.f32 -1.442695, %v4682_v18  ;;  %v9693_v0 = vld [vmem:[%s13108_s3 + $0x350] ss:$8 sps:$4 sm:$0xff]   ;;  %v2078_v32 = vrot.slane %v10789_v53, 1 }
  0xe3   : > { %13218 = vst [vmem:[#allocation23_spill] sm:$0xff] %v11266_v4  ;;  %v10185_v27 = vpop.eup %10184  ;;  %10198 = vpow2.f32 %v8531_v13  ;;  %v4836_v61 = vmul.f32 %v4816_v33, %v10550_v50  ;;  %v4821_v6 = vadd.f32 %v10183_v35, %v11237_v26  ;;  %v4859_v46 = vmax.f32 %v4839_v36, 0.0  ;;  %v4658_v13 = vpop.xlane.xlu0 %4657 }
  0xe4   : > { %2652 = vmatpush1.bf16.msra.mxu1 %v9681_v37  ;;  %v13219_v37 = vunpack.c.l.bf16 %v10435_v7  ;;  %v10187_v49 = vpop.eup %10186  ;;  %v2077_v7 = vrot.slane %v10771_v5, 1  ;;  %v4758_v18 = vadd.f32 1.0, %v10185_v27  ;;  %10200 = vrcp.f32 %v4759_v57 }
  0xe5   : > { %2653 = vmatprep.subr.bf16.mxu1 %v9689_v17  ;;  %v2069_v17 = vrot.slane %v10782_v21, 1  ;;  %v10189_v48 = vpop.eup %10188  ;;  %v9698_v21 = vld [vmem:[%s13108_s3 + $0x364] ss:$8 sps:$4 sm:$0xff]   ;;  %10202 = vpow2.f32 %v8530_v62  ;;  %v4856_v36 = vmax.f32 %v4836_v61, 0.0 }
  0xe6   : > { %v4838_v23 = vmul.f32 %v13219_v37, %v4818_v45  ;;  %v4817_v45 = vadd.f32 %v10187_v49, %v11237_v26  ;;  %v9696_v37 = vld [vmem:[%s13108_s3 + $0x360] ss:$8 sps:$4 sm:$0xff]   ;;  %v4761_v35 = vadd.f32 1.0, %v10189_v48  ;;  %10204 = vrcp.f32 %v4758_v18  ;;  %v9702_v18 = vld [vmem:[%s13108_s3 + $0x370] ss:$8 sps:$4 sm:$0xff]  }
  0xe7   : > { %2360 = vmatmul.mubr.bf16.gmra.mrb[8].mxu1 %v11258_v14  ;;  %v11292_v50 = vsel %vm2049_vm4, %v2068_v55, %v2069_v17  ;;  %v4684_v55 = vadd.f32 %v11132_v56, %v4658_v13  ;;  %v13221_v48 = vunpack.c.h.bf16 %v10458_v15 }
  0xe8   : > { %2654 = vmatpush1.bf16.msra.mxu1 %v9687_v25  ;;  %2369 = vmatprep.mubr.bf16.mxu1 %v11266_v4  ;;  %v4660_v25 = vpop.xlane.xlu1 %4659  ;;  %v4858_v53 = vmax.f32 %v4838_v23, 0.0  ;;  %v4837_v49 = vmul.f32 %v4817_v45, %v10552_v51  ;;  %v10191_v33 = vpop.eup %10190  ;;  %v11299_v23 = vsel %vm2049_vm4, %v2077_v7, %v2078_v32  ;;  %v2074_v7 = vrot.slane %v10813_v11, 1 }
  0xe9   : > { %2655 = vmatprep.subr.bf16.mxu1 %v9695_v38  ;;  %v9704_v38 = vld [vmem:[%s13108_s3 + $0x374] ss:$8 sps:$4 sm:$0xff]   ;;  %v4685_v27 = vadd.f32 %v11132_v56, %v4660_v25  ;;  %v4820_v57 = vadd.f32 %v10191_v33, %v11237_v26  ;;  %v10193_v17 = vpop.eup %10192  ;;  %v4841_v62 = vmul.f32 %v13221_v48, %v4821_v6  ;;  %v13222_v32 = vunpack.c.l.bf16 %v10458_v15  ;;  %v9707_v15 = vld [vmem:[%s13108_s3 + $0x384] ss:$8 sps:$4 sm:$0xff]   ;;  %v9705_v33 = vld [vmem:[%s13108_s3 + $0x380] ss:$8 sps:$4 sm:$0xff]  }
  0xea   : > { %v4857_v51 = vmax.f32 %v4837_v49, 0.0  ;;  %v11303_v45 = vpack.c.bf16 %v4859_v46, %v4858_v53  ;;  %v2075_v6 = vrot.slane %v10826_v28, 1  ;;  %10206 = vrcp.f32 %v4761_v35  ;;  %v9713_v48 = vld [vmem:[%s13108_s3 + $0x394] ss:$8 sps:$4 sm:$0xff]  }
  0xeb   : > { %v4840_v61 = vmul.f32 %v13222_v32, %v4820_v57  ;;  %v8532_v46 = vmul.f32 -1.442695, %v4684_v55  ;;  %v4823_v13 = vadd.f32 %v10193_v17, %v11237_v26  ;;  %v9701_v55 = vld [vmem:[%s13112_s7 + $0x94] ss:$8 sps:$4 sm:$0xff]  }
  0xec   : > { %2656 = vmatpush1.bf16.msra.mxu1 %v9693_v0  ;;  %v10195_v0 = vpop.eup %10194  ;;  %v4876_v4 = vpack.c.bf16 %v4857_v51, %v4856_v36  ;;  %v11332_v17 = vsel %vm2049_vm4, %v2074_v7, %v2075_v6  ;;  %v9711_v7 = vld [vmem:[%s13108_s3 + $0x390] ss:$8 sps:$4 sm:$0xff]  }
  0xed   : > { %2657 = vmatprep.subr.bf16.mxu1 %v9698_v21  ;;  %v10197_v25 = vpop.eup %10196  ;;  %v8533_v21 = vmul.f32 -1.442695, %v4685_v27  ;;  %v4760_v49 = vadd.f32 1.0, %v10195_v0  ;;  %v4861_v27 = vmax.f32 %v4841_v62, 0.0  ;;  %v4860_v51 = vmax.f32 %v4840_v61, 0.0  ;;  %13223 = vst [vmem:[#allocation24_spill] sm:$0xff] %v11332_v17 }
  0xee   : > { %v4887_v53 = vshrl.u32 %v4876_v4, 16  ;;  %v10199_v57 = vpop.eup %10198  ;;  %v4822_v28 = vadd.f32 %v10197_v25, %v11237_v26  ;;  %v4890_v36 = vshll.u32 %v4876_v4, 16  ;;  %v2083_v62 = vrot.slane %v10817_v39, 1 }
  0xef   : > { %2370 = vmatmul.mubr.bf16.gmra.mrb[12].mxu1 %v11292_v50  ;;  %10208 = vpow2.f32 %v8533_v21  ;;  %v2084_v0 = vrot.slane %v10832_v12, 1  ;;  %v10201_v32 = vpop.eup %10200  ;;  %v4897_v21 = vshll.u32 %v11303_v45, 16 }
  0xf0   : > { %2658 = vmatpush1.bf16.msra.mxu1 %v9696_v37  ;;  %2379 = vmatprep.mubr.bf16.mxu1 %v11299_v23  ;;  %v4894_v37 = vshrl.u32 %v11303_v45, 16  ;;  %v4889_v35 = vrot.slane %v4887_v53, 7  ;;  %10210 = vpow2.f32 %v8532_v46  ;;  %v10203_v61 = vpop.eup %10202  ;;  %v9699_v53 = vld [vmem:[%s13112_s7 + $0x90] ss:$8 sps:$4 sm:$0xff]   ;;  %v11355_v46 = vpack.c.bf16 %v4861_v27, %v4860_v51 }
  0xf1   : > { %2659 = vmatprep.subr.bf16.mxu1 %v9704_v38  ;;  %v9690_v38 = vld [vmem:[%s13112_s7 + $0x80] ss:$8 sps:$4 sm:$0xff]   ;;  %10212 = vrcp.f32 %v4760_v49  ;;  %v13225_v45 = vunpack.c.l.bf16 %v10479_v20  ;;  %v10205_v49 = vpop.eup %10204  ;;  %v2089_v27 = vrot.slane %v10868_v30, 1  ;;  %v4762_v51 = vadd.f32 1.0, %v10203_v61 }
  0xf2   : > { %v4892_v4 = vor.u32 %v4890_v36, %v4889_v35  ;;  %v11339_v25 = vrot.slane %v4894_v37, 7  ;;  %v2080_v37 = vrot.slane %v10854_v10, 1  ;;  %v2081_v36 = vrot.slane %v10876_v19, 1  ;;  %v9710_v19 = vld [vmem:[%s13112_s7 + $0xa4] ss:$8 sps:$4 sm:$0xff]  }
  0xf3   : > { %v4904_v56 = vshll.u32 %v11355_v46, 16 }
  0xf4   : > { %2660 = vmatpush1.bf16.msra.mxu1 %v9702_v18  ;;  %v13224_v18 = vunpack.c.h.bf16 %v10479_v20  ;;  %v11349_v12 = vsel %vm10576_vm2, 0, %v4892_v4  ;;  %v4763_v4 = vadd.f32 1.0, %v10199_v57  ;;  %v9716_v20 = vld [vmem:[%s13108_s3 + $0x3a4] ss:$8 sps:$4 sm:$0xff]  }
  0xf5   : > { %2661 = vmatprep.subr.bf16.mxu1 %v9707_v15  ;;  %v4842_v15 = vmul.f32 %v13225_v45, %v4822_v28  ;;  %5125 = vmatmul.mubr.bf16.vlgmr.msra.gmra.mrb[0].mxu0 %v11349_v12  ;;  %v2090_v28 = vrot.slane %v10882_v54, 1  ;;  %v11379_v45 = vsel %vm10576_vm2, %v4889_v35, 0  ;;  %v9708_v54 = vld [vmem:[%s13112_s7 + $0xa0] ss:$8 sps:$4 sm:$0xff]   ;;  %v5599_v61 = vrot.slane %v11349_v12, 1 }
  0xf6   : > { %v4843_v6 = vmul.f32 %v13224_v18, %v4823_v13  ;;  %v11361_v13 = vsel %vm2049_vm4, %v2083_v62, %v2084_v0  ;;  %5439 = vmatpush1.bf16.msra.mxu0 %v9690_v38  ;;  %v13227_v18 = vmov 0   ;;  %v4899_v62 = vor.u32 %v4897_v21, %v11339_v25  ;;  %v10207_v38 = vpop.eup %10206  ;;  %v9719_v35 = vld [vmem:[%s13112_s7 + $0xb4] ss:$8 sps:$4 sm:$0xff]  }
  0xf7   : > { %2380 = vmatmul.mubr.bf16.gmra.mrb[16].mxu1 %v11332_v17  ;;  %13226 = vst [vmem:[#allocation25_spill] sm:$0xff] %v11361_v13  ;;  %5134 = vmatprep.mubr.bf16.mxu0 %v13227_v18  ;;  %v4824_v0 = vadd.f32 %v10205_v49, %v11237_v26  ;;  %v11391_v21 = vsel %vm2049_vm4, %v2080_v37, %v2081_v36  ;;  %10214 = vrcp.f32 %v4763_v4  ;;  %v5600_v36 = vrot.slane %v11379_v45, 1 }
  0xf8   : > { %2662 = vmatpush1.bf16.msra.mxu1 %v9705_v33  ;;  %v4825_v33 = vadd.f32 %v10201_v32, %v11237_v26  ;;  %5440 = vmatprep.subr.bf16.mxu0 %v9701_v55  ;;  %v4863_v57 = vmax.f32 %v4843_v6, 0.0  ;;  %v4901_v55 = vshrl.u32 %v11355_v46, 16  ;;  %v4862_v32 = vmax.f32 %v4842_v15, 0.0  ;;  %v9722_v6 = vld [vmem:[%s13108_s3 + $0x3b4] ss:$8 sps:$4 sm:$0xff]  }
  0xf9   : > { %2663 = vmatprep.subr.bf16.mxu1 %v9713_v48  ;;  %2389 = vmatprep.mubr.bf16.mxu1 %v11361_v13  ;;  %v9714_v48 = vld [vmem:[%s13108_s3 + $0x3a0] ss:$8 sps:$4 sm:$0xff]   ;;  %v10209_v49 = vpop.eup %10208  ;;  %10216 = vrcp.f32 %v4762_v51  ;;  %v11401_v15 = vsel %vm10576_vm2, 0, %v4899_v62  ;;  %v13229_v4 = vunpack.c.l.bf16 %v10493_v24  ;;  %v11419_v62 = vsel %vm2049_vm4, %v2089_v27, %v2090_v28  ;;  %v9725_v27 = vld [vmem:[%s13108_s3 + $0x3c4] ss:$8 sps:$4 sm:$0xff]  }
  0xfa   : > { %5441 = vmatpush1.bf16.msra.mxu0 %v9699_v53  ;;  %v10211_v13 = vpop.eup %10210  ;;  %v11406_v17 = vrot.slane %v4901_v55, 7  ;;  %v11410_v53 = vpack.c.bf16 %v4863_v57, %v4862_v32  ;;  %v2086_v46 = vrot.slane %v10916_v42, 1  ;;  %v11424_v57 = vsel %vm2049_vm4, %v5599_v61, %v5600_v36 }
  0xfb   : > { %5442 = vmatprep.subr.bf16.mxu0 %v9710_v19  ;;  %v10213_v51 = vpop.eup %10212  ;;  %v2087_v19 = vrot.slane %v10932_v40, 1  ;;  %v2095_v28 = vrot.slane %v10924_v59, 1  ;;  %v4827_v55 = vadd.f32 %v10207_v38, %v11237_v26  ;;  %v4764_v40 = vadd.f32 1.0, %v10211_v13  ;;  %v9726_v13 = vld [vmem:[%s13112_s7 + $0xc0] ss:$8 sps:$4 sm:$0xff]  }
  0xfc   : > { %2664 = vmatpush1.bf16.msra.mxu1 %v9711_v7  ;;  %v13228_v7 = vunpack.c.h.bf16 %v10493_v24  ;;  %v4765_v24 = vadd.f32 1.0, %v10209_v49  ;;  %v2096_v61 = vrot.slane %v10947_v47, 1  ;;  %v4826_v49 = vadd.f32 %v10213_v51, %v11237_v26  ;;  %v9731_v47 = vld [vmem:[%s13108_s3 + $0x3d4] ss:$8 sps:$4 sm:$0xff]  }
  0xfd   : > { %2665 = vmatprep.subr.bf16.mxu1 %v9716_v20  ;;  %v4844_v20 = vmul.f32 %v13229_v4, %v4824_v0  ;;  %5135 = vmatmul.mubr.bf16.gmra.mrb[4].mxu0 %v11401_v15  ;;  %v9717_v0 = vld [vmem:[%s13112_s7 + $0xb0] ss:$8 sps:$4 sm:$0xff]   ;;  %v4908_v38 = vshrl.u32 %v11410_v53, 16  ;;  %v13230_v4 = vunpack.c.h.bf16 %v10510_v29 }
  0xfe   : > { %v4845_v37 = vmul.f32 %v13228_v7, %v4825_v33  ;;  %v9720_v33 = vld [vmem:[%s13108_s3 + $0x3b0] ss:$8 sps:$4 sm:$0xff]   ;;  %5144 = vmatprep.mubr.bf16.mxu0 %v13227_v18  ;;  %5443 = vmatpush1.bf16.msra.mxu0 %v9708_v54  ;;  %v9728_v54 = vld [vmem:[%s13112_s7 + $0xc4] ss:$8 sps:$4 sm:$0xff]   ;;  %v4906_v7 = vor.u32 %v4904_v56, %v11406_v17  ;;  %10218 = vrcp.f32 %v4765_v24  ;;  %v9737_v56 = vld [vmem:[%s13112_s7 + $0xd4] ss:$8 sps:$4 sm:$0xff]   ;;  %v11460_v36 = vsel %vm2049_vm4, %v2095_v28, %v2096_v61 }
  0xff   : > { %2390 = vmatmul.mubr.bf16.gmra.mrb[20].mxu1 %v11391_v21  ;;  %5444 = vmatprep.subr.bf16.mxu0 %v9719_v35  ;;  %v4864_v35 = vmax.f32 %v4844_v20, 0.0  ;;  %10220 = vrcp.f32 %v4764_v40  ;;  %v4847_v20 = vmul.f32 %v13230_v4, %v4827_v55  ;;  %v13231_v24 = vunpack.c.l.bf16 %v10510_v29  ;;  %v9734_v29 = vld [vmem:[%s13108_s3 + $0x3e4] ss:$8 sps:$4 sm:$0xff]   ;;  %v9735_v40 = vld [vmem:[%s13112_s7 + $0xd0] ss:$8 sps:$4 sm:$0xff]  }
 0x100   : > { %2666 = vmatpush1.bf16.msra.mxu1 %v9714_v48  ;;  %v9723_v48 = vld [vmem:[%s13108_s3 + $0x3c0] ss:$8 sps:$4 sm:$0xff]   ;;  %v4865_v32 = vmax.f32 %v4845_v37, 0.0  ;;  %2399 = vmatprep.mubr.bf16.mxu1 %v11419_v62  ;;  %v4911_v37 = vshll.u32 %v11410_v53, 16  ;;  %v2092_v28 = vrot.slane %v10972_v2, 1  ;;  %v2093_v55 = vrot.slane %v10994_v44, 1 }
 0x101   : > { %2667 = vmatprep.subr.bf16.mxu1 %v9722_v6  ;;  %v11450_v6 = vsel %vm2049_vm4, %v2086_v46, %v2087_v19  ;;  %v10215_v51 = vpop.eup %10214  ;;  %v11468_v46 = vrot.slane %v4908_v38, 7  ;;  %v4846_v53 = vmul.f32 %v13231_v24, %v4826_v49  ;;  %v9746_v44 = vld [vmem:[%s13112_s7 + $0xe4] ss:$8 sps:$4 sm:$0xff]  }
 0x102   : > { %5445 = vmatpush1.bf16.msra.mxu0 %v9717_v0  ;;  %v4880_v19 = vpack.c.bf16 %v4865_v32, %v4864_v35  ;;  %v11494_v38 = vsel %vm2049_vm4, %v2092_v28, %v2093_v55  ;;  %v9740_v35 = vld [vmem:[%s13108_s3 + $0x3f4] ss:$8 sps:$4 sm:$0xff]   ;;  %v9738_v55 = vld [vmem:[%s13108_s3 + $0x3f0] ss:$8 sps:$4 sm:$0xff]  }
 0x103   : > { %5446 = vmatprep.subr.bf16.mxu0 %v9728_v54  ;;  %v10217_v0 = vpop.eup %10216  ;;  %v4867_v54 = vmax.f32 %v4847_v20, 0.0  ;;  %v4913_v61 = vor.u32 %v4911_v37, %v11468_v46  ;;  %v13232_v37 = vunpack.c.h.bf16 %v10527_v34 }
 0x104   : > { %2668 = vmatpush1.bf16.msra.mxu1 %v9720_v33  ;;  %v11466_v33 = vsel %vm10576_vm2, 0, %v4906_v7  ;;  %v4828_v32 = vadd.f32 %v10217_v0, %v11237_v26  ;;  %v4915_v49 = vshrl.u32 %v4880_v19, 16  ;;  %v4866_v7 = vmax.f32 %v4846_v53, 0.0 }
 0x105   : > { %2669 = vmatprep.subr.bf16.mxu1 %v9725_v27  ;;  %5145 = vmatmul.mubr.bf16.gmra.mrb[8].mxu0 %v11466_v33  ;;  %v9729_v27 = vld [vmem:[%s13108_s3 + $0x3d0] ss:$8 sps:$4 sm:$0xff]   ;;  %v13233_v0 = vunpack.c.l.bf16 %v10527_v34  ;;  %v9743_v34 = vld [vmem:[%s13108_s3 + $0x404] ss:$8 sps:$4 sm:$0xff]  }
 0x106   : > { %5154 = vmatprep.mubr.bf16.mxu0 %v13227_v18  ;;  %5447 = vmatpush1.bf16.msra.mxu0 %v9726_v13  ;;  %v9732_v13 = vld [vmem:[%s13108_s3 + $0x3e0] ss:$8 sps:$4 sm:$0xff]   ;;  %v11511_v24 = vrot.slane %v4915_v49, 7  ;;  %v4881_v53 = vpack.c.bf16 %v4867_v54, %v4866_v7  ;;  %v9753_v54 = vld [vmem:[%s13112_s7 + $0xf0] ss:$8 sps:$4 sm:$0xff]  }
 0x107   : > { %2400 = vmatmul.mubr.bf16.gmra.mrb[24].mxu1 %v11450_v6  ;;  %5448 = vmatprep.subr.bf16.mxu0 %v9737_v56  ;;  %v4918_v56 = vshll.u32 %v4880_v19, 16  ;;  %v9755_v19 = vld [vmem:[%s13112_s7 + $0xf4] ss:$8 sps:$4 sm:$0xff]  }
 0x108   : > { %2670 = vmatpush1.bf16.msra.mxu1 %v9723_v48  ;;  %v4829_v48 = vadd.f32 %v10215_v51, %v11237_v26  ;;  %2409 = vmatprep.mubr.bf16.mxu1 %v11460_v36  ;;  %v10219_v20 = vpop.eup %10218  ;;  %v11509_v51 = vsel %vm10576_vm2, 0, %v4913_v61  ;;  %v4922_v49 = vshrl.u32 %v4881_v53, 16  ;;  %v9749_v7 = vld [vmem:[%s13108_s3 + $0x414] ss:$8 sps:$4 sm:$0xff]  }
 0x109   : > { %2671 = vmatprep.subr.bf16.mxu1 %v9731_v47  ;;  %v9744_v47 = vld [vmem:[%s13112_s7 + $0xe0] ss:$8 sps:$4 sm:$0xff]   ;;  %v10221_v28 = vpop.eup %10220  ;;  %v4920_v61 = vor.u32 %v4918_v56, %v11511_v24 }
 0x10a   : > { %5449 = vmatpush1.bf16.msra.mxu0 %v9735_v40  ;;  %v4849_v4 = vmul.f32 %v13232_v37, %v4829_v48  ;;  %v9741_v40 = vld [vmem:[%s13108_s3 + $0x400] ss:$8 sps:$4 sm:$0xff]  }
 0x10b   : > { %5450 = vmatprep.subr.bf16.mxu0 %v9746_v44  ;;  %v9764_v44 = vld [vmem:[%s13112_s7 + $0x104] ss:$8 sps:$4 sm:$0xff]   ;;  %v11547_v37 = vsel %vm10576_vm2, 0, %v4920_v61 }
 0x10c   : > { %2672 = vmatpush1.bf16.msra.mxu1 %v9729_v27  ;;  %v4848_v27 = vmul.f32 %v13233_v0, %v4828_v32  ;;  %v4869_v48 = vmax.f32 %v4849_v4, 0.0  ;;  %v4830_v32 = vadd.f32 %v10221_v28, %v11237_v26  ;;  %v13235_v4 = vunpack.c.l.bf16 %v10569_v1  ;;  %v9752_v0 = vld [vmem:[%s13108_s3 + $0x424] ss:$8 sps:$4 sm:$0xff]  }
 0x10d   : > { %2673 = vmatprep.subr.bf16.mxu1 %v9734_v29  ;;  %5155 = vmatmul.mubr.bf16.gmra.mrb[12].mxu0 %v11509_v51  ;;  %v4831_v29 = vadd.f32 %v10219_v20, %v11237_v26  ;;  %v11549_v26 = vrot.slane %v4922_v49, 7 }
 0x10e   : > { %5164 = vmatprep.mubr.bf16.mxu0 %v13227_v18  ;;  %5451 = vmatpush1.bf16.msra.mxu0 %v9744_v47  ;;  %v4850_v20 = vmul.f32 %v13235_v4, %v4830_v32  ;;  %v9759_v32 = vld [vmem:[%s13108_s3 + $0x440] ss:$8 sps:$4 sm:$0xff]   ;;  %v5240_v4 = vshll.u32 %v11349_v12, 16 }
 0x10f   : > { %2410 = vmatmul.mubr.bf16.gmra.mrb[28].mxu1 %v11494_v38  ;;  %5452 = vmatprep.subr.bf16.mxu0 %v9755_v19 }
 0x110   : > { %2674 = vmatpush1.bf16.msra.mxu1 %v9732_v13  ;;  %2677 = vmatprep.mubr.bf16.mxu1 %v10631_v58  ;;  %v4868_v58 = vmax.f32 %v4848_v27, 0.0  ;;  %v4925_v13 = vshll.u32 %v4881_v53, 16  ;;  %v9747_v53 = vld [vmem:[%s13108_s3 + $0x410] ss:$8 sps:$4 sm:$0xff]   ;;  %v4870_v19 = vmax.f32 %v4850_v20, 0.0 }
 0x111   : > { %2675 = vmatprep.subr.bf16.mxu1 %v9740_v35  ;;  %v13234_v35 = vunpack.c.h.bf16 %v10569_v1  ;;  %v9750_v1 = vld [vmem:[%s13108_s3 + $0x420] ss:$8 sps:$4 sm:$0xff]  }
 0x112   : > { %5453 = vmatpush1.bf16.msra.mxu0 %v9753_v54  ;;  %v4882_v56 = vpack.c.bf16 %v4869_v48, %v4868_v58  ;;  %v9756_v54 = vld [vmem:[%s13108_s3 + $0x430] ss:$8 sps:$4 sm:$0xff]   ;;  %v9767_v58 = vld [vmem:[%s13108_s3 + $0x454] ss:$8 sps:$4 sm:$0xff]  }
 0x113   : > { %v4851_v47 = vmul.f32 %v13234_v35, %v4831_v29  ;;  %5728 = vmatprep.subr.bf16.mxu0 %v9764_v44  ;;  %v9761_v44 = vld [vmem:[%s13108_s3 + $0x444] ss:$8 sps:$4 sm:$0xff]  }
 0x114   : > { %2676 = vmatpush1.bf16.msra.mxu1 %v9738_v55  ;;  %v4929_v27 = vshrl.u32 %v4882_v56, 16  ;;  %v9758_v55 = vld [vmem:[%s13108_s3 + $0x434] ss:$8 sps:$4 sm:$0xff]  }
 0x115   : > { %3009 = vmatprep.subr.bf16.mxu1 %v9743_v34  ;;  %5165 = vmatmul.mubr.bf16.gmra.mrb[16].mxu0 %v11547_v37  ;;  %v4871_v28 = vmax.f32 %v4851_v47, 0.0  ;;  %v9765_v47 = vld [vmem:[%s13108_s3 + $0x450] ss:$8 sps:$4 sm:$0xff]  }
 0x116   : > { %5174 = vmatprep.mubr.bf16.mxu0 %v13227_v18  ;;  %v11574_v29 = vrot.slane %v4929_v27, 7  ;;  %v9774_v27 = vld [vmem:[%s13108_s3 + $0x470] ss:$8 sps:$4 sm:$0xff]  }
 0x117   : > { %2678 = vmatmul.mubr.bf16.vlgmr.msra.gmra.mrb[0].mxu1 %v10666_v31  ;;  %v4927_v31 = vor.u32 %v4925_v13, %v11549_v26  ;;  %v4883_v48 = vpack.c.bf16 %v4871_v28, %v4870_v19  ;;  %v5238_v19 = vshrl.u32 %v11349_v12, 16  ;;  %v5245_v28 = vshll.u32 %v11379_v45, 16  ;;  %v9777_v12 = vld [vmem:[%s13108_s3 + $0x480] ss:$8 sps:$4 sm:$0xff]  }
 0x118   : > { %3010 = vmatpush1.bf16.msra.mxu1 %v9741_v40  ;;  %2687 = vmatprep.mubr.bf16.mxu1 %v10675_v41  ;;  %v4932_v40 = vshll.u32 %v4882_v56, 16  ;;  %v9770_v56 = vld [vmem:[%s13108_s3 + $0x464] ss:$8 sps:$4 sm:$0xff]   ;;  %v9762_v45 = vld [vmem:[%s13112_s7 + $0x100] ss:$8 sps:$4 sm:$0xff]  }
 0x119   : > { %3011 = vmatprep.subr.bf16.mxu1 %v9749_v7  ;;  %v11572_v34 = vsel %vm10576_vm2, 0, %v4927_v31  ;;  %v4936_v49 = vshrl.u32 %v4883_v48, 16  ;;  %v4939_v35 = vshll.u32 %v4883_v48, 16  ;;  %v5252_v48 = vshll.u32 %v11401_v15, 16 }
 0x11a   : > { %v4934_v61 = vor.u32 %v4932_v40, %v11574_v29 }
 0x11b   : > { %v11597_v13 = vrot.slane %v4936_v49, 7 }
 0x11c   : > { %3012 = vmatpush1.bf16.msra.mxu1 %v9747_v53  ;;  %v11595_v7 = vsel %vm10576_vm2, 0, %v4934_v61  ;;  %v9768_v53 = vld [vmem:[%s13108_s3 + $0x460] ss:$8 sps:$4 sm:$0xff]   ;;  %v9804_v61 = vld [vmem:[%s10534_s14 + $0x74] ss:$8 sps:$4 sm:$0xff]  }
 0x11d   : > { %3013 = vmatprep.subr.bf16.mxu1 %v9752_v0  ;;  %5175 = vmatmul.mubr.bf16.gmra.mrb[20].mxu0 %v11572_v34  ;;  %v4941_v20 = vor.u32 %v4939_v35, %v11597_v13  ;;  %v9776_v0 = vld [vmem:[%s13108_s3 + $0x474] ss:$8 sps:$4 sm:$0xff]   ;;  %v5254_v35 = vrot.slane %v5252_v48, 1  ;;  %v9780_v48 = vld [vmem:[%s13112_s7 + $0x120] ss:$8 sps:$4 sm:$0xff]  }
 0x11e   : > { %5184 = vmatprep.mubr.bf16.mxu0 %v13227_v18 }
 0x11f   : > { %2688 = vmatmul.mubr.bf16.gmra.mrb[4].mxu1 %v10718_v43  ;;  %v11619_v31 = vsel %vm10576_vm2, 0, %v4941_v20  ;;  %v9788_v20 = vld [vmem:[%s13108_s3 + $0x4a4] ss:$8 sps:$4 sm:$0xff]  }
 0x120   : > { %3014 = vmatpush1.bf16.msra.mxu1 %v9750_v1  ;;  %2697 = vmatprep.mubr.bf16.mxu1 %v10726_v52  ;;  %v5242_v1 = vrot.slane %v5240_v4, 1  ;;  %v9771_v4 = vld [vmem:[%s13112_s7 + $0x110] ss:$8 sps:$4 sm:$0xff]  }
 0x121   : > { %3015 = vmatprep.subr.bf16.mxu1 %v9758_v55  ;;  %v9779_v55 = vld [vmem:[%s13108_s3 + $0x484] ss:$8 sps:$4 sm:$0xff]  }
 0x122   : > { %v5243_v40 = vor.u32 %v5242_v1, %v5238_v19  ;;  %v5264_v19 = vshll.u32 %v11466_v33, 16 }
 0x124   : > { %3016 = vmatpush1.bf16.msra.mxu1 %v9756_v54  ;;  %v11637_v54 = vsel %vm10576_vm2, %v11339_v25, 0  ;;  %v9785_v25 = vld [vmem:[%s13108_s3 + $0x494] ss:$8 sps:$4 sm:$0xff]  }
 0x125   : > { %3017 = vmatprep.subr.bf16.mxu1 %v9761_v44  ;;  %5185 = vmatmul.mubr.bf16.gmra.mrb[24].mxu0 %v11595_v7  ;;  %v5247_v44 = vrot.slane %v5245_v28, 1  ;;  %v11674_v28 = vsel %vm10576_vm2, %v11406_v17, 0  ;;  %v9794_v17 = vld [vmem:[%s13108_s3 + $0x4b4] ss:$8 sps:$4 sm:$0xff]  }
 0x126   : > { %5194 = vmatprep.mubr.bf16.mxu0 %v13227_v18 }
 0x127   : > { %2698 = vmatmul.mubr.bf16.gmra.mrb[8].mxu1 %v10763_v60  ;;  %v5248_v49 = vsel %vm1229_vm3, %v5243_v40, %v5247_v44  ;;  %v9806_v40 = vld [vmem:[%s10534_s14 + $0x70] ss:$8 sps:$4 sm:$0xff]   ;;  %v1097_v44 = vshll.u32 %v9804_v61, 16  ;;  %s806_s14 = sadd.s32 %s7944_s17, %s10419_s25  ;;  %s13282_s17 = sld [smem:[#allocation36_spill]] }
 0x128   : > { %3018 = vmatpush1.bf16.msra.mxu1 %v9759_v32  ;;  %2707 = vmatprep.mubr.bf16.mxu1 %v10771_v5  ;;  %v9773_v32 = vld [vmem:[%s13112_s7 + $0x114] ss:$8 sps:$4 sm:$0xff]   ;;  %s7946_s30 = sshll.u32 %s806_s14, 2  ;;  %s7952_s14 = sshll.u32 %s13298_s16, 2 }
 0x129   : > { %3019 = vmatprep.subr.bf16.mxu1 %v9767_v58  ;;  %v5250_v58 = vshrl.u32 %v11401_v15, 16  ;;  %s808_s2 = scalar_lea.vmem %s13111_s6, %s7946_s30 }
 0x12b   : > { %v5255_v1 = vor.u32 %v5254_v35, %v5250_v58  ;;  %v5269_v58 = vshll.u32 %v11674_v28, 16  ;;  %v9792_v35 = vld [vmem:[%s13108_s3 + $0x4b0] ss:$8 sps:$4 sm:$0xff]  }
 0x12c   : > { %3020 = vmatpush1.bf16.msra.mxu1 %v9765_v47  ;;  %v5257_v47 = vshll.u32 %v11637_v54, 16 }
 0x12d   : > { %3021 = vmatprep.subr.bf16.mxu1 %v9770_v56  ;;  %5195 = vmatmul.mubr.bf16.gmra.mrb[28].mxu0 %v11619_v31  ;;  %v9783_v56 = vld [vmem:[%s13108_s3 + $0x490] ss:$8 sps:$4 sm:$0xff]  }
 0x12e   : > { %5470 = vmatprep.mubr.bf16.mxu0 %v13227_v18 }
 0x12f   : > { %2708 = vmatmul.mubr.bf16.gmra.mrb[12].mxu1 %v10813_v11 }
 0x130   : > { %3022 = vmatpush1.bf16.msra.mxu1 %v9768_v53  ;;  %2717 = vmatprep.mubr.bf16.mxu1 %v10817_v39  ;;  %v9782_v53 = vld [vmem:[%s13112_s7 + $0x124] ss:$8 sps:$4 sm:$0xff]  }
 0x131   : > { %3023 = vmatprep.subr.bf16.mxu1 %v9776_v0  ;;  %v1094_v0 = vshrl.u32 %v9804_v61, 16  ;;  %v9789_v61 = vld [vmem:[%s13112_s7 + $0x130] ss:$8 sps:$4 sm:$0xff]  }
 0x134   : > { %3024 = vmatpush1.bf16.msra.mxu1 %v9774_v27  ;;  %v5259_v27 = vrot.slane %v5257_v47, 1  ;;  %v1087_v47 = vshrl.u32 %v9806_v40, 16 }
 0x135   : > { %3025 = vmatprep.subr.bf16.mxu1 %v9779_v55  ;;  %5471 = vmatmul.mubr.bf16.vlgmr.msra.gmra.mrb[0].mxu0 %v5248_v49  ;;  %v9786_v55 = vld [vmem:[%s13108_s3 + $0x4a0] ss:$8 sps:$4 sm:$0xff]   ;;  %v5266_v49 = vrot.slane %v5264_v19, 1 }
 0x136   : > { %5729 = vmatpush1.bf16.msra.mxu0 %v9762_v45  ;;  %5480 = vmatprep.mubr.bf16.mxu0 %v13227_v18  ;;  %v11689_v45 = vrot.slane %v1094_v0, 7  ;;  %v5271_v0 = vrot.slane %v5269_v58, 1  ;;  %v9795_v19 = vld [vmem:[%s13108_s3 + $0x4c0] ss:$8 sps:$4 sm:$0xff]   ;;  %v9812_v58 = vld [vmem:[%s13112_s7 + $0x154] ss:$8 sps:$4 sm:$0xff]  }
 0x137   : > { %2718 = vmatmul.mubr.bf16.gmra.mrb[16].mxu1 %v10854_v10  ;;  %5730 = vmatprep.subr.bf16.mxu0 %v9773_v32  ;;  %v11692_v32 = vsel %vm1229_vm3, %v5255_v1, %v5259_v27  ;;  %v5276_v1 = vshll.u32 %v11509_v51, 16  ;;  %v11717_v27 = vsel %vm10576_vm2, %v11468_v46, 0  ;;  %v9803_v46 = vld [vmem:[%s13108_s3 + $0x4d4] ss:$8 sps:$4 sm:$0xff]  }
 0x138   : > { %3026 = vmatpush1.bf16.msra.mxu1 %v9777_v12  ;;  %2727 = vmatprep.mubr.bf16.mxu1 %v10868_v30  ;;  %v9791_v12 = vld [vmem:[%s13112_s7 + $0x134] ss:$8 sps:$4 sm:$0xff]  }
 0x139   : > { %3027 = vmatprep.subr.bf16.mxu1 %v9785_v25  ;;  %v5262_v25 = vshrl.u32 %v11466_v33, 16 }
 0x13a   : > { %5731 = vmatpush1.bf16.msra.mxu0 %v9771_v4  ;;  %v9800_v4 = vld [vmem:[%s13112_s7 + $0x144] ss:$8 sps:$4 sm:$0xff]  }
 0x13b   : > { %5732 = vmatprep.subr.bf16.mxu0 %v9782_v53  ;;  %v5267_v53 = vor.u32 %v5266_v49, %v5262_v25  ;;  %v5278_v25 = vrot.slane %v5276_v1, 1  ;;  %v5281_v49 = vshll.u32 %v11717_v27, 16  ;;  %v11763_v1 = vsel %vm10576_vm2, %v11511_v24, 0  ;;  %v9819_v24 = vld [vmem:[%s13112_s7 + $0x160] ss:$8 sps:$4 sm:$0xff]  }
 0x13c   : > { %3028 = vmatpush1.bf16.msra.mxu1 %v9783_v56  ;;  %v9797_v56 = vld [vmem:[%s13108_s3 + $0x4c4] ss:$8 sps:$4 sm:$0xff]  }
 0x13d   : > { %3029 = vmatprep.subr.bf16.mxu1 %v9788_v20  ;;  %5481 = vmatmul.mubr.bf16.gmra.mrb[4].mxu0 %v11692_v32  ;;  %v1099_v20 = vor.u32 %v1097_v44, %v11689_v45  ;;  %v11735_v44 = vsel %vm1229_vm3, %v5267_v53, %v5271_v0  ;;  %v5283_v53 = vrot.slane %v5281_v49, 1  ;;  %v5288_v0 = vshll.u32 %v11547_v37, 16 }
 0x13e   : > { %5490 = vmatprep.mubr.bf16.mxu0 %v13227_v18  ;;  %5733 = vmatpush1.bf16.msra.mxu0 %v9780_v48  ;;  %v1090_v48 = vshll.u32 %v9806_v40, 16  ;;  %v5274_v40 = vshrl.u32 %v11509_v51, 16  ;;  %v5293_v49 = vshll.u32 %v11763_v1, 16 }
 0x13f   : > { %2728 = vmatmul.mubr.bf16.gmra.mrb[20].mxu1 %v10916_v42  ;;  %5734 = vmatprep.subr.bf16.mxu0 %v9791_v12  ;;  %v9798_v12 = vld [vmem:[%s13112_s7 + $0x140] ss:$8 sps:$4 sm:$0xff]  }
 0x140   : > { %3030 = vmatpush1.bf16.msra.mxu1 %v9786_v55  ;;  %2737 = vmatprep.mubr.bf16.mxu1 %v10924_v59  ;;  %v11722_v55 = vrot.slane %v1087_v47, 7 }
 0x141   : > { %3031 = vmatprep.subr.bf16.mxu1 %v9794_v17  ;;  %v11732_v17 = vsel %vm10576_vm2, 0, %v1099_v20  ;;  %v5279_v20 = vor.u32 %v5278_v25, %v5274_v40  ;;  %v5286_v40 = vshrl.u32 %v11547_v37, 16  ;;  %v5290_v25 = vrot.slane %v5288_v0, 1 }
 0x142   : > { %5735 = vmatpush1.bf16.msra.mxu0 %v9789_v61  ;;  %v1092_v47 = vor.u32 %v1090_v48, %v11722_v55  ;;  %v9809_v61 = vld [vmem:[%s13108_s3 + $0x4e4] ss:$8 sps:$4 sm:$0xff]   ;;  %v9807_v48 = vld [vmem:[%s13108_s3 + $0x4e0] ss:$8 sps:$4 sm:$0xff]   ;;  %v11806_v0 = vsel %vm10576_vm2, %v11549_v26, 0 }
 0x143   : > { %5736 = vmatprep.subr.bf16.mxu0 %v9800_v4  ;;  %v9821_v4 = vld [vmem:[%s13112_s7 + $0x164] ss:$8 sps:$4 sm:$0xff]   ;;  %v5305_v26 = vshll.u32 %v11806_v0, 16 }
 0x144   : > { %3032 = vmatpush1.bf16.msra.mxu1 %v9792_v35  ;;  %v9801_v35 = vld [vmem:[%s13108_s3 + $0x4d0] ss:$8 sps:$4 sm:$0xff]  }
 0x145   : > { %3033 = vmatprep.subr.bf16.mxu1 %v9797_v56  ;;  %5491 = vmatmul.mubr.bf16.gmra.mrb[8].mxu0 %v11735_v44  ;;  %v9810_v56 = vld [vmem:[%s13112_s7 + $0x150] ss:$8 sps:$4 sm:$0xff]  }
 0x146   : > { %5500 = vmatprep.mubr.bf16.mxu0 %v13227_v18  ;;  %5737 = vmatpush1.bf16.msra.mxu0 %v9798_v12  ;;  %v9815_v12 = vld [vmem:[%s13108_s3 + $0x4f4] ss:$8 sps:$4 sm:$0xff]  }
 0x147   : > { %2738 = vmatmul.mubr.bf16.gmra.mrb[24].mxu1 %v10972_v2  ;;  %5738 = vmatprep.subr.bf16.mxu0 %v9812_v58  ;;  %v9830_v58 = vld [vmem:[%s13112_s7 + $0x174] ss:$8 sps:$4 sm:$0xff]  }
 0x148   : > { %3034 = vmatpush1.bf16.msra.mxu1 %v9795_v19  ;;  %2747 = vmatprep.mubr.bf16.mxu1 %v11732_v17  ;;  %v11767_v19 = vsel %vm10576_vm2, 0, %v1092_v47  ;;  %v9818_v47 = vld [vmem:[%s13108_s3 + $0x504] ss:$8 sps:$4 sm:$0xff]  }
 0x149   : > { %3035 = vmatprep.subr.bf16.mxu1 %v9803_v46  ;;  %v11779_v46 = vsel %vm1229_vm3, %v5279_v20, %v5283_v53  ;;  %v5300_v20 = vshll.u32 %v11572_v34, 16  ;;  %v9839_v53 = vld [vmem:[%s13112_s7 + $0x184] ss:$8 sps:$4 sm:$0xff]  }
 0x14a   : > { %5739 = vmatpush1.bf16.msra.mxu0 %v9810_v56  ;;  %13236 = vst [vmem:[#allocation26_spill] sm:$0xff] %v11779_v46  ;;  %v5291_v56 = vor.u32 %v5290_v25, %v5286_v40  ;;  %v9822_v25 = vld [vmem:[%s13108_s3 + $0x510] ss:$8 sps:$4 sm:$0xff]  }
 0x14b   : > { %5740 = vmatprep.subr.bf16.mxu0 %v9821_v4  ;;  %v5295_v4 = vrot.slane %v5293_v49, 1  ;;  %v5302_v40 = vrot.slane %v5300_v20, 1  ;;  %v9827_v49 = vld [vmem:[%s13108_s3 + $0x524] ss:$8 sps:$4 sm:$0xff]  }
 0x14c   : > { %3036 = vmatpush1.bf16.msra.mxu1 %v9801_v35  ;;  %v9813_v35 = vld [vmem:[%s13108_s3 + $0x4f0] ss:$8 sps:$4 sm:$0xff]  }
 0x14d   : > { %3037 = vmatprep.subr.bf16.mxu1 %v9809_v61  ;;  %5501 = vmatmul.mubr.bf16.gmra.mrb[12].mxu0 %v11779_v46  ;;  %v9828_v61 = vld [vmem:[%s13112_s7 + $0x170] ss:$8 sps:$4 sm:$0xff]  }
 0x14e   : > { %5510 = vmatprep.mubr.bf16.mxu0 %v13227_v18  ;;  %5741 = vmatpush1.bf16.msra.mxu0 %v9819_v24  ;;  %v5298_v24 = vshrl.u32 %v11572_v34, 16 }
 0x14f   : > { %2748 = vmatmul.mubr.bf16.gmra.mrb[28].mxu1 %v11767_v19  ;;  %5742 = vmatprep.subr.bf16.mxu0 %v9830_v58  ;;  %v13238_v58 = vld [vmem:[#allocation8_spill] sm:$0xff] }
 0x150   : > { %3038 = vmatpush1.bf16.msra.mxu1 %v9807_v48  ;;  %3041 = vmatprep.mubr.bf16.mxu1 %v10722_v8  ;;  %v9816_v8 = vld [vmem:[%s13108_s3 + $0x500] ss:$8 sps:$4 sm:$0xff]   ;;  %v9824_v48 = vld [vmem:[%s13108_s3 + $0x514] ss:$8 sps:$4 sm:$0xff]  }
 0x151   : > { %3039 = vmatprep.subr.bf16.mxu1 %v9815_v12  ;;  %v11815_v12 = vsel %vm1229_vm3, %v5291_v56, %v5295_v4  ;;  %v9825_v56 = vld [vmem:[%s13108_s3 + $0x520] ss:$8 sps:$4 sm:$0xff]   ;;  %v9833_v4 = vld [vmem:[%s13108_s3 + $0x534] ss:$8 sps:$4 sm:$0xff]  }
 0x152   : > { %5743 = vmatpush1.bf16.msra.mxu0 %v9828_v61  ;;  %13237 = vst [vmem:[#allocation27_spill] sm:$0xff] %v11815_v12  ;;  %v11833_v61 = vsel %vm10576_vm2, %v11574_v29, 0 }
 0x153   : > { %5970 = vmatprep.subr.bf16.mxu0 %v9839_v53  ;;  %v5310_v53 = vshrl.u32 %v11595_v7, 16  ;;  %v5317_v29 = vshll.u32 %v11833_v61, 16 }
 0x154   : > { %3040 = vmatpush1.bf16.msra.mxu1 %v9813_v35  ;;  %v5303_v35 = vor.u32 %v5302_v40, %v5298_v24  ;;  %v9831_v24 = vld [vmem:[%s13108_s3 + $0x530] ss:$8 sps:$4 sm:$0xff]   ;;  %v9836_v40 = vld [vmem:[%s13108_s3 + $0x544] ss:$8 sps:$4 sm:$0xff]  }
 0x155   : > { %3359 = vmatprep.subr.bf16.mxu1 %v9818_v47  ;;  %5511 = vmatmul.mubr.bf16.gmra.mrb[16].mxu0 %v11815_v12  ;;  %v5307_v47 = vrot.slane %v5305_v26, 1  ;;  %v13241_v26 = vld [vmem:[#allocation10_spill] sm:$0xff] }
 0x156   : > { %5520 = vmatprep.mubr.bf16.mxu0 %v13227_v18 }
 0x157   : > { %3042 = vmatmul.mubr.bf16.vlgmr.msra.gmra.mrb[0].mxu1 %v10749_v16  ;;  %v5312_v16 = vshll.u32 %v11595_v7, 16  ;;  %v11842_v20 = vsel %vm1229_vm3, %v5303_v35, %v5307_v47  ;;  %v5324_v35 = vshll.u32 %v11619_v31, 16  ;;  %v11861_v47 = vsel %vm10576_vm2, %v11597_v13, 0 }
 0x158   : > { %3360 = vmatpush1.bf16.msra.mxu1 %v9816_v8  ;;  %3051 = vmatprep.mubr.bf16.mxu1 %v13238_v58  ;;  %13239 = vst [vmem:[#allocation28_spill] sm:$0xff] %v11842_v20  ;;  %v5322_v13 = vshrl.u32 %v11619_v31, 16  ;;  %v13252_v58 = vld [vmem:[#allocation18_spill] sm:$0xff] }
 0x159   : > { %3361 = vmatprep.subr.bf16.mxu1 %v9824_v48  ;;  %v5314_v8 = vrot.slane %v5312_v16, 1  ;;  %v13240_v48 = vld [vmem:[#allocation9_spill] sm:$0xff] }
 0x15a   : > { %v9834_v16 = vld [vmem:[%s13108_s3 + $0x540] ss:$8 sps:$4 sm:$0xff]  }
 0x15c   : > { %3362 = vmatpush1.bf16.msra.mxu1 %v9822_v25  ;;  %v5315_v25 = vor.u32 %v5314_v8, %v5310_v53  ;;  %v5326_v53 = vrot.slane %v5324_v35, 1  ;;  %v5329_v8 = vshll.u32 %v11861_v47, 16 }
 0x15d   : > { %3363 = vmatprep.subr.bf16.mxu1 %v9827_v49  ;;  %5521 = vmatmul.mubr.bf16.gmra.mrb[20].mxu0 %v11842_v20  ;;  %v5319_v49 = vrot.slane %v5317_v29, 1  ;;  %v13243_v29 = vld [vmem:[#allocation11_spill] sm:$0xff]  ;;  %v2793_v20 = vshll.u32 %v11767_v19, 16 }
 0x15e   : > { %5530 = vmatprep.mubr.bf16.mxu0 %v13227_v18  ;;  %v5331_v35 = vrot.slane %v5329_v8, 1  ;;  %v9854_v8 = vld [vmem:[%s13108_s3 + $0x584] ss:$8 sps:$4 sm:$0xff]  }
 0x15f   : > { %3052 = vmatmul.mubr.bf16.gmra.mrb[4].mxu1 %v13240_v48  ;;  %v9875_v48 = vld [vmem:[%s13112_s7 + $0x1c4] ss:$8 sps:$4 sm:$0xff]  }
 0x160   : > { %3364 = vmatpush1.bf16.msra.mxu1 %v9825_v56  ;;  %3061 = vmatprep.mubr.bf16.mxu1 %v13241_v26  ;;  %v9842_v56 = vld [vmem:[%s13108_s3 + $0x554] ss:$8 sps:$4 sm:$0xff]  }
 0x161   : > { %3365 = vmatprep.subr.bf16.mxu1 %v9833_v4  ;;  %v11874_v4 = vsel %vm1229_vm3, %v5315_v25, %v5319_v49  ;;  %v13244_v25 = vld [vmem:[#allocation12_spill] sm:$0xff]  ;;  %v5327_v49 = vor.u32 %v5326_v53, %v5322_v13  ;;  %v9849_v53 = vld [vmem:[%s13108_s3 + $0x570] ss:$8 sps:$4 sm:$0xff]  }
 0x162   : > { %13242 = vst [vmem:[#allocation29_spill] sm:$0xff] %v11874_v4 }
 0x163   : > { %v11899_v13 = vsel %vm1229_vm3, %v5327_v49, %v5331_v35  ;;  %v9837_v49 = vld [vmem:[%s13112_s7 + $0x180] ss:$8 sps:$4 sm:$0xff]   ;;  %v9848_v35 = vld [vmem:[%s13112_s7 + $0x194] ss:$8 sps:$4 sm:$0xff]  }
 0x164   : > { %3366 = vmatpush1.bf16.msra.mxu1 %v9831_v24  ;;  %v9840_v24 = vld [vmem:[%s13108_s3 + $0x550] ss:$8 sps:$4 sm:$0xff]   ;;  %13245 = vst [vmem:[#allocation30_spill] sm:$0xff] %v11899_v13 }
 0x165   : > { %3367 = vmatprep.subr.bf16.mxu1 %v9836_v40  ;;  %5531 = vmatmul.mubr.bf16.gmra.mrb[24].mxu0 %v11874_v4  ;;  %v9845_v40 = vld [vmem:[%s13108_s3 + $0x564] ss:$8 sps:$4 sm:$0xff]   ;;  %v11971_v4 = vstv %s873_s11  ;;  %s13283_s11 = sshll.u32 %s10486_s26, 2  ;;  %s7951_s26 = sshll.u32 %s13312_s15, 1 }
 0x166   : > { %5540 = vmatprep.mubr.bf16.mxu0 %v13227_v18  ;;  %s12979_s29 = scalar_lea.vmem %s13284_s18, %s13283_s11 }
 0x167   : > { %3062 = vmatmul.mubr.bf16.gmra.mrb[8].mxu1 %v13243_v29  ;;  %v13250_v29 = vld [vmem:[#allocation17_spill] sm:$0xff] }
 0x168   : > { %3368 = vmatpush1.bf16.msra.mxu1 %v9834_v16  ;;  %3071 = vmatprep.mubr.bf16.mxu1 %v13244_v25  ;;  %v9843_v16 = vld [vmem:[%s13108_s3 + $0x560] ss:$8 sps:$4 sm:$0xff]  }
 0x169   : > { %3369 = vmatprep.subr.bf16.mxu1 %v9842_v56  ;;  %v9851_v56 = vld [vmem:[%s13108_s3 + $0x574] ss:$8 sps:$4 sm:$0xff]   ;;  %v4560_v25 = vld [vmem:[%s808_s2] sm:$0xf] }
 0x16c   : > { %3370 = vmatpush1.bf16.msra.mxu1 %v9840_v24  ;;  %v13246_v24 = vld [vmem:[#allocation14_spill] sm:$0xff] }
 0x16d   : > { %3371 = vmatprep.subr.bf16.mxu1 %v9845_v40  ;;  %5541 = vmatmul.mubr.bf16.gmra.mrb[28].mxu0 %v11899_v13  ;;  %v9852_v40 = vld [vmem:[%s13108_s3 + $0x580] ss:$8 sps:$4 sm:$0xff]  }
 0x16e   : > { %5760 = vmatprep.mubr.bf16.mxu0 %v13227_v18  ;;  %v9861_v13 = vld [vmem:[%s13108_s3 + $0x5a0] ss:$8 sps:$4 sm:$0xff]  }
 0x16f   : > { %3072 = vmatmul.mubr.bf16.gmra.mrb[12].mxu1 %v10904_v22  ;;  %v2805_v22 = vshll.u32 %v11732_v17, 16 }
 0x170   : > { %3372 = vmatpush1.bf16.msra.mxu1 %v9843_v16  ;;  %3081 = vmatprep.mubr.bf16.mxu1 %v13246_v24  ;;  %v9860_v16 = vld [vmem:[%s13108_s3 + $0x594] ss:$8 sps:$4 sm:$0xff]   ;;  %v13248_v24 = vld [vmem:[#allocation16_spill] sm:$0xff] }
 0x171   : > { %3373 = vmatprep.subr.bf16.mxu1 %v9851_v56  ;;  %v13247_v56 = vld [vmem:[#allocation15_spill] sm:$0xff] }
 0x174   : > { %3374 = vmatpush1.bf16.msra.mxu1 %v9849_v53  ;;  %v9858_v53 = vld [vmem:[%s13108_s3 + $0x590] ss:$8 sps:$4 sm:$0xff]  }
 0x175   : > { %3375 = vmatprep.subr.bf16.mxu1 %v9854_v8  ;;  %5761 = vmatmul.mubr.bf16.vlgmr.msra.gmra.mrb[0].mxu0 %v11424_v57  ;;  %v9846_v8 = vld [vmem:[%s13112_s7 + $0x190] ss:$8 sps:$4 sm:$0xff]   ;;  %v9863_v57 = vld [vmem:[%s13108_s3 + $0x5a4] ss:$8 sps:$4 sm:$0xff]  }
 0x176   : > { %5971 = vmatpush1.bf16.msra.mxu0 %v9837_v49  ;;  %5770 = vmatprep.mubr.bf16.mxu0 %v13227_v18  ;;  %v9857_v49 = vld [vmem:[%s13112_s7 + $0x1a4] ss:$8 sps:$4 sm:$0xff]  }
 0x177   : > { %3082 = vmatmul.mubr.bf16.gmra.mrb[16].mxu1 %v13247_v56  ;;  %5972 = vmatprep.subr.bf16.mxu0 %v9848_v35  ;;  %v5603_v56 = vrot.slane %v11637_v54, 1  ;;  %v11956_v35 = vsel %vm10576_vm2, %v11689_v45, 0  ;;  %v4561_v54 = vld [vmem:[%s808_s2 + $0x4] sm:$0xf]  ;;  %v9869_v45 = vld [vmem:[%s13108_s3 + $0x5b4] ss:$8 sps:$4 sm:$0xff]  }
 0x178   : > { %3376 = vmatpush1.bf16.msra.mxu1 %v9852_v40  ;;  %v5602_v40 = vrot.slane %v11401_v15, 1  ;;  %3091 = vmatprep.mubr.bf16.mxu1 %v13248_v24  ;;  %v2810_v26 = vshll.u32 %v11956_v35, 16 }
 0x179   : > { %3377 = vmatprep.subr.bf16.mxu1 %v9860_v16  ;;  %v9855_v16 = vld [vmem:[%s13112_s7 + $0x1a0] ss:$8 sps:$4 sm:$0xff]  }
 0x17a   : > { %5973 = vmatpush1.bf16.msra.mxu0 %v9846_v8  ;;  %v11962_v24 = vsel %vm2049_vm4, %v5602_v40, %v5603_v56  ;;  %v2803_v8 = vshrl.u32 %v11732_v17, 16  ;;  %v4563_v56 = vmul.bf16 %v4561_v54, %v11971_v4  ;;  %v4562_v40 = vmul.bf16 %v4560_v25, %v11971_v4  ;;  %v9872_v25 = vld [vmem:[%s13108_s3 + $0x5c4] ss:$8 sps:$4 sm:$0xff]  }
 0x17b   : > { %13249 = vst [vmem:[#allocation31_spill] sm:$0xff] %v11962_v24  ;;  %5974 = vmatprep.subr.bf16.mxu0 %v9857_v49  ;;  %v9867_v49 = vld [vmem:[%s13108_s3 + $0x5b0] ss:$8 sps:$4 sm:$0xff]   ;;  %v2812_v46 = vrot.slane %v2810_v26, 1  ;;  %v9873_v26 = vld [vmem:[%s13112_s7 + $0x1c0] ss:$8 sps:$4 sm:$0xff]  }
 0x17c   : > { %3378 = vmatpush1.bf16.msra.mxu1 %v9858_v53  ;;  %v9866_v53 = vld [vmem:[%s13112_s7 + $0x1b4] ss:$8 sps:$4 sm:$0xff]   ;;  %v11994_v54 = vunpack.c.l.bf16 %v4563_v56 }
 0x17d   : > { %3379 = vmatprep.subr.bf16.mxu1 %v9863_v57  ;;  %v2807_v57 = vrot.slane %v2805_v22, 1  ;;  %5771 = vmatmul.mubr.bf16.gmra.mrb[4].mxu0 %v11962_v24  ;;  %v9864_v22 = vld [vmem:[%s13112_s7 + $0x1b0] ss:$8 sps:$4 sm:$0xff]   ;;  %v11996_v24 = vunpack.c.l.bf16 %v4562_v40 }
 0x17e   : > { %5780 = vmatprep.mubr.bf16.mxu0 %v13227_v18  ;;  %5975 = vmatpush1.bf16.msra.mxu0 %v9855_v16  ;;  %13251 = vst [vmem:[#allocation32_spill] sm:$0xff] %v11994_v54  ;;  %v5606_v16 = vrot.slane %v11674_v28, 1  ;;  %v9870_v28 = vld [vmem:[%s13108_s3 + $0x5c0] ss:$8 sps:$4 sm:$0xff]  }
 0x17f   : > { %3092 = vmatmul.mubr.bf16.gmra.mrb[20].mxu1 %v13250_v29  ;;  %v5605_v29 = vrot.slane %v11466_v33, 1  ;;  %5976 = vmatprep.subr.bf16.mxu0 %v9866_v53  ;;  %v2808_v12 = vor.u32 %v2807_v57, %v2803_v8  ;;  %v2791_v53 = vshrl.u32 %v11767_v19, 16  ;;  %v9878_v8 = vld [vmem:[%s13108_s3 + $0x5d4] ss:$8 sps:$4 sm:$0xff]  }
 0x180   : > { %3380 = vmatpush1.bf16.msra.mxu1 %v9861_v13  ;;  %v11992_v13 = vsel %vm10576_vm2, %v11722_v55, 0  ;;  %3101 = vmatprep.mubr.bf16.mxu1 %v13252_v58  ;;  %v10239_v55 = vld [vmem:[%s13115_s10] ss:$0 sm:$0xff] }
 0x181   : > { %3381 = vmatprep.subr.bf16.mxu1 %v9869_v45  ;;  %v4628_v56 = vmul.f32 %v10239_v55, %v11994_v54  ;;  %v4627_v40 = vmul.f32 %v10239_v55, %v11996_v24  ;;  %v2795_v45 = vrot.slane %v2793_v20, 1  ;;  %v2798_v58 = vshll.u32 %v11992_v13, 16 }
 0x182   : > { %5977 = vmatpush1.bf16.msra.mxu0 %v9864_v22  ;;  %v12021_v57 = vsel %vm2049_vm4, %v5605_v29, %v5606_v16  ;;  %v12025_v20 = vsel %vm1229_vm3, %v2808_v12, %v2812_v46  ;;  %v9884_v22 = vld [vmem:[%s13112_s7 + $0x1d4] ss:$8 sps:$4 sm:$0xff]   ;;  %v9881_v46 = vld [vmem:[%s13108_s3 + $0x5e4] ss:$8 sps:$4 sm:$0xff]   ;;  %v9882_v12 = vld [vmem:[%s13112_s7 + $0x1d0] ss:$8 sps:$4 sm:$0xff]  }
 0x183   : > { %5978 = vmatprep.subr.bf16.mxu0 %v9875_v48  ;;  %4667 = vadd.xlane.f32.xlu1 %v4628_v56  ;;  %v9876_v48 = vld [vmem:[%s13108_s3 + $0x5d0] ss:$8 sps:$4 sm:$0xff]   ;;  %v2796_v29 = vor.u32 %v2795_v45, %v2791_v53  ;;  %v9893_v16 = vld [vmem:[%s13112_s7 + $0x1e4] ss:$8 sps:$4 sm:$0xff]   ;;  %v5609_v55 = vrot.slane %v11717_v27, 1 }
 0x184   : > { %3382 = vmatpush1.bf16.msra.mxu1 %v9867_v49  ;;  %v13253_v49 = vld [vmem:[#allocation19_spill] sm:$0xff]  ;;  %4665 = vadd.xlane.f32.xlu0 %v4627_v40  ;;  %v9879_v40 = vld [vmem:[%s13108_s3 + $0x5e0] ss:$8 sps:$4 sm:$0xff]  }
 0x185   : > { %3383 = vmatprep.subr.bf16.mxu1 %v9872_v25  ;;  %5781 = vmatmul.mubr.bf16.gmra.mrb[8].mxu0 %v12021_v57  ;;  %v2800_v25 = vrot.slane %v2798_v58, 1  ;;  %v5608_v58 = vrot.slane %v11509_v51, 1  ;;  %v9891_v27 = vld [vmem:[%s13112_s7 + $0x1e0] ss:$8 sps:$4 sm:$0xff]   ;;  %v9902_v45 = vld [vmem:[%s13112_s7 + $0x1f4] ss:$8 sps:$4 sm:$0xff]  }
 0x186   : > { %5790 = vmatprep.mubr.bf16.mxu0 %v13227_v18  ;;  %5979 = vmatpush1.bf16.msra.mxu0 %v9873_v26  ;;  %v9885_v26 = vld [vmem:[%s13108_s3 + $0x5f0] ss:$8 sps:$4 sm:$0xff]  }
 0x187   : > { %3102 = vmatmul.mubr.bf16.gmra.mrb[24].mxu1 %v13253_v49  ;;  %5980 = vmatprep.subr.bf16.mxu0 %v9884_v22  ;;  %v12049_v56 = vsel %vm1229_vm3, %v2796_v29, %v2800_v25  ;;  %v12062_v53 = vsel %vm2049_vm4, %v5608_v58, %v5609_v55  ;;  %v9900_v22 = vld [vmem:[%s13112_s7 + $0x1f0] ss:$8 sps:$4 sm:$0xff]   ;;  %v5612_v29 = vrot.slane %v11763_v1, 1  ;;  %v9911_v25 = vld [vmem:[%s13112_s7 + $0x204] ss:$8 sps:$4 sm:$0xff]  }
 0x188   : > { %3384 = vmatpush1.bf16.msra.mxu1 %v9870_v28  ;;  %3111 = vmatprep.mubr.bf16.mxu1 %v12025_v20  ;;  %v9887_v28 = vld [vmem:[%s13108_s3 + $0x5f4] ss:$8 sps:$4 sm:$0xff]   ;;  %v9894_v58 = vld [vmem:[%s13108_s3 + $0x610] ss:$8 sps:$4 sm:$0xff]  }
 0x189   : > { %3385 = vmatprep.subr.bf16.mxu1 %v9878_v8  ;;  %v9890_v8 = vld [vmem:[%s13108_s3 + $0x604] ss:$8 sps:$4 sm:$0xff]  }
 0x18a   : > { %5981 = vmatpush1.bf16.msra.mxu0 %v9882_v12  ;;  %v870_v12 = vld [vmem:[%s763_s19] sm:$0xff] }
 0x18b   : > { %5982 = vmatprep.subr.bf16.mxu0 %v9893_v16  ;;  %v871_v16 = vld [vmem:[%s763_s19 + $0x8] sm:$0xff]  ;;  %v876_v55 = vmul.bf16 %v11971_v4, %v870_v12 }
 0x18c   : > { %3386 = vmatpush1.bf16.msra.mxu1 %v9876_v48  ;;  %v5611_v48 = vrot.slane %v11547_v37, 1  ;;  %v9906_v12 = vld [vmem:[%s13108_s3 + $0x640] ss:$8 sps:$4 sm:$0xff]  }
 0x18d   : > { %3387 = vmatprep.subr.bf16.mxu1 %v9881_v46  ;;  %5791 = vmatmul.mubr.bf16.gmra.mrb[12].mxu0 %v12062_v53  ;;  %v9888_v46 = vld [vmem:[%s13108_s3 + $0x600] ss:$8 sps:$4 sm:$0xff]  }
 0x18e   : > { %5800 = vmatprep.mubr.bf16.mxu0 %v13227_v18  ;;  %5983 = vmatpush1.bf16.msra.mxu0 %v9891_v27  ;;  %v12095_v1 = vsel %vm2049_vm4, %v5611_v48, %v5612_v29  ;;  %v9908_v29 = vld [vmem:[%s13108_s3 + $0x644] ss:$8 sps:$4 sm:$0xff]  }
 0x18f   : > { %3112 = vmatmul.mubr.bf16.gmra.mrb[28].mxu1 %v12049_v56  ;;  %5984 = vmatprep.subr.bf16.mxu0 %v9902_v45 }
 0x190   : > { %3388 = vmatpush1.bf16.msra.mxu1 %v9879_v40  ;;  %3391 = vmatprep.mubr.bf16.mxu1 %v11202_v63  ;;  %v9896_v63 = vld [vmem:[%s13108_s3 + $0x614] ss:$8 sps:$4 sm:$0xff]   ;;  %v877_v40 = vmul.bf16 %v11971_v4, %v871_v16  ;;  %v9897_v4 = vld [vmem:[%s13108_s3 + $0x620] ss:$8 sps:$4 sm:$0xff]  }
 0x191   : > { %3389 = vmatprep.subr.bf16.mxu1 %v9887_v28  ;;  %v13255_v28 = vld [vmem:[#allocation22_spill] sm:$0xff] }
 0x192   : > { %5985 = vmatpush1.bf16.msra.mxu0 %v9900_v22  ;;  %v12109_v27 = vcombine.high %v876_v55, %v877_v40  ;;  %v12111_v45 = vcombine.low %v876_v55, %v877_v40  ;;  %v9905_v22 = vld [vmem:[%s13108_s3 + $0x634] ss:$8 sps:$4 sm:$0xff]   ;;  %v9917_v55 = vld [vmem:[%s13108_s3 + $0x664] ss:$8 sps:$4 sm:$0xff]   ;;  %v4664_v40 = vpop.xlane.xlu1 %4663 }
 0x193   : > { %6225 = vmatprep.subr.bf16.mxu0 %v9911_v25  ;;  %v13256_v25 = vld [vmem:[#allocation23_spill] sm:$0xff] }
 0x194   : > { %3390 = vmatpush1.bf16.msra.mxu1 %v9885_v26  ;;  %v5614_v26 = vrot.slane %v11572_v34, 1  ;;  %v9914_v16 = vld [vmem:[%s13108_s3 + $0x654] ss:$8 sps:$4 sm:$0xff]  }
 0x195   : > { %3697 = vmatprep.subr.bf16.mxu1 %v9890_v8  ;;  %5801 = vmatmul.mubr.bf16.gmra.mrb[16].mxu0 %v12095_v1  ;;  %v5615_v8 = vrot.slane %v11806_v0, 1  ;;  %v9903_v0 = vld [vmem:[%s13108_s3 + $0x630] ss:$8 sps:$4 sm:$0xff]  }
 0x196   : > { %5810 = vmatprep.mubr.bf16.mxu0 %v13227_v18 }
 0x197   : > { %3392 = vmatmul.mubr.bf16.vlgmr.msra.gmra.mrb[0].mxu1 %v11230_v9  ;;  %v9899_v9 = vld [vmem:[%s13108_s3 + $0x624] ss:$8 sps:$4 sm:$0xff]   ;;  %v12122_v48 = vsel %vm2049_vm4, %v5614_v26, %v5615_v8  ;;  %v5620_v26 = vrot.slane %v11619_v31, 1  ;;  %v5621_v8 = vrot.slane %v11861_v47, 1 }
 0x198   : > { %3698 = vmatpush1.bf16.msra.mxu1 %v9888_v46  ;;  %3401 = vmatprep.mubr.bf16.mxu1 %v13255_v28  ;;  %v5617_v46 = vrot.slane %v11595_v7, 1 }
 0x199   : > { %3699 = vmatprep.subr.bf16.mxu1 %v9896_v63  ;;  %v5618_v63 = vrot.slane %v11833_v61, 1  ;;  %v9912_v61 = vld [vmem:[%s13108_s3 + $0x650] ss:$8 sps:$4 sm:$0xff]  }
 0x19c   : > { %3700 = vmatpush1.bf16.msra.mxu1 %v9894_v58  ;;  %v12143_v58 = vsel %vm2049_vm4, %v5617_v46, %v5618_v63  ;;  %v9923_v46 = vld [vmem:[%s13108_s3 + $0x674] ss:$8 sps:$4 sm:$0xff]   ;;  %v12166_v63 = vsel %vm2049_vm4, %v5620_v26, %v5621_v8  ;;  %v9909_v26 = vld [vmem:[%s13112_s7 + $0x200] ss:$8 sps:$4 sm:$0xff]  }
 0x19d   : > { %3701 = vmatprep.subr.bf16.mxu1 %v9899_v9  ;;  %5811 = vmatmul.mubr.bf16.gmra.mrb[20].mxu0 %v12122_v48  ;;  %v4662_v9 = vpop.xlane.xlu0 %4661  ;;  %v9920_v8 = vld [vmem:[%s13112_s7 + $0x214] ss:$8 sps:$4 sm:$0xff]  }
 0x19e   : > { %5820 = vmatprep.mubr.bf16.mxu0 %v13227_v18 }
 0x19f   : > { %3402 = vmatmul.mubr.bf16.gmra.mrb[4].mxu1 %v11258_v14 }
 0x1a0   : > { %3702 = vmatpush1.bf16.msra.mxu1 %v9897_v4  ;;  %3411 = vmatprep.mubr.bf16.mxu1 %v13256_v25  ;;  %v9915_v4 = vld [vmem:[%s13108_s3 + $0x660] ss:$8 sps:$4 sm:$0xff]  }
 0x1a1   : > { %3703 = vmatprep.subr.bf16.mxu1 %v9905_v22  ;;  %v13257_v22 = vld [vmem:[#allocation21_spill] sm:$0xff] }
 0x1a4   : > { %3704 = vmatpush1.bf16.msra.mxu1 %v9903_v0  ;;  %v4687_v0 = vadd.f32 %v13257_v22, %v4664_v40  ;;  %v13259_v40 = vld [vmem:[#allocation25_spill] sm:$0xff] }
 0x1a5   : > { %3705 = vmatprep.subr.bf16.mxu1 %v9908_v29  ;;  %5821 = vmatmul.mubr.bf16.gmra.mrb[24].mxu0 %v12143_v58  ;;  %v4686_v29 = vadd.f32 %v13257_v22, %v4662_v9  ;;  %v9924_v9 = vld [vmem:[%s13108_s3 + $0x680] ss:$8 sps:$4 sm:$0xff]  }
 0x1a6   : > { %5830 = vmatprep.mubr.bf16.mxu0 %v13227_v18  ;;  %v8535_v47 = vmul.f32 -1.442695, %v4687_v0  ;;  %v9930_v0 = vld [vmem:[%s13108_s3 + $0x690] ss:$8 sps:$4 sm:$0xff]  }
 0x1a7   : > { %3412 = vmatmul.mubr.bf16.gmra.mrb[8].mxu1 %v11292_v50 }
 0x1a8   : > { %3706 = vmatpush1.bf16.msra.mxu1 %v9906_v12  ;;  %3421 = vmatprep.mubr.bf16.mxu1 %v11299_v23  ;;  %v13258_v12 = vld [vmem:[#allocation24_spill] sm:$0xff]  ;;  %10222 = vpow2.f32 %v8535_v47 }
 0x1a9   : > { %3707 = vmatprep.subr.bf16.mxu1 %v9914_v16  ;;  %v9921_v16 = vld [vmem:[%s13108_s3 + $0x670] ss:$8 sps:$4 sm:$0xff]   ;;  %v9933_v47 = vld [vmem:[%s13108_s3 + $0x6a0] ss:$8 sps:$4 sm:$0xff]  }
 0x1ac   : > { %3708 = vmatpush1.bf16.msra.mxu1 %v9912_v61  ;;  %v8534_v61 = vmul.f32 -1.442695, %v4686_v29  ;;  %v9918_v29 = vld [vmem:[%s13112_s7 + $0x210] ss:$8 sps:$4 sm:$0xff]  }
 0x1ad   : > { %3709 = vmatprep.subr.bf16.mxu1 %v9917_v55  ;;  %5831 = vmatmul.mubr.bf16.gmra.mrb[28].mxu0 %v12166_v63  ;;  %v9926_v55 = vld [vmem:[%s13108_s3 + $0x684] ss:$8 sps:$4 sm:$0xff]  }
 0x1ae   : > { %6002 = vmatprep.mubr.bf16.mxu0 %v13227_v18  ;;  %10224 = vpow2.f32 %v8534_v61 }
 0x1af   : > { %3422 = vmatmul.mubr.bf16.gmra.mrb[12].mxu1 %v13258_v12 }
 0x1b0   : > { %3710 = vmatpush1.bf16.msra.mxu1 %v9915_v4  ;;  %3431 = vmatprep.mubr.bf16.mxu1 %v13259_v40  ;;  %v9932_v4 = vld [vmem:[%s13108_s3 + $0x694] ss:$8 sps:$4 sm:$0xff]  }
 0x1b1   : > { %3711 = vmatprep.subr.bf16.mxu1 %v9923_v46  ;;  %v9935_v46 = vld [vmem:[%s13108_s3 + $0x6a4] ss:$8 sps:$4 sm:$0xff]  }
 0x1b2   : > { %v10223_v61 = vpop.eup %10222 }
 0x1b4   : > { %3712 = vmatpush1.bf16.msra.mxu1 %v9921_v16  ;;  %v9927_v16 = vld [vmem:[%s13112_s7 + $0x220] ss:$8 sps:$4 sm:$0xff]  }
 0x1b5   : > { %3713 = vmatprep.subr.bf16.mxu1 %v9926_v55  ;;  %6003 = vmatmul.mubr.bf16.vlgmr.msra.gmra.mrb[0].mxu0 %v11401_v15  ;;  %v9929_v15 = vld [vmem:[%s13112_s7 + $0x224] ss:$8 sps:$4 sm:$0xff]   ;;  %v9938_v55 = vld [vmem:[%s13112_s7 + $0x234] ss:$8 sps:$4 sm:$0xff]  }
 0x1b6   : > { %6226 = vmatpush1.bf16.msra.mxu0 %v9909_v26  ;;  %6012 = vmatprep.mubr.bf16.mxu0 %v13227_v18 }
 0x1b7   : > { %3432 = vmatmul.mubr.bf16.gmra.mrb[16].mxu1 %v11391_v21  ;;  %6227 = vmatprep.subr.bf16.mxu0 %v9920_v8  ;;  %v9939_v8 = vld [vmem:[%s13108_s3 + $0x6b0] ss:$8 sps:$4 sm:$0xff]  }
 0x1b8   : > { %3714 = vmatpush1.bf16.msra.mxu1 %v9924_v9  ;;  %3441 = vmatprep.mubr.bf16.mxu1 %v11419_v62  ;;  %v9941_v9 = vld [vmem:[%s13108_s3 + $0x6b4] ss:$8 sps:$4 sm:$0xff]   ;;  %v10225_v26 = vpop.eup %10224 }
 0x1b9   : > { %3715 = vmatprep.subr.bf16.mxu1 %v9932_v4  ;;  %v4767_v4 = vadd.f32 1.0, %v10223_v61  ;;  %v9942_v61 = vld [vmem:[%s13108_s3 + $0x6c0] ss:$8 sps:$4 sm:$0xff]  }
 0x1ba   : > { %6228 = vmatpush1.bf16.msra.mxu0 %v9918_v29  ;;  %v9944_v29 = vld [vmem:[%s13108_s3 + $0x6c4] ss:$8 sps:$4 sm:$0xff]  }
 0x1bb   : > { %6229 = vmatprep.subr.bf16.mxu0 %v9929_v15  ;;  %v9947_v15 = vld [vmem:[%s13112_s7 + $0x244] ss:$8 sps:$4 sm:$0xff]   ;;  %10226 = vrcp.f32 %v4767_v4  ;;  %v3158_v4 = vrot.slane %v11767_v19, 1 }
 0x1bc   : > { %3716 = vmatpush1.bf16.msra.mxu1 %v9930_v0  ;;  %v9936_v0 = vld [vmem:[%s13112_s7 + $0x230] ss:$8 sps:$4 sm:$0xff]  }
 0x1bd   : > { %3717 = vmatprep.subr.bf16.mxu1 %v9935_v46  ;;  %6013 = vmatmul.mubr.bf16.gmra.mrb[4].mxu0 %v11466_v33  ;;  %v4766_v46 = vadd.f32 1.0, %v10225_v26  ;;  %v9956_v26 = vld [vmem:[%s13112_s7 + $0x254] ss:$8 sps:$4 sm:$0xff]  }
 0x1be   : > { %6022 = vmatprep.mubr.bf16.mxu0 %v13227_v18  ;;  %6230 = vmatpush1.bf16.msra.mxu0 %v9927_v16  ;;  %v3162_v16 = vrot.slane %v11956_v35, 1 }
 0x1bf   : > { %3442 = vmatmul.mubr.bf16.gmra.mrb[20].mxu1 %v11450_v6  ;;  %6231 = vmatprep.subr.bf16.mxu0 %v9938_v55  ;;  %v9945_v55 = vld [vmem:[%s13112_s7 + $0x240] ss:$8 sps:$4 sm:$0xff]   ;;  %10228 = vrcp.f32 %v4766_v46  ;;  %v9954_v46 = vld [vmem:[%s13112_s7 + $0x250] ss:$8 sps:$4 sm:$0xff]  }
 0x1c0   : > { %3718 = vmatpush1.bf16.msra.mxu1 %v9933_v47  ;;  %3451 = vmatprep.mubr.bf16.mxu1 %v11460_v36  ;;  %v3161_v47 = vrot.slane %v11732_v17, 1 }
 0x1c1   : > { %3719 = vmatprep.subr.bf16.mxu1 %v9941_v9  ;;  %v9950_v9 = vld [vmem:[%s13108_s3 + $0x6d4] ss:$8 sps:$4 sm:$0xff]  }
 0x1c2   : > { %6232 = vmatpush1.bf16.msra.mxu0 %v9936_v0  ;;  %v12247_v35 = vsel %vm2049_vm4, %v3161_v47, %v3162_v16  ;;  %v3159_v0 = vrot.slane %v11992_v13, 1  ;;  %v9951_v47 = vld [vmem:[%s13108_s3 + $0x6e0] ss:$8 sps:$4 sm:$0xff]   ;;  %v9959_v16 = vld [vmem:[%s13108_s3 + $0x6f4] ss:$8 sps:$4 sm:$0xff]  }
 0x1c3   : > { %6233 = vmatprep.subr.bf16.mxu0 %v9947_v15  ;;  %v9965_v15 = vld [vmem:[%s13112_s7 + $0x264] ss:$8 sps:$4 sm:$0xff]  }
 0x1c4   : > { %3720 = vmatpush1.bf16.msra.mxu1 %v9939_v8  ;;  %v9948_v8 = vld [vmem:[%s13108_s3 + $0x6d0] ss:$8 sps:$4 sm:$0xff]   ;;  %v12270_v13 = vsel %vm2049_vm4, %v3158_v4, %v3159_v0  ;;  %v9962_v4 = vld [vmem:[%s13108_s3 + $0x704] ss:$8 sps:$4 sm:$0xff]  }
 0x1c5   : > { %3721 = vmatprep.subr.bf16.mxu1 %v9944_v29  ;;  %6023 = vmatmul.mubr.bf16.gmra.mrb[8].mxu0 %v11509_v51  ;;  %v9953_v29 = vld [vmem:[%s13108_s3 + $0x6e4] ss:$8 sps:$4 sm:$0xff]   ;;  %v9972_v0 = vld [vmem:[%s13112_s7 + $0x270] ss:$8 sps:$4 sm:$0xff]  }
 0x1c6   : > { %6032 = vmatprep.mubr.bf16.mxu0 %v13227_v18  ;;  %6234 = vmatpush1.bf16.msra.mxu0 %v9945_v55  ;;  %v10227_v55 = vpop.eup %10226 }
 0x1c7   : > { %3452 = vmatmul.mubr.bf16.gmra.mrb[24].mxu1 %v11494_v38  ;;  %6235 = vmatprep.subr.bf16.mxu0 %v9956_v26 }
 0x1c8   : > { %3722 = vmatpush1.bf16.msra.mxu1 %v9942_v61  ;;  %3461 = vmatprep.mubr.bf16.mxu1 %v12247_v35  ;;  %v9963_v61 = vld [vmem:[%s13112_s7 + $0x260] ss:$8 sps:$4 sm:$0xff]  }
 0x1c9   : > { %3723 = vmatprep.subr.bf16.mxu1 %v9950_v9  ;;  %v9974_v9 = vld [vmem:[%s13112_s7 + $0x274] ss:$8 sps:$4 sm:$0xff]   ;;  %v10229_v26 = vpop.eup %10228 }
 0x1ca   : > { %6236 = vmatpush1.bf16.msra.mxu0 %v9954_v46 }
 0x1cb   : > { %6237 = vmatprep.subr.bf16.mxu0 %v9965_v15 }
 0x1cc   : > { %3724 = vmatpush1.bf16.msra.mxu1 %v9948_v8  ;;  %v9957_v8 = vld [vmem:[%s13108_s3 + $0x6f0] ss:$8 sps:$4 sm:$0xff]  }
 0x1cd   : > { %3725 = vmatprep.subr.bf16.mxu1 %v9953_v29  ;;  %6033 = vmatmul.mubr.bf16.gmra.mrb[12].mxu0 %v11547_v37  ;;  %v12298_v29 = vld [vmem:[%s11227_s21] ss:$0 sm:$0xff]  ;;  %s833_s21 = sadd.s32 %s7952_s14, %s7951_s26 }
 0x1ce   : > { %6042 = vmatprep.mubr.bf16.mxu0 %v13227_v18  ;;  %6238 = vmatpush1.bf16.msra.mxu0 %v9963_v61  ;;  %v4833_v46 = vadd.f32 %v12298_v29, %v10227_v55  ;;  %v4832_v15 = vadd.f32 %v12298_v29, %v10229_v26  ;;  %v13260_v61 = vld [vmem:[#allocation20_spill] sm:$0xff]  ;;  %s834_s27 = scalar_lea.vmem %s13285_s20, %s833_s21 }
 0x1cf   : > { %3462 = vmatmul.mubr.bf16.gmra.mrb[28].mxu1 %v12270_v13  ;;  %6239 = vmatprep.subr.bf16.mxu0 %v9974_v9  ;;  %v13261_v55 = vunpack.c.l.bf16 %v13260_v61  ;;  %v13262_v26 = vunpack.c.h.bf16 %v13260_v61 }
 0x1d0   : > { %3726 = vmatpush1.bf16.msra.mxu1 %v9951_v47  ;;  %3729 = vmatprep.mubr.bf16.mxu1 %v10675_v41  ;;  %v9983_v47 = vld [vmem:[%s13112_s7 + $0x284] ss:$8 sps:$4 sm:$0xff]   ;;  %v9960_v41 = vld [vmem:[%s13108_s3 + $0x700] ss:$8 sps:$4 sm:$0xff]  }
 0x1d1   : > { %3727 = vmatprep.subr.bf16.mxu1 %v9959_v16  ;;  %v9968_v16 = vld [vmem:[%s13108_s3 + $0x714] ss:$8 sps:$4 sm:$0xff]   ;;  %v4852_v9 = vmul.f32 %v13261_v55, %v4832_v15  ;;  %v4853_v54 = vmul.f32 %v13262_v26, %v4833_v46  ;;  %v9969_v46 = vld [vmem:[%s13108_s3 + $0x720] ss:$8 sps:$4 sm:$0xff]  }
 0x1d2   : > { %6240 = vmatpush1.bf16.msra.mxu0 %v9972_v0  ;;  %v9977_v15 = vld [vmem:[%s13108_s3 + $0x734] ss:$8 sps:$4 sm:$0xff]  }
 0x1d3   : > { %6473 = vmatprep.subr.bf16.mxu0 %v9983_v47  ;;  %v4873_v0 = vmax.f32 %v4853_v54, 0.0  ;;  %v9980_v54 = vld [vmem:[%s13108_s3 + $0x744] ss:$8 sps:$4 sm:$0xff]  }
 0x1d4   : > { %3728 = vmatpush1.bf16.msra.mxu1 %v9957_v8  ;;  %v9966_v8 = vld [vmem:[%s13108_s3 + $0x710] ss:$8 sps:$4 sm:$0xff]  }
 0x1d5   : > { %4061 = vmatprep.subr.bf16.mxu1 %v9962_v4  ;;  %6043 = vmatmul.mubr.bf16.gmra.mrb[16].mxu0 %v11572_v34  ;;  %v4872_v4 = vmax.f32 %v4852_v9, 0.0  ;;  %v9989_v9 = vld [vmem:[%s13108_s3 + $0x764] ss:$8 sps:$4 sm:$0xff]  }
 0x1d6   : > { %6052 = vmatprep.mubr.bf16.mxu0 %v13227_v18 }
 0x1d7   : > { %3730 = vmatmul.mubr.bf16.vlgmr.msra.gmra.mrb[0].mxu1 %v10718_v43  ;;  %v9971_v43 = vld [vmem:[%s13108_s3 + $0x724] ss:$8 sps:$4 sm:$0xff]   ;;  %v4884_v47 = vpack.c.bf16 %v4873_v0, %v4872_v4  ;;  %v9981_v0 = vld [vmem:[%s13112_s7 + $0x280] ss:$8 sps:$4 sm:$0xff]  }
 0x1d8   : > { %4062 = vmatpush1.bf16.msra.mxu1 %v9960_v41  ;;  %3739 = vmatprep.mubr.bf16.mxu1 %v10726_v52  ;;  %v9975_v52 = vld [vmem:[%s13108_s3 + $0x730] ss:$8 sps:$4 sm:$0xff]   ;;  %v9998_v4 = vld [vmem:[%s13108_s3 + $0x784] ss:$8 sps:$4 sm:$0xff]  }
 0x1d9   : > { %4063 = vmatprep.subr.bf16.mxu1 %v9968_v16  ;;  %v4943_v41 = vshrl.u32 %v4884_v47, 16  ;;  %v9986_v16 = vld [vmem:[%s13108_s3 + $0x754] ss:$8 sps:$4 sm:$0xff]   ;;  %v4946_v55 = vshll.u32 %v4884_v47, 16  ;;  %v9990_v47 = vld [vmem:[%s13112_s7 + $0x290] ss:$8 sps:$4 sm:$0xff]  }
 0x1db   : > { %v12347_v61 = vrot.slane %v4943_v41, 7  ;;  %v9999_v41 = vld [vmem:[%s13112_s7 + $0x2a0] ss:$8 sps:$4 sm:$0xff]  }
 0x1dc   : > { %4064 = vmatpush1.bf16.msra.mxu1 %v9966_v8  ;;  %v9995_v8 = vld [vmem:[%s13108_s3 + $0x774] ss:$8 sps:$4 sm:$0xff]  }
 0x1dd   : > { %4065 = vmatprep.subr.bf16.mxu1 %v9971_v43  ;;  %6053 = vmatmul.mubr.bf16.gmra.mrb[20].mxu0 %v11595_v7  ;;  %v4948_v26 = vor.u32 %v4946_v55, %v12347_v61  ;;  %v1111_v55 = vshll.u32 %v12109_v27, 16 }
 0x1de   : > { %6062 = vmatprep.mubr.bf16.mxu0 %v13227_v18 }
 0x1df   : > { %3740 = vmatmul.mubr.bf16.gmra.mrb[4].mxu1 %v10763_v60  ;;  %v9978_v60 = vld [vmem:[%s13108_s3 + $0x740] ss:$8 sps:$4 sm:$0xff]   ;;  %v12368_v43 = vsel %vm10576_vm2, 0, %v4948_v26  ;;  %v10019_v26 = vld [vmem:[%s13112_s7 + $0x2c4] ss:$8 sps:$4 sm:$0xff]  }
 0x1e0   : > { %4066 = vmatpush1.bf16.msra.mxu1 %v9969_v46  ;;  %3749 = vmatprep.mubr.bf16.mxu1 %v10771_v5  ;;  %v9984_v5 = vld [vmem:[%s13108_s3 + $0x750] ss:$8 sps:$4 sm:$0xff]   ;;  %v9992_v46 = vld [vmem:[%s13112_s7 + $0x294] ss:$8 sps:$4 sm:$0xff]  }
 0x1e1   : > { %4067 = vmatprep.subr.bf16.mxu1 %v9977_v15  ;;  %v10004_v15 = vld [vmem:[%s13108_s3 + $0x794] ss:$8 sps:$4 sm:$0xff]  }
 0x1e4   : > { %4068 = vmatpush1.bf16.msra.mxu1 %v9975_v52  ;;  %v10007_v52 = vld [vmem:[%s13108_s3 + $0x7a4] ss:$8 sps:$4 sm:$0xff]  }
 0x1e5   : > { %4069 = vmatprep.subr.bf16.mxu1 %v9980_v54  ;;  %6063 = vmatmul.mubr.bf16.gmra.mrb[24].mxu0 %v11619_v31  ;;  %v10005_v54 = vld [vmem:[%s13108_s3 + $0x7a0] ss:$8 sps:$4 sm:$0xff]  }
 0x1e6   : > { %6072 = vmatprep.mubr.bf16.mxu0 %v13227_v18 }
 0x1e7   : > { %3750 = vmatmul.mubr.bf16.gmra.mrb[8].mxu1 %v10813_v11  ;;  %v9987_v11 = vld [vmem:[%s13108_s3 + $0x760] ss:$8 sps:$4 sm:$0xff]  }
 0x1e8   : > { %4070 = vmatpush1.bf16.msra.mxu1 %v9978_v60  ;;  %3759 = vmatprep.mubr.bf16.mxu1 %v10817_v39  ;;  %v9993_v39 = vld [vmem:[%s13108_s3 + $0x770] ss:$8 sps:$4 sm:$0xff]   ;;  %v10010_v60 = vld [vmem:[%s13112_s7 + $0x2b4] ss:$8 sps:$4 sm:$0xff]  }
 0x1e9   : > { %4071 = vmatprep.subr.bf16.mxu1 %v9986_v16 }
 0x1ec   : > { %4072 = vmatpush1.bf16.msra.mxu1 %v9984_v5  ;;  %v10011_v5 = vld [vmem:[%s13108_s3 + $0x7b0] ss:$8 sps:$4 sm:$0xff]  }
 0x1ed   : > { %4073 = vmatprep.subr.bf16.mxu1 %v9989_v9  ;;  %6073 = vmatmul.mubr.bf16.gmra.mrb[28].mxu0 %v12368_v43  ;;  %v1101_v9 = vshrl.u32 %v12111_v45, 16 }
 0x1ee   : > { %6257 = vmatprep.mubr.bf16.mxu0 %v13227_v18 }
 0x1ef   : > { %3760 = vmatmul.mubr.bf16.gmra.mrb[12].mxu1 %v10854_v10  ;;  %v9996_v10 = vld [vmem:[%s13108_s3 + $0x780] ss:$8 sps:$4 sm:$0xff]  }
 0x1f0   : > { %4074 = vmatpush1.bf16.msra.mxu1 %v9987_v11  ;;  %3769 = vmatprep.mubr.bf16.mxu1 %v10868_v30  ;;  %v10002_v30 = vld [vmem:[%s13108_s3 + $0x790] ss:$8 sps:$4 sm:$0xff]  }
 0x1f1   : > { %4075 = vmatprep.subr.bf16.mxu1 %v9995_v8  ;;  %v10014_v8 = vld [vmem:[%s13108_s3 + $0x7c0] ss:$8 sps:$4 sm:$0xff]  }
 0x1f4   : > { %4076 = vmatpush1.bf16.msra.mxu1 %v9993_v39  ;;  %v12445_v39 = vrot.slane %v1101_v9, 7  ;;  %v13265_v9 = vld [vmem:[#allocation8_spill] sm:$0xff] }
 0x1f5   : > { %4077 = vmatprep.subr.bf16.mxu1 %v9998_v4  ;;  %6258 = vmatmul.mubr.bf16.vlgmr.msra.gmra.mrb[0].mxu0 %v11692_v32  ;;  %v1108_v32 = vshrl.u32 %v12109_v27, 16  ;;  %v10016_v27 = vld [vmem:[%s13108_s3 + $0x7c4] ss:$8 sps:$4 sm:$0xff]   ;;  %v1104_v4 = vshll.u32 %v12111_v45, 16  ;;  %v10028_v45 = vld [vmem:[%s13112_s7 + $0x2d4] ss:$8 sps:$4 sm:$0xff]  }
 0x1f6   : > { %6474 = vmatpush1.bf16.msra.mxu0 %v9981_v0  ;;  %6267 = vmatprep.mubr.bf16.mxu0 %v13227_v18 }
 0x1f7   : > { %3770 = vmatmul.mubr.bf16.gmra.mrb[16].mxu1 %v10916_v42  ;;  %6475 = vmatprep.subr.bf16.mxu0 %v9992_v46  ;;  %v10001_v42 = vld [vmem:[%s13112_s7 + $0x2a4] ss:$8 sps:$4 sm:$0xff]   ;;  %v12422_v16 = vrot.slane %v1108_v32, 7  ;;  %v13263_v46 = vld [vmem:[#allocation26_spill] sm:$0xff]  ;;  %v10023_v32 = vld [vmem:[%s13108_s3 + $0x7e0] ss:$8 sps:$4 sm:$0xff]  }
 0x1f8   : > { %4078 = vmatpush1.bf16.msra.mxu1 %v9996_v10  ;;  %3779 = vmatprep.mubr.bf16.mxu1 %v10924_v59  ;;  %v10013_v59 = vld [vmem:[%s13108_s3 + $0x7b4] ss:$8 sps:$4 sm:$0xff]   ;;  %v10017_v10 = vld [vmem:[%s13112_s7 + $0x2c0] ss:$8 sps:$4 sm:$0xff]  }
 0x1f9   : > { %4079 = vmatprep.subr.bf16.mxu1 %v10004_v15  ;;  %v1113_v11 = vor.u32 %v1111_v55, %v12422_v16  ;;  %v10020_v15 = vld [vmem:[%s13108_s3 + $0x7d0] ss:$8 sps:$4 sm:$0xff]  }
 0x1fa   : > { %6476 = vmatpush1.bf16.msra.mxu0 %v9990_v47  ;;  %v10026_v47 = vld [vmem:[%s13112_s7 + $0x2d0] ss:$8 sps:$4 sm:$0xff]  }
 0x1fb   : > { %6477 = vmatprep.subr.bf16.mxu0 %v10001_v42  ;;  %v12457_v0 = vsel %vm10576_vm2, 0, %v1113_v11  ;;  %v10029_v55 = vld [vmem:[%s13108_s3 + $0x7f0] ss:$8 sps:$4 sm:$0xff]   ;;  %v10040_v11 = vld [vmem:[%s13108_s3 + $0x814] ss:$8 sps:$4 sm:$0xff]  }
 0x1fc   : > { %4080 = vmatpush1.bf16.msra.mxu1 %v10002_v30  ;;  %v1106_v30 = vor.u32 %v1104_v4, %v12445_v39  ;;  %v13267_v4 = vld [vmem:[#allocation28_spill] sm:$0xff] }
 0x1fd   : > { %4081 = vmatprep.subr.bf16.mxu1 %v10007_v52  ;;  %6268 = vmatmul.mubr.bf16.gmra.mrb[4].mxu0 %v11735_v44  ;;  %v10037_v52 = vld [vmem:[%s13112_s7 + $0x2e4] ss:$8 sps:$4 sm:$0xff]  }
 0x1fe   : > { %6277 = vmatprep.mubr.bf16.mxu0 %v13227_v18  ;;  %6478 = vmatpush1.bf16.msra.mxu0 %v9999_v41  ;;  %v12480_v42 = vsel %vm10576_vm2, 0, %v1106_v30  ;;  %v10035_v41 = vld [vmem:[%s13112_s7 + $0x2e0] ss:$8 sps:$4 sm:$0xff]   ;;  %v10049_v30 = vld [vmem:[%s13108_s3 + $0x834] ss:$8 sps:$4 sm:$0xff]  }
 0x1ff   : > { %3780 = vmatmul.mubr.bf16.gmra.mrb[20].mxu1 %v10972_v2  ;;  %v10008_v2 = vld [vmem:[%s13112_s7 + $0x2b0] ss:$8 sps:$4 sm:$0xff]   ;;  %6479 = vmatprep.subr.bf16.mxu0 %v10010_v60  ;;  %v10046_v60 = vld [vmem:[%s13112_s7 + $0x2f4] ss:$8 sps:$4 sm:$0xff]  }
 0x200   : > { %4082 = vmatpush1.bf16.msra.mxu1 %v10005_v54  ;;  %3789 = vmatprep.mubr.bf16.mxu1 %v11732_v17  ;;  %v10022_v17 = vld [vmem:[%s13108_s3 + $0x7d4] ss:$8 sps:$4 sm:$0xff]  }
 0x201   : > { %4083 = vmatprep.subr.bf16.mxu1 %v10013_v59  ;;  %v10031_v54 = vld [vmem:[%s13108_s3 + $0x7f4] ss:$8 sps:$4 sm:$0xff]  }
 0x202   : > { %6480 = vmatpush1.bf16.msra.mxu0 %v10008_v2  ;;  %v13264_v59 = vld [vmem:[#allocation27_spill] sm:$0xff] }
 0x203   : > { %6481 = vmatprep.subr.bf16.mxu0 %v10019_v26  ;;  %v10044_v2 = vld [vmem:[%s13112_s7 + $0x2f0] ss:$8 sps:$4 sm:$0xff]   ;;  %v10032_v26 = vld [vmem:[%s13108_s3 + $0x800] ss:$8 sps:$4 sm:$0xff]  }
 0x204   : > { %4084 = vmatpush1.bf16.msra.mxu1 %v10011_v5  ;;  %v10034_v5 = vld [vmem:[%s13108_s3 + $0x804] ss:$8 sps:$4 sm:$0xff]  }
 0x205   : > { %4085 = vmatprep.subr.bf16.mxu1 %v10016_v27  ;;  %6278 = vmatmul.mubr.bf16.gmra.mrb[8].mxu0 %v13263_v46  ;;  %v10055_v27 = vld [vmem:[%s13112_s7 + $0x304] ss:$8 sps:$4 sm:$0xff]  }
 0x206   : > { %6287 = vmatprep.mubr.bf16.mxu0 %v13227_v18  ;;  %6482 = vmatpush1.bf16.msra.mxu0 %v10017_v10  ;;  %v10038_v10 = vld [vmem:[%s13108_s3 + $0x810] ss:$8 sps:$4 sm:$0xff]  }
 0x207   : > { %3790 = vmatmul.mubr.bf16.gmra.mrb[24].mxu1 %v11767_v19  ;;  %v10025_v19 = vld [vmem:[%s13108_s3 + $0x7e4] ss:$8 sps:$4 sm:$0xff]   ;;  %6483 = vmatprep.subr.bf16.mxu0 %v10028_v45  ;;  %v13268_v45 = vld [vmem:[#allocation10_spill] sm:$0xff] }
 0x208   : > { %4086 = vmatpush1.bf16.msra.mxu1 %v10014_v8  ;;  %3799 = vmatprep.mubr.bf16.mxu1 %v12457_v0  ;;  %v13266_v8 = vld [vmem:[#allocation9_spill] sm:$0xff] }
 0x209   : > { %4087 = vmatprep.subr.bf16.mxu1 %v10022_v17  ;;  %v10043_v17 = vld [vmem:[%s13108_s3 + $0x824] ss:$8 sps:$4 sm:$0xff]  }
 0x20a   : > { %6484 = vmatpush1.bf16.msra.mxu0 %v10026_v47  ;;  %v13270_v47 = vld [vmem:[#allocation29_spill] sm:$0xff] }
 0x20b   : > { %6485 = vmatprep.subr.bf16.mxu0 %v10037_v52  ;;  %v10047_v52 = vld [vmem:[%s13108_s3 + $0x830] ss:$8 sps:$4 sm:$0xff]  }
 0x20c   : > { %4088 = vmatpush1.bf16.msra.mxu1 %v10020_v15  ;;  %v10041_v15 = vld [vmem:[%s13108_s3 + $0x820] ss:$8 sps:$4 sm:$0xff]  }
 0x20d   : > { %4089 = vmatprep.subr.bf16.mxu1 %v10025_v19  ;;  %6288 = vmatmul.mubr.bf16.gmra.mrb[12].mxu0 %v13264_v59  ;;  %v13269_v19 = vld [vmem:[#allocation11_spill] sm:$0xff] }
 0x20e   : > { %6297 = vmatprep.mubr.bf16.mxu0 %v13227_v18  ;;  %6486 = vmatpush1.bf16.msra.mxu0 %v10035_v41  ;;  %v6118_v41 = vshll.u32 %v12368_v43, 16 }
 0x20f   : > { %3800 = vmatmul.mubr.bf16.gmra.mrb[28].mxu1 %v12480_v42  ;;  %6487 = vmatprep.subr.bf16.mxu0 %v10046_v60  ;;  %v12546_v60 = vsel %vm10576_vm2, %v12347_v61, 0  ;;  %v10056_v61 = vld [vmem:[%s13108_s3 + $0x850] ss:$8 sps:$4 sm:$0xff]  }
 0x210   : > { %4090 = vmatpush1.bf16.msra.mxu1 %v10023_v32  ;;  %4093 = vmatprep.mubr.bf16.mxu1 %v13265_v9  ;;  %v10052_v32 = vld [vmem:[%s13108_s3 + $0x844] ss:$8 sps:$4 sm:$0xff]   ;;  %v6116_v9 = vshrl.u32 %v12368_v43, 16 }
 0x211   : > { %4091 = vmatprep.subr.bf16.mxu1 %v10031_v54  ;;  %v13271_v54 = vld [vmem:[#allocation12_spill] sm:$0xff] }
 0x212   : > { %6488 = vmatpush1.bf16.msra.mxu0 %v10044_v2  ;;  %v6120_v2 = vrot.slane %v6118_v41, 1  ;;  %v13276_v41 = vld [vmem:[#allocation16_spill] sm:$0xff] }
 0x213   : > { %6715 = vmatprep.subr.bf16.mxu0 %v10055_v27  ;;  %v6123_v27 = vshll.u32 %v12546_v60, 16 }
 0x214   : > { %4092 = vmatpush1.bf16.msra.mxu1 %v10029_v55  ;;  %v10050_v55 = vld [vmem:[%s13108_s3 + $0x840] ss:$8 sps:$4 sm:$0xff]  }
 0x215   : > { %4411 = vmatprep.subr.bf16.mxu1 %v10034_v5  ;;  %6298 = vmatmul.mubr.bf16.gmra.mrb[16].mxu0 %v13267_v4  ;;  %v10058_v5 = vld [vmem:[%s13108_s3 + $0x854] ss:$8 sps:$4 sm:$0xff]  }
 0x216   : > { %6307 = vmatprep.mubr.bf16.mxu0 %v13227_v18 }
 0x217   : > { %4094 = vmatmul.mubr.bf16.vlgmr.msra.gmra.mrb[0].mxu1 %v13266_v8  ;;  %v10061_v8 = vld [vmem:[%s13108_s3 + $0x864] ss:$8 sps:$4 sm:$0xff]  }
 0x218   : > { %4412 = vmatpush1.bf16.msra.mxu1 %v10032_v26  ;;  %4103 = vmatprep.mubr.bf16.mxu1 %v13268_v45  ;;  %v13272_v26 = vld [vmem:[#allocation13_spill] sm:$0xff]  ;;  %v6125_v45 = vrot.slane %v6123_v27, 1 }
 0x219   : > { %4413 = vmatprep.subr.bf16.mxu1 %v10040_v11  ;;  %v13273_v11 = vld [vmem:[#allocation30_spill] sm:$0xff]  ;;  %v13277_v27 = vld [vmem:[#allocation17_spill] sm:$0xff] }
 0x21c   : > { %4414 = vmatpush1.bf16.msra.mxu1 %v10038_v10  ;;  %v13274_v10 = vld [vmem:[#allocation14_spill] sm:$0xff] }
 0x21d   : > { %4415 = vmatprep.subr.bf16.mxu1 %v10043_v17  ;;  %6308 = vmatmul.mubr.bf16.gmra.mrb[20].mxu0 %v13270_v47  ;;  %v6121_v17 = vor.u32 %v6120_v2, %v6116_v9  ;;  %v10064_v9 = vld [vmem:[%s13112_s7 + $0x314] ss:$8 sps:$4 sm:$0xff]  }
 0x21e   : > { %6317 = vmatprep.mubr.bf16.mxu0 %v13227_v18  ;;  %v10076_v2 = vld [vmem:[%s13108_s3 + $0x894] ss:$8 sps:$4 sm:$0xff]  }
 0x21f   : > { %4104 = vmatmul.mubr.bf16.gmra.mrb[4].mxu1 %v13269_v19  ;;  %v12573_v19 = vsel %vm1229_vm3, %v6121_v17, %v6125_v45  ;;  %v10073_v17 = vld [vmem:[%s13112_s7 + $0x324] ss:$8 sps:$4 sm:$0xff]   ;;  %v3857_v45 = vshll.u32 %v12457_v0, 16 }
 0x220   : > { %4416 = vmatpush1.bf16.msra.mxu1 %v10041_v15  ;;  %4113 = vmatprep.mubr.bf16.mxu1 %v13271_v54  ;;  %v10059_v15 = vld [vmem:[%s13108_s3 + $0x860] ss:$8 sps:$4 sm:$0xff]   ;;  %v10070_v54 = vld [vmem:[%s13108_s3 + $0x884] ss:$8 sps:$4 sm:$0xff]  }
 0x221   : > { %4417 = vmatprep.subr.bf16.mxu1 %v10049_v30  ;;  %v10067_v30 = vld [vmem:[%s13108_s3 + $0x874] ss:$8 sps:$4 sm:$0xff]  }
 0x224   : > { %4418 = vmatpush1.bf16.msra.mxu1 %v10047_v52  ;;  %v13275_v52 = vld [vmem:[#allocation15_spill] sm:$0xff] }
 0x225   : > { %4419 = vmatprep.subr.bf16.mxu1 %v10052_v32  ;;  %6318 = vmatmul.mubr.bf16.gmra.mrb[24].mxu0 %v13273_v11  ;;  %v10065_v32 = vld [vmem:[%s13108_s3 + $0x870] ss:$8 sps:$4 sm:$0xff]  }
 0x226   : > { %6327 = vmatprep.mubr.bf16.mxu0 %v13227_v18 }
 0x227   : > { %4114 = vmatmul.mubr.bf16.gmra.mrb[8].mxu1 %v13272_v26  ;;  %v13278_v26 = vld [vmem:[#allocation31_spill] sm:$0xff] }
 0x228   : > { %4420 = vmatpush1.bf16.msra.mxu1 %v10050_v55  ;;  %4123 = vmatprep.mubr.bf16.mxu1 %v13274_v10  ;;  %v10068_v55 = vld [vmem:[%s13108_s3 + $0x880] ss:$8 sps:$4 sm:$0xff]   ;;  %v10079_v10 = vld [vmem:[%s13108_s3 + $0x8a4] ss:$8 sps:$4 sm:$0xff]  }
 0x229   : > { %4421 = vmatprep.subr.bf16.mxu1 %v10058_v5  ;;  %v10053_v5 = vld [vmem:[%s13112_s7 + $0x300] ss:$8 sps:$4 sm:$0xff]  }
 0x22c   : > { %4422 = vmatpush1.bf16.msra.mxu1 %v10056_v61  ;;  %v10074_v61 = vld [vmem:[%s13108_s3 + $0x890] ss:$8 sps:$4 sm:$0xff]  }
 0x22d   : > { %4423 = vmatprep.subr.bf16.mxu1 %v10061_v8  ;;  %6328 = vmatmul.mubr.bf16.gmra.mrb[28].mxu0 %v12573_v19  ;;  %v10062_v8 = vld [vmem:[%s13112_s7 + $0x310] ss:$8 sps:$4 sm:$0xff]  }
 0x22e   : > { %6505 = vmatprep.mubr.bf16.mxu0 %v13227_v18 }
 0x22f   : > { %4124 = vmatmul.mubr.bf16.gmra.mrb[12].mxu1 %v13275_v52  ;;  %v12620_v52 = vsel %vm10576_vm2, %v12422_v16, 0 }
 0x230   : > { %4424 = vmatpush1.bf16.msra.mxu1 %v10059_v15  ;;  %4133 = vmatprep.mubr.bf16.mxu1 %v13276_v41  ;;  %v13279_v15 = vld [vmem:[#allocation18_spill] sm:$0xff]  ;;  %v3862_v16 = vshll.u32 %v12620_v52, 16 }
 0x231   : > { %4425 = vmatprep.subr.bf16.mxu1 %v10067_v30  ;;  %v10077_v30 = vld [vmem:[%s13108_s3 + $0x8a0] ss:$8 sps:$4 sm:$0xff]   ;;  %v10085_v41 = vld [vmem:[%s13108_s3 + $0x8b4] ss:$8 sps:$4 sm:$0xff]  }
 0x234   : > { %4426 = vmatpush1.bf16.msra.mxu1 %v10065_v32  ;;  %v10071_v32 = vld [vmem:[%s13112_s7 + $0x320] ss:$8 sps:$4 sm:$0xff]  }
 0x235   : > { %4427 = vmatprep.subr.bf16.mxu1 %v10070_v54  ;;  %6506 = vmatmul.mubr.bf16.vlgmr.msra.gmra.mrb[0].mxu0 %v13278_v26  ;;  %v10082_v54 = vld [vmem:[%s13112_s7 + $0x334] ss:$8 sps:$4 sm:$0xff]   ;;  %v12649_v26 = vsel %vm10576_vm2, %v12445_v39, 0 }
 0x236   : > { %6716 = vmatpush1.bf16.msra.mxu0 %v10053_v5  ;;  %6515 = vmatprep.mubr.bf16.mxu0 %v13227_v18  ;;  %v3859_v5 = vrot.slane %v3857_v45, 1  ;;  %v3850_v39 = vshll.u32 %v12649_v26, 16 }
 0x237   : > { %4134 = vmatmul.mubr.bf16.gmra.mrb[16].mxu1 %v13277_v27  ;;  %6717 = vmatprep.subr.bf16.mxu0 %v10064_v9  ;;  %v3845_v9 = vshll.u32 %v12480_v42, 16  ;;  %v10080_v27 = vld [vmem:[%s13112_s7 + $0x330] ss:$8 sps:$4 sm:$0xff]  }
 0x238   : > { %4428 = vmatpush1.bf16.msra.mxu1 %v10068_v55  ;;  %4143 = vmatprep.mubr.bf16.mxu1 %v13279_v15  ;;  %v3855_v55 = vshrl.u32 %v12457_v0, 16  ;;  %v10086_v15 = vld [vmem:[%s13108_s3 + $0x8c0] ss:$8 sps:$4 sm:$0xff]  }
 0x239   : > { %4429 = vmatprep.subr.bf16.mxu1 %v10076_v2  ;;  %v10083_v2 = vld [vmem:[%s13108_s3 + $0x8b0] ss:$8 sps:$4 sm:$0xff]   ;;  %v3847_v45 = vrot.slane %v3845_v9, 1  ;;  %v10106_v9 = vld [vmem:[%s13112_s7 + $0x364] ss:$8 sps:$4 sm:$0xff]  }
 0x23a   : > { %6718 = vmatpush1.bf16.msra.mxu0 %v10062_v8  ;;  %v3860_v8 = vor.u32 %v3859_v5, %v3855_v55  ;;  %v3852_v5 = vrot.slane %v3850_v39, 1 }
 0x23b   : > { %6719 = vmatprep.subr.bf16.mxu0 %v10073_v17  ;;  %v3843_v17 = vshrl.u32 %v12480_v42, 16 }
 0x23c   : > { %4430 = vmatpush1.bf16.msra.mxu1 %v10074_v61  ;;  %v10091_v61 = vld [vmem:[%s13112_s7 + $0x344] ss:$8 sps:$4 sm:$0xff]  }
 0x23d   : > { %4431 = vmatprep.subr.bf16.mxu1 %v10079_v10  ;;  %6516 = vmatmul.mubr.bf16.gmra.mrb[4].mxu0 %v12021_v57  ;;  %v3864_v10 = vrot.slane %v3862_v16, 1  ;;  %v3848_v55 = vor.u32 %v3847_v45, %v3843_v17  ;;  %v10098_v16 = vld [vmem:[%s13112_s7 + $0x350] ss:$8 sps:$4 sm:$0xff]   ;;  %v10112_v45 = vld [vmem:[%s13112_s7 + $0x384] ss:$8 sps:$4 sm:$0xff]  }
 0x23e   : > { %6525 = vmatprep.mubr.bf16.mxu0 %v13227_v18  ;;  %6720 = vmatpush1.bf16.msra.mxu0 %v10071_v32  ;;  %v10107_v17 = vld [vmem:[%s13112_s7 + $0x370] ss:$8 sps:$4 sm:$0xff]  }
 0x23f   : > { %4144 = vmatmul.mubr.bf16.gmra.mrb[20].mxu1 %v13253_v49  ;;  %v10088_v49 = vld [vmem:[%s13108_s3 + $0x8c4] ss:$8 sps:$4 sm:$0xff]   ;;  %6721 = vmatprep.subr.bf16.mxu0 %v10082_v54  ;;  %v3865_v32 = vsel %vm1229_vm3, %v3860_v8, %v3864_v10  ;;  %v10100_v54 = vld [vmem:[%s13112_s7 + $0x354] ss:$8 sps:$4 sm:$0xff]   ;;  %v10101_v10 = vld [vmem:[%s13108_s3 + $0x8f0] ss:$8 sps:$4 sm:$0xff]  }
 0x240   : > { %4432 = vmatpush1.bf16.msra.mxu1 %v10077_v30  ;;  %4153 = vmatprep.mubr.bf16.mxu1 %v12025_v20  ;;  %v10089_v30 = vld [vmem:[%s13112_s7 + $0x340] ss:$8 sps:$4 sm:$0xff]   ;;  %v10094_v20 = vld [vmem:[%s13108_s3 + $0x8d4] ss:$8 sps:$4 sm:$0xff]  }
 0x241   : > { %4433 = vmatprep.subr.bf16.mxu1 %v10085_v41  ;;  %v10092_v41 = vld [vmem:[%s13108_s3 + $0x8d0] ss:$8 sps:$4 sm:$0xff]   ;;  %v10109_v8 = vld [vmem:[%s13112_s7 + $0x374] ss:$8 sps:$4 sm:$0xff]  }
 0x242   : > { %6722 = vmatpush1.bf16.msra.mxu0 %v10080_v27  ;;  %v10095_v27 = vld [vmem:[%s13108_s3 + $0x8e0] ss:$8 sps:$4 sm:$0xff]  }
 0x243   : > { %6723 = vmatprep.subr.bf16.mxu0 %v10091_v61  ;;  %v10104_v61 = vld [vmem:[%s13112_s7 + $0x360] ss:$8 sps:$4 sm:$0xff]  }
 0x244   : > { %4434 = vmatpush1.bf16.msra.mxu1 %v10083_v2  ;;  %v3853_v2 = vsel %vm1229_vm3, %v3848_v55, %v3852_v5  ;;  %v4211_v5 = vrot.slane %v12649_v26, 1 }
 0x245   : > { %4435 = vmatprep.subr.bf16.mxu1 %v10088_v49  ;;  %6526 = vmatmul.mubr.bf16.gmra.mrb[8].mxu0 %v12062_v53  ;;  %v10103_v49 = vld [vmem:[%s13108_s3 + $0x8f4] ss:$8 sps:$4 sm:$0xff]  }
 0x246   : > { %6535 = vmatprep.mubr.bf16.mxu0 %v13227_v18  ;;  %6724 = vmatpush1.bf16.msra.mxu0 %v10089_v30 }
 0x247   : > { %4154 = vmatmul.mubr.bf16.gmra.mrb[24].mxu1 %v12049_v56  ;;  %v10097_v56 = vld [vmem:[%s13108_s3 + $0x8e4] ss:$8 sps:$4 sm:$0xff]   ;;  %6725 = vmatprep.subr.bf16.mxu0 %v10100_v54  ;;  %v4213_v54 = vrot.slane %v12457_v0, 1  ;;  %v10127_v0 = vld [vmem:[%s13112_s7 + $0x3d4] ss:$8 sps:$4 sm:$0xff]  }
 0x248   : > { %4436 = vmatpush1.bf16.msra.mxu1 %v10086_v15  ;;  %4163 = vmatprep.mubr.bf16.mxu1 %v3865_v32  ;;  %v10119_v32 = vld [vmem:[%s13112_s7 + $0x3b0] ss:$8 sps:$4 sm:$0xff]  }
 0x249   : > { %4437 = vmatprep.subr.bf16.mxu1 %v10094_v20 }
 0x24a   : > { %6726 = vmatpush1.bf16.msra.mxu0 %v10098_v16  ;;  %v10130_v16 = vld [vmem:[%s13112_s7 + $0x3e4] ss:$8 sps:$4 sm:$0xff]  }
 0x24b   : > { %6727 = vmatprep.subr.bf16.mxu0 %v10106_v9 }
 0x24c   : > { %4438 = vmatpush1.bf16.msra.mxu1 %v10092_v41  ;;  %v4214_v41 = vrot.slane %v12620_v52, 1  ;;  %v4210_v52 = vrot.slane %v12480_v42, 1  ;;  %v10133_v42 = vld [vmem:[%s13112_s7 + $0x3f4] ss:$8 sps:$4 sm:$0xff]  }
 0x24d   : > { %4439 = vmatprep.subr.bf16.mxu1 %v10097_v56  ;;  %6536 = vmatmul.mubr.bf16.gmra.mrb[12].mxu0 %v12095_v1  ;;  %v10125_v56 = vld [vmem:[%s13112_s7 + $0x3d0] ss:$8 sps:$4 sm:$0xff]  }
 0x24e   : > { %6545 = vmatprep.mubr.bf16.mxu0 %v13227_v18  ;;  %6728 = vmatpush1.bf16.msra.mxu0 %v10104_v61 }
 0x24f   : > { %4164 = vmatmul.mubr.bf16.gmra.mrb[28].mxu1 %v3853_v2  ;;  %6729 = vmatprep.subr.bf16.mxu0 %v10109_v8  ;;  %v10131_v2 = vld [vmem:[%s13112_s7 + $0x3f0] ss:$8 sps:$4 sm:$0xff]   ;;  %v13280_v8 = vld [vmem:[#allocation32_spill] sm:$0xff] }
 0x250   : > { %4440 = vmatpush1.bf16.msra.mxu1 %v10095_v27  ;;  %4443 = vmatprep.mubr.bf16.mxu1 %v13255_v28  ;;  %v4666_v28 = vpop.xlane.xlu0 %4665  ;;  %v10136_v27 = vld [vmem:[%s13112_s7 + $0x404] ss:$8 sps:$4 sm:$0xff]  }
 0x251   : > { %4441 = vmatprep.subr.bf16.mxu1 %v10103_v49 }
 0x252   : > { %6730 = vmatpush1.bf16.msra.mxu0 %v10107_v17 }
 0x253   : > { %6970 = vmatprep.subr.bf16.mxu0 %v10112_v45 }
 0x254   : > { %4442 = vmatpush1.bf16.msra.mxu1 %v10101_v10 }
 0x255   : > { %6546 = vmatmul.mubr.bf16.gmra.mrb[16].mxu0 %v12122_v48 }
 0x256   : > { %6555 = vmatprep.mubr.bf16.mxu0 %v13227_v18 }
 0x257   : > { %4444 = vmatmul.mubr.bf16.vlgmr.msra.gmra.mrb[0].mxu1 %v11258_v14  ;;  %v4668_v14 = vpop.xlane.xlu1 %4667 }
 0x258   : > { %4453 = vmatprep.mubr.bf16.mxu1 %v13256_v25  ;;  %v6372_v25 = vrot.slane %v12368_v43, 1  ;;  %v4689_v15 = vadd.f32 %v13257_v22, %v4668_v14 }
 0x25d   : > { %6556 = vmatmul.mubr.bf16.gmra.mrb[20].mxu0 %v12143_v58 }
 0x25e   : > { %6565 = vmatprep.mubr.bf16.mxu0 %v13227_v18 }
 0x25f   : > { %4454 = vmatmul.mubr.bf16.gmra.mrb[4].mxu1 %v11292_v50  ;;  %v6373_v50 = vrot.slane %v12546_v60, 1  ;;  %v10110_v60 = vld [vmem:[%s13112_s7 + $0x380] ss:$8 sps:$4 sm:$0xff]  }
 0x260   : > { %4463 = vmatprep.mubr.bf16.mxu1 %v11299_v23  ;;  %v4688_v23 = vadd.f32 %v13257_v22, %v4666_v28  ;;  %v10115_v22 = vld [vmem:[%s13112_s7 + $0x394] ss:$8 sps:$4 sm:$0xff]  }
 0x261   : > { %v12727_v39 = vsel %vm2049_vm4, %v6372_v25, %v6373_v50  ;;  %v10139_v50 = vld [vmem:[%s13112_s7 + $0x414] ss:$8 sps:$4 sm:$0xff]  }
 0x265   : > { %6566 = vmatmul.mubr.bf16.gmra.mrb[24].mxu0 %v12166_v63 }
 0x266   : > { %6575 = vmatprep.mubr.bf16.mxu0 %v13227_v18 }
 0x267   : > { %4464 = vmatmul.mubr.bf16.gmra.mrb[8].mxu1 %v13258_v12  ;;  %v8537_v12 = vmul.f32 -1.442695, %v4689_v15  ;;  %v10142_v15 = vld [vmem:[%s13112_s7 + $0x424] ss:$8 sps:$4 sm:$0xff]  }
 0x268   : > { %4473 = vmatprep.mubr.bf16.mxu1 %v13259_v40  ;;  %v8536_v40 = vmul.f32 -1.442695, %v4688_v23  ;;  %v10140_v23 = vld [vmem:[%s13112_s7 + $0x420] ss:$8 sps:$4 sm:$0xff]  }
 0x269   : > { %10230 = vpow2.f32 %v8537_v12  ;;  %v10143_v12 = vld [vmem:[%s13112_s7 + $0x430] ss:$8 sps:$4 sm:$0xff]  }
 0x26a   : > { %10232 = vpow2.f32 %v8536_v40  ;;  %v10148_v40 = vld [vmem:[%s13112_s7 + $0x444] ss:$8 sps:$4 sm:$0xff]  }
 0x26d   : > { %6576 = vmatmul.mubr.bf16.gmra.mrb[28].mxu0 %v12727_v39 }
 0x26e   : > { %6747 = vmatprep.mubr.bf16.mxu0 %v13227_v18 }
 0x26f   : > { %4474 = vmatmul.mubr.bf16.gmra.mrb[12].mxu1 %v11391_v21  ;;  %v10113_v21 = vld [vmem:[%s13112_s7 + $0x390] ss:$8 sps:$4 sm:$0xff]  }
 0x270   : > { %4483 = vmatprep.mubr.bf16.mxu1 %v11419_v62  ;;  %v10118_v62 = vld [vmem:[%s13112_s7 + $0x3a4] ss:$8 sps:$4 sm:$0xff]  }
 0x275   : > { %6748 = vmatmul.mubr.bf16.vlgmr.msra.gmra.mrb[0].mxu0 %v11466_v33  ;;  %v10231_v33 = vpop.eup %10230 }
 0x276   : > { %6971 = vmatpush1.bf16.msra.mxu0 %v10110_v60  ;;  %6757 = vmatprep.mubr.bf16.mxu0 %v13227_v18  ;;  %v10233_v30 = vpop.eup %10232  ;;  %v4769_v20 = vadd.f32 1.0, %v10231_v33  ;;  %v10146_v60 = vld [vmem:[%s13112_s7 + $0x440] ss:$8 sps:$4 sm:$0xff]  }
 0x277   : > { %4484 = vmatmul.mubr.bf16.gmra.mrb[16].mxu1 %v11450_v6  ;;  %6972 = vmatprep.subr.bf16.mxu0 %v10115_v22  ;;  %v10116_v6 = vld [vmem:[%s13112_s7 + $0x3a0] ss:$8 sps:$4 sm:$0xff]   ;;  %v4768_v55 = vadd.f32 1.0, %v10233_v30  ;;  %v10149_v22 = vld [vmem:[%s13112_s7 + $0x450] ss:$8 sps:$4 sm:$0xff]  }
 0x278   : > { %4493 = vmatprep.mubr.bf16.mxu1 %v11460_v36  ;;  %v10121_v36 = vld [vmem:[%s13112_s7 + $0x3b4] ss:$8 sps:$4 sm:$0xff]   ;;  %10234 = vrcp.f32 %v4769_v20 }
 0x279   : > { %10236 = vrcp.f32 %v4768_v55 }
 0x27a   : > { %6973 = vmatpush1.bf16.msra.mxu0 %v10113_v21  ;;  %v10154_v21 = vld [vmem:[%s13112_s7 + $0x464] ss:$8 sps:$4 sm:$0xff]  }
 0x27b   : > { %6974 = vmatprep.subr.bf16.mxu0 %v10118_v62  ;;  %v10152_v62 = vld [vmem:[%s13112_s7 + $0x460] ss:$8 sps:$4 sm:$0xff]  }
 0x27d   : > { %6758 = vmatmul.mubr.bf16.gmra.mrb[4].mxu0 %v11509_v51  ;;  %v10122_v51 = vld [vmem:[%s13112_s7 + $0x3c0] ss:$8 sps:$4 sm:$0xff]  }
 0x27e   : > { %6767 = vmatprep.mubr.bf16.mxu0 %v13227_v18  ;;  %6975 = vmatpush1.bf16.msra.mxu0 %v10116_v6  ;;  %v10155_v6 = vld [vmem:[%s13112_s7 + $0x470] ss:$8 sps:$4 sm:$0xff]  }
 0x27f   : > { %4494 = vmatmul.mubr.bf16.gmra.mrb[20].mxu1 %v11494_v38  ;;  %6976 = vmatprep.subr.bf16.mxu0 %v10121_v36  ;;  %v10124_v38 = vld [vmem:[%s13112_s7 + $0x3c4] ss:$8 sps:$4 sm:$0xff]  }
 0x280   : > { %4503 = vmatprep.mubr.bf16.mxu1 %v12247_v35  ;;  %v4215_v35 = vsel %vm2049_vm4, %v4213_v54, %v4214_v41 }
 0x282   : > { %6977 = vmatpush1.bf16.msra.mxu0 %v10119_v32  ;;  %v10235_v26 = vpop.eup %10234 }
 0x283   : > { %6978 = vmatprep.subr.bf16.mxu0 %v10124_v38  ;;  %v10237_v9 = vpop.eup %10236  ;;  %v4835_v61 = vadd.f32 %v12298_v29, %v10235_v26 }
 0x284   : > { %v4834_v49 = vadd.f32 %v12298_v29, %v10237_v9 }
 0x285   : > { %6768 = vmatmul.mubr.bf16.gmra.mrb[8].mxu0 %v11547_v37  ;;  %v10128_v37 = vld [vmem:[%s13112_s7 + $0x3e0] ss:$8 sps:$4 sm:$0xff]   ;;  %v4855_v10 = vmul.f32 %v4835_v61, %v13280_v8 }
 0x286   : > { %6777 = vmatprep.mubr.bf16.mxu0 %v13227_v18  ;;  %6979 = vmatpush1.bf16.msra.mxu0 %v10122_v51 }
 0x287   : > { %4504 = vmatmul.mubr.bf16.gmra.mrb[24].mxu1 %v12270_v13  ;;  %6980 = vmatprep.subr.bf16.mxu0 %v10127_v0  ;;  %v4212_v13 = vsel %vm2049_vm4, %v4210_v52, %v4211_v5  ;;  %v4875_v45 = vmax.f32 %v4855_v10, 0.0 }
 0x288   : > { %4513 = vmatprep.mubr.bf16.mxu1 %v4215_v35 }
 0x28a   : > { %6981 = vmatpush1.bf16.msra.mxu0 %v10125_v56 }
 0x28b   : > { %6982 = vmatprep.subr.bf16.mxu0 %v10130_v16 }
 0x28d   : > { %6778 = vmatmul.mubr.bf16.gmra.mrb[12].mxu0 %v11572_v34  ;;  %v4854_v34 = vmul.f32 %v4834_v49, %v11996_v24 }
 0x28e   : > { %6787 = vmatprep.mubr.bf16.mxu0 %v13227_v18  ;;  %6983 = vmatpush1.bf16.msra.mxu0 %v10128_v37 }
 0x28f   : > { %4514 = vmatmul.mubr.bf16.gmra.mrb[28].mxu1 %v4212_v13  ;;  %6984 = vmatprep.subr.bf16.mxu0 %v10133_v42  ;;  %v4874_v17 = vmax.f32 %v4854_v34, 0.0 }
 0x291   : > { %v4885_v14 = vpack.c.bf16 %v4875_v45, %v4874_v17 }
 0x292   : > { %6985 = vmatpush1.bf16.msra.mxu0 %v10131_v2 }
 0x293   : > { %7218 = vmatprep.subr.bf16.mxu0 %v10136_v27  ;;  %v4950_v28 = vshrl.u32 %v4885_v14, 16  ;;  %v4953_v29 = vshll.u32 %v4885_v14, 16  ;;  %v7365_v14 = vlaneseq }
 0x295   : > { %6788 = vmatmul.mubr.bf16.gmra.mrb[16].mxu0 %v11595_v7  ;;  %v4952_v25 = vrot.slane %v4950_v28, 7  ;;  %v12950_v28 = vshrl.u32 %v7365_v14, 7  ;;  %vm7625_vm5 = vcmp.lt.s32.totalorder %v7365_v14, 256 }
 0x296   : > { %6797 = vmatprep.mubr.bf16.mxu0 %v13227_v18 }
 0x297   : > { %v4955_v24 = vor.u32 %v4953_v29, %v4952_v25  ;;  %v7363_v29 = vld [vmem:[%s13281_s8] sm:$0x3] }
 0x299   : > { %v12812_v7 = vsel %vm10576_vm2, 0, %v4955_v24  ;;  %v7371_v24 = vsub.s32 1, %v12950_v28 }
 0x29a   : > { %v6863_v33 = vshll.u32 %v12812_v7, 16  ;;  %v6861_v36 = vshrl.u32 %v12812_v7, 16 }
 0x29c   : > { %v6865_v30 = vrot.slane %v6863_v33, 1 }
 0x29d   : > { %6798 = vmatmul.mubr.bf16.gmra.mrb[20].mxu0 %v11619_v31  ;;  %v10134_v31 = vld [vmem:[%s13112_s7 + $0x400] ss:$8 sps:$4 sm:$0xff]  }
 0x29e   : > { %6807 = vmatprep.mubr.bf16.mxu0 %v13227_v18 }
 0x2a5   : > { %6808 = vmatmul.mubr.bf16.gmra.mrb[24].mxu0 %v12368_v43  ;;  %v10137_v43 = vld [vmem:[%s13112_s7 + $0x410] ss:$8 sps:$4 sm:$0xff]  }
 0x2a6   : > { %6817 = vmatprep.mubr.bf16.mxu0 %v13227_v18 }
 0x2ad   : > { %6818 = vmatmul.mubr.bf16.gmra.mrb[28].mxu0 %v12812_v7 }
 0x2ae   : > { %7002 = vmatprep.mubr.bf16.mxu0 %v13227_v18 }
 0x2b5   : > { %7003 = vmatmul.mubr.bf16.vlgmr.msra.gmra.mrb[0].mxu0 %v11735_v44  ;;  %v10145_v44 = vld [vmem:[%s13112_s7 + $0x434] ss:$8 sps:$4 sm:$0xff]  }
 0x2b6   : > { %7219 = vmatpush1.bf16.msra.mxu0 %v10134_v31  ;;  %7012 = vmatprep.mubr.bf16.mxu0 %v13227_v18 }
 0x2b7   : > { %7220 = vmatprep.subr.bf16.mxu0 %v10139_v50 }
 0x2ba   : > { %7221 = vmatpush1.bf16.msra.mxu0 %v10137_v43  ;;  %v12962_v43 = vrot.slane %v7363_v29, %v7371_v24 }
 0x2bb   : > { %7222 = vmatprep.subr.bf16.mxu0 %v10142_v15 }
 0x2bd   : > { %7013 = vmatmul.mubr.bf16.gmra.mrb[4].mxu0 %v13263_v46  ;;  %v10151_v46 = vld [vmem:[%s13112_s7 + $0x454] ss:$8 sps:$4 sm:$0xff]  }
 0x2be   : > { %7022 = vmatprep.mubr.bf16.mxu0 %v13227_v18  ;;  %7223 = vmatpush1.bf16.msra.mxu0 %v10140_v23 }
 0x2bf   : > { %7224 = vmatprep.subr.bf16.mxu0 %v10145_v44 }
 0x2c2   : > { %7225 = vmatpush1.bf16.msra.mxu0 %v10143_v12 }
 0x2c3   : > { %7226 = vmatprep.subr.bf16.mxu0 %v10148_v40 }
 0x2c5   : > { %7023 = vmatmul.mubr.bf16.gmra.mrb[8].mxu0 %v13264_v59  ;;  %v10157_v59 = vld [vmem:[%s13112_s7 + $0x474] ss:$8 sps:$4 sm:$0xff]  }
 0x2c6   : > { %7032 = vmatprep.mubr.bf16.mxu0 %v13227_v18  ;;  %7227 = vmatpush1.bf16.msra.mxu0 %v10146_v60 }
 0x2c7   : > { %7228 = vmatprep.subr.bf16.mxu0 %v10151_v46 }
 0x2ca   : > { %7229 = vmatpush1.bf16.msra.mxu0 %v10149_v22 }
 0x2cb   : > { %7230 = vmatprep.subr.bf16.mxu0 %v10154_v21 }
 0x2cd   : > { %7033 = vmatmul.mubr.bf16.gmra.mrb[12].mxu0 %v13267_v4  ;;  %v4995_v4 = vsel %vm10576_vm2, %v4952_v25, 0  ;;  %v7367_v25 = vsub.s32 0, %v12950_v28 }
 0x2ce   : > { %7042 = vmatprep.mubr.bf16.mxu0 %v13227_v18  ;;  %7231 = vmatpush1.bf16.msra.mxu0 %v10152_v62  ;;  %v6868_v20 = vshll.u32 %v4995_v4, 16 }
 0x2cf   : > { %7232 = vmatprep.subr.bf16.mxu0 %v10157_v59  ;;  %v12960_v31 = vrot.slane %v7363_v29, %v7367_v25 }
 0x2d0   : > { %v6870_v32 = vrot.slane %v6868_v20, 1 }
 0x2d2   : > { %7233 = vmatpush1.bf16.msra.mxu0 %v10155_v6 }
 0x2d5   : > { %7043 = vmatmul.mubr.bf16.gmra.mrb[16].mxu0 %v13270_v47  ;;  %v6866_v47 = vor.u32 %v6865_v30, %v6861_v36 }
 0x2d6   : > { %7052 = vmatprep.mubr.bf16.mxu0 %v13227_v18 }
 0x2d7   : > { %v6871_v54 = vsel %vm1229_vm3, %v6866_v47, %v6870_v32 }
 0x2dd   : > { %7053 = vmatmul.mubr.bf16.gmra.mrb[20].mxu0 %v13273_v11 }
 0x2de   : > { %7062 = vmatprep.mubr.bf16.mxu0 %v13227_v18 }
 0x2e5   : > { %7063 = vmatmul.mubr.bf16.gmra.mrb[24].mxu0 %v12573_v19 }
 0x2e6   : > { %7072 = vmatprep.mubr.bf16.mxu0 %v13227_v18 }
 0x2ed   : > { %7073 = vmatmul.mubr.bf16.gmra.mrb[28].mxu0 %v6871_v54 }
 0x2ee   : > { %7250 = vmatprep.mubr.bf16.mxu0 %v13227_v18 }
 0x2f5   : > { %7251 = vmatmul.mubr.bf16.vlgmr.msra.gmra.mrb[0].mxu0 %v12021_v57  ;;  %v7117_v57 = vrot.slane %v12812_v7, 1  ;;  %v7407_v7 = vld [vmem:[%s13282_s17] sm:$0x3] }
 0x2f6   : > { %7260 = vmatprep.mubr.bf16.mxu0 %v13227_v18  ;;  %v12964_v23 = vrot.slane %v7407_v7, %v7367_v25  ;;  %v12966_v40 = vrot.slane %v7407_v7, %v7371_v24 }
 0x2fd   : > { %7261 = vmatmul.mubr.bf16.gmra.mrb[4].mxu0 %v12062_v53  ;;  %v7118_v53 = vrot.slane %v4995_v4, 1 }
 0x2fe   : > { %7270 = vmatprep.mubr.bf16.mxu0 %v13227_v18 }
 0x2ff   : > { %v7119_v19 = vsel %vm2049_vm4, %v7117_v57, %v7118_v53 }
 0x305   : > { %7271 = vmatmul.mubr.bf16.gmra.mrb[8].mxu0 %v12095_v1 }
 0x306   : > { %7280 = vmatprep.mubr.bf16.mxu0 %v13227_v18 }
 0x30d   : > { %7281 = vmatmul.mubr.bf16.gmra.mrb[12].mxu0 %v12122_v48 }
 0x30e   : > { %7290 = vmatprep.mubr.bf16.mxu0 %v13227_v18 }
 0x315   : > { %7291 = vmatmul.mubr.bf16.gmra.mrb[16].mxu0 %v12143_v58 }
 0x316   : > { %7300 = vmatprep.mubr.bf16.mxu0 %v13227_v18 }
 0x31d   : > { %7301 = vmatmul.mubr.bf16.gmra.mrb[20].mxu0 %v12166_v63 }
 0x31e   : > { %7310 = vmatprep.mubr.bf16.mxu0 %v13227_v18 }
 0x325   : > { %7311 = vmatmul.mubr.bf16.gmra.mrb[24].mxu0 %v12727_v39 }
 0x326   : > { %7320 = vmatprep.mubr.bf16.mxu0 %v13227_v18 }
 0x32a   : > { %v4445_v3 = vpop.f32.mrb[0].mxu1 }
 0x32b   : > { %v4447_v1 = vpop.f32.mrb[1].mxu1 }
 0x32c   : > { %v4449_v48 = vpop.f32.mrb[2].mxu1 }
 0x32d   : > { %v4451_v11 = vpop.f32.mrb[3].mxu1  ;;  %7321 = vmatmul.mubr.bf16.gmra.mrb[28].mxu0 %v7119_v19 }
 0x332   : > { %v4455_v58 = vpop.f32.mrb[4].mxu1 }
 0x333   : > { %v4457_v41 = vpop.f32.mrb[5].mxu1 }
 0x334   : > { %v12897_v55 = vpop.f32.mrb[6].mxu1 }
 0x335   : > { %v12899_v63 = vpop.f32.mrb[7].mxu1 }
 0x33a   : > { %v12901_v38 = vpop.f32.mrb[8].mxu1 }
 0x33b   : > { %v12903_v39 = vpop.f32.mrb[9].mxu1 }
 0x33c   : > { %v12905_v18 = vpop.f32.mrb[10].mxu1 }
 0x33d   : > { %v12907_v51 = vpop.f32.mrb[11].mxu1 }
 0x342   : > { %v12909_v35 = vpop.f32.mrb[12].mxu1 }
 0x343   : > { %v12911_v0 = vpop.f32.mrb[13].mxu1 }
 0x344   : > { %v12913_v52 = vpop.f32.mrb[14].mxu1 }
 0x345   : > { %v12915_v5 = vpop.f32.mrb[15].mxu1 }
 0x34a   : > { %v12917_v56 = vpop.f32.mrb[16].mxu1 }
 0x34b   : > { %v12919_v16 = vpop.f32.mrb[17].mxu1 }
 0x34c   : > { %v12921_v13 = vpop.f32.mrb[18].mxu1 }
 0x34d   : > { %v12923_v37 = vpop.f32.mrb[19].mxu1 }
 0x352   : > { %v12925_v42 = vpop.f32.mrb[20].mxu1 }
 0x353   : > { %v12927_v26 = vpop.f32.mrb[21].mxu1 }
 0x354   : > { %v12929_v9 = vpop.f32.mrb[22].mxu1 }
 0x355   : > { %v12931_v2 = vpop.f32.mrb[23].mxu1 }
 0x35a   : > { %v12933_v27 = vpop.f32.mrb[24].mxu1 }
 0x35b   : > { %v12935_v49 = vpop.f32.mrb[25].mxu1 }
 0x35c   : > { %v12937_v61 = vpop.f32.mrb[26].mxu1 }
 0x35d   : > { %v12939_v34 = vpop.f32.mrb[27].mxu1 }
 0x362   : > { %v12941_v8 = vpop.f32.mrb[28].mxu1 }
 0x363   : > { %v12943_v10 = vpop.f32.mrb[29].mxu1 }
 0x364   : > { %v12945_v17 = vpop.f32.mrb[30].mxu1 }
 0x365   : > { %v12947_v45 = vpop.f32.mrb[31].mxu1 }
 0x3c8   : > { %v7252_v50 = vpop.f32.mrb[0].mxu0 }
 0x3c9   : > { %v8900_v15 = vadd.f32 %v7252_v50, %v4445_v3  ;;  %v7254_v44 = vpop.f32.mrb[1].mxu0 }
 0x3ca   : > { %v8901_v12 = vadd.f32 %v7254_v44, %v4447_v1  ;;  %v7256_v60 = vpop.f32.mrb[2].mxu0 }
 0x3cb   : > { %v7375_v46 = vmul.f32 %v8900_v15, %v12960_v31  ;;  %v8902_v22 = vadd.f32 %v7256_v60, %v4449_v48  ;;  %v7258_v21 = vpop.f32.mrb[3].mxu0 }
 0x3cc   : > { %v7376_v62 = vmul.f32 %v8901_v12, %v12962_v43  ;;  %v8903_v59 = vadd.f32 %v7258_v21, %v4451_v11 }
 0x3cd   : > { %v7419_v6 = vadd.f32 %v12964_v23, %v7375_v46  ;;  %v7377_v33 = vmul.f32 %v8902_v22, %v12960_v31 }
 0x3ce   : > { %v7420_v4 = vadd.f32 %v12966_v40, %v7376_v62  ;;  %v7378_v36 = vmul.f32 %v8903_v59, %v12962_v43 }
 0x3cf   : > { %v7421_v30 = vadd.f32 %v12964_v23, %v7377_v33 }
 0x3d0   : > { %v8845_v20 = vpack.c.bf16 %v7420_v4, %v7419_v6  ;;  %v7422_v47 = vadd.f32 %v12966_v40, %v7378_v36  ;;  %v7262_v32 = vpop.f32.mrb[4].mxu0 }
 0x3d1   : > { %v7563_v54 = vadd.f32 %v7421_v30, %v7419_v6  ;;  %v8904_v3 = vadd.f32 %v7262_v32, %v4455_v58  ;;  %v7264_v57 = vpop.f32.mrb[5].mxu0 }
 0x3d2   : > { %7547 = vst [vmem:[%s12979_s29] sm:$0xff] %v8845_v20  ;;  %v8846_v53 = vpack.c.bf16 %v7422_v47, %v7421_v30  ;;  %v7584_v1 = vadd.f32 %v7422_v47, %v7420_v4  ;;  %v8905_v48 = vadd.f32 %v7264_v57, %v4457_v41  ;;  %v7266_v11 = vpop.f32.mrb[6].mxu0 }
 0x3d3   : > { %v7379_v19 = vmul.f32 %v8904_v3, %v12960_v31  ;;  %v8906_v25 = vadd.f32 %v7266_v11, %v12897_v55  ;;  %v7268_v29 = vpop.f32.mrb[7].mxu0 }
 0x3d4   : > { %7548 = vst [vmem:[%s12979_s29 + $0x8] sm:$0xff] %v8846_v53  ;;  %v7380_v24 = vmul.f32 %v8905_v48, %v12962_v43  ;;  %v8907_v7 = vadd.f32 %v7268_v29, %v12899_v63 }
 0x3d5   : > { %v7423_v50 = vadd.f32 %v12964_v23, %v7379_v19  ;;  %v7381_v58 = vmul.f32 %v8906_v25, %v12960_v31 }
 0x3d6   : > { %v7424_v15 = vadd.f32 %v12966_v40, %v7380_v24  ;;  %v7382_v41 = vmul.f32 %v8907_v7, %v12962_v43 }
 0x3d7   : > { %v7564_v44 = vadd.f32 %v7563_v54, %v7423_v50  ;;  %v7425_v12 = vadd.f32 %v12964_v23, %v7381_v58 }
 0x3d8   : > { %v8847_v55 = vpack.c.bf16 %v7424_v15, %v7423_v50  ;;  %v7585_v60 = vadd.f32 %v7584_v1, %v7424_v15  ;;  %v7426_v46 = vadd.f32 %v12966_v40, %v7382_v41  ;;  %v7272_v22 = vpop.f32.mrb[8].mxu0 }
 0x3d9   : > { %v7565_v21 = vadd.f32 %v7564_v44, %v7425_v12  ;;  %v8908_v63 = vadd.f32 %v7272_v22, %v12901_v38  ;;  %v7274_v62 = vpop.f32.mrb[9].mxu0 }
 0x3da   : > { %7549 = vst [vmem:[%s12979_s29 + $0x10] sm:$0xff] %v8847_v55  ;;  %v8848_v59 = vpack.c.bf16 %v7426_v46, %v7425_v12  ;;  %v7586_v6 = vadd.f32 %v7585_v60, %v7426_v46  ;;  %v8909_v33 = vadd.f32 %v7274_v62, %v12903_v39  ;;  %v7276_v4 = vpop.f32.mrb[10].mxu0 }
 0x3db   : > { %v7383_v36 = vmul.f32 %v8908_v63, %v12960_v31  ;;  %v8910_v30 = vadd.f32 %v7276_v4, %v12905_v18  ;;  %v7278_v20 = vpop.f32.mrb[11].mxu0 }
 0x3dc   : > { %7550 = vst [vmem:[%s12979_s29 + $0x18] sm:$0xff] %v8848_v59  ;;  %v7384_v47 = vmul.f32 %v8909_v33, %v12962_v43  ;;  %v8911_v32 = vadd.f32 %v7278_v20, %v12907_v51 }
 0x3dd   : > { %v7427_v38 = vadd.f32 %v12964_v23, %v7383_v36  ;;  %v7385_v54 = vmul.f32 %v8910_v30, %v12960_v31 }
 0x3de   : > { %v7428_v3 = vadd.f32 %v12966_v40, %v7384_v47  ;;  %v7386_v39 = vmul.f32 %v8911_v32, %v12962_v43 }
 0x3df   : > { %v7566_v57 = vadd.f32 %v7565_v21, %v7427_v38  ;;  %v7429_v53 = vadd.f32 %v12964_v23, %v7385_v54 }
 0x3e0   : > { %v8849_v18 = vpack.c.bf16 %v7428_v3, %v7427_v38  ;;  %v7587_v1 = vadd.f32 %v7586_v6, %v7428_v3  ;;  %v7430_v48 = vadd.f32 %v12966_v40, %v7386_v39  ;;  %v7282_v11 = vpop.f32.mrb[12].mxu0 }
 0x3e1   : > { %v7567_v19 = vadd.f32 %v7566_v57, %v7429_v53  ;;  %v8912_v51 = vadd.f32 %v7282_v11, %v12909_v35  ;;  %v7284_v25 = vpop.f32.mrb[13].mxu0 }
 0x3e2   : > { %7551 = vst [vmem:[%s12979_s29 + $0x20] sm:$0xff] %v8849_v18  ;;  %v8850_v29 = vpack.c.bf16 %v7430_v48, %v7429_v53  ;;  %v7588_v24 = vadd.f32 %v7587_v1, %v7430_v48  ;;  %v8913_v7 = vadd.f32 %v7284_v25, %v12911_v0  ;;  %v7286_v50 = vpop.f32.mrb[14].mxu0 }
 0x3e3   : > { %v7387_v58 = vmul.f32 %v8912_v51, %v12960_v31  ;;  %v8914_v15 = vadd.f32 %v7286_v50, %v12913_v52  ;;  %v7288_v41 = vpop.f32.mrb[15].mxu0 }
 0x3e4   : > { %7552 = vst [vmem:[%s12979_s29 + $0x28] sm:$0xff] %v8850_v29  ;;  %v7388_v44 = vmul.f32 %v8913_v7, %v12962_v43  ;;  %v8915_v12 = vadd.f32 %v7288_v41, %v12915_v5 }
 0x3e5   : > { %v7431_v35 = vadd.f32 %v12964_v23, %v7387_v58  ;;  %v7389_v55 = vmul.f32 %v8914_v15, %v12960_v31 }
 0x3e6   : > { %v7432_v60 = vadd.f32 %v12966_v40, %v7388_v44  ;;  %v7390_v0 = vmul.f32 %v8915_v12, %v12962_v43 }
 0x3e7   : > { %v7568_v46 = vadd.f32 %v7567_v19, %v7431_v35  ;;  %v7433_v22 = vadd.f32 %v12964_v23, %v7389_v55 }
 0x3e8   : > { %v8851_v52 = vpack.c.bf16 %v7432_v60, %v7431_v35  ;;  %v7589_v21 = vadd.f32 %v7588_v24, %v7432_v60  ;;  %v7434_v63 = vadd.f32 %v12966_v40, %v7390_v0  ;;  %v7292_v62 = vpop.f32.mrb[16].mxu0 }
 0x3e9   : > { %v7569_v59 = vadd.f32 %v7568_v46, %v7433_v22  ;;  %v8916_v5 = vadd.f32 %v7292_v62, %v12917_v56  ;;  %v7294_v6 = vpop.f32.mrb[17].mxu0 }
 0x3ea   : > { %7553 = vst [vmem:[%s12979_s29 + $0x30] sm:$0xff] %v8851_v52  ;;  %v8852_v33 = vpack.c.bf16 %v7434_v63, %v7433_v22  ;;  %v7590_v4 = vadd.f32 %v7589_v21, %v7434_v63  ;;  %v8917_v36 = vadd.f32 %v7294_v6, %v12919_v16  ;;  %v7296_v30 = vpop.f32.mrb[18].mxu0 }
 0x3eb   : > { %v7391_v20 = vmul.f32 %v8916_v5, %v12960_v31  ;;  %v8918_v47 = vadd.f32 %v7296_v30, %v12921_v13  ;;  %v7298_v32 = vpop.f32.mrb[19].mxu0 }
 0x3ec   : > { %7554 = vst [vmem:[%s12979_s29 + $0x38] sm:$0xff] %v8852_v33  ;;  %v7392_v38 = vmul.f32 %v8917_v36, %v12962_v43  ;;  %v8919_v54 = vadd.f32 %v7298_v32, %v12923_v37 }
 0x3ed   : > { %v7435_v56 = vadd.f32 %v12964_v23, %v7391_v20  ;;  %v7393_v3 = vmul.f32 %v8918_v47, %v12960_v31 }
 0x3ee   : > { %v7436_v39 = vadd.f32 %v12966_v40, %v7392_v38  ;;  %v7394_v16 = vmul.f32 %v8919_v54, %v12962_v43 }
 0x3ef   : > { %v7570_v57 = vadd.f32 %v7569_v59, %v7435_v56  ;;  %v7437_v53 = vadd.f32 %v12964_v23, %v7393_v3 }
 0x3f0   : > { %v8853_v13 = vpack.c.bf16 %v7436_v39, %v7435_v56  ;;  %v7591_v18 = vadd.f32 %v7590_v4, %v7436_v39  ;;  %v7438_v1 = vadd.f32 %v12966_v40, %v7394_v16  ;;  %v7302_v48 = vpop.f32.mrb[20].mxu0 }
 0x3f1   : > { %v7571_v11 = vadd.f32 %v7570_v57, %v7437_v53  ;;  %v8920_v37 = vadd.f32 %v7302_v48, %v12925_v42  ;;  %v7304_v19 = vpop.f32.mrb[21].mxu0 }
 0x3f2   : > { %7555 = vst [vmem:[%s12979_s29 + $0x40] sm:$0xff] %v8853_v13  ;;  %v8854_v51 = vpack.c.bf16 %v7438_v1, %v7437_v53  ;;  %v7592_v25 = vadd.f32 %v7591_v18, %v7438_v1  ;;  %v8921_v29 = vadd.f32 %v7304_v19, %v12927_v26  ;;  %v7306_v24 = vpop.f32.mrb[22].mxu0 }
 0x3f3   : > { %v7395_v7 = vmul.f32 %v8920_v37, %v12960_v31  ;;  %v8922_v50 = vadd.f32 %v7306_v24, %v12929_v9  ;;  %v7308_v58 = vpop.f32.mrb[23].mxu0 }
 0x3f4   : > { %7556 = vst [vmem:[%s12979_s29 + $0x48] sm:$0xff] %v8854_v51  ;;  %v7396_v15 = vmul.f32 %v8921_v29, %v12962_v43  ;;  %v8923_v41 = vadd.f32 %v7308_v58, %v12931_v2 }
 0x3f5   : > { %v7439_v42 = vadd.f32 %v12964_v23, %v7395_v7  ;;  %v7397_v44 = vmul.f32 %v8922_v50, %v12960_v31 }
 0x3f6   : > { %v7440_v12 = vadd.f32 %v12966_v40, %v7396_v15  ;;  %v7398_v26 = vmul.f32 %v8923_v41, %v12962_v43 }
 0x3f7   : > { %v7572_v35 = vadd.f32 %v7571_v11, %v7439_v42  ;;  %v7441_v55 = vadd.f32 %v12964_v23, %v7397_v44 }
 0x3f8   : > { %v8855_v9 = vpack.c.bf16 %v7440_v12, %v7439_v42  ;;  %v7593_v60 = vadd.f32 %v7592_v25, %v7440_v12  ;;  %v7442_v0 = vadd.f32 %v12966_v40, %v7398_v26  ;;  %v7312_v46 = vpop.f32.mrb[24].mxu0 }
 0x3f9   : > { %v7573_v22 = vadd.f32 %v7572_v35, %v7441_v55  ;;  %v8924_v2 = vadd.f32 %v7312_v46, %v12933_v27  ;;  %v7314_v52 = vpop.f32.mrb[25].mxu0 }
 0x3fa   : > { %7557 = vst [vmem:[%s12979_s29 + $0x50] sm:$0xff] %v8855_v9  ;;  %v8856_v21 = vpack.c.bf16 %v7442_v0, %v7441_v55  ;;  %v7594_v63 = vadd.f32 %v7593_v60, %v7442_v0  ;;  %v8925_v62 = vadd.f32 %v7314_v52, %v12935_v49  ;;  %v7316_v59 = vpop.f32.mrb[26].mxu0 }
 0x3fb   : > { %v7399_v5 = vmul.f32 %v8924_v2, %v12960_v31  ;;  %v8926_v6 = vadd.f32 %v7316_v59, %v12937_v61  ;;  %v7318_v33 = vpop.f32.mrb[27].mxu0 }
 0x3fc   : > { %7558 = vst [vmem:[%s12979_s29 + $0x58] sm:$0xff] %v8856_v21  ;;  %v7400_v4 = vmul.f32 %v8925_v62, %v12962_v43  ;;  %v8927_v36 = vadd.f32 %v7318_v33, %v12939_v34 }
 0x3fd   : > { %v7443_v27 = vadd.f32 %v12964_v23, %v7399_v5  ;;  %v7401_v30 = vmul.f32 %v8926_v6, %v12960_v31 }
 0x3fe   : > { %v7444_v20 = vadd.f32 %v12966_v40, %v7400_v4  ;;  %v7402_v49 = vmul.f32 %v8927_v36, %v12962_v43 }
 0x3ff   : > { %v7574_v47 = vadd.f32 %v7573_v22, %v7443_v27  ;;  %v7445_v32 = vadd.f32 %v12964_v23, %v7401_v30 }
 0x400   : > { %v8857_v61 = vpack.c.bf16 %v7444_v20, %v7443_v27  ;;  %v7595_v38 = vadd.f32 %v7594_v63, %v7444_v20  ;;  %v7446_v54 = vadd.f32 %v12966_v40, %v7402_v49  ;;  %v7322_v56 = vpop.f32.mrb[28].mxu0 }
 0x401   : > { %v7575_v3 = vadd.f32 %v7574_v47, %v7445_v32  ;;  %v8928_v34 = vadd.f32 %v7322_v56, %v12941_v8  ;;  %v7324_v39 = vpop.f32.mrb[29].mxu0 }
 0x402   : > { %7559 = vst [vmem:[%s12979_s29 + $0x60] sm:$0xff] %v8857_v61  ;;  %v8858_v16 = vpack.c.bf16 %v7446_v54, %v7445_v32  ;;  %v7596_v57 = vadd.f32 %v7595_v38, %v7446_v54  ;;  %v8929_v53 = vadd.f32 %v7324_v39, %v12943_v10  ;;  %v7326_v13 = vpop.f32.mrb[30].mxu0 }
 0x403   : > { %v7403_v18 = vmul.f32 %v8928_v34, %v12960_v31  ;;  %v8930_v1 = vadd.f32 %v7326_v13, %v12945_v17  ;;  %v7328_v48 = vpop.f32.mrb[31].mxu0 }
 0x404   : > { %7560 = vst [vmem:[%s12979_s29 + $0x68] sm:$0xff] %v8858_v16  ;;  %v7404_v11 = vmul.f32 %v8929_v53, %v12962_v43  ;;  %v8931_v37 = vadd.f32 %v7328_v48, %v12947_v45 }
 0x405   : > { %v7447_v8 = vadd.f32 %v12964_v23, %v7403_v18  ;;  %v7405_v19 = vmul.f32 %v8930_v1, %v12960_v31 }
 0x406   : > { %v7448_v51 = vadd.f32 %v12966_v40, %v7404_v11  ;;  %v7406_v10 = vmul.f32 %v8931_v37, %v12962_v43  ;;  %v10282_v43 = vmov 1966171168  }
 0x407   : > { %v7576_v25 = vadd.f32 %v7575_v3, %v7447_v8  ;;  %v7449_v29 = vadd.f32 %v12964_v23, %v7405_v19  ;;  %v7609_v44 = vunpack.c.l.s4 %v10282_v43 }
 0x408   : > { %v8859_v24 = vpack.c.bf16 %v7448_v51, %v7447_v8  ;;  %v7597_v17 = vadd.f32 %v7596_v57, %v7448_v51  ;;  %v7450_v7 = vadd.f32 %v12966_v40, %v7406_v10 }
 0x409   : > { %v7577_v50 = vadd.f32 %v7576_v25, %v7449_v29  ;;  %v7610_v55 = vunpack.c.0.s8 %v7609_v44 }
 0x40a   : > { %7561 = vst [vmem:[%s12979_s29 + $0x70] sm:$0xff] %v8859_v24  ;;  %v8860_v45 = vpack.c.bf16 %v7450_v7, %v7449_v29  ;;  %v7598_v58 = vadd.f32 %v7597_v17, %v7450_v7 }
 0x40b   : > { %v7578_v15 = vrot.slane %v7577_v50, 4  ;;  %v7613_v46 = vsub.s32 %v7610_v55, %v12950_v28 }
 0x40c   : > { %7562 = vst [vmem:[%s12979_s29 + $0x78] sm:$0xff] %v8860_v45  ;;  %v7599_v31 = vrot.slane %v7598_v58, 4 }
 0x40d   : > { %v7579_v41 = vadd.f32 %v7578_v15, %v7577_v50 }
 0x40e   : > { %v7600_v42 = vadd.f32 %v7599_v31, %v7598_v58 }
 0x40f   : > { %v7580_v12 = vrot.slane %v7579_v41, 2 }
 0x410   : > { %v7601_v23 = vrot.slane %v7600_v42, 2 }
 0x411   : > { %v7581_v26 = vadd.f32 %v7580_v12, %v7579_v41 }
 0x412   : > { %v7602_v35 = vadd.f32 %v7601_v23, %v7600_v42 }
 0x413   : > { %v7582_v40 = vrot.slane %v7581_v26, 1 }
 0x414   : > { %v7603_v9 = vrot.slane %v7602_v35, 1 }
 0x415   : > { %v7583_v60 = vadd.f32 %v7582_v40, %v7581_v26 }
 0x416   : > { %v7604_v0 = vadd.f32 %v7603_v9, %v7602_v35 }
 0x418   : > { %v7607_v22 = vcombine.low %v7583_v60, %v7604_v0 }
 0x41a   : > { %v7614_v2 = vrot.slane %v7607_v22, %v7613_v46 }
 0x41c   : > { %v7621_v52 = vrot.slane %v7614_v2, %v7613_v46 }
 0x41e   : > { %7627 = vst.msk [vmem:[%s834_s27] sm:$0x3] %vm7625_vm5, %v7621_v52 }
 0x41f PF: > { %s13286_s22 = sld [smem:[#allocation5_spill]]  ;;  %s13287_s15 = sld [smem:[#allocation3_spill]] }
 0x420   : > { %s13288_s16 = sld [smem:[#allocation4_spill]]  ;;  %s13289_s17 = sld [smem:[#allocation6_spill]] }
 0x421   : > { %s13290_s18 = sld [smem:[#allocation7_spill]] }
 0x425   : > { %s26_s19 = sadd.s32 1, %s13286_s22  }
 0x426   : > { %p23_p0 = scmp.ge.s32.totalorder %s26_s19, 6  }
 0x428   :  { %25 = sbr.rel (!%p23_p0) target bundleno = 8 (0x8), region = 148 }

</bundles_post_ra>
